<compile_context>
chip_gen: v6e
topology: v6e:2x2x1
jax: 0.10.0
libtpu: 0.0.40
codegen_flags: <defaults>
</compile_context>

<pallas_src>
import jax
import jax.numpy as jnp
import numpy as np
from jax import lax
from jax.experimental import pallas as pl
from jax.experimental.pallas import tpu as pltpu

BN_EPS = 1e-5
KSIZE = 3  # ConvNormAct kernel: 3x3, stride 1, pad 1


# ------------------------- fused Pallas kernel ------------------------------

def _output_head_kernel(xpad_ref, s_ref,
                        w1c_ref, b1_ref, w2c_ref, b2_ref,
                        fc1_ref, fb1_ref, fc2_ref, fb2_ref,
                        fc3x_ref, fc3s_ref, fb3_ref,
                        fc4_ref, fb4_ref, fc5_ref, fb5_ref,
                        fc6_ref, fb6_ref,
                        o_ref,
                        pad2_sc, h2_sc, xf_sc):
    f32 = jnp.float32
    B = xpad_ref.shape[0]
    H = xpad_ref.shape[1] - 2
    W = xpad_ref.shape[2] - 2
    C0 = xpad_ref.shape[3]          # conv1 in channels  (256)
    C1 = w1c_ref.shape[1]           # conv1 out channels (64)
    C2 = w2c_ref.shape[1]           # conv2 out channels (16)
    M = B * H * W

    # ---- ConvNormAct 1: 3x3/s1/p1 conv (BN folded into w/b) + ReLU ---------
    # In-VMEM im2col: 9 shifted windows of the padded input, each a
    # (B*H*W, C0) @ (C0, C1) MXU matmul accumulated in f32.
    acc = jnp.zeros((M, C1), f32)
    for dy in range(KSIZE):
        for dx in range(KSIZE):
            t = dy * KSIZE + dx
            win = xpad_ref[:, dy:dy + H, dx:dx + W, :].reshape(M, C0)
            acc = acc + jnp.dot(win, w1c_ref[t * C0:(t + 1) * C0, :],
                                preferred_element_type=f32)
    h1 = jnp.maximum(acc + b1_ref[...], 0.0)                       # (M, C1)

    # ---- ConvNormAct 2 ------------------------------------------------------
    # Zero-pad conv1's output into a VMEM scratch, then the same 9-tap matmul.
    pad2_sc[...] = jnp.zeros(pad2_sc.shape, f32)
    pad2_sc[:, 1:H + 1, 1:W + 1, :] = h1.reshape(B, H, W, C1)
    acc = jnp.zeros((M, C2), f32)
    for dy in range(KSIZE):
        for dx in range(KSIZE):
            t = dy * KSIZE + dx
            win = pad2_sc[:, dy:dy + H, dx:dx + W, :].reshape(M, C1)
            acc = acc + jnp.dot(win, w2c_ref[t * C1:(t + 1) * C1, :],
                                preferred_element_type=f32)
    h2 = jnp.maximum(acc + b2_ref[...], 0.0)                       # (M, C2)

    # ---- nn.Flatten(1) + Linear(1024, 256) ----------------------------------
    # fc1's input columns were permuted to NHWC order at pack time, so here we
    # only re-pack the (B, H*W, C2) sublane rows into a lane-dense (B, H*W*C2)
    # row using H*W small static ref copies (no lane-changing vector reshape).
    h2_sc[...] = h2.reshape(B, H * W, C2)
    for p in range(H * W):
        xf_sc[:, p * C2:(p + 1) * C2] = h2_sc[:, p, :]
    x_flat = xf_sc[...]                                            # (B, H*W*C2)

    h = jnp.maximum(jnp.dot(x_flat, fc1_ref[...], preferred_element_type=f32)
                    + fb1_ref[...], 0.0)
    h = jnp.maximum(jnp.dot(h, fc2_ref[...], preferred_element_type=f32)
                    + fb2_ref[...], 0.0)
    # torch.cat([h, spatial], 1) @ fc3.T == h @ fc3[:, :64].T + s @ fc3[:, 64:].T
    h = jnp.maximum(jnp.dot(h, fc3x_ref[...], preferred_element_type=f32)
                    + jnp.dot(s_ref[...], fc3s_ref[...], preferred_element_type=f32)
                    + fb3_ref[...], 0.0)
    h = jnp.maximum(jnp.dot(h, fc4_ref[...], preferred_element_type=f32)
                    + fb4_ref[...], 0.0)
    h = jnp.maximum(jnp.dot(h, fc5_ref[...], preferred_element_type=f32)
                    + fb5_ref[...], 0.0)
    # Lane-dense padded final store; wrapper slices back to out_size.
    o_ref[...] = jnp.dot(h, fc6_ref[...], preferred_element_type=f32) + fb6_ref[...]


# ------------------------- one-time weight packing ---------------------------

def pack_params(params):
    """One-time weight preprocessing (keeps per-forward XLA glue to ~nothing)."""
    # BatchNorm2d eval-mode with default stats (mean=0, var=1, gamma=1, beta=0):
    #   y = (conv(x) + b) / sqrt(1 + eps)  ->  fold the scale into conv w and b.
    # TODO(synk): with trained running stats, fold gamma/sqrt(var+eps) into w and
    # (beta - mean*gamma/sqrt(var+eps)) into b; training-mode BN (batch stats /
    # running-stat updates) is not reproduced.
    scale = 1.0 / np.sqrt(1.0 + BN_EPS)

    def conv_cols(w_oihw, b):
        co, ci, kh, kw = w_oihw.shape
        # (co, ci, kh, kw) -> ((kh*KSIZE + kw)*ci + ci_idx, co): tap-major,
        # channel-minor rows, matching the kernel's window slicing order.
        w_col = jnp.transpose(w_oihw, (2, 3, 1, 0)).reshape(kh * kw * ci, co)
        return ((w_col * scale).astype(jnp.float32),
                (b * scale).reshape(1, co).astype(jnp.float32))

    w1c, b1 = conv_cols(params['c1_w'], params['c1_b'])
    w2c, b2 = conv_cols(params['c2_w'], params['c2_b'])

    # fc1 consumes nn.Flatten(1) of the NCHW conv output (channel-major). The
    # kernel builds the NHWC-flat activation instead, so permute fc1's input
    # columns once here: (c, h*w) -> (h*w, c).
    c2_out = params['c2_w'].shape[0]
    fc1_w = params['fc1_w']
    n1, k1 = fc1_w.shape
    hw = k1 // c2_out
    fc1_perm = fc1_w.reshape(n1, c2_out, hw).transpose(0, 2, 1).reshape(n1, k1)
    fc1_T = fc1_perm.T.astype(jnp.float32)

    # fc3 acts on cat([h, spatial], 1); split its weight at fc2's output width
    # (shape-derived, not hardcoded) so the concat becomes two matmuls.
    split = params['fc2_w'].shape[0]
    fc3_w = params['fc3_w']
    fc3x_T = fc3_w[:, :split].T.astype(jnp.float32)
    fc3s_T = fc3_w[:, split:].T.astype(jnp.float32)

    # Pad the final layer to a lane-dense (multiple of 128) output width.
    out_size = params['fc6_w'].shape[0]
    out_padded = ((out_size + 127) // 128) * 128
    fc6_T = jnp.zeros((params['fc6_w'].shape[1], out_padded), jnp.float32)
    fc6_T = fc6_T.at[:, :out_size].set(params['fc6_w'].T)
    fb6 = jnp.zeros((1, out_padded), jnp.float32)
    fb6 = fb6.at[:, :out_size].set(params['fc6_b'].reshape(1, -1))

    def rowvec(b):
        return b.reshape(1, -1).astype(jnp.float32)

    args = (w1c, b1, w2c, b2,
            fc1_T, rowvec(params['fc1_b']),
            params['fc2_w'].T.astype(jnp.float32), rowvec(params['fc2_b']),
            fc3x_T, fc3s_T, rowvec(params['fc3_b']),
            params['fc4_w'].T.astype(jnp.float32), rowvec(params['fc4_b']),
            params['fc5_w'].T.astype(jnp.float32), rowvec(params['fc5_b']),
            fc6_T, fb6)
    return args, out_size, out_padded


# ------------------------- wrapper -------------------------------------------

def output_head_forward(shared_feature_nchw, spatial_feature, packed):
    """Fused forward: one pallas_call for conv1 + conv2 + the whole MLP head."""
    args, out_size, out_padded = packed
    c1_out = args[0].shape[1]            # conv1 out channels (64)
    c2_out = args[2].shape[1]            # conv2 out channels (16)

    # Only per-call XLA glue: NCHW -> NHWC + zero pad (~80 KB total).
    x = jnp.transpose(shared_feature_nchw, (0, 2, 3, 1))
    xpad = jnp.pad(x, ((0, 0), (1, 1), (1, 1), (0, 0)))
    B = xpad.shape[0]
    H, W = xpad.shape[1] - 2, xpad.shape[2] - 2

    ins = (xpad, spatial_feature.astype(jnp.float32)) + args
    in_specs = [pl.BlockSpec(a.shape, (lambda i, n=a.ndim: (0,) * n))
                for a in ins]

    out = pl.pallas_call(
        _output_head_kernel,
        out_shape=jax.ShapeDtypeStruct((B, out_padded), jnp.float32),
        # Whole problem (<4 MB of weights + activations) fits one VMEM-resident
        # block on v5e/v6e/v7x.
        # TODO(synk): if batch grows, tile the B*H*W row axis and mark that grid
        # axis "parallel" so v7x's 2 TensorCores split the work.
        grid=(1,),
        in_specs=in_specs,
        out_specs=pl.BlockSpec((B, out_padded), lambda i: (0, 0)),
        scratch_shapes=[
            pltpu.VMEM((B, H + 2, W + 2, c1_out), jnp.float32),  # padded conv1 out
            pltpu.VMEM((B, H * W, c2_out), jnp.float32),         # conv2 out
            pltpu.VMEM((B, H * W * c2_out), jnp.float32),        # flattened fc1 input
        ],
        compiler_params=pltpu.CompilerParams(
            dimension_semantics=("arbitrary",)),
    )(*ins)
    return out[:, :out_size]


# ------------------------- params & reference --------------------------------

def init_params(key, out_size):
    ks = jax.random.split(key, 8)

    def lin(k, fan_in, fan_out):
        kw, kb = jax.random.split(k)
        w = jax.random.normal(kw, (fan_out, fan_in), jnp.float32) / jnp.sqrt(fan_in)
        b = jax.random.normal(kb, (fan_out,), jnp.float32) * 0.01
        return w, b

    def conv(k, cin, cout):
        kw, kb = jax.random.split(k)
        w = jax.random.normal(kw, (cout, cin, 3, 3), jnp.float32) / jnp.sqrt(cin * 9)
        b = jax.random.normal(kb, (cout,), jnp.float32) * 0.01
        return w, b

    p = {}
    p['c1_w'], p['c1_b'] = conv(ks[0], 256, 64)
    p['c2_w'], p['c2_b'] = conv(ks[1], 64, 16)
    p['fc1_w'], p['fc1_b'] = lin(ks[2], 1024, 256)
    p['fc2_w'], p['fc2_b'] = lin(ks[3], 256, 64)
    p['fc3_w'], p['fc3_b'] = lin(ks[4], 64 + 5, 64)
    p['fc4_w'], p['fc4_b'] = lin(ks[5], 64, 32)
    p['fc5_w'], p['fc5_b'] = lin(ks[6], 32, 16)
    p['fc6_w'], p['fc6_b'] = lin(ks[7], 16, out_size)
    return p


def reference_forward(shared, spatial, params):
    """Pure-JAX reference mirroring the PyTorch forward (eval-mode BN)."""
    scale = 1.0 / jnp.sqrt(jnp.float32(1.0 + BN_EPS))

    def conv_bn_relu(x_nchw, w, b):
        y = lax.conv_general_dilated(x_nchw, w, (1, 1), ((1, 1), (1, 1)),
                                     dimension_numbers=('NCHW', 'OIHW', 'NCHW'))
        y = (y + b[None, :, None, None]) * scale
        return jnp.maximum(y, 0.0)

    def lin(h, w, b):
        return h @ w.T + b

    x = conv_bn_relu(shared, params['c1_w'], params['c1_b'])
    x = conv_bn_relu(x, params['c2_w'], params['c2_b'])
    x = x.reshape(x.shape[0], -1)
    h = jnp.maximum(lin(x, params['fc1_w'], params['fc1_b']), 0.0)
    h = jnp.maximum(lin(h, params['fc2_w'], params['fc2_b']), 0.0)
    h = jnp.concatenate([h, spatial], axis=1)
    h = jnp.maximum(lin(h, params['fc3_w'], params['fc3_b']), 0.0)
    h = jnp.maximum(lin(h, params['fc4_w'], params['fc4_b']), 0.0)
    h = jnp.maximum(lin(h, params['fc5_w'], params['fc5_b']), 0.0)
    return lin(h, params['fc6_w'], params['fc6_b'])


# ------------------------- main ----------------------------------------------

if __name__ == "__main__":
    key = jax.random.PRNGKey(0)
    k_params, k_x, k_s = jax.random.split(key, 3)

    out_size = 8
    params = init_params(k_params, out_size)
    packed = pack_params(params)           # one-time weight prep, not per-call

    shared_feature = jax.random.normal(k_x, (2, 256, 8, 8), jnp.float32)   # NCHW
    spatial_feature = jax.random.normal(k_s, (2, 5), jnp.float32)

    out = output_head_forward(shared_feature, spatial_feature, packed)
    out = jax.block_until_ready(out)

    ref = reference_forward(shared_feature, spatial_feature, params)
    np.testing.assert_allclose(np.asarray(out), np.asarray(ref),
                               rtol=1e-4, atol=1e-4)
    print("KERNEL_OK")
</pallas_src>

<mosaic_0001>
module attributes {stable_mosaic.version = 11 : i64} {
  func.func @_output_head_kernel(%arg0: i32, %arg1: memref<2x10x10x256xf32, #tpu.memory_space<vmem>>, %arg2: memref<2x5xf32, #tpu.memory_space<vmem>>, %arg3: memref<2304x64xf32, #tpu.memory_space<vmem>>, %arg4: memref<1x64xf32, #tpu.memory_space<vmem>>, %arg5: memref<576x16xf32, #tpu.memory_space<vmem>>, %arg6: memref<1x16xf32, #tpu.memory_space<vmem>>, %arg7: memref<1024x256xf32, #tpu.memory_space<vmem>>, %arg8: memref<1x256xf32, #tpu.memory_space<vmem>>, %arg9: memref<256x64xf32, #tpu.memory_space<vmem>>, %arg10: memref<1x64xf32, #tpu.memory_space<vmem>>, %arg11: memref<64x64xf32, #tpu.memory_space<vmem>>, %arg12: memref<5x64xf32, #tpu.memory_space<vmem>>, %arg13: memref<1x64xf32, #tpu.memory_space<vmem>>, %arg14: memref<64x32xf32, #tpu.memory_space<vmem>>, %arg15: memref<1x32xf32, #tpu.memory_space<vmem>>, %arg16: memref<32x16xf32, #tpu.memory_space<vmem>>, %arg17: memref<1x16xf32, #tpu.memory_space<vmem>>, %arg18: memref<16x128xf32, #tpu.memory_space<vmem>>, %arg19: memref<1x128xf32, #tpu.memory_space<vmem>>, %arg20: memref<2x128xf32, #tpu.memory_space<vmem>>, %arg21: memref<2x10x10x64xf32, #tpu.memory_space<vmem>>, %arg22: memref<2x64x16xf32, #tpu.memory_space<vmem>>, %arg23: memref<2x1024xf32, #tpu.memory_space<vmem>>) attributes {dimension_semantics = [#tpu.dimension_semantics<arbitrary>], iteration_bounds = array<i64: 1>, scalar_prefetch = 0 : i64, scratch_operands = 3 : i64, tpu.core_type = #tpu.core_type<tc>, window_params = [{pipeline_mode = #tpu.pipeline_mode<synchronous>, transform_indices = @transform_0, window_bounds = array<i64: 2, 10, 10, 256>}, {pipeline_mode = #tpu.pipeline_mode<synchronous>, transform_indices = @transform_1, window_bounds = array<i64: 2, 5>}, {pipeline_mode = #tpu.pipeline_mode<synchronous>, transform_indices = @transform_2, window_bounds = array<i64: 2304, 64>}, {pipeline_mode = #tpu.pipeline_mode<synchronous>, transform_indices = @transform_3, window_bounds = array<i64: 1, 64>}, {pipeline_mode = #tpu.pipeline_mode<synchronous>, transform_indices = @transform_4, window_bounds = array<i64: 576, 16>}, {pipeline_mode = #tpu.pipeline_mode<synchronous>, transform_indices = @transform_5, window_bounds = array<i64: 1, 16>}, {pipeline_mode = #tpu.pipeline_mode<synchronous>, transform_indices = @transform_6, window_bounds = array<i64: 1024, 256>}, {pipeline_mode = #tpu.pipeline_mode<synchronous>, transform_indices = @transform_7, window_bounds = array<i64: 1, 256>}, {pipeline_mode = #tpu.pipeline_mode<synchronous>, transform_indices = @transform_8, window_bounds = array<i64: 256, 64>}, {pipeline_mode = #tpu.pipeline_mode<synchronous>, transform_indices = @transform_9, window_bounds = array<i64: 1, 64>}, {pipeline_mode = #tpu.pipeline_mode<synchronous>, transform_indices = @transform_10, window_bounds = array<i64: 64, 64>}, {pipeline_mode = #tpu.pipeline_mode<synchronous>, transform_indices = @transform_11, window_bounds = array<i64: 5, 64>}, {pipeline_mode = #tpu.pipeline_mode<synchronous>, transform_indices = @transform_12, window_bounds = array<i64: 1, 64>}, {pipeline_mode = #tpu.pipeline_mode<synchronous>, transform_indices = @transform_13, window_bounds = array<i64: 64, 32>}, {pipeline_mode = #tpu.pipeline_mode<synchronous>, transform_indices = @transform_14, window_bounds = array<i64: 1, 32>}, {pipeline_mode = #tpu.pipeline_mode<synchronous>, transform_indices = @transform_15, window_bounds = array<i64: 32, 16>}, {pipeline_mode = #tpu.pipeline_mode<synchronous>, transform_indices = @transform_16, window_bounds = array<i64: 1, 16>}, {pipeline_mode = #tpu.pipeline_mode<synchronous>, transform_indices = @transform_17, window_bounds = array<i64: 16, 128>}, {pipeline_mode = #tpu.pipeline_mode<synchronous>, transform_indices = @transform_18, window_bounds = array<i64: 1, 128>}, {pipeline_mode = #tpu.pipeline_mode<synchronous>, transform_indices = @transform_19, window_bounds = array<i64: 2, 128>}]} {
    %cst = arith.constant 0.000000e+00 : f32
    %0 = vector.broadcast %cst : f32 to vector<128x64xf32>
    %c0 = arith.constant 0 : index
    %c0_0 = arith.constant 0 : index
    %c0_1 = arith.constant 0 : index
    %c0_2 = arith.constant 0 : index
    %1 = vector.load %arg1[%c0, %c0_0, %c0_1, %c0_2] : memref<2x10x10x256xf32, #tpu.memory_space<vmem>>, vector<2x8x8x256xf32>
    %2 = vector.shape_cast %1 : vector<2x8x8x256xf32> to vector<128x256xf32>
    %c0_3 = arith.constant 0 : index
    %c0_4 = arith.constant 0 : index
    %3 = vector.load %arg3[%c0_3, %c0_4] : memref<2304x64xf32, #tpu.memory_space<vmem>>, vector<256x64xf32>
    %cst_5 = arith.constant dense<0.000000e+00> : vector<128x64xf32>
    %4 = tpu.matmul %2, %3, %cst_5 {dimension_numbers = #tpu.dot_dimension_numbers<[1], [0], [0], [1], [0, 0, 1, 1], [], []>} : vector<128x256xf32>, vector<256x64xf32>, vector<128x64xf32> -> vector<128x64xf32>
    %5 = arith.addf %0, %4 : vector<128x64xf32>
    %c0_6 = arith.constant 0 : index
    %c0_7 = arith.constant 0 : index
    %c1 = arith.constant 1 : index
    %c0_8 = arith.constant 0 : index
    %6 = vector.load %arg1[%c0_6, %c0_7, %c1, %c0_8] : memref<2x10x10x256xf32, #tpu.memory_space<vmem>>, vector<2x8x8x256xf32>
    %7 = vector.shape_cast %6 : vector<2x8x8x256xf32> to vector<128x256xf32>
    %c256 = arith.constant 256 : index
    %c0_9 = arith.constant 0 : index
    %8 = vector.load %arg3[%c256, %c0_9] : memref<2304x64xf32, #tpu.memory_space<vmem>>, vector<256x64xf32>
    %cst_10 = arith.constant dense<0.000000e+00> : vector<128x64xf32>
    %9 = tpu.matmul %7, %8, %cst_10 {dimension_numbers = #tpu.dot_dimension_numbers<[1], [0], [0], [1], [0, 0, 1, 1], [], []>} : vector<128x256xf32>, vector<256x64xf32>, vector<128x64xf32> -> vector<128x64xf32>
    %10 = arith.addf %5, %9 : vector<128x64xf32>
    %c0_11 = arith.constant 0 : index
    %c0_12 = arith.constant 0 : index
    %c2 = arith.constant 2 : index
    %c0_13 = arith.constant 0 : index
    %11 = vector.load %arg1[%c0_11, %c0_12, %c2, %c0_13] : memref<2x10x10x256xf32, #tpu.memory_space<vmem>>, vector<2x8x8x256xf32>
    %12 = vector.shape_cast %11 : vector<2x8x8x256xf32> to vector<128x256xf32>
    %c512 = arith.constant 512 : index
    %c0_14 = arith.constant 0 : index
    %13 = vector.load %arg3[%c512, %c0_14] : memref<2304x64xf32, #tpu.memory_space<vmem>>, vector<256x64xf32>
    %cst_15 = arith.constant dense<0.000000e+00> : vector<128x64xf32>
    %14 = tpu.matmul %12, %13, %cst_15 {dimension_numbers = #tpu.dot_dimension_numbers<[1], [0], [0], [1], [0, 0, 1, 1], [], []>} : vector<128x256xf32>, vector<256x64xf32>, vector<128x64xf32> -> vector<128x64xf32>
    %15 = arith.addf %10, %14 : vector<128x64xf32>
    %c0_16 = arith.constant 0 : index
    %c1_17 = arith.constant 1 : index
    %c0_18 = arith.constant 0 : index
    %c0_19 = arith.constant 0 : index
    %16 = vector.load %arg1[%c0_16, %c1_17, %c0_18, %c0_19] : memref<2x10x10x256xf32, #tpu.memory_space<vmem>>, vector<2x8x8x256xf32>
    %17 = vector.shape_cast %16 : vector<2x8x8x256xf32> to vector<128x256xf32>
    %c768 = arith.constant 768 : index
    %c0_20 = arith.constant 0 : index
    %18 = vector.load %arg3[%c768, %c0_20] : memref<2304x64xf32, #tpu.memory_space<vmem>>, vector<256x64xf32>
    %cst_21 = arith.constant dense<0.000000e+00> : vector<128x64xf32>
    %19 = tpu.matmul %17, %18, %cst_21 {dimension_numbers = #tpu.dot_dimension_numbers<[1], [0], [0], [1], [0, 0, 1, 1], [], []>} : vector<128x256xf32>, vector<256x64xf32>, vector<128x64xf32> -> vector<128x64xf32>
    %20 = arith.addf %15, %19 : vector<128x64xf32>
    %c0_22 = arith.constant 0 : index
    %c1_23 = arith.constant 1 : index
    %c1_24 = arith.constant 1 : index
    %c0_25 = arith.constant 0 : index
    %21 = vector.load %arg1[%c0_22, %c1_23, %c1_24, %c0_25] : memref<2x10x10x256xf32, #tpu.memory_space<vmem>>, vector<2x8x8x256xf32>
    %22 = vector.shape_cast %21 : vector<2x8x8x256xf32> to vector<128x256xf32>
    %c1024 = arith.constant 1024 : index
    %c0_26 = arith.constant 0 : index
    %23 = vector.load %arg3[%c1024, %c0_26] : memref<2304x64xf32, #tpu.memory_space<vmem>>, vector<256x64xf32>
    %cst_27 = arith.constant dense<0.000000e+00> : vector<128x64xf32>
    %24 = tpu.matmul %22, %23, %cst_27 {dimension_numbers = #tpu.dot_dimension_numbers<[1], [0], [0], [1], [0, 0, 1, 1], [], []>} : vector<128x256xf32>, vector<256x64xf32>, vector<128x64xf32> -> vector<128x64xf32>
    %25 = arith.addf %20, %24 : vector<128x64xf32>
    %c0_28 = arith.constant 0 : index
    %c1_29 = arith.constant 1 : index
    %c2_30 = arith.constant 2 : index
    %c0_31 = arith.constant 0 : index
    %26 = vector.load %arg1[%c0_28, %c1_29, %c2_30, %c0_31] : memref<2x10x10x256xf32, #tpu.memory_space<vmem>>, vector<2x8x8x256xf32>
    %27 = vector.shape_cast %26 : vector<2x8x8x256xf32> to vector<128x256xf32>
    %c1280 = arith.constant 1280 : index
    %c0_32 = arith.constant 0 : index
    %28 = vector.load %arg3[%c1280, %c0_32] : memref<2304x64xf32, #tpu.memory_space<vmem>>, vector<256x64xf32>
    %cst_33 = arith.constant dense<0.000000e+00> : vector<128x64xf32>
    %29 = tpu.matmul %27, %28, %cst_33 {dimension_numbers = #tpu.dot_dimension_numbers<[1], [0], [0], [1], [0, 0, 1, 1], [], []>} : vector<128x256xf32>, vector<256x64xf32>, vector<128x64xf32> -> vector<128x64xf32>
    %30 = arith.addf %25, %29 : vector<128x64xf32>
    %c0_34 = arith.constant 0 : index
    %c2_35 = arith.constant 2 : index
    %c0_36 = arith.constant 0 : index
    %c0_37 = arith.constant 0 : index
    %31 = vector.load %arg1[%c0_34, %c2_35, %c0_36, %c0_37] : memref<2x10x10x256xf32, #tpu.memory_space<vmem>>, vector<2x8x8x256xf32>
    %32 = vector.shape_cast %31 : vector<2x8x8x256xf32> to vector<128x256xf32>
    %c1536 = arith.constant 1536 : index
    %c0_38 = arith.constant 0 : index
    %33 = vector.load %arg3[%c1536, %c0_38] : memref<2304x64xf32, #tpu.memory_space<vmem>>, vector<256x64xf32>
    %cst_39 = arith.constant dense<0.000000e+00> : vector<128x64xf32>
    %34 = tpu.matmul %32, %33, %cst_39 {dimension_numbers = #tpu.dot_dimension_numbers<[1], [0], [0], [1], [0, 0, 1, 1], [], []>} : vector<128x256xf32>, vector<256x64xf32>, vector<128x64xf32> -> vector<128x64xf32>
    %35 = arith.addf %30, %34 : vector<128x64xf32>
    %c0_40 = arith.constant 0 : index
    %c2_41 = arith.constant 2 : index
    %c1_42 = arith.constant 1 : index
    %c0_43 = arith.constant 0 : index
    %36 = vector.load %arg1[%c0_40, %c2_41, %c1_42, %c0_43] : memref<2x10x10x256xf32, #tpu.memory_space<vmem>>, vector<2x8x8x256xf32>
    %37 = vector.shape_cast %36 : vector<2x8x8x256xf32> to vector<128x256xf32>
    %c1792 = arith.constant 1792 : index
    %c0_44 = arith.constant 0 : index
    %38 = vector.load %arg3[%c1792, %c0_44] : memref<2304x64xf32, #tpu.memory_space<vmem>>, vector<256x64xf32>
    %cst_45 = arith.constant dense<0.000000e+00> : vector<128x64xf32>
    %39 = tpu.matmul %37, %38, %cst_45 {dimension_numbers = #tpu.dot_dimension_numbers<[1], [0], [0], [1], [0, 0, 1, 1], [], []>} : vector<128x256xf32>, vector<256x64xf32>, vector<128x64xf32> -> vector<128x64xf32>
    %40 = arith.addf %35, %39 : vector<128x64xf32>
    %c0_46 = arith.constant 0 : index
    %c2_47 = arith.constant 2 : index
    %c2_48 = arith.constant 2 : index
    %c0_49 = arith.constant 0 : index
    %41 = vector.load %arg1[%c0_46, %c2_47, %c2_48, %c0_49] : memref<2x10x10x256xf32, #tpu.memory_space<vmem>>, vector<2x8x8x256xf32>
    %42 = vector.shape_cast %41 : vector<2x8x8x256xf32> to vector<128x256xf32>
    %c2048 = arith.constant 2048 : index
    %c0_50 = arith.constant 0 : index
    %43 = vector.load %arg3[%c2048, %c0_50] : memref<2304x64xf32, #tpu.memory_space<vmem>>, vector<256x64xf32>
    %cst_51 = arith.constant dense<0.000000e+00> : vector<128x64xf32>
    %44 = tpu.matmul %42, %43, %cst_51 {dimension_numbers = #tpu.dot_dimension_numbers<[1], [0], [0], [1], [0, 0, 1, 1], [], []>} : vector<128x256xf32>, vector<256x64xf32>, vector<128x64xf32> -> vector<128x64xf32>
    %45 = arith.addf %40, %44 : vector<128x64xf32>
    %c0_52 = arith.constant 0 : index
    %c0_53 = arith.constant 0 : index
    %46 = vector.load %arg4[%c0_52, %c0_53] : memref<1x64xf32, #tpu.memory_space<vmem>>, vector<1x64xf32>
    %47 = vector.broadcast %46 : vector<1x64xf32> to vector<128x64xf32>
    %48 = arith.addf %45, %47 : vector<128x64xf32>
    %cst_54 = arith.constant 0.000000e+00 : f32
    %49 = vector.broadcast %cst_54 : f32 to vector<128x64xf32>
    %50 = arith.maximumf %48, %49 : vector<128x64xf32>
    %cst_55 = arith.constant 0.000000e+00 : f32
    %51 = vector.broadcast %cst_55 : f32 to vector<2x10x10x64xf32>
    %c0_56 = arith.constant 0 : index
    %c0_57 = arith.constant 0 : index
    %c0_58 = arith.constant 0 : index
    %c0_59 = arith.constant 0 : index
    %52 = vector.load %arg21[%c0_56, %c0_57, %c0_58, %c0_59] : memref<2x10x10x64xf32, #tpu.memory_space<vmem>>, vector<2x10x10x64xf32>
    tpu.vector_store %arg21[%c0_56, %c0_57, %c0_58, %c0_59], %51 {strides = array<i32>} : memref<2x10x10x64xf32, #tpu.memory_space<vmem>>, vector<2x10x10x64xf32>,
    %53 = vector.shape_cast %50 : vector<128x64xf32> to vector<2x8x8x64xf32>
    %c0_60 = arith.constant 0 : index
    %c1_61 = arith.constant 1 : index
    %c1_62 = arith.constant 1 : index
    %c0_63 = arith.constant 0 : index
    %54 = vector.load %arg21[%c0_60, %c1_61, %c1_62, %c0_63] : memref<2x10x10x64xf32, #tpu.memory_space<vmem>>, vector<2x8x8x64xf32>
    tpu.vector_store %arg21[%c0_60, %c1_61, %c1_62, %c0_63], %53 {strides = array<i32>} : memref<2x10x10x64xf32, #tpu.memory_space<vmem>>, vector<2x8x8x64xf32>,
    %cst_64 = arith.constant 0.000000e+00 : f32
    %55 = vector.broadcast %cst_64 : f32 to vector<128x16xf32>
    %c0_65 = arith.constant 0 : index
    %c0_66 = arith.constant 0 : index
    %c0_67 = arith.constant 0 : index
    %c0_68 = arith.constant 0 : index
    %56 = vector.load %arg21[%c0_65, %c0_66, %c0_67, %c0_68] : memref<2x10x10x64xf32, #tpu.memory_space<vmem>>, vector<2x8x8x64xf32>
    %57 = vector.shape_cast %56 : vector<2x8x8x64xf32> to vector<128x64xf32>
    %c0_69 = arith.constant 0 : index
    %c0_70 = arith.constant 0 : index
    %58 = vector.load %arg5[%c0_69, %c0_70] : memref<576x16xf32, #tpu.memory_space<vmem>>, vector<64x16xf32>
    %cst_71 = arith.constant dense<0.000000e+00> : vector<128x16xf32>
    %59 = tpu.matmul %57, %58, %cst_71 {dimension_numbers = #tpu.dot_dimension_numbers<[1], [0], [0], [1], [0, 0, 1, 1], [], []>} : vector<128x64xf32>, vector<64x16xf32>, vector<128x16xf32> -> vector<128x16xf32>
    %60 = arith.addf %55, %59 : vector<128x16xf32>
    %c0_72 = arith.constant 0 : index
    %c0_73 = arith.constant 0 : index
    %c1_74 = arith.constant 1 : index
    %c0_75 = arith.constant 0 : index
    %61 = vector.load %arg21[%c0_72, %c0_73, %c1_74, %c0_75] : memref<2x10x10x64xf32, #tpu.memory_space<vmem>>, vector<2x8x8x64xf32>
    %62 = vector.shape_cast %61 : vector<2x8x8x64xf32> to vector<128x64xf32>
    %c64 = arith.constant 64 : index
    %c0_76 = arith.constant 0 : index
    %63 = vector.load %arg5[%c64, %c0_76] : memref<576x16xf32, #tpu.memory_space<vmem>>, vector<64x16xf32>
    %cst_77 = arith.constant dense<0.000000e+00> : vector<128x16xf32>
    %64 = tpu.matmul %62, %63, %cst_77 {dimension_numbers = #tpu.dot_dimension_numbers<[1], [0], [0], [1], [0, 0, 1, 1], [], []>} : vector<128x64xf32>, vector<64x16xf32>, vector<128x16xf32> -> vector<128x16xf32>
    %65 = arith.addf %60, %64 : vector<128x16xf32>
    %c0_78 = arith.constant 0 : index
    %c0_79 = arith.constant 0 : index
    %c2_80 = arith.constant 2 : index
    %c0_81 = arith.constant 0 : index
    %66 = vector.load %arg21[%c0_78, %c0_79, %c2_80, %c0_81] : memref<2x10x10x64xf32, #tpu.memory_space<vmem>>, vector<2x8x8x64xf32>
    %67 = vector.shape_cast %66 : vector<2x8x8x64xf32> to vector<128x64xf32>
    %c128 = arith.constant 128 : index
    %c0_82 = arith.constant 0 : index
    %68 = vector.load %arg5[%c128, %c0_82] : memref<576x16xf32, #tpu.memory_space<vmem>>, vector<64x16xf32>
    %cst_83 = arith.constant dense<0.000000e+00> : vector<128x16xf32>
    %69 = tpu.matmul %67, %68, %cst_83 {dimension_numbers = #tpu.dot_dimension_numbers<[1], [0], [0], [1], [0, 0, 1, 1], [], []>} : vector<128x64xf32>, vector<64x16xf32>, vector<128x16xf32> -> vector<128x16xf32>
    %70 = arith.addf %65, %69 : vector<128x16xf32>
    %c0_84 = arith.constant 0 : index
    %c1_85 = arith.constant 1 : index
    %c0_86 = arith.constant 0 : index
    %c0_87 = arith.constant 0 : index
    %71 = vector.load %arg21[%c0_84, %c1_85, %c0_86, %c0_87] : memref<2x10x10x64xf32, #tpu.memory_space<vmem>>, vector<2x8x8x64xf32>
    %72 = vector.shape_cast %71 : vector<2x8x8x64xf32> to vector<128x64xf32>
    %c192 = arith.constant 192 : index
    %c0_88 = arith.constant 0 : index
    %73 = vector.load %arg5[%c192, %c0_88] : memref<576x16xf32, #tpu.memory_space<vmem>>, vector<64x16xf32>
    %cst_89 = arith.constant dense<0.000000e+00> : vector<128x16xf32>
    %74 = tpu.matmul %72, %73, %cst_89 {dimension_numbers = #tpu.dot_dimension_numbers<[1], [0], [0], [1], [0, 0, 1, 1], [], []>} : vector<128x64xf32>, vector<64x16xf32>, vector<128x16xf32> -> vector<128x16xf32>
    %75 = arith.addf %70, %74 : vector<128x16xf32>
    %c0_90 = arith.constant 0 : index
    %c1_91 = arith.constant 1 : index
    %c1_92 = arith.constant 1 : index
    %c0_93 = arith.constant 0 : index
    %76 = vector.load %arg21[%c0_90, %c1_91, %c1_92, %c0_93] : memref<2x10x10x64xf32, #tpu.memory_space<vmem>>, vector<2x8x8x64xf32>
    %77 = vector.shape_cast %76 : vector<2x8x8x64xf32> to vector<128x64xf32>
    %c256_94 = arith.constant 256 : index
    %c0_95 = arith.constant 0 : index
    %78 = vector.load %arg5[%c256_94, %c0_95] : memref<576x16xf32, #tpu.memory_space<vmem>>, vector<64x16xf32>
    %cst_96 = arith.constant dense<0.000000e+00> : vector<128x16xf32>
    %79 = tpu.matmul %77, %78, %cst_96 {dimension_numbers = #tpu.dot_dimension_numbers<[1], [0], [0], [1], [0, 0, 1, 1], [], []>} : vector<128x64xf32>, vector<64x16xf32>, vector<128x16xf32> -> vector<128x16xf32>
    %80 = arith.addf %75, %79 : vector<128x16xf32>
    %c0_97 = arith.constant 0 : index
    %c1_98 = arith.constant 1 : index
    %c2_99 = arith.constant 2 : index
    %c0_100 = arith.constant 0 : index
    %81 = vector.load %arg21[%c0_97, %c1_98, %c2_99, %c0_100] : memref<2x10x10x64xf32, #tpu.memory_space<vmem>>, vector<2x8x8x64xf32>
    %82 = vector.shape_cast %81 : vector<2x8x8x64xf32> to vector<128x64xf32>
    %c320 = arith.constant 320 : index
    %c0_101 = arith.constant 0 : index
    %83 = vector.load %arg5[%c320, %c0_101] : memref<576x16xf32, #tpu.memory_space<vmem>>, vector<64x16xf32>
    %cst_102 = arith.constant dense<0.000000e+00> : vector<128x16xf32>
    %84 = tpu.matmul %82, %83, %cst_102 {dimension_numbers = #tpu.dot_dimension_numbers<[1], [0], [0], [1], [0, 0, 1, 1], [], []>} : vector<128x64xf32>, vector<64x16xf32>, vector<128x16xf32> -> vector<128x16xf32>
    %85 = arith.addf %80, %84 : vector<128x16xf32>
    %c0_103 = arith.constant 0 : index
    %c2_104 = arith.constant 2 : index
    %c0_105 = arith.constant 0 : index
    %c0_106 = arith.constant 0 : index
    %86 = vector.load %arg21[%c0_103, %c2_104, %c0_105, %c0_106] : memref<2x10x10x64xf32, #tpu.memory_space<vmem>>, vector<2x8x8x64xf32>
    %87 = vector.shape_cast %86 : vector<2x8x8x64xf32> to vector<128x64xf32>
    %c384 = arith.constant 384 : index
    %c0_107 = arith.constant 0 : index
    %88 = vector.load %arg5[%c384, %c0_107] : memref<576x16xf32, #tpu.memory_space<vmem>>, vector<64x16xf32>
    %cst_108 = arith.constant dense<0.000000e+00> : vector<128x16xf32>
    %89 = tpu.matmul %87, %88, %cst_108 {dimension_numbers = #tpu.dot_dimension_numbers<[1], [0], [0], [1], [0, 0, 1, 1], [], []>} : vector<128x64xf32>, vector<64x16xf32>, vector<128x16xf32> -> vector<128x16xf32>
    %90 = arith.addf %85, %89 : vector<128x16xf32>
    %c0_109 = arith.constant 0 : index
    %c2_110 = arith.constant 2 : index
    %c1_111 = arith.constant 1 : index
    %c0_112 = arith.constant 0 : index
    %91 = vector.load %arg21[%c0_109, %c2_110, %c1_111, %c0_112] : memref<2x10x10x64xf32, #tpu.memory_space<vmem>>, vector<2x8x8x64xf32>
    %92 = vector.shape_cast %91 : vector<2x8x8x64xf32> to vector<128x64xf32>
    %c448 = arith.constant 448 : index
    %c0_113 = arith.constant 0 : index
    %93 = vector.load %arg5[%c448, %c0_113] : memref<576x16xf32, #tpu.memory_space<vmem>>, vector<64x16xf32>
    %cst_114 = arith.constant dense<0.000000e+00> : vector<128x16xf32>
    %94 = tpu.matmul %92, %93, %cst_114 {dimension_numbers = #tpu.dot_dimension_numbers<[1], [0], [0], [1], [0, 0, 1, 1], [], []>} : vector<128x64xf32>, vector<64x16xf32>, vector<128x16xf32> -> vector<128x16xf32>
    %95 = arith.addf %90, %94 : vector<128x16xf32>
    %c0_115 = arith.constant 0 : index
    %c2_116 = arith.constant 2 : index
    %c2_117 = arith.constant 2 : index
    %c0_118 = arith.constant 0 : index
    %96 = vector.load %arg21[%c0_115, %c2_116, %c2_117, %c0_118] : memref<2x10x10x64xf32, #tpu.memory_space<vmem>>, vector<2x8x8x64xf32>
    %97 = vector.shape_cast %96 : vector<2x8x8x64xf32> to vector<128x64xf32>
    %c512_119 = arith.constant 512 : index
    %c0_120 = arith.constant 0 : index
    %98 = vector.load %arg5[%c512_119, %c0_120] : memref<576x16xf32, #tpu.memory_space<vmem>>, vector<64x16xf32>
    %cst_121 = arith.constant dense<0.000000e+00> : vector<128x16xf32>
    %99 = tpu.matmul %97, %98, %cst_121 {dimension_numbers = #tpu.dot_dimension_numbers<[1], [0], [0], [1], [0, 0, 1, 1], [], []>} : vector<128x64xf32>, vector<64x16xf32>, vector<128x16xf32> -> vector<128x16xf32>
    %100 = arith.addf %95, %99 : vector<128x16xf32>
    %c0_122 = arith.constant 0 : index
    %c0_123 = arith.constant 0 : index
    %101 = vector.load %arg6[%c0_122, %c0_123] : memref<1x16xf32, #tpu.memory_space<vmem>>, vector<1x16xf32>
    %102 = vector.broadcast %101 : vector<1x16xf32> to vector<128x16xf32>
    %103 = arith.addf %100, %102 : vector<128x16xf32>
    %cst_124 = arith.constant 0.000000e+00 : f32
    %104 = vector.broadcast %cst_124 : f32 to vector<128x16xf32>
    %105 = arith.maximumf %103, %104 : vector<128x16xf32>
    %106 = vector.shape_cast %105 : vector<128x16xf32> to vector<2x64x16xf32>
    %c0_125 = arith.constant 0 : index
    %c0_126 = arith.constant 0 : index
    %c0_127 = arith.constant 0 : index
    %107 = vector.load %arg22[%c0_125, %c0_126, %c0_127] : memref<2x64x16xf32, #tpu.memory_space<vmem>>, vector<2x64x16xf32>
    tpu.vector_store %arg22[%c0_125, %c0_126, %c0_127], %106 {strides = array<i32>} : memref<2x64x16xf32, #tpu.memory_space<vmem>>, vector<2x64x16xf32>,
    %c0_128 = arith.constant 0 : index
    %c0_129 = arith.constant 0 : index
    %c0_130 = arith.constant 0 : index
    %108 = vector.load %arg22[%c0_128, %c0_129, %c0_130] : memref<2x64x16xf32, #tpu.memory_space<vmem>>, vector<2x1x16xf32>
    %109 = vector.shape_cast %108 : vector<2x1x16xf32> to vector<2x16xf32>
    %c0_131 = arith.constant 0 : index
    %c0_132 = arith.constant 0 : index
    %110 = vector.load %arg23[%c0_131, %c0_132] : memref<2x1024xf32, #tpu.memory_space<vmem>>, vector<2x16xf32>
    tpu.vector_store %arg23[%c0_131, %c0_132], %109 {strides = array<i32>} : memref<2x1024xf32, #tpu.memory_space<vmem>>, vector<2x16xf32>,
    %c0_133 = arith.constant 0 : index
    %c1_134 = arith.constant 1 : index
    %c0_135 = arith.constant 0 : index
    %111 = vector.load %arg22[%c0_133, %c1_134, %c0_135] : memref<2x64x16xf32, #tpu.memory_space<vmem>>, vector<2x1x16xf32>
    %112 = vector.shape_cast %111 : vector<2x1x16xf32> to vector<2x16xf32>
    %c0_136 = arith.constant 0 : index
    %c16 = arith.constant 16 : index
    %113 = vector.load %arg23[%c0_136, %c16] : memref<2x1024xf32, #tpu.memory_space<vmem>>, vector<2x16xf32>
    tpu.vector_store %arg23[%c0_136, %c16], %112 {strides = array<i32>} : memref<2x1024xf32, #tpu.memory_space<vmem>>, vector<2x16xf32>,
    %c0_137 = arith.constant 0 : index
    %c2_138 = arith.constant 2 : index
    %c0_139 = arith.constant 0 : index
    %114 = vector.load %arg22[%c0_137, %c2_138, %c0_139] : memref<2x64x16xf32, #tpu.memory_space<vmem>>, vector<2x1x16xf32>
    %115 = vector.shape_cast %114 : vector<2x1x16xf32> to vector<2x16xf32>
    %c0_140 = arith.constant 0 : index
    %c32 = arith.constant 32 : index
    %116 = vector.load %arg23[%c0_140, %c32] : memref<2x1024xf32, #tpu.memory_space<vmem>>, vector<2x16xf32>
    tpu.vector_store %arg23[%c0_140, %c32], %115 {strides = array<i32>} : memref<2x1024xf32, #tpu.memory_space<vmem>>, vector<2x16xf32>,
    %c0_141 = arith.constant 0 : index
    %c3 = arith.constant 3 : index
    %c0_142 = arith.constant 0 : index
    %117 = vector.load %arg22[%c0_141, %c3, %c0_142] : memref<2x64x16xf32, #tpu.memory_space<vmem>>, vector<2x1x16xf32>
    %118 = vector.shape_cast %117 : vector<2x1x16xf32> to vector<2x16xf32>
    %c0_143 = arith.constant 0 : index
    %c48 = arith.constant 48 : index
    %119 = vector.load %arg23[%c0_143, %c48] : memref<2x1024xf32, #tpu.memory_space<vmem>>, vector<2x16xf32>
    tpu.vector_store %arg23[%c0_143, %c48], %118 {strides = array<i32>} : memref<2x1024xf32, #tpu.memory_space<vmem>>, vector<2x16xf32>,
    %c0_144 = arith.constant 0 : index
    %c4 = arith.constant 4 : index
    %c0_145 = arith.constant 0 : index
    %120 = vector.load %arg22[%c0_144, %c4, %c0_145] : memref<2x64x16xf32, #tpu.memory_space<vmem>>, vector<2x1x16xf32>
    %121 = vector.shape_cast %120 : vector<2x1x16xf32> to vector<2x16xf32>
    %c0_146 = arith.constant 0 : index
    %c64_147 = arith.constant 64 : index
    %122 = vector.load %arg23[%c0_146, %c64_147] : memref<2x1024xf32, #tpu.memory_space<vmem>>, vector<2x16xf32>
    tpu.vector_store %arg23[%c0_146, %c64_147], %121 {strides = array<i32>} : memref<2x1024xf32, #tpu.memory_space<vmem>>, vector<2x16xf32>,
    %c0_148 = arith.constant 0 : index
    %c5 = arith.constant 5 : index
    %c0_149 = arith.constant 0 : index
    %123 = vector.load %arg22[%c0_148, %c5, %c0_149] : memref<2x64x16xf32, #tpu.memory_space<vmem>>, vector<2x1x16xf32>
    %124 = vector.shape_cast %123 : vector<2x1x16xf32> to vector<2x16xf32>
    %c0_150 = arith.constant 0 : index
    %c80 = arith.constant 80 : index
    %125 = vector.load %arg23[%c0_150, %c80] : memref<2x1024xf32, #tpu.memory_space<vmem>>, vector<2x16xf32>
    tpu.vector_store %arg23[%c0_150, %c80], %124 {strides = array<i32>} : memref<2x1024xf32, #tpu.memory_space<vmem>>, vector<2x16xf32>,
    %c0_151 = arith.constant 0 : index
    %c6 = arith.constant 6 : index
    %c0_152 = arith.constant 0 : index
    %126 = vector.load %arg22[%c0_151, %c6, %c0_152] : memref<2x64x16xf32, #tpu.memory_space<vmem>>, vector<2x1x16xf32>
    %127 = vector.shape_cast %126 : vector<2x1x16xf32> to vector<2x16xf32>
    %c0_153 = arith.constant 0 : index
    %c96 = arith.constant 96 : index
    %128 = vector.load %arg23[%c0_153, %c96] : memref<2x1024xf32, #tpu.memory_space<vmem>>, vector<2x16xf32>
    tpu.vector_store %arg23[%c0_153, %c96], %127 {strides = array<i32>} : memref<2x1024xf32, #tpu.memory_space<vmem>>, vector<2x16xf32>,
    %c0_154 = arith.constant 0 : index
    %c7 = arith.constant 7 : index
    %c0_155 = arith.constant 0 : index
    %129 = vector.load %arg22[%c0_154, %c7, %c0_155] : memref<2x64x16xf32, #tpu.memory_space<vmem>>, vector<2x1x16xf32>
    %130 = vector.shape_cast %129 : vector<2x1x16xf32> to vector<2x16xf32>
    %c0_156 = arith.constant 0 : index
    %c112 = arith.constant 112 : index
    %131 = vector.load %arg23[%c0_156, %c112] : memref<2x1024xf32, #tpu.memory_space<vmem>>, vector<2x16xf32>
    tpu.vector_store %arg23[%c0_156, %c112], %130 {strides = array<i32>} : memref<2x1024xf32, #tpu.memory_space<vmem>>, vector<2x16xf32>,
    %c0_157 = arith.constant 0 : index
    %c8 = arith.constant 8 : index
    %c0_158 = arith.constant 0 : index
    %132 = vector.load %arg22[%c0_157, %c8, %c0_158] : memref<2x64x16xf32, #tpu.memory_space<vmem>>, vector<2x1x16xf32>
    %133 = vector.shape_cast %132 : vector<2x1x16xf32> to vector<2x16xf32>
    %c0_159 = arith.constant 0 : index
    %c128_160 = arith.constant 128 : index
    %134 = vector.load %arg23[%c0_159, %c128_160] : memref<2x1024xf32, #tpu.memory_space<vmem>>, vector<2x16xf32>
    tpu.vector_store %arg23[%c0_159, %c128_160], %133 {strides = array<i32>} : memref<2x1024xf32, #tpu.memory_space<vmem>>, vector<2x16xf32>,
    %c0_161 = arith.constant 0 : index
    %c9 = arith.constant 9 : index
    %c0_162 = arith.constant 0 : index
    %135 = vector.load %arg22[%c0_161, %c9, %c0_162] : memref<2x64x16xf32, #tpu.memory_space<vmem>>, vector<2x1x16xf32>
    %136 = vector.shape_cast %135 : vector<2x1x16xf32> to vector<2x16xf32>
    %c0_163 = arith.constant 0 : index
    %c144 = arith.constant 144 : index
    %137 = vector.load %arg23[%c0_163, %c144] : memref<2x1024xf32, #tpu.memory_space<vmem>>, vector<2x16xf32>
    tpu.vector_store %arg23[%c0_163, %c144], %136 {strides = array<i32>} : memref<2x1024xf32, #tpu.memory_space<vmem>>, vector<2x16xf32>,
    %c0_164 = arith.constant 0 : index
    %c10 = arith.constant 10 : index
    %c0_165 = arith.constant 0 : index
    %138 = vector.load %arg22[%c0_164, %c10, %c0_165] : memref<2x64x16xf32, #tpu.memory_space<vmem>>, vector<2x1x16xf32>
    %139 = vector.shape_cast %138 : vector<2x1x16xf32> to vector<2x16xf32>
    %c0_166 = arith.constant 0 : index
    %c160 = arith.constant 160 : index
    %140 = vector.load %arg23[%c0_166, %c160] : memref<2x1024xf32, #tpu.memory_space<vmem>>, vector<2x16xf32>
    tpu.vector_store %arg23[%c0_166, %c160], %139 {strides = array<i32>} : memref<2x1024xf32, #tpu.memory_space<vmem>>, vector<2x16xf32>,
    %c0_167 = arith.constant 0 : index
    %c11 = arith.constant 11 : index
    %c0_168 = arith.constant 0 : index
    %141 = vector.load %arg22[%c0_167, %c11, %c0_168] : memref<2x64x16xf32, #tpu.memory_space<vmem>>, vector<2x1x16xf32>
    %142 = vector.shape_cast %141 : vector<2x1x16xf32> to vector<2x16xf32>
    %c0_169 = arith.constant 0 : index
    %c176 = arith.constant 176 : index
    %143 = vector.load %arg23[%c0_169, %c176] : memref<2x1024xf32, #tpu.memory_space<vmem>>, vector<2x16xf32>
    tpu.vector_store %arg23[%c0_169, %c176], %142 {strides = array<i32>} : memref<2x1024xf32, #tpu.memory_space<vmem>>, vector<2x16xf32>,
    %c0_170 = arith.constant 0 : index
    %c12 = arith.constant 12 : index
    %c0_171 = arith.constant 0 : index
    %144 = vector.load %arg22[%c0_170, %c12, %c0_171] : memref<2x64x16xf32, #tpu.memory_space<vmem>>, vector<2x1x16xf32>
    %145 = vector.shape_cast %144 : vector<2x1x16xf32> to vector<2x16xf32>
    %c0_172 = arith.constant 0 : index
    %c192_173 = arith.constant 192 : index
    %146 = vector.load %arg23[%c0_172, %c192_173] : memref<2x1024xf32, #tpu.memory_space<vmem>>, vector<2x16xf32>
    tpu.vector_store %arg23[%c0_172, %c192_173], %145 {strides = array<i32>} : memref<2x1024xf32, #tpu.memory_space<vmem>>, vector<2x16xf32>,
    %c0_174 = arith.constant 0 : index
    %c13 = arith.constant 13 : index
    %c0_175 = arith.constant 0 : index
    %147 = vector.load %arg22[%c0_174, %c13, %c0_175] : memref<2x64x16xf32, #tpu.memory_space<vmem>>, vector<2x1x16xf32>
    %148 = vector.shape_cast %147 : vector<2x1x16xf32> to vector<2x16xf32>
    %c0_176 = arith.constant 0 : index
    %c208 = arith.constant 208 : index
    %149 = vector.load %arg23[%c0_176, %c208] : memref<2x1024xf32, #tpu.memory_space<vmem>>, vector<2x16xf32>
    tpu.vector_store %arg23[%c0_176, %c208], %148 {strides = array<i32>} : memref<2x1024xf32, #tpu.memory_space<vmem>>, vector<2x16xf32>,
    %c0_177 = arith.constant 0 : index
    %c14 = arith.constant 14 : index
    %c0_178 = arith.constant 0 : index
    %150 = vector.load %arg22[%c0_177, %c14, %c0_178] : memref<2x64x16xf32, #tpu.memory_space<vmem>>, vector<2x1x16xf32>
    %151 = vector.shape_cast %150 : vector<2x1x16xf32> to vector<2x16xf32>
    %c0_179 = arith.constant 0 : index
    %c224 = arith.constant 224 : index
    %152 = vector.load %arg23[%c0_179, %c224] : memref<2x1024xf32, #tpu.memory_space<vmem>>, vector<2x16xf32>
    tpu.vector_store %arg23[%c0_179, %c224], %151 {strides = array<i32>} : memref<2x1024xf32, #tpu.memory_space<vmem>>, vector<2x16xf32>,
    %c0_180 = arith.constant 0 : index
    %c15 = arith.constant 15 : index
    %c0_181 = arith.constant 0 : index
    %153 = vector.load %arg22[%c0_180, %c15, %c0_181] : memref<2x64x16xf32, #tpu.memory_space<vmem>>, vector<2x1x16xf32>
    %154 = vector.shape_cast %153 : vector<2x1x16xf32> to vector<2x16xf32>
    %c0_182 = arith.constant 0 : index
    %c240 = arith.constant 240 : index
    %155 = vector.load %arg23[%c0_182, %c240] : memref<2x1024xf32, #tpu.memory_space<vmem>>, vector<2x16xf32>
    tpu.vector_store %arg23[%c0_182, %c240], %154 {strides = array<i32>} : memref<2x1024xf32, #tpu.memory_space<vmem>>, vector<2x16xf32>,
    %c0_183 = arith.constant 0 : index
    %c16_184 = arith.constant 16 : index
    %c0_185 = arith.constant 0 : index
    %156 = vector.load %arg22[%c0_183, %c16_184, %c0_185] : memref<2x64x16xf32, #tpu.memory_space<vmem>>, vector<2x1x16xf32>
    %157 = vector.shape_cast %156 : vector<2x1x16xf32> to vector<2x16xf32>
    %c0_186 = arith.constant 0 : index
    %c256_187 = arith.constant 256 : index
    %158 = vector.load %arg23[%c0_186, %c256_187] : memref<2x1024xf32, #tpu.memory_space<vmem>>, vector<2x16xf32>
    tpu.vector_store %arg23[%c0_186, %c256_187], %157 {strides = array<i32>} : memref<2x1024xf32, #tpu.memory_space<vmem>>, vector<2x16xf32>,
    %c0_188 = arith.constant 0 : index
    %c17 = arith.constant 17 : index
    %c0_189 = arith.constant 0 : index
    %159 = vector.load %arg22[%c0_188, %c17, %c0_189] : memref<2x64x16xf32, #tpu.memory_space<vmem>>, vector<2x1x16xf32>
    %160 = vector.shape_cast %159 : vector<2x1x16xf32> to vector<2x16xf32>
    %c0_190 = arith.constant 0 : index
    %c272 = arith.constant 272 : index
    %161 = vector.load %arg23[%c0_190, %c272] : memref<2x1024xf32, #tpu.memory_space<vmem>>, vector<2x16xf32>
    tpu.vector_store %arg23[%c0_190, %c272], %160 {strides = array<i32>} : memref<2x1024xf32, #tpu.memory_space<vmem>>, vector<2x16xf32>,
    %c0_191 = arith.constant 0 : index
    %c18 = arith.constant 18 : index
    %c0_192 = arith.constant 0 : index
    %162 = vector.load %arg22[%c0_191, %c18, %c0_192] : memref<2x64x16xf32, #tpu.memory_space<vmem>>, vector<2x1x16xf32>
    %163 = vector.shape_cast %162 : vector<2x1x16xf32> to vector<2x16xf32>
    %c0_193 = arith.constant 0 : index
    %c288 = arith.constant 288 : index
    %164 = vector.load %arg23[%c0_193, %c288] : memref<2x1024xf32, #tpu.memory_space<vmem>>, vector<2x16xf32>
    tpu.vector_store %arg23[%c0_193, %c288], %163 {strides = array<i32>} : memref<2x1024xf32, #tpu.memory_space<vmem>>, vector<2x16xf32>,
    %c0_194 = arith.constant 0 : index
    %c19 = arith.constant 19 : index
    %c0_195 = arith.constant 0 : index
    %165 = vector.load %arg22[%c0_194, %c19, %c0_195] : memref<2x64x16xf32, #tpu.memory_space<vmem>>, vector<2x1x16xf32>
    %166 = vector.shape_cast %165 : vector<2x1x16xf32> to vector<2x16xf32>
    %c0_196 = arith.constant 0 : index
    %c304 = arith.constant 304 : index
    %167 = vector.load %arg23[%c0_196, %c304] : memref<2x1024xf32, #tpu.memory_space<vmem>>, vector<2x16xf32>
    tpu.vector_store %arg23[%c0_196, %c304], %166 {strides = array<i32>} : memref<2x1024xf32, #tpu.memory_space<vmem>>, vector<2x16xf32>,
    %c0_197 = arith.constant 0 : index
    %c20 = arith.constant 20 : index
    %c0_198 = arith.constant 0 : index
    %168 = vector.load %arg22[%c0_197, %c20, %c0_198] : memref<2x64x16xf32, #tpu.memory_space<vmem>>, vector<2x1x16xf32>
    %169 = vector.shape_cast %168 : vector<2x1x16xf32> to vector<2x16xf32>
    %c0_199 = arith.constant 0 : index
    %c320_200 = arith.constant 320 : index
    %170 = vector.load %arg23[%c0_199, %c320_200] : memref<2x1024xf32, #tpu.memory_space<vmem>>, vector<2x16xf32>
    tpu.vector_store %arg23[%c0_199, %c320_200], %169 {strides = array<i32>} : memref<2x1024xf32, #tpu.memory_space<vmem>>, vector<2x16xf32>,
    %c0_201 = arith.constant 0 : index
    %c21 = arith.constant 21 : index
    %c0_202 = arith.constant 0 : index
    %171 = vector.load %arg22[%c0_201, %c21, %c0_202] : memref<2x64x16xf32, #tpu.memory_space<vmem>>, vector<2x1x16xf32>
    %172 = vector.shape_cast %171 : vector<2x1x16xf32> to vector<2x16xf32>
    %c0_203 = arith.constant 0 : index
    %c336 = arith.constant 336 : index
    %173 = vector.load %arg23[%c0_203, %c336] : memref<2x1024xf32, #tpu.memory_space<vmem>>, vector<2x16xf32>
    tpu.vector_store %arg23[%c0_203, %c336], %172 {strides = array<i32>} : memref<2x1024xf32, #tpu.memory_space<vmem>>, vector<2x16xf32>,
    %c0_204 = arith.constant 0 : index
    %c22 = arith.constant 22 : index
    %c0_205 = arith.constant 0 : index
    %174 = vector.load %arg22[%c0_204, %c22, %c0_205] : memref<2x64x16xf32, #tpu.memory_space<vmem>>, vector<2x1x16xf32>
    %175 = vector.shape_cast %174 : vector<2x1x16xf32> to vector<2x16xf32>
    %c0_206 = arith.constant 0 : index
    %c352 = arith.constant 352 : index
    %176 = vector.load %arg23[%c0_206, %c352] : memref<2x1024xf32, #tpu.memory_space<vmem>>, vector<2x16xf32>
    tpu.vector_store %arg23[%c0_206, %c352], %175 {strides = array<i32>} : memref<2x1024xf32, #tpu.memory_space<vmem>>, vector<2x16xf32>,
    %c0_207 = arith.constant 0 : index
    %c23 = arith.constant 23 : index
    %c0_208 = arith.constant 0 : index
    %177 = vector.load %arg22[%c0_207, %c23, %c0_208] : memref<2x64x16xf32, #tpu.memory_space<vmem>>, vector<2x1x16xf32>
    %178 = vector.shape_cast %177 : vector<2x1x16xf32> to vector<2x16xf32>
    %c0_209 = arith.constant 0 : index
    %c368 = arith.constant 368 : index
    %179 = vector.load %arg23[%c0_209, %c368] : memref<2x1024xf32, #tpu.memory_space<vmem>>, vector<2x16xf32>
    tpu.vector_store %arg23[%c0_209, %c368], %178 {strides = array<i32>} : memref<2x1024xf32, #tpu.memory_space<vmem>>, vector<2x16xf32>,
    %c0_210 = arith.constant 0 : index
    %c24 = arith.constant 24 : index
    %c0_211 = arith.constant 0 : index
    %180 = vector.load %arg22[%c0_210, %c24, %c0_211] : memref<2x64x16xf32, #tpu.memory_space<vmem>>, vector<2x1x16xf32>
    %181 = vector.shape_cast %180 : vector<2x1x16xf32> to vector<2x16xf32>
    %c0_212 = arith.constant 0 : index
    %c384_213 = arith.constant 384 : index
    %182 = vector.load %arg23[%c0_212, %c384_213] : memref<2x1024xf32, #tpu.memory_space<vmem>>, vector<2x16xf32>
    tpu.vector_store %arg23[%c0_212, %c384_213], %181 {strides = array<i32>} : memref<2x1024xf32, #tpu.memory_space<vmem>>, vector<2x16xf32>,
    %c0_214 = arith.constant 0 : index
    %c25 = arith.constant 25 : index
    %c0_215 = arith.constant 0 : index
    %183 = vector.load %arg22[%c0_214, %c25, %c0_215] : memref<2x64x16xf32, #tpu.memory_space<vmem>>, vector<2x1x16xf32>
    %184 = vector.shape_cast %183 : vector<2x1x16xf32> to vector<2x16xf32>
    %c0_216 = arith.constant 0 : index
    %c400 = arith.constant 400 : index
    %185 = vector.load %arg23[%c0_216, %c400] : memref<2x1024xf32, #tpu.memory_space<vmem>>, vector<2x16xf32>
    tpu.vector_store %arg23[%c0_216, %c400], %184 {strides = array<i32>} : memref<2x1024xf32, #tpu.memory_space<vmem>>, vector<2x16xf32>,
    %c0_217 = arith.constant 0 : index
    %c26 = arith.constant 26 : index
    %c0_218 = arith.constant 0 : index
    %186 = vector.load %arg22[%c0_217, %c26, %c0_218] : memref<2x64x16xf32, #tpu.memory_space<vmem>>, vector<2x1x16xf32>
    %187 = vector.shape_cast %186 : vector<2x1x16xf32> to vector<2x16xf32>
    %c0_219 = arith.constant 0 : index
    %c416 = arith.constant 416 : index
    %188 = vector.load %arg23[%c0_219, %c416] : memref<2x1024xf32, #tpu.memory_space<vmem>>, vector<2x16xf32>
    tpu.vector_store %arg23[%c0_219, %c416], %187 {strides = array<i32>} : memref<2x1024xf32, #tpu.memory_space<vmem>>, vector<2x16xf32>,
    %c0_220 = arith.constant 0 : index
    %c27 = arith.constant 27 : index
    %c0_221 = arith.constant 0 : index
    %189 = vector.load %arg22[%c0_220, %c27, %c0_221] : memref<2x64x16xf32, #tpu.memory_space<vmem>>, vector<2x1x16xf32>
    %190 = vector.shape_cast %189 : vector<2x1x16xf32> to vector<2x16xf32>
    %c0_222 = arith.constant 0 : index
    %c432 = arith.constant 432 : index
    %191 = vector.load %arg23[%c0_222, %c432] : memref<2x1024xf32, #tpu.memory_space<vmem>>, vector<2x16xf32>
    tpu.vector_store %arg23[%c0_222, %c432], %190 {strides = array<i32>} : memref<2x1024xf32, #tpu.memory_space<vmem>>, vector<2x16xf32>,
    %c0_223 = arith.constant 0 : index
    %c28 = arith.constant 28 : index
    %c0_224 = arith.constant 0 : index
    %192 = vector.load %arg22[%c0_223, %c28, %c0_224] : memref<2x64x16xf32, #tpu.memory_space<vmem>>, vector<2x1x16xf32>
    %193 = vector.shape_cast %192 : vector<2x1x16xf32> to vector<2x16xf32>
    %c0_225 = arith.constant 0 : index
    %c448_226 = arith.constant 448 : index
    %194 = vector.load %arg23[%c0_225, %c448_226] : memref<2x1024xf32, #tpu.memory_space<vmem>>, vector<2x16xf32>
    tpu.vector_store %arg23[%c0_225, %c448_226], %193 {strides = array<i32>} : memref<2x1024xf32, #tpu.memory_space<vmem>>, vector<2x16xf32>,
    %c0_227 = arith.constant 0 : index
    %c29 = arith.constant 29 : index
    %c0_228 = arith.constant 0 : index
    %195 = vector.load %arg22[%c0_227, %c29, %c0_228] : memref<2x64x16xf32, #tpu.memory_space<vmem>>, vector<2x1x16xf32>
    %196 = vector.shape_cast %195 : vector<2x1x16xf32> to vector<2x16xf32>
    %c0_229 = arith.constant 0 : index
    %c464 = arith.constant 464 : index
    %197 = vector.load %arg23[%c0_229, %c464] : memref<2x1024xf32, #tpu.memory_space<vmem>>, vector<2x16xf32>
    tpu.vector_store %arg23[%c0_229, %c464], %196 {strides = array<i32>} : memref<2x1024xf32, #tpu.memory_space<vmem>>, vector<2x16xf32>,
    %c0_230 = arith.constant 0 : index
    %c30 = arith.constant 30 : index
    %c0_231 = arith.constant 0 : index
    %198 = vector.load %arg22[%c0_230, %c30, %c0_231] : memref<2x64x16xf32, #tpu.memory_space<vmem>>, vector<2x1x16xf32>
    %199 = vector.shape_cast %198 : vector<2x1x16xf32> to vector<2x16xf32>
    %c0_232 = arith.constant 0 : index
    %c480 = arith.constant 480 : index
    %200 = vector.load %arg23[%c0_232, %c480] : memref<2x1024xf32, #tpu.memory_space<vmem>>, vector<2x16xf32>
    tpu.vector_store %arg23[%c0_232, %c480], %199 {strides = array<i32>} : memref<2x1024xf32, #tpu.memory_space<vmem>>, vector<2x16xf32>,
    %c0_233 = arith.constant 0 : index
    %c31 = arith.constant 31 : index
    %c0_234 = arith.constant 0 : index
    %201 = vector.load %arg22[%c0_233, %c31, %c0_234] : memref<2x64x16xf32, #tpu.memory_space<vmem>>, vector<2x1x16xf32>
    %202 = vector.shape_cast %201 : vector<2x1x16xf32> to vector<2x16xf32>
    %c0_235 = arith.constant 0 : index
    %c496 = arith.constant 496 : index
    %203 = vector.load %arg23[%c0_235, %c496] : memref<2x1024xf32, #tpu.memory_space<vmem>>, vector<2x16xf32>
    tpu.vector_store %arg23[%c0_235, %c496], %202 {strides = array<i32>} : memref<2x1024xf32, #tpu.memory_space<vmem>>, vector<2x16xf32>,
    %c0_236 = arith.constant 0 : index
    %c32_237 = arith.constant 32 : index
    %c0_238 = arith.constant 0 : index
    %204 = vector.load %arg22[%c0_236, %c32_237, %c0_238] : memref<2x64x16xf32, #tpu.memory_space<vmem>>, vector<2x1x16xf32>
    %205 = vector.shape_cast %204 : vector<2x1x16xf32> to vector<2x16xf32>
    %c0_239 = arith.constant 0 : index
    %c512_240 = arith.constant 512 : index
    %206 = vector.load %arg23[%c0_239, %c512_240] : memref<2x1024xf32, #tpu.memory_space<vmem>>, vector<2x16xf32>
    tpu.vector_store %arg23[%c0_239, %c512_240], %205 {strides = array<i32>} : memref<2x1024xf32, #tpu.memory_space<vmem>>, vector<2x16xf32>,
    %c0_241 = arith.constant 0 : index
    %c33 = arith.constant 33 : index
    %c0_242 = arith.constant 0 : index
    %207 = vector.load %arg22[%c0_241, %c33, %c0_242] : memref<2x64x16xf32, #tpu.memory_space<vmem>>, vector<2x1x16xf32>
    %208 = vector.shape_cast %207 : vector<2x1x16xf32> to vector<2x16xf32>
    %c0_243 = arith.constant 0 : index
    %c528 = arith.constant 528 : index
    %209 = vector.load %arg23[%c0_243, %c528] : memref<2x1024xf32, #tpu.memory_space<vmem>>, vector<2x16xf32>
    tpu.vector_store %arg23[%c0_243, %c528], %208 {strides = array<i32>} : memref<2x1024xf32, #tpu.memory_space<vmem>>, vector<2x16xf32>,
    %c0_244 = arith.constant 0 : index
    %c34 = arith.constant 34 : index
    %c0_245 = arith.constant 0 : index
    %210 = vector.load %arg22[%c0_244, %c34, %c0_245] : memref<2x64x16xf32, #tpu.memory_space<vmem>>, vector<2x1x16xf32>
    %211 = vector.shape_cast %210 : vector<2x1x16xf32> to vector<2x16xf32>
    %c0_246 = arith.constant 0 : index
    %c544 = arith.constant 544 : index
    %212 = vector.load %arg23[%c0_246, %c544] : memref<2x1024xf32, #tpu.memory_space<vmem>>, vector<2x16xf32>
    tpu.vector_store %arg23[%c0_246, %c544], %211 {strides = array<i32>} : memref<2x1024xf32, #tpu.memory_space<vmem>>, vector<2x16xf32>,
    %c0_247 = arith.constant 0 : index
    %c35 = arith.constant 35 : index
    %c0_248 = arith.constant 0 : index
    %213 = vector.load %arg22[%c0_247, %c35, %c0_248] : memref<2x64x16xf32, #tpu.memory_space<vmem>>, vector<2x1x16xf32>
    %214 = vector.shape_cast %213 : vector<2x1x16xf32> to vector<2x16xf32>
    %c0_249 = arith.constant 0 : index
    %c560 = arith.constant 560 : index
    %215 = vector.load %arg23[%c0_249, %c560] : memref<2x1024xf32, #tpu.memory_space<vmem>>, vector<2x16xf32>
    tpu.vector_store %arg23[%c0_249, %c560], %214 {strides = array<i32>} : memref<2x1024xf32, #tpu.memory_space<vmem>>, vector<2x16xf32>,
    %c0_250 = arith.constant 0 : index
    %c36 = arith.constant 36 : index
    %c0_251 = arith.constant 0 : index
    %216 = vector.load %arg22[%c0_250, %c36, %c0_251] : memref<2x64x16xf32, #tpu.memory_space<vmem>>, vector<2x1x16xf32>
    %217 = vector.shape_cast %216 : vector<2x1x16xf32> to vector<2x16xf32>
    %c0_252 = arith.constant 0 : index
    %c576 = arith.constant 576 : index
    %218 = vector.load %arg23[%c0_252, %c576] : memref<2x1024xf32, #tpu.memory_space<vmem>>, vector<2x16xf32>
    tpu.vector_store %arg23[%c0_252, %c576], %217 {strides = array<i32>} : memref<2x1024xf32, #tpu.memory_space<vmem>>, vector<2x16xf32>,
    %c0_253 = arith.constant 0 : index
    %c37 = arith.constant 37 : index
    %c0_254 = arith.constant 0 : index
    %219 = vector.load %arg22[%c0_253, %c37, %c0_254] : memref<2x64x16xf32, #tpu.memory_space<vmem>>, vector<2x1x16xf32>
    %220 = vector.shape_cast %219 : vector<2x1x16xf32> to vector<2x16xf32>
    %c0_255 = arith.constant 0 : index
    %c592 = arith.constant 592 : index
    %221 = vector.load %arg23[%c0_255, %c592] : memref<2x1024xf32, #tpu.memory_space<vmem>>, vector<2x16xf32>
    tpu.vector_store %arg23[%c0_255, %c592], %220 {strides = array<i32>} : memref<2x1024xf32, #tpu.memory_space<vmem>>, vector<2x16xf32>,
    %c0_256 = arith.constant 0 : index
    %c38 = arith.constant 38 : index
    %c0_257 = arith.constant 0 : index
    %222 = vector.load %arg22[%c0_256, %c38, %c0_257] : memref<2x64x16xf32, #tpu.memory_space<vmem>>, vector<2x1x16xf32>
    %223 = vector.shape_cast %222 : vector<2x1x16xf32> to vector<2x16xf32>
    %c0_258 = arith.constant 0 : index
    %c608 = arith.constant 608 : index
    %224 = vector.load %arg23[%c0_258, %c608] : memref<2x1024xf32, #tpu.memory_space<vmem>>, vector<2x16xf32>
    tpu.vector_store %arg23[%c0_258, %c608], %223 {strides = array<i32>} : memref<2x1024xf32, #tpu.memory_space<vmem>>, vector<2x16xf32>,
    %c0_259 = arith.constant 0 : index
    %c39 = arith.constant 39 : index
    %c0_260 = arith.constant 0 : index
    %225 = vector.load %arg22[%c0_259, %c39, %c0_260] : memref<2x64x16xf32, #tpu.memory_space<vmem>>, vector<2x1x16xf32>
    %226 = vector.shape_cast %225 : vector<2x1x16xf32> to vector<2x16xf32>
    %c0_261 = arith.constant 0 : index
    %c624 = arith.constant 624 : index
    %227 = vector.load %arg23[%c0_261, %c624] : memref<2x1024xf32, #tpu.memory_space<vmem>>, vector<2x16xf32>
    tpu.vector_store %arg23[%c0_261, %c624], %226 {strides = array<i32>} : memref<2x1024xf32, #tpu.memory_space<vmem>>, vector<2x16xf32>,
    %c0_262 = arith.constant 0 : index
    %c40 = arith.constant 40 : index
    %c0_263 = arith.constant 0 : index
    %228 = vector.load %arg22[%c0_262, %c40, %c0_263] : memref<2x64x16xf32, #tpu.memory_space<vmem>>, vector<2x1x16xf32>
    %229 = vector.shape_cast %228 : vector<2x1x16xf32> to vector<2x16xf32>
    %c0_264 = arith.constant 0 : index
    %c640 = arith.constant 640 : index
    %230 = vector.load %arg23[%c0_264, %c640] : memref<2x1024xf32, #tpu.memory_space<vmem>>, vector<2x16xf32>
    tpu.vector_store %arg23[%c0_264, %c640], %229 {strides = array<i32>} : memref<2x1024xf32, #tpu.memory_space<vmem>>, vector<2x16xf32>,
    %c0_265 = arith.constant 0 : index
    %c41 = arith.constant 41 : index
    %c0_266 = arith.constant 0 : index
    %231 = vector.load %arg22[%c0_265, %c41, %c0_266] : memref<2x64x16xf32, #tpu.memory_space<vmem>>, vector<2x1x16xf32>
    %232 = vector.shape_cast %231 : vector<2x1x16xf32> to vector<2x16xf32>
    %c0_267 = arith.constant 0 : index
    %c656 = arith.constant 656 : index
    %233 = vector.load %arg23[%c0_267, %c656] : memref<2x1024xf32, #tpu.memory_space<vmem>>, vector<2x16xf32>
    tpu.vector_store %arg23[%c0_267, %c656], %232 {strides = array<i32>} : memref<2x1024xf32, #tpu.memory_space<vmem>>, vector<2x16xf32>,
    %c0_268 = arith.constant 0 : index
    %c42 = arith.constant 42 : index
    %c0_269 = arith.constant 0 : index
    %234 = vector.load %arg22[%c0_268, %c42, %c0_269] : memref<2x64x16xf32, #tpu.memory_space<vmem>>, vector<2x1x16xf32>
    %235 = vector.shape_cast %234 : vector<2x1x16xf32> to vector<2x16xf32>
    %c0_270 = arith.constant 0 : index
    %c672 = arith.constant 672 : index
    %236 = vector.load %arg23[%c0_270, %c672] : memref<2x1024xf32, #tpu.memory_space<vmem>>, vector<2x16xf32>
    tpu.vector_store %arg23[%c0_270, %c672], %235 {strides = array<i32>} : memref<2x1024xf32, #tpu.memory_space<vmem>>, vector<2x16xf32>,
    %c0_271 = arith.constant 0 : index
    %c43 = arith.constant 43 : index
    %c0_272 = arith.constant 0 : index
    %237 = vector.load %arg22[%c0_271, %c43, %c0_272] : memref<2x64x16xf32, #tpu.memory_space<vmem>>, vector<2x1x16xf32>
    %238 = vector.shape_cast %237 : vector<2x1x16xf32> to vector<2x16xf32>
    %c0_273 = arith.constant 0 : index
    %c688 = arith.constant 688 : index
    %239 = vector.load %arg23[%c0_273, %c688] : memref<2x1024xf32, #tpu.memory_space<vmem>>, vector<2x16xf32>
    tpu.vector_store %arg23[%c0_273, %c688], %238 {strides = array<i32>} : memref<2x1024xf32, #tpu.memory_space<vmem>>, vector<2x16xf32>,
    %c0_274 = arith.constant 0 : index
    %c44 = arith.constant 44 : index
    %c0_275 = arith.constant 0 : index
    %240 = vector.load %arg22[%c0_274, %c44, %c0_275] : memref<2x64x16xf32, #tpu.memory_space<vmem>>, vector<2x1x16xf32>
    %241 = vector.shape_cast %240 : vector<2x1x16xf32> to vector<2x16xf32>
    %c0_276 = arith.constant 0 : index
    %c704 = arith.constant 704 : index
    %242 = vector.load %arg23[%c0_276, %c704] : memref<2x1024xf32, #tpu.memory_space<vmem>>, vector<2x16xf32>
    tpu.vector_store %arg23[%c0_276, %c704], %241 {strides = array<i32>} : memref<2x1024xf32, #tpu.memory_space<vmem>>, vector<2x16xf32>,
    %c0_277 = arith.constant 0 : index
    %c45 = arith.constant 45 : index
    %c0_278 = arith.constant 0 : index
    %243 = vector.load %arg22[%c0_277, %c45, %c0_278] : memref<2x64x16xf32, #tpu.memory_space<vmem>>, vector<2x1x16xf32>
    %244 = vector.shape_cast %243 : vector<2x1x16xf32> to vector<2x16xf32>
    %c0_279 = arith.constant 0 : index
    %c720 = arith.constant 720 : index
    %245 = vector.load %arg23[%c0_279, %c720] : memref<2x1024xf32, #tpu.memory_space<vmem>>, vector<2x16xf32>
    tpu.vector_store %arg23[%c0_279, %c720], %244 {strides = array<i32>} : memref<2x1024xf32, #tpu.memory_space<vmem>>, vector<2x16xf32>,
    %c0_280 = arith.constant 0 : index
    %c46 = arith.constant 46 : index
    %c0_281 = arith.constant 0 : index
    %246 = vector.load %arg22[%c0_280, %c46, %c0_281] : memref<2x64x16xf32, #tpu.memory_space<vmem>>, vector<2x1x16xf32>
    %247 = vector.shape_cast %246 : vector<2x1x16xf32> to vector<2x16xf32>
    %c0_282 = arith.constant 0 : index
    %c736 = arith.constant 736 : index
    %248 = vector.load %arg23[%c0_282, %c736] : memref<2x1024xf32, #tpu.memory_space<vmem>>, vector<2x16xf32>
    tpu.vector_store %arg23[%c0_282, %c736], %247 {strides = array<i32>} : memref<2x1024xf32, #tpu.memory_space<vmem>>, vector<2x16xf32>,
    %c0_283 = arith.constant 0 : index
    %c47 = arith.constant 47 : index
    %c0_284 = arith.constant 0 : index
    %249 = vector.load %arg22[%c0_283, %c47, %c0_284] : memref<2x64x16xf32, #tpu.memory_space<vmem>>, vector<2x1x16xf32>
    %250 = vector.shape_cast %249 : vector<2x1x16xf32> to vector<2x16xf32>
    %c0_285 = arith.constant 0 : index
    %c752 = arith.constant 752 : index
    %251 = vector.load %arg23[%c0_285, %c752] : memref<2x1024xf32, #tpu.memory_space<vmem>>, vector<2x16xf32>
    tpu.vector_store %arg23[%c0_285, %c752], %250 {strides = array<i32>} : memref<2x1024xf32, #tpu.memory_space<vmem>>, vector<2x16xf32>,
    %c0_286 = arith.constant 0 : index
    %c48_287 = arith.constant 48 : index
    %c0_288 = arith.constant 0 : index
    %252 = vector.load %arg22[%c0_286, %c48_287, %c0_288] : memref<2x64x16xf32, #tpu.memory_space<vmem>>, vector<2x1x16xf32>
    %253 = vector.shape_cast %252 : vector<2x1x16xf32> to vector<2x16xf32>
    %c0_289 = arith.constant 0 : index
    %c768_290 = arith.constant 768 : index
    %254 = vector.load %arg23[%c0_289, %c768_290] : memref<2x1024xf32, #tpu.memory_space<vmem>>, vector<2x16xf32>
    tpu.vector_store %arg23[%c0_289, %c768_290], %253 {strides = array<i32>} : memref<2x1024xf32, #tpu.memory_space<vmem>>, vector<2x16xf32>,
    %c0_291 = arith.constant 0 : index
    %c49 = arith.constant 49 : index
    %c0_292 = arith.constant 0 : index
    %255 = vector.load %arg22[%c0_291, %c49, %c0_292] : memref<2x64x16xf32, #tpu.memory_space<vmem>>, vector<2x1x16xf32>
    %256 = vector.shape_cast %255 : vector<2x1x16xf32> to vector<2x16xf32>
    %c0_293 = arith.constant 0 : index
    %c784 = arith.constant 784 : index
    %257 = vector.load %arg23[%c0_293, %c784] : memref<2x1024xf32, #tpu.memory_space<vmem>>, vector<2x16xf32>
    tpu.vector_store %arg23[%c0_293, %c784], %256 {strides = array<i32>} : memref<2x1024xf32, #tpu.memory_space<vmem>>, vector<2x16xf32>,
    %c0_294 = arith.constant 0 : index
    %c50 = arith.constant 50 : index
    %c0_295 = arith.constant 0 : index
    %258 = vector.load %arg22[%c0_294, %c50, %c0_295] : memref<2x64x16xf32, #tpu.memory_space<vmem>>, vector<2x1x16xf32>
    %259 = vector.shape_cast %258 : vector<2x1x16xf32> to vector<2x16xf32>
    %c0_296 = arith.constant 0 : index
    %c800 = arith.constant 800 : index
    %260 = vector.load %arg23[%c0_296, %c800] : memref<2x1024xf32, #tpu.memory_space<vmem>>, vector<2x16xf32>
    tpu.vector_store %arg23[%c0_296, %c800], %259 {strides = array<i32>} : memref<2x1024xf32, #tpu.memory_space<vmem>>, vector<2x16xf32>,
    %c0_297 = arith.constant 0 : index
    %c51 = arith.constant 51 : index
    %c0_298 = arith.constant 0 : index
    %261 = vector.load %arg22[%c0_297, %c51, %c0_298] : memref<2x64x16xf32, #tpu.memory_space<vmem>>, vector<2x1x16xf32>
    %262 = vector.shape_cast %261 : vector<2x1x16xf32> to vector<2x16xf32>
    %c0_299 = arith.constant 0 : index
    %c816 = arith.constant 816 : index
    %263 = vector.load %arg23[%c0_299, %c816] : memref<2x1024xf32, #tpu.memory_space<vmem>>, vector<2x16xf32>
    tpu.vector_store %arg23[%c0_299, %c816], %262 {strides = array<i32>} : memref<2x1024xf32, #tpu.memory_space<vmem>>, vector<2x16xf32>,
    %c0_300 = arith.constant 0 : index
    %c52 = arith.constant 52 : index
    %c0_301 = arith.constant 0 : index
    %264 = vector.load %arg22[%c0_300, %c52, %c0_301] : memref<2x64x16xf32, #tpu.memory_space<vmem>>, vector<2x1x16xf32>
    %265 = vector.shape_cast %264 : vector<2x1x16xf32> to vector<2x16xf32>
    %c0_302 = arith.constant 0 : index
    %c832 = arith.constant 832 : index
    %266 = vector.load %arg23[%c0_302, %c832] : memref<2x1024xf32, #tpu.memory_space<vmem>>, vector<2x16xf32>
    tpu.vector_store %arg23[%c0_302, %c832], %265 {strides = array<i32>} : memref<2x1024xf32, #tpu.memory_space<vmem>>, vector<2x16xf32>,
    %c0_303 = arith.constant 0 : index
    %c53 = arith.constant 53 : index
    %c0_304 = arith.constant 0 : index
    %267 = vector.load %arg22[%c0_303, %c53, %c0_304] : memref<2x64x16xf32, #tpu.memory_space<vmem>>, vector<2x1x16xf32>
    %268 = vector.shape_cast %267 : vector<2x1x16xf32> to vector<2x16xf32>
    %c0_305 = arith.constant 0 : index
    %c848 = arith.constant 848 : index
    %269 = vector.load %arg23[%c0_305, %c848] : memref<2x1024xf32, #tpu.memory_space<vmem>>, vector<2x16xf32>
    tpu.vector_store %arg23[%c0_305, %c848], %268 {strides = array<i32>} : memref<2x1024xf32, #tpu.memory_space<vmem>>, vector<2x16xf32>,
    %c0_306 = arith.constant 0 : index
    %c54 = arith.constant 54 : index
    %c0_307 = arith.constant 0 : index
    %270 = vector.load %arg22[%c0_306, %c54, %c0_307] : memref<2x64x16xf32, #tpu.memory_space<vmem>>, vector<2x1x16xf32>
    %271 = vector.shape_cast %270 : vector<2x1x16xf32> to vector<2x16xf32>
    %c0_308 = arith.constant 0 : index
    %c864 = arith.constant 864 : index
    %272 = vector.load %arg23[%c0_308, %c864] : memref<2x1024xf32, #tpu.memory_space<vmem>>, vector<2x16xf32>
    tpu.vector_store %arg23[%c0_308, %c864], %271 {strides = array<i32>} : memref<2x1024xf32, #tpu.memory_space<vmem>>, vector<2x16xf32>,
    %c0_309 = arith.constant 0 : index
    %c55 = arith.constant 55 : index
    %c0_310 = arith.constant 0 : index
    %273 = vector.load %arg22[%c0_309, %c55, %c0_310] : memref<2x64x16xf32, #tpu.memory_space<vmem>>, vector<2x1x16xf32>
    %274 = vector.shape_cast %273 : vector<2x1x16xf32> to vector<2x16xf32>
    %c0_311 = arith.constant 0 : index
    %c880 = arith.constant 880 : index
    %275 = vector.load %arg23[%c0_311, %c880] : memref<2x1024xf32, #tpu.memory_space<vmem>>, vector<2x16xf32>
    tpu.vector_store %arg23[%c0_311, %c880], %274 {strides = array<i32>} : memref<2x1024xf32, #tpu.memory_space<vmem>>, vector<2x16xf32>,
    %c0_312 = arith.constant 0 : index
    %c56 = arith.constant 56 : index
    %c0_313 = arith.constant 0 : index
    %276 = vector.load %arg22[%c0_312, %c56, %c0_313] : memref<2x64x16xf32, #tpu.memory_space<vmem>>, vector<2x1x16xf32>
    %277 = vector.shape_cast %276 : vector<2x1x16xf32> to vector<2x16xf32>
    %c0_314 = arith.constant 0 : index
    %c896 = arith.constant 896 : index
    %278 = vector.load %arg23[%c0_314, %c896] : memref<2x1024xf32, #tpu.memory_space<vmem>>, vector<2x16xf32>
    tpu.vector_store %arg23[%c0_314, %c896], %277 {strides = array<i32>} : memref<2x1024xf32, #tpu.memory_space<vmem>>, vector<2x16xf32>,
    %c0_315 = arith.constant 0 : index
    %c57 = arith.constant 57 : index
    %c0_316 = arith.constant 0 : index
    %279 = vector.load %arg22[%c0_315, %c57, %c0_316] : memref<2x64x16xf32, #tpu.memory_space<vmem>>, vector<2x1x16xf32>
    %280 = vector.shape_cast %279 : vector<2x1x16xf32> to vector<2x16xf32>
    %c0_317 = arith.constant 0 : index
    %c912 = arith.constant 912 : index
    %281 = vector.load %arg23[%c0_317, %c912] : memref<2x1024xf32, #tpu.memory_space<vmem>>, vector<2x16xf32>
    tpu.vector_store %arg23[%c0_317, %c912], %280 {strides = array<i32>} : memref<2x1024xf32, #tpu.memory_space<vmem>>, vector<2x16xf32>,
    %c0_318 = arith.constant 0 : index
    %c58 = arith.constant 58 : index
    %c0_319 = arith.constant 0 : index
    %282 = vector.load %arg22[%c0_318, %c58, %c0_319] : memref<2x64x16xf32, #tpu.memory_space<vmem>>, vector<2x1x16xf32>
    %283 = vector.shape_cast %282 : vector<2x1x16xf32> to vector<2x16xf32>
    %c0_320 = arith.constant 0 : index
    %c928 = arith.constant 928 : index
    %284 = vector.load %arg23[%c0_320, %c928] : memref<2x1024xf32, #tpu.memory_space<vmem>>, vector<2x16xf32>
    tpu.vector_store %arg23[%c0_320, %c928], %283 {strides = array<i32>} : memref<2x1024xf32, #tpu.memory_space<vmem>>, vector<2x16xf32>,
    %c0_321 = arith.constant 0 : index
    %c59 = arith.constant 59 : index
    %c0_322 = arith.constant 0 : index
    %285 = vector.load %arg22[%c0_321, %c59, %c0_322] : memref<2x64x16xf32, #tpu.memory_space<vmem>>, vector<2x1x16xf32>
    %286 = vector.shape_cast %285 : vector<2x1x16xf32> to vector<2x16xf32>
    %c0_323 = arith.constant 0 : index
    %c944 = arith.constant 944 : index
    %287 = vector.load %arg23[%c0_323, %c944] : memref<2x1024xf32, #tpu.memory_space<vmem>>, vector<2x16xf32>
    tpu.vector_store %arg23[%c0_323, %c944], %286 {strides = array<i32>} : memref<2x1024xf32, #tpu.memory_space<vmem>>, vector<2x16xf32>,
    %c0_324 = arith.constant 0 : index
    %c60 = arith.constant 60 : index
    %c0_325 = arith.constant 0 : index
    %288 = vector.load %arg22[%c0_324, %c60, %c0_325] : memref<2x64x16xf32, #tpu.memory_space<vmem>>, vector<2x1x16xf32>
    %289 = vector.shape_cast %288 : vector<2x1x16xf32> to vector<2x16xf32>
    %c0_326 = arith.constant 0 : index
    %c960 = arith.constant 960 : index
    %290 = vector.load %arg23[%c0_326, %c960] : memref<2x1024xf32, #tpu.memory_space<vmem>>, vector<2x16xf32>
    tpu.vector_store %arg23[%c0_326, %c960], %289 {strides = array<i32>} : memref<2x1024xf32, #tpu.memory_space<vmem>>, vector<2x16xf32>,
    %c0_327 = arith.constant 0 : index
    %c61 = arith.constant 61 : index
    %c0_328 = arith.constant 0 : index
    %291 = vector.load %arg22[%c0_327, %c61, %c0_328] : memref<2x64x16xf32, #tpu.memory_space<vmem>>, vector<2x1x16xf32>
    %292 = vector.shape_cast %291 : vector<2x1x16xf32> to vector<2x16xf32>
    %c0_329 = arith.constant 0 : index
    %c976 = arith.constant 976 : index
    %293 = vector.load %arg23[%c0_329, %c976] : memref<2x1024xf32, #tpu.memory_space<vmem>>, vector<2x16xf32>
    tpu.vector_store %arg23[%c0_329, %c976], %292 {strides = array<i32>} : memref<2x1024xf32, #tpu.memory_space<vmem>>, vector<2x16xf32>,
    %c0_330 = arith.constant 0 : index
    %c62 = arith.constant 62 : index
    %c0_331 = arith.constant 0 : index
    %294 = vector.load %arg22[%c0_330, %c62, %c0_331] : memref<2x64x16xf32, #tpu.memory_space<vmem>>, vector<2x1x16xf32>
    %295 = vector.shape_cast %294 : vector<2x1x16xf32> to vector<2x16xf32>
    %c0_332 = arith.constant 0 : index
    %c992 = arith.constant 992 : index
    %296 = vector.load %arg23[%c0_332, %c992] : memref<2x1024xf32, #tpu.memory_space<vmem>>, vector<2x16xf32>
    tpu.vector_store %arg23[%c0_332, %c992], %295 {strides = array<i32>} : memref<2x1024xf32, #tpu.memory_space<vmem>>, vector<2x16xf32>,
    %c0_333 = arith.constant 0 : index
    %c63 = arith.constant 63 : index
    %c0_334 = arith.constant 0 : index
    %297 = vector.load %arg22[%c0_333, %c63, %c0_334] : memref<2x64x16xf32, #tpu.memory_space<vmem>>, vector<2x1x16xf32>
    %298 = vector.shape_cast %297 : vector<2x1x16xf32> to vector<2x16xf32>
    %c0_335 = arith.constant 0 : index
    %c1008 = arith.constant 1008 : index
    %299 = vector.load %arg23[%c0_335, %c1008] : memref<2x1024xf32, #tpu.memory_space<vmem>>, vector<2x16xf32>
    tpu.vector_store %arg23[%c0_335, %c1008], %298 {strides = array<i32>} : memref<2x1024xf32, #tpu.memory_space<vmem>>, vector<2x16xf32>,
    %c0_336 = arith.constant 0 : index
    %c0_337 = arith.constant 0 : index
    %300 = vector.load %arg23[%c0_336, %c0_337] : memref<2x1024xf32, #tpu.memory_space<vmem>>, vector<2x1024xf32>
    %c0_338 = arith.constant 0 : index
    %c0_339 = arith.constant 0 : index
    %301 = vector.load %arg7[%c0_338, %c0_339] : memref<1024x256xf32, #tpu.memory_space<vmem>>, vector<1024x256xf32>
    %cst_340 = arith.constant dense<0.000000e+00> : vector<2x256xf32>
    %302 = tpu.matmul %300, %301, %cst_340 {dimension_numbers = #tpu.dot_dimension_numbers<[1], [0], [0], [1], [0, 0, 1, 1], [], []>} : vector<2x1024xf32>, vector<1024x256xf32>, vector<2x256xf32> -> vector<2x256xf32>
    %c0_341 = arith.constant 0 : index
    %c0_342 = arith.constant 0 : index
    %303 = vector.load %arg8[%c0_341, %c0_342] : memref<1x256xf32, #tpu.memory_space<vmem>>, vector<1x256xf32>
    %304 = vector.broadcast %303 : vector<1x256xf32> to vector<2x256xf32>
    %305 = arith.addf %302, %304 : vector<2x256xf32>
    %cst_343 = arith.constant 0.000000e+00 : f32
    %306 = vector.broadcast %cst_343 : f32 to vector<2x256xf32>
    %307 = arith.maximumf %305, %306 : vector<2x256xf32>
    %c0_344 = arith.constant 0 : index
    %c0_345 = arith.constant 0 : index
    %308 = vector.load %arg9[%c0_344, %c0_345] : memref<256x64xf32, #tpu.memory_space<vmem>>, vector<256x64xf32>
    %cst_346 = arith.constant dense<0.000000e+00> : vector<2x64xf32>
    %309 = tpu.matmul %307, %308, %cst_346 {dimension_numbers = #tpu.dot_dimension_numbers<[1], [0], [0], [1], [0, 0, 1, 1], [], []>} : vector<2x256xf32>, vector<256x64xf32>, vector<2x64xf32> -> vector<2x64xf32>
    %c0_347 = arith.constant 0 : index
    %c0_348 = arith.constant 0 : index
    %310 = vector.load %arg10[%c0_347, %c0_348] : memref<1x64xf32, #tpu.memory_space<vmem>>, vector<1x64xf32>
    %311 = vector.broadcast %310 : vector<1x64xf32> to vector<2x64xf32>
    %312 = arith.addf %309, %311 : vector<2x64xf32>
    %cst_349 = arith.constant 0.000000e+00 : f32
    %313 = vector.broadcast %cst_349 : f32 to vector<2x64xf32>
    %314 = arith.maximumf %312, %313 : vector<2x64xf32>
    %c0_350 = arith.constant 0 : index
    %c0_351 = arith.constant 0 : index
    %315 = vector.load %arg11[%c0_350, %c0_351] : memref<64x64xf32, #tpu.memory_space<vmem>>, vector<64x64xf32>
    %cst_352 = arith.constant dense<0.000000e+00> : vector<2x64xf32>
    %316 = tpu.matmul %314, %315, %cst_352 {dimension_numbers = #tpu.dot_dimension_numbers<[1], [0], [0], [1], [0, 0, 1, 1], [], []>} : vector<2x64xf32>, vector<64x64xf32>, vector<2x64xf32> -> vector<2x64xf32>
    %c0_353 = arith.constant 0 : index
    %c0_354 = arith.constant 0 : index
    %317 = vector.load %arg2[%c0_353, %c0_354] : memref<2x5xf32, #tpu.memory_space<vmem>>, vector<2x5xf32>
    %c0_355 = arith.constant 0 : index
    %c0_356 = arith.constant 0 : index
    %318 = vector.load %arg12[%c0_355, %c0_356] : memref<5x64xf32, #tpu.memory_space<vmem>>, vector<5x64xf32>
    %cst_357 = arith.constant dense<0.000000e+00> : vector<2x64xf32>
    %319 = tpu.matmul %317, %318, %cst_357 {dimension_numbers = #tpu.dot_dimension_numbers<[1], [0], [0], [1], [0, 0, 1, 1], [], []>} : vector<2x5xf32>, vector<5x64xf32>, vector<2x64xf32> -> vector<2x64xf32>
    %320 = arith.addf %316, %319 : vector<2x64xf32>
    %c0_358 = arith.constant 0 : index
    %c0_359 = arith.constant 0 : index
    %321 = vector.load %arg13[%c0_358, %c0_359] : memref<1x64xf32, #tpu.memory_space<vmem>>, vector<1x64xf32>
    %322 = vector.broadcast %321 : vector<1x64xf32> to vector<2x64xf32>
    %323 = arith.addf %320, %322 : vector<2x64xf32>
    %cst_360 = arith.constant 0.000000e+00 : f32
    %324 = vector.broadcast %cst_360 : f32 to vector<2x64xf32>
    %325 = arith.maximumf %323, %324 : vector<2x64xf32>
    %c0_361 = arith.constant 0 : index
    %c0_362 = arith.constant 0 : index
    %326 = vector.load %arg14[%c0_361, %c0_362] : memref<64x32xf32, #tpu.memory_space<vmem>>, vector<64x32xf32>
    %cst_363 = arith.constant dense<0.000000e+00> : vector<2x32xf32>
    %327 = tpu.matmul %325, %326, %cst_363 {dimension_numbers = #tpu.dot_dimension_numbers<[1], [0], [0], [1], [0, 0, 1, 1], [], []>} : vector<2x64xf32>, vector<64x32xf32>, vector<2x32xf32> -> vector<2x32xf32>
    %c0_364 = arith.constant 0 : index
    %c0_365 = arith.constant 0 : index
    %328 = vector.load %arg15[%c0_364, %c0_365] : memref<1x32xf32, #tpu.memory_space<vmem>>, vector<1x32xf32>
    %329 = vector.broadcast %328 : vector<1x32xf32> to vector<2x32xf32>
    %330 = arith.addf %327, %329 : vector<2x32xf32>
    %cst_366 = arith.constant 0.000000e+00 : f32
    %331 = vector.broadcast %cst_366 : f32 to vector<2x32xf32>
    %332 = arith.maximumf %330, %331 : vector<2x32xf32>
    %c0_367 = arith.constant 0 : index
    %c0_368 = arith.constant 0 : index
    %333 = vector.load %arg16[%c0_367, %c0_368] : memref<32x16xf32, #tpu.memory_space<vmem>>, vector<32x16xf32>
    %cst_369 = arith.constant dense<0.000000e+00> : vector<2x16xf32>
    %334 = tpu.matmul %332, %333, %cst_369 {dimension_numbers = #tpu.dot_dimension_numbers<[1], [0], [0], [1], [0, 0, 1, 1], [], []>} : vector<2x32xf32>, vector<32x16xf32>, vector<2x16xf32> -> vector<2x16xf32>
    %c0_370 = arith.constant 0 : index
    %c0_371 = arith.constant 0 : index
    %335 = vector.load %arg17[%c0_370, %c0_371] : memref<1x16xf32, #tpu.memory_space<vmem>>, vector<1x16xf32>
    %336 = vector.broadcast %335 : vector<1x16xf32> to vector<2x16xf32>
    %337 = arith.addf %334, %336 : vector<2x16xf32>
    %cst_372 = arith.constant 0.000000e+00 : f32
    %338 = vector.broadcast %cst_372 : f32 to vector<2x16xf32>
    %339 = arith.maximumf %337, %338 : vector<2x16xf32>
    %c0_373 = arith.constant 0 : index
    %c0_374 = arith.constant 0 : index
    %340 = vector.load %arg18[%c0_373, %c0_374] : memref<16x128xf32, #tpu.memory_space<vmem>>, vector<16x128xf32>
    %cst_375 = arith.constant dense<0.000000e+00> : vector<2x128xf32>
    %341 = tpu.matmul %339, %340, %cst_375 {dimension_numbers = #tpu.dot_dimension_numbers<[1], [0], [0], [1], [0, 0, 1, 1], [], []>} : vector<2x16xf32>, vector<16x128xf32>, vector<2x128xf32> -> vector<2x128xf32>
    %c0_376 = arith.constant 0 : index
    %c0_377 = arith.constant 0 : index
    %342 = vector.load %arg19[%c0_376, %c0_377] : memref<1x128xf32, #tpu.memory_space<vmem>>, vector<1x128xf32>
    %343 = vector.broadcast %342 : vector<1x128xf32> to vector<2x128xf32>
    %344 = arith.addf %341, %343 : vector<2x128xf32>
    %c0_378 = arith.constant 0 : index
    %c0_379 = arith.constant 0 : index
    %345 = vector.load %arg20[%c0_378, %c0_379] : memref<2x128xf32, #tpu.memory_space<vmem>>, vector<2x128xf32>
    tpu.vector_store %arg20[%c0_378, %c0_379], %344 {strides = array<i32>} : memref<2x128xf32, #tpu.memory_space<vmem>>, vector<2x128xf32>,
    return
  }
  func.func @transform_0(%arg0: i32) -> (i32, i32, i32, i32) {
    %c0_i32 = arith.constant 0 : i32
    %c0_i32_0 = arith.constant 0 : i32
    %c0_i32_1 = arith.constant 0 : i32
    %c0_i32_2 = arith.constant 0 : i32
    %c0_i32_3 = arith.constant 0 : i32
    return %c0_i32, %c0_i32_0, %c0_i32_1, %c0_i32_2 : i32, i32, i32, i32
  }
  func.func @transform_1(%arg0: i32) -> (i32, i32) {
    %c0_i32 = arith.constant 0 : i32
    %c0_i32_0 = arith.constant 0 : i32
    %c0_i32_1 = arith.constant 0 : i32
    return %c0_i32, %c0_i32_0 : i32, i32
  }
  func.func @transform_2(%arg0: i32) -> (i32, i32) {
    %c0_i32 = arith.constant 0 : i32
    %c0_i32_0 = arith.constant 0 : i32
    %c0_i32_1 = arith.constant 0 : i32
    return %c0_i32, %c0_i32_0 : i32, i32
  }
  func.func @transform_3(%arg0: i32) -> (i32, i32) {
    %c0_i32 = arith.constant 0 : i32
    %c0_i32_0 = arith.constant 0 : i32
    %c0_i32_1 = arith.constant 0 : i32
    return %c0_i32, %c0_i32_0 : i32, i32
  }
  func.func @transform_4(%arg0: i32) -> (i32, i32) {
    %c0_i32 = arith.constant 0 : i32
    %c0_i32_0 = arith.constant 0 : i32
    %c0_i32_1 = arith.constant 0 : i32
    return %c0_i32, %c0_i32_0 : i32, i32
  }
  func.func @transform_5(%arg0: i32) -> (i32, i32) {
    %c0_i32 = arith.constant 0 : i32
    %c0_i32_0 = arith.constant 0 : i32
    %c0_i32_1 = arith.constant 0 : i32
    return %c0_i32, %c0_i32_0 : i32, i32
  }
  func.func @transform_6(%arg0: i32) -> (i32, i32) {
    %c0_i32 = arith.constant 0 : i32
    %c0_i32_0 = arith.constant 0 : i32
    %c0_i32_1 = arith.constant 0 : i32
    return %c0_i32, %c0_i32_0 : i32, i32
  }
  func.func @transform_7(%arg0: i32) -> (i32, i32) {
    %c0_i32 = arith.constant 0 : i32
    %c0_i32_0 = arith.constant 0 : i32
    %c0_i32_1 = arith.constant 0 : i32
    return %c0_i32, %c0_i32_0 : i32, i32
  }
  func.func @transform_8(%arg0: i32) -> (i32, i32) {
    %c0_i32 = arith.constant 0 : i32
    %c0_i32_0 = arith.constant 0 : i32
    %c0_i32_1 = arith.constant 0 : i32
    return %c0_i32, %c0_i32_0 : i32, i32
  }
  func.func @transform_9(%arg0: i32) -> (i32, i32) {
    %c0_i32 = arith.constant 0 : i32
    %c0_i32_0 = arith.constant 0 : i32
    %c0_i32_1 = arith.constant 0 : i32
    return %c0_i32, %c0_i32_0 : i32, i32
  }
  func.func @transform_10(%arg0: i32) -> (i32, i32) {
    %c0_i32 = arith.constant 0 : i32
    %c0_i32_0 = arith.constant 0 : i32
    %c0_i32_1 = arith.constant 0 : i32
    return %c0_i32, %c0_i32_0 : i32, i32
  }
  func.func @transform_11(%arg0: i32) -> (i32, i32) {
    %c0_i32 = arith.constant 0 : i32
    %c0_i32_0 = arith.constant 0 : i32
    %c0_i32_1 = arith.constant 0 : i32
    return %c0_i32, %c0_i32_0 : i32, i32
  }
  func.func @transform_12(%arg0: i32) -> (i32, i32) {
    %c0_i32 = arith.constant 0 : i32
    %c0_i32_0 = arith.constant 0 : i32
    %c0_i32_1 = arith.constant 0 : i32
    return %c0_i32, %c0_i32_0 : i32, i32
  }
  func.func @transform_13(%arg0: i32) -> (i32, i32) {
    %c0_i32 = arith.constant 0 : i32
    %c0_i32_0 = arith.constant 0 : i32
    %c0_i32_1 = arith.constant 0 : i32
    return %c0_i32, %c0_i32_0 : i32, i32
  }
  func.func @transform_14(%arg0: i32) -> (i32, i32) {
    %c0_i32 = arith.constant 0 : i32
    %c0_i32_0 = arith.constant 0 : i32
    %c0_i32_1 = arith.constant 0 : i32
    return %c0_i32, %c0_i32_0 : i32, i32
  }
  func.func @transform_15(%arg0: i32) -> (i32, i32) {
    %c0_i32 = arith.constant 0 : i32
    %c0_i32_0 = arith.constant 0 : i32
    %c0_i32_1 = arith.constant 0 : i32
    return %c0_i32, %c0_i32_0 : i32, i32
  }
  func.func @transform_16(%arg0: i32) -> (i32, i32) {
    %c0_i32 = arith.constant 0 : i32
    %c0_i32_0 = arith.constant 0 : i32
    %c0_i32_1 = arith.constant 0 : i32
    return %c0_i32, %c0_i32_0 : i32, i32
  }
  func.func @transform_17(%arg0: i32) -> (i32, i32) {
    %c0_i32 = arith.constant 0 : i32
    %c0_i32_0 = arith.constant 0 : i32
    %c0_i32_1 = arith.constant 0 : i32
    return %c0_i32, %c0_i32_0 : i32, i32
  }
  func.func @transform_18(%arg0: i32) -> (i32, i32) {
    %c0_i32 = arith.constant 0 : i32
    %c0_i32_0 = arith.constant 0 : i32
    %c0_i32_1 = arith.constant 0 : i32
    return %c0_i32, %c0_i32_0 : i32, i32
  }
  func.func @transform_19(%arg0: i32) -> (i32, i32) {
    %c0_i32 = arith.constant 0 : i32
    %c0_i32_0 = arith.constant 0 : i32
    %c0_i32_1 = arith.constant 0 : i32
    return %c0_i32, %c0_i32_0 : i32, i32
  }
}

</mosaic_0001>

<bundles_post_ra>
// kernel: tpu_custom_call.1
= control target key start
LH: loop header
LB: loop body
LE: loop exit
PB: predicated region body
PF: predicated region fallthrough
CT: control target
= control target key end

     0   :  { %s16765_s0 = inlined_call_operand.vmem [shape: f32[2,10,10,256], index: 0, kind: input, shape index: {}]   ;;  %s16766_s1 = inlined_call_operand.vmem [shape: f32[2,5], index: 1, kind: input, shape index: {}]   ;;  %s16767_s2 = inlined_call_operand.vmem [shape: f32[2304,64], index: 2, kind: input, shape index: {}]   ;;  %s16768_s3 = inlined_call_operand.vmem [shape: f32[1,64], index: 3, kind: input, shape index: {}]   ;;  %s16769_s4 = inlined_call_operand.vmem [shape: f32[576,16], index: 4, kind: input, shape index: {}]   ;;  %s16770_s5 = inlined_call_operand.vmem [shape: f32[1,16], index: 5, kind: input, shape index: {}]   ;;  %s16771_s6 = inlined_call_operand.vmem [shape: f32[1024,256], index: 6, kind: input, shape index: {}]   ;;  %s16772_s7 = inlined_call_operand.vmem [shape: f32[1,256], index: 7, kind: input, shape index: {}]   ;;  %s16773_s8 = inlined_call_operand.vmem [shape: f32[256,64], index: 8, kind: input, shape index: {}]   ;;  %s16774_s9 = inlined_call_operand.vmem [shape: f32[1,64], index: 9, kind: input, shape index: {}]   ;;  %s16775_s10 = inlined_call_operand.vmem [shape: f32[64,64], index: 10, kind: input, shape index: {}]   ;;  %s16776_s11 = inlined_call_operand.vmem [shape: f32[5,64], index: 11, kind: input, shape index: {}]   ;;  %s16777_s12 = inlined_call_operand.vmem [shape: f32[1,64], index: 12, kind: input, shape index: {}]   ;;  %s16778_s13 = inlined_call_operand.vmem [shape: f32[64,32], index: 13, kind: input, shape index: {}]   ;;  %s16779_s14 = inlined_call_operand.vmem [shape: f32[1,32], index: 14, kind: input, shape index: {}]   ;;  %s16780_s15 = inlined_call_operand.vmem [shape: f32[32,16], index: 15, kind: input, shape index: {}]   ;;  %s16781_s16 = inlined_call_operand.vmem [shape: f32[1,16], index: 16, kind: input, shape index: {}]   ;;  %s16782_s17 = inlined_call_operand.vmem [shape: f32[16,128], index: 17, kind: input, shape index: {}]   ;;  %s16783_s18 = inlined_call_operand.vmem [shape: f32[1,128], index: 18, kind: input, shape index: {}]   ;;  %s16784_s19 = inlined_call_operand.hbm [shape: f32[2,128], index: 19, kind: output, shape index: {}]  }
   0x1   :  { %16789 = sst [smem:[#allocation54_spill]] %s16765_s0 }
   0x2   :  { %16790 = sst [smem:[#allocation55_spill]] %s16766_s1 }
   0x3   :  { %16791 = sst [smem:[#allocation56_spill]] %s16767_s2 }
   0x4   :  { %16792 = sst [smem:[#allocation57_spill]] %s16768_s3 }
   0x5   :  { %s16793_s20 = sld [smem:[#allocation56_spill]]  ;;  %vm255_vm0 = vcmask 1046528   ;;  %vm834_vm1 = vcmask 1045504  }
   0x6   :  { %s16794_s25 = sld [smem:[#allocation54_spill]] }
   0xb   :  { %v415_v0 = vld [vmem:[%s16793_s20 + $0x1f8] sm:$0xff]  ;;  %v414_v4 = vld [vmem:[%s16793_s20 + $0x1f0] sm:$0xff]  ;;  %v413_v8 = vld [vmem:[%s16793_s20 + $0x1e8] sm:$0xff] }
   0xc   :  { %v126_v1 = vld [vmem:[%s16793_s20 + $0xf8] sm:$0xff]  ;;  %9235 = vmatprep.subr.mxu0 %v415_v0  ;;  %v125_v5 = vld [vmem:[%s16793_s20 + $0xf0] sm:$0xff]  ;;  %v124_v9 = vld [vmem:[%s16793_s20 + $0xe8] sm:$0xff] }
   0xd   :  { %v399_v2 = vld [vmem:[%s16793_s20 + $0x178] sm:$0xff]  ;;  %9315 = vmatprep.subr.mxu1 %v126_v1  ;;  %v398_v6 = vld [vmem:[%s16793_s20 + $0x170] sm:$0xff]  ;;  %v397_v10 = vld [vmem:[%s16793_s20 + $0x168] sm:$0xff] }
   0xe   :  { %v110_v3 = vld [vmem:[%s16793_s20 + $0x78] sm:$0xff]  ;;  %9236 = vmatpush3.msra.mxu0 %v399_v2  ;;  %v109_v7 = vld [vmem:[%s16793_s20 + $0x70] sm:$0xff]  ;;  %v108_v11 = vld [vmem:[%s16793_s20 + $0x68] sm:$0xff] }
   0xf   :  { %9316 = vmatpush3.msra.mxu1 %v110_v3  ;;  %9237 = vmatprep.subr.mxu0 %v414_v4  ;;  %v412_v12 = vld [vmem:[%s16793_s20 + $0x1e0] sm:$0xff]  ;;  %v411_v16 = vld [vmem:[%s16793_s20 + $0x1d8] sm:$0xff]  ;;  %v410_v20 = vld [vmem:[%s16793_s20 + $0x1d0] sm:$0xff] }
  0x10   :  { %9317 = vmatprep.subr.mxu1 %v125_v5  ;;  %9238 = vmatpush3.msra.mxu0 %v398_v6  ;;  %v123_v13 = vld [vmem:[%s16793_s20 + $0xe0] sm:$0xff]  ;;  %v122_v17 = vld [vmem:[%s16793_s20 + $0xd8] sm:$0xff]  ;;  %v121_v21 = vld [vmem:[%s16793_s20 + $0xd0] sm:$0xff] }
  0x11   :  { %9318 = vmatpush3.msra.mxu1 %v109_v7  ;;  %9239 = vmatprep.subr.mxu0 %v413_v8  ;;  %v396_v14 = vld [vmem:[%s16793_s20 + $0x160] sm:$0xff]  ;;  %v395_v18 = vld [vmem:[%s16793_s20 + $0x158] sm:$0xff]  ;;  %v394_v22 = vld [vmem:[%s16793_s20 + $0x150] sm:$0xff] }
  0x12   :  { %9319 = vmatprep.subr.mxu1 %v124_v9  ;;  %v107_v15 = vld [vmem:[%s16793_s20 + $0x60] sm:$0xff]  ;;  %9240 = vmatpush3.msra.mxu0 %v397_v10  ;;  %v106_v19 = vld [vmem:[%s16793_s20 + $0x58] sm:$0xff]  ;;  %v105_v23 = vld [vmem:[%s16793_s20 + $0x50] sm:$0xff] }
  0x13   :  { %9320 = vmatpush3.msra.mxu1 %v108_v11  ;;  %9241 = vmatprep.subr.mxu0 %v412_v12  ;;  %v409_v24 = vld [vmem:[%s16793_s20 + $0x1c8] sm:$0xff]  ;;  %v408_v28 = vld [vmem:[%s16793_s20 + $0x1c0] sm:$0xff]  ;;  %v407_v32 = vld [vmem:[%s16793_s20 + $0x1b8] sm:$0xff] }
  0x14   :  { %9321 = vmatprep.subr.mxu1 %v123_v13  ;;  %9242 = vmatpush3.msra.mxu0 %v396_v14  ;;  %v120_v25 = vld [vmem:[%s16793_s20 + $0xc8] sm:$0xff]  ;;  %v119_v29 = vld [vmem:[%s16793_s20 + $0xc0] sm:$0xff]  ;;  %v118_v33 = vld [vmem:[%s16793_s20 + $0xb8] sm:$0xff] }
  0x15   :  { %9322 = vmatpush3.msra.mxu1 %v107_v15  ;;  %9243 = vmatprep.subr.mxu0 %v411_v16  ;;  %v393_v26 = vld [vmem:[%s16793_s20 + $0x148] sm:$0xff]  ;;  %v392_v30 = vld [vmem:[%s16793_s20 + $0x140] sm:$0xff]  ;;  %v391_v34 = vld [vmem:[%s16793_s20 + $0x138] sm:$0xff] }
  0x16   :  { %9323 = vmatprep.subr.mxu1 %v122_v17  ;;  %9244 = vmatpush3.msra.mxu0 %v395_v18  ;;  %v104_v27 = vld [vmem:[%s16793_s20 + $0x48] sm:$0xff]  ;;  %v103_v31 = vld [vmem:[%s16793_s20 + $0x40] sm:$0xff]  ;;  %v102_v35 = vld [vmem:[%s16793_s20 + $0x38] sm:$0xff] }
  0x17   :  { %9324 = vmatpush3.msra.mxu1 %v106_v19  ;;  %9245 = vmatprep.subr.mxu0 %v410_v20  ;;  %v406_v36 = vld [vmem:[%s16793_s20 + $0x1b0] sm:$0xff]  ;;  %v405_v40 = vld [vmem:[%s16793_s20 + $0x1a8] sm:$0xff]  ;;  %v404_v44 = vld [vmem:[%s16793_s20 + $0x1a0] sm:$0xff] }
  0x18   :  { %9325 = vmatprep.subr.mxu1 %v121_v21  ;;  %9246 = vmatpush3.msra.mxu0 %v394_v22  ;;  %v117_v37 = vld [vmem:[%s16793_s20 + $0xb0] sm:$0xff]  ;;  %v116_v41 = vld [vmem:[%s16793_s20 + $0xa8] sm:$0xff]  ;;  %v115_v45 = vld [vmem:[%s16793_s20 + $0xa0] sm:$0xff] }
  0x19   :  { %9326 = vmatpush3.msra.mxu1 %v105_v23  ;;  %9247 = vmatprep.subr.mxu0 %v409_v24  ;;  %v390_v38 = vld [vmem:[%s16793_s20 + $0x130] sm:$0xff]  ;;  %v389_v42 = vld [vmem:[%s16793_s20 + $0x128] sm:$0xff]  ;;  %v388_v46 = vld [vmem:[%s16793_s20 + $0x120] sm:$0xff] }
  0x1a   :  { %9327 = vmatprep.subr.mxu1 %v120_v25  ;;  %9248 = vmatpush3.msra.mxu0 %v393_v26  ;;  %v101_v39 = vld [vmem:[%s16793_s20 + $0x30] sm:$0xff]  ;;  %v100_v43 = vld [vmem:[%s16793_s20 + $0x28] sm:$0xff]  ;;  %v99_v47 = vld [vmem:[%s16793_s20 + $0x20] sm:$0xff] }
  0x1b   :  { %9328 = vmatpush3.msra.mxu1 %v104_v27  ;;  %9249 = vmatprep.subr.mxu0 %v408_v28  ;;  %v403_v48 = vld [vmem:[%s16793_s20 + $0x198] sm:$0xff]  ;;  %v128_v52 = vld [vmem:[%s16794_s25 + $0x8] sm:$0xfe]  ;;  %v402_v54 = vld [vmem:[%s16793_s20 + $0x190] sm:$0xff] }
  0x1c   :  { %9329 = vmatprep.subr.mxu1 %v119_v29  ;;  %9250 = vmatpush3.msra.mxu0 %v392_v30  ;;  %v114_v49 = vld [vmem:[%s16793_s20 + $0x98] sm:$0xff]  ;;  %v113_v55 = vld [vmem:[%s16793_s20 + $0x90] sm:$0xff]  ;;  %v127_v58 = vld [vmem:[%s16794_s25] sm:$0xfe]  ;;  %v259_v60 = vrot.slane %v128_v52, 1 }
  0x1d   :  { %9330 = vmatpush3.msra.mxu1 %v103_v31  ;;  %9251 = vmatprep.subr.mxu0 %v407_v32  ;;  %v387_v50 = vld [vmem:[%s16793_s20 + $0x118] sm:$0xff]  ;;  %v386_v56 = vld [vmem:[%s16793_s20 + $0x110] sm:$0xff]  ;;  %v132_v62 = vld [vmem:[%s16794_s25 + $0x28] sm:$0xfe]  ;;  %v256_v6 = vrot.slane %v127_v58, 1 }
  0x1e   :  { %9331 = vmatprep.subr.mxu1 %v118_v33  ;;  %9252 = vmatpush3.msra.mxu0 %v391_v34  ;;  %v98_v51 = vld [vmem:[%s16793_s20 + $0x18] sm:$0xff]  ;;  %v97_v57 = vld [vmem:[%s16793_s20 + $0x10] sm:$0xff]  ;;  %v401_v0 = vld [vmem:[%s16793_s20 + $0x188] sm:$0xff]  ;;  %v265_v8 = vrot.slane %v132_v62, 1 }
  0x1f   :  { %9332 = vmatpush3.msra.mxu1 %v102_v35  ;;  %9253 = vmatprep.subr.mxu0 %v406_v36  ;;  %v130_v53 = vld [vmem:[%s16794_s25 + $0x18] sm:$0x1]  ;;  %v129_v59 = vld [vmem:[%s16794_s25 + $0x10] sm:$0x1]  ;;  %v112_v1 = vld [vmem:[%s16793_s20 + $0x88] sm:$0xff] }
  0x20   :  { %9333 = vmatprep.subr.mxu1 %v117_v37  ;;  %9254 = vmatpush3.msra.mxu0 %v390_v38  ;;  %v260_v61 = vrot.slane %v130_v53, 1  ;;  %v134_v63 = vld [vmem:[%s16794_s25 + $0x38] sm:$0x1]  ;;  %v385_v2 = vld [vmem:[%s16793_s20 + $0x108] sm:$0xff]  ;;  %v400_v4 = vld [vmem:[%s16793_s20 + $0x180] sm:$0xff]  ;;  %v257_v7 = vrot.slane %v129_v59, 1 }
  0x21   :  { %9334 = vmatpush3.msra.mxu1 %v101_v39  ;;  %9255 = vmatprep.subr.mxu0 %v405_v40  ;;  %v96_v3 = vld [vmem:[%s16793_s20 + $0x8] sm:$0xff]  ;;  %v111_v5 = vld [vmem:[%s16793_s20 + $0x80] sm:$0xff]  ;;  %v266_v9 = vrot.slane %v134_v63, 1  ;;  %v133_v11 = vld [vmem:[%s16794_s25 + $0x30] sm:$0x1] }
  0x22   :  { %9335 = vmatprep.subr.mxu1 %v116_v41  ;;  %9256 = vmatpush3.msra.mxu0 %v389_v42  ;;  %v131_v10 = vld [vmem:[%s16794_s25 + $0x20] sm:$0xfe]  ;;  %v261_v13 = vsel %vm255_vm0, %v259_v60, %v260_v61  ;;  %v136_v14 = vld [vmem:[%s16794_s25 + $0x48] sm:$0xfe]  ;;  %v138_v15 = vld [vmem:[%s16794_s25 + $0x58] sm:$0x1]  ;;  %v258_v18 = vsel %vm255_vm0, %v256_v6, %v257_v7 }
  0x23   :  { %9336 = vmatpush3.msra.mxu1 %v100_v43  ;;  %9257 = vmatprep.subr.mxu0 %v404_v44  ;;  %v384_v12 = vld [vmem:[%s16793_s20 + $0x100] sm:$0xff]  ;;  %v64_v17 = vld [vmem:[%s16794_s25 + $0x8] sm:$0xff]  ;;  %v994_v20 = vld [vmem:[%s16793_s20 + $0x2f8] sm:$0xff]  ;;  %v262_v22 = vrot.slane %v131_v10, 1  ;;  %v263_v23 = vrot.slane %v133_v11, 1  ;;  %v267_v24 = vsel %vm255_vm0, %v265_v8, %v266_v9  ;;  %v271_v25 = vrot.slane %v136_v14, 1 }
  0x24   :  { %9337 = vmatprep.subr.mxu1 %v115_v45  ;;  %9258 = vmatpush3.msra.mxu0 %v388_v46  ;;  %v95_v16 = vld [vmem:[%s16793_s20] sm:$0xff]  ;;  %v978_v21 = vld [vmem:[%s16793_s20 + $0x278] sm:$0xff]  ;;  %v272_v26 = vrot.slane %v138_v15, 1  ;;  %v137_v28 = vld [vmem:[%s16794_s25 + $0x50] sm:$0x1] }
  0x25   :  { %9338 = vmatpush3.msra.mxu1 %v99_v47  ;;  %9259 = vmatprep.subr.mxu0 %v403_v48  ;;  %v63_v19 = vld [vmem:[%s16794_s25] sm:$0xff]  ;;  %v11047_v29 = vld [vmem:[%s16794_s25 + $0x28] sm:$0xff]  ;;  %v142_v31 = vld [vmem:[%s16794_s25 + $0x78] sm:$0x1]  ;;  %v264_v35 = vsel %vm255_vm0, %v262_v22, %v263_v23  ;;  %v269_v37 = vrot.slane %v137_v28, 1 }
  0x26   :  { %9339 = vmatprep.subr.mxu1 %v114_v49  ;;  %9260 = vmatpush3.msra.mxu0 %v387_v50  ;;  %v135_v27 = vld [vmem:[%s16794_s25 + $0x40] sm:$0xfe]  ;;  %v140_v30 = vld [vmem:[%s16794_s25 + $0x68] sm:$0xfe]  ;;  %v993_v33 = vld [vmem:[%s16793_s20 + $0x2f0] sm:$0xff]  ;;  %v273_v40 = vsel %vm255_vm0, %v271_v25, %v272_v26  ;;  %v278_v42 = vrot.slane %v142_v31, 1 }
  0x27   :  { %9340 = vmatpush3.msra.mxu1 %v98_v51  ;;  %9261 = vmatprep.subr.mxu0 %v402_v54  ;;  %v11058_v32 = vld [vmem:[%s16794_s25 + $0x20] sm:$0xff]  ;;  %v977_v34 = vld [vmem:[%s16793_s20 + $0x270] sm:$0xff]  ;;  %v268_v36 = vrot.slane %v135_v27, 1  ;;  %v277_v41 = vrot.slane %v140_v30, 1  ;;  %v144_v43 = vld [vmem:[%s16794_s25 + $0x88] sm:$0xfe] }
  0x28   :  { %9341 = vmatprep.subr.mxu1 %v113_v55  ;;  %9262 = vmatpush3.msra.mxu0 %v386_v56  ;;  %v139_v38 = vld [vmem:[%s16794_s25 + $0x60] sm:$0xfe]  ;;  %v141_v39 = vld [vmem:[%s16794_s25 + $0x70] sm:$0x1]  ;;  %v146_v44 = vld [vmem:[%s16794_s25 + $0x98] sm:$0x1] }
  0x29   :  { %9342 = vmatpush3.msra.mxu1 %v97_v57  ;;  %9263 = vmatprep.subr.mxu0 %v401_v0  ;;  %v11084_v45 = vld [vmem:[%s16794_s25 + $0x48] sm:$0xff]  ;;  %v274_v48 = vrot.slane %v139_v38, 1  ;;  %v275_v49 = vrot.slane %v141_v39, 1  ;;  %v270_v50 = vsel %vm255_vm0, %v268_v36, %v269_v37  ;;  %v11097_v51 = vld [vmem:[%s16794_s25 + $0x40] sm:$0xff]  ;;  %v283_v53 = vrot.slane %v144_v43, 1  ;;  %v990_v9 = vld [vmem:[%s16793_s20 + $0x2d8] sm:$0xff] }
  0x2a   :  { %9343 = vmatprep.subr.mxu1 %v112_v1  ;;  %9264 = vmatpush3.msra.mxu0 %v385_v2  ;;  %v992_v46 = vld [vmem:[%s16793_s20 + $0x2e8] sm:$0xff]  ;;  %v284_v54 = vrot.slane %v146_v44, 1  ;;  %v143_v55 = vld [vmem:[%s16794_s25 + $0x80] sm:$0xfe]  ;;  %v279_v56 = vsel %vm255_vm0, %v277_v41, %v278_v42  ;;  %v145_v57 = vld [vmem:[%s16794_s25 + $0x90] sm:$0x1] }
  0x2b   :  { %9344 = vmatpush3.msra.mxu1 %v96_v3  ;;  %9265 = vmatprep.subr.mxu0 %v400_v4  ;;  %v976_v47 = vld [vmem:[%s16793_s20 + $0x268] sm:$0xff]  ;;  %v150_v59 = vld [vmem:[%s16794_s25 + $0xb8] sm:$0x1]  ;;  %v991_v60 = vld [vmem:[%s16793_s20 + $0x2e0] sm:$0xff]  ;;  %v276_v61 = vsel %vm255_vm0, %v274_v48, %v275_v49  ;;  %v280_v1 = vrot.slane %v143_v55, 1  ;;  %v281_v2 = vrot.slane %v145_v57, 1 }
  0x2c   :  { %9345 = vmatprep.subr.mxu1 %v111_v5  ;;  %9266 = vmatpush3.msra.mxu0 %v384_v12  ;;  %v11102_v52 = vld [vmem:[%s16794_s25 + $0x68] sm:$0xff]  ;;  %v975_v62 = vld [vmem:[%s16793_s20 + $0x260] sm:$0xff]  ;;  %v290_v4 = vrot.slane %v150_v59, 1  ;;  %v285_v5 = vsel %vm255_vm0, %v283_v53, %v284_v54  ;;  %v149_v7 = vld [vmem:[%s16794_s25 + $0xb0] sm:$0x1] }
  0x2d   :  { %480 = vmatprep.mubr.f32.mxu0 %v261_v13  ;;  %9346 = vmatpush3.msra.mxu1 %v95_v16  ;;  %v148_v58 = vld [vmem:[%s16794_s25 + $0xa8] sm:$0xfe]  ;;  %v11130_v63 = vld [vmem:[%s16794_s25 + $0x60] sm:$0xff]  ;;  %v154_v10 = vld [vmem:[%s16794_s25 + $0xd8] sm:$0x1]  ;;  %v282_v12 = vsel %vm255_vm0, %v280_v1, %v281_v2  ;;  %v287_v16 = vrot.slane %v149_v7, 1 }
  0x2e   :  { %625 = vmatprep.mubr.f32.mxu1 %v64_v17  ;;  %481 = vmatmul.mubr.f32.vlgmr.msra.gmra.mxu0 %v258_v18  ;;  %v11135_v0 = vld [vmem:[%s16794_s25 + $0x88] sm:$0xff]  ;;  %v289_v3 = vrot.slane %v148_v58, 1  ;;  %v147_v6 = vld [vmem:[%s16794_s25 + $0xa0] sm:$0xfe]  ;;  %v974_v11 = vld [vmem:[%s16793_s20 + $0x258] sm:$0xff] }
  0x2f   :  { %626 = vmatmul.mubr.f32.vlgmr.msra.gmra.mxu1 %v63_v19  ;;  %9395 = vmatprep.subr.mxu0 %v994_v20  ;;  %v152_v8 = vld [vmem:[%s16794_s25 + $0xc8] sm:$0xfe]  ;;  %v11162_v13 = vld [vmem:[%s16794_s25 + $0x80] sm:$0xff]  ;;  %v286_v15 = vrot.slane %v147_v6, 1  ;;  %v989_v17 = vld [vmem:[%s16793_s20 + $0x2d0] sm:$0xff]  ;;  %v296_v20 = vrot.slane %v154_v10, 1 }
  0x30   :  { %485 = vmatprep.mubr.f32.mxu0 %v267_v24  ;;  %9396 = vmatpush3.msra.mxu0 %v978_v21  ;;  %v11167_v14 = vld [vmem:[%s16794_s25 + $0xa8] sm:$0xff]  ;;  %v295_v18 = vrot.slane %v152_v8, 1  ;;  %v291_v19 = vsel %vm255_vm0, %v289_v3, %v290_v4  ;;  %v151_v21 = vld [vmem:[%s16794_s25 + $0xc0] sm:$0xfe]  ;;  %v153_v22 = vld [vmem:[%s16794_s25 + $0xd0] sm:$0x1] }
  0x31   :  { %630 = vmatprep.mubr.f32.mxu1 %v11047_v29  ;;  %9397 = vmatprep.subr.mxu0 %v993_v33  ;;  %v1220_v23 = vld [vmem:[%s16793_s20 + $0x3f8] sm:$0xff]  ;;  %v156_v24 = vld [vmem:[%s16794_s25 + $0xe8] sm:$0xfe]  ;;  %v11195_v27 = vld [vmem:[%s16794_s25 + $0xa0] sm:$0xff]  ;;  %v288_v30 = vsel %vm255_vm0, %v286_v15, %v287_v16  ;;  %v292_v33 = vrot.slane %v151_v21, 1 }
  0x32   :  { %486 = vmatmul.mubr.f32.gmra.mxu0 %v264_v35  ;;  %v158_v25 = vld [vmem:[%s16794_s25 + $0xf8] sm:$0x1]  ;;  %9475 = vmatprep.subr.mxu1 %v1220_v23  ;;  %v973_v28 = vld [vmem:[%s16793_s20 + $0x250] sm:$0xff]  ;;  %v11205_v31 = vld [vmem:[%s16794_s25 + $0xc8] sm:$0xff]  ;;  %v297_v37 = vsel %vm255_vm0, %v295_v18, %v296_v20  ;;  %v301_v38 = vrot.slane %v156_v24, 1 }
  0x33   :  { %631 = vmatmul.mubr.f32.gmra.mxu1 %v11058_v32  ;;  %9398 = vmatpush3.msra.mxu0 %v977_v34  ;;  %v1204_v26 = vld [vmem:[%s16793_s20 + $0x378] sm:$0xff]  ;;  %v293_v34 = vrot.slane %v153_v22, 1  ;;  %v988_v35 = vld [vmem:[%s16793_s20 + $0x2c8] sm:$0xff]  ;;  %v1219_v36 = vld [vmem:[%s16793_s20 + $0x3f0] sm:$0xff]  ;;  %v302_v39 = vrot.slane %v158_v25, 1 }
  0x34   :  { %490 = vmatprep.mubr.f32.mxu0 %v273_v40  ;;  %635 = vmatprep.mubr.f32.mxu1 %v11084_v45  ;;  %v155_v40 = vld [vmem:[%s16794_s25 + $0xe0] sm:$0xfe]  ;;  %v157_v41 = vld [vmem:[%s16794_s25 + $0xf0] sm:$0x1]  ;;  %v160_v42 = vld [vmem:[%s16794_s25 + $0x148] sm:$0xfe] }
  0x35   :  { %9399 = vmatprep.subr.mxu0 %v992_v46  ;;  %9476 = vmatpush3.msra.mxu1 %v1204_v26  ;;  %v162_v43 = vld [vmem:[%s16794_s25 + $0x158] sm:$0x1]  ;;  %v1203_v44 = vld [vmem:[%s16793_s20 + $0x370] sm:$0xff]  ;;  %v972_v46 = vld [vmem:[%s16793_s20 + $0x248] sm:$0xff]  ;;  %v294_v48 = vsel %vm255_vm0, %v292_v33, %v293_v34  ;;  %v298_v53 = vrot.slane %v155_v40, 1  ;;  %v299_v54 = vrot.slane %v157_v41, 1 }
  0x36   :  { %9400 = vmatpush3.msra.mxu0 %v976_v47  ;;  %9477 = vmatprep.subr.mxu1 %v1219_v36  ;;  %v1218_v47 = vld [vmem:[%s16793_s20 + $0x3e8] sm:$0xff]  ;;  %v11241_v49 = vld [vmem:[%s16794_s25 + $0xc0] sm:$0xff]  ;;  %v307_v57 = vrot.slane %v160_v42, 1  ;;  %v308_v58 = vrot.slane %v162_v43, 1  ;;  %v165_v16 = vld [vmem:[%s16794_s25 + $0x170] sm:$0x1] }
  0x37   :  { %491 = vmatmul.mubr.f32.gmra.mxu0 %v270_v50  ;;  %636 = vmatmul.mubr.f32.gmra.mxu1 %v11097_v51  ;;  %v11246_v50 = vld [vmem:[%s16794_s25 + $0xe8] sm:$0xff]  ;;  %v987_v55 = vld [vmem:[%s16793_s20 + $0x2c0] sm:$0xff]  ;;  %v300_v4 = vsel %vm255_vm0, %v298_v53, %v299_v54  ;;  %v170_v18 = vld [vmem:[%s16794_s25 + $0x198] sm:$0x1]  ;;  %v311_v26 = vrot.slane %v165_v16, 1 }
  0x38   :  { %495 = vmatprep.mubr.f32.mxu0 %v279_v56  ;;  %640 = vmatprep.mubr.f32.mxu1 %v11102_v52  ;;  %v303_v56 = vsel %vm255_vm0, %v301_v38, %v302_v39  ;;  %v159_v59 = vld [vmem:[%s16794_s25 + $0x140] sm:$0xfe]  ;;  %v1202_v1 = vld [vmem:[%s16793_s20 + $0x368] sm:$0xff]  ;;  %v309_v10 = vsel %vm255_vm0, %v307_v57, %v308_v58  ;;  %v970_v20 = vld [vmem:[%s16793_s20 + $0x238] sm:$0xff]  ;;  %v320_v34 = vrot.slane %v170_v18, 1 }
  0x39   :  { %9401 = vmatprep.subr.mxu0 %v991_v60  ;;  %v161_v60 = vld [vmem:[%s16794_s25 + $0x150] sm:$0x1]  ;;  %9478 = vmatpush3.msra.mxu1 %v1203_v44  ;;  %v971_v2 = vld [vmem:[%s16793_s20 + $0x240] sm:$0xff]  ;;  %v80_v6 = vld [vmem:[%s16794_s25 + $0x148] sm:$0xff]  ;;  %v304_v7 = vrot.slane %v159_v59, 1 }
  0x3a   :  { %9402 = vmatpush3.msra.mxu0 %v975_v62  ;;  %v166_v62 = vld [vmem:[%s16794_s25 + $0x178] sm:$0x1]  ;;  %9479 = vmatprep.subr.mxu1 %v1218_v47  ;;  %v1217_v3 = vld [vmem:[%s16793_s20 + $0x3e0] sm:$0xff]  ;;  %v305_v8 = vrot.slane %v161_v60, 1  ;;  %v11317_v24 = vld [vmem:[%s16794_s25 + $0x168] sm:$0xff] }
  0x3b   :  { %496 = vmatmul.mubr.f32.gmra.mxu0 %v276_v61  ;;  %641 = vmatmul.mubr.f32.gmra.mxu1 %v11130_v63  ;;  %v164_v61 = vld [vmem:[%s16794_s25 + $0x168] sm:$0xfe]  ;;  %v163_v15 = vld [vmem:[%s16794_s25 + $0x160] sm:$0xfe]  ;;  %v1216_v21 = vld [vmem:[%s16793_s20 + $0x3d8] sm:$0xff] }
  0x3c   :  { %500 = vmatprep.mubr.f32.mxu0 %v285_v5  ;;  %645 = vmatprep.mubr.f32.mxu1 %v11135_v0  ;;  %v11279_v5 = vld [vmem:[%s16794_s25 + $0xe0] sm:$0xff]  ;;  %v306_v22 = vsel %vm255_vm0, %v304_v7, %v305_v8  ;;  %v310_v25 = vrot.slane %v163_v15, 1  ;;  %v169_v36 = vld [vmem:[%s16794_s25 + $0x190] sm:$0x1]  ;;  %v174_v38 = vld [vmem:[%s16794_s25 + $0x1b8] sm:$0x1] }
  0x3d   :  { %9403 = vmatprep.subr.mxu0 %v990_v9  ;;  %v986_v9 = vld [vmem:[%s16793_s20 + $0x2b8] sm:$0xff]  ;;  %9480 = vmatpush3.msra.mxu1 %v1202_v1  ;;  %v79_v23 = vld [vmem:[%s16794_s25 + $0x140] sm:$0xff]  ;;  %v969_v40 = vld [vmem:[%s16793_s20 + $0x230] sm:$0xff]  ;;  %v317_v47 = vrot.slane %v169_v36, 1 }
  0x3e   :  { %9404 = vmatpush3.msra.mxu0 %v974_v11  ;;  %v313_v11 = vrot.slane %v164_v61, 1  ;;  %9481 = vmatprep.subr.mxu1 %v1217_v3  ;;  %v1200_v39 = vld [vmem:[%s16793_s20 + $0x358] sm:$0xff]  ;;  %v1215_v41 = vld [vmem:[%s16793_s20 + $0x3d0] sm:$0xff]  ;;  %v312_v42 = vsel %vm255_vm0, %v310_v25, %v311_v26  ;;  %v11349_v43 = vld [vmem:[%s16794_s25 + $0x160] sm:$0xff] }
  0x3f   :  { %501 = vmatmul.mubr.f32.gmra.mxu0 %v282_v12  ;;  %646 = vmatmul.mubr.f32.gmra.mxu1 %v11162_v13  ;;  %v314_v12 = vrot.slane %v166_v62, 1  ;;  %v11354_v44 = vld [vmem:[%s16794_s25 + $0x188] sm:$0xff]  ;;  %v173_v57 = vld [vmem:[%s16794_s25 + $0x1b0] sm:$0x1]  ;;  %v178_v60 = vld [vmem:[%s16794_s25 + $0x1d8] sm:$0x1] }
  0x40   :  { %505 = vmatprep.mubr.f32.mxu0 %v291_v19  ;;  %650 = vmatprep.mubr.f32.mxu1 %v11167_v14  ;;  %v1201_v19 = vld [vmem:[%s16793_s20 + $0x360] sm:$0xff]  ;;  %v1199_v58 = vld [vmem:[%s16793_s20 + $0x350] sm:$0xff]  ;;  %v176_v59 = vld [vmem:[%s16794_s25 + $0x1c8] sm:$0xfe] }
  0x41   :  { %9405 = vmatprep.subr.mxu0 %v989_v17  ;;  %v168_v17 = vld [vmem:[%s16794_s25 + $0x188] sm:$0xfe]  ;;  %9482 = vmatpush3.msra.mxu1 %v1201_v19  ;;  %v983_v7 = vld [vmem:[%s16793_s20 + $0x2a0] sm:$0xff]  ;;  %v982_v26 = vld [vmem:[%s16793_s20 + $0x298] sm:$0xff] }
  0x42   :  { %9406 = vmatpush3.msra.mxu0 %v973_v28  ;;  %v985_v28 = vld [vmem:[%s16793_s20 + $0x2b0] sm:$0xff]  ;;  %v319_v33 = vrot.slane %v168_v17, 1  ;;  %9483 = vmatprep.subr.mxu1 %v1216_v21  ;;  %v968_v61 = vld [vmem:[%s16793_s20 + $0x228] sm:$0xff]  ;;  %v182_v17 = vld [vmem:[%s16794_s25 + $0x1f8] sm:$0x1] }
  0x43   :  { %506 = vmatmul.mubr.f32.gmra.mxu0 %v288_v30  ;;  %651 = vmatmul.mubr.f32.gmra.mxu1 %v11195_v27  ;;  %v315_v30 = vsel %vm255_vm0, %v313_v11, %v314_v12  ;;  %v1214_v62 = vld [vmem:[%s16793_s20 + $0x3c8] sm:$0xff]  ;;  %v175_v11 = vld [vmem:[%s16794_s25 + $0x1c0] sm:$0xfe]  ;;  %v177_v12 = vld [vmem:[%s16794_s25 + $0x1d0] sm:$0x1] }
  0x44   :  { %510 = vmatprep.mubr.f32.mxu0 %v297_v37  ;;  %655 = vmatprep.mubr.f32.mxu1 %v11205_v31  ;;  %v172_v37 = vld [vmem:[%s16794_s25 + $0x1a8] sm:$0xfe]  ;;  %v321_v53 = vsel %vm255_vm0, %v319_v33, %v320_v34  ;;  %v967_v18 = vld [vmem:[%s16793_s20 + $0x220] sm:$0xff]  ;;  %v329_v25 = vrot.slane %v177_v12, 1  ;;  %v338_v33 = vrot.slane %v182_v17, 1 }
  0x45   :  { %9407 = vmatprep.subr.mxu0 %v988_v35  ;;  %v167_v35 = vld [vmem:[%s16794_s25 + $0x180] sm:$0xfe]  ;;  %v325_v54 = vrot.slane %v172_v37, 1  ;;  %9484 = vmatpush3.msra.mxu1 %v1200_v39  ;;  %v11392_v3 = vld [vmem:[%s16794_s25 + $0x1a8] sm:$0xff]  ;;  %v966_v39 = vld [vmem:[%s16793_s20 + $0x218] sm:$0xff] }
  0x46   :  { %9408 = vmatpush3.msra.mxu0 %v972_v46  ;;  %v316_v46 = vrot.slane %v167_v35, 1  ;;  %9485 = vmatprep.subr.mxu1 %v1215_v41  ;;  %v1198_v15 = vld [vmem:[%s16793_s20 + $0x348] sm:$0xff]  ;;  %v1213_v19 = vld [vmem:[%s16793_s20 + $0x3c0] sm:$0xff]  ;;  %v181_v35 = vld [vmem:[%s16794_s25 + $0x1f0] sm:$0x1] }
  0x47   :  { %511 = vmatmul.mubr.f32.gmra.mxu0 %v294_v48  ;;  %656 = vmatmul.mubr.f32.gmra.mxu1 %v11241_v49  ;;  %v984_v48 = vld [vmem:[%s16793_s20 + $0x2a8] sm:$0xff]  ;;  %v11425_v21 = vld [vmem:[%s16794_s25 + $0x1a0] sm:$0xff]  ;;  %v189_v12 = vld [vmem:[%s16794_s25 + $0x230] sm:$0x1] }
  0x48   :  { %515 = vmatprep.mubr.f32.mxu0 %v303_v56  ;;  %660 = vmatprep.mubr.f32.mxu1 %v11246_v50  ;;  %v171_v56 = vld [vmem:[%s16794_s25 + $0x1a0] sm:$0xfe]  ;;  %v318_v1 = vsel %vm255_vm0, %v316_v46, %v317_v47  ;;  %v180_v16 = vld [vmem:[%s16794_s25 + $0x1e8] sm:$0xfe] }
  0x49   :  { %9409 = vmatprep.subr.mxu0 %v987_v55  ;;  %v326_v55 = vrot.slane %v174_v38, 1  ;;  %9486 = vmatpush3.msra.mxu1 %v1199_v58  ;;  %v179_v34 = vld [vmem:[%s16794_s25 + $0x1e0] sm:$0xfe]  ;;  %v184_v37 = vld [vmem:[%s16794_s25 + $0x208] sm:$0xfe]  ;;  %v1196_v58 = vld [vmem:[%s16793_s20 + $0x338] sm:$0xff] }
  0x4a   :  { %9410 = vmatpush3.msra.mxu0 %v971_v2  ;;  %v11387_v2 = vld [vmem:[%s16794_s25 + $0x180] sm:$0xff]  ;;  %9487 = vmatprep.subr.mxu1 %v1214_v62  ;;  %v186_v38 = vld [vmem:[%s16794_s25 + $0x218] sm:$0x1]  ;;  %v11468_v46 = vld [vmem:[%s16794_s25 + $0x1e8] sm:$0xff]  ;;  %v334_v47 = vrot.slane %v179_v34, 1 }
  0x4b   :  { %516 = vmatmul.mubr.f32.gmra.mxu0 %v300_v4  ;;  %661 = vmatmul.mubr.f32.gmra.mxu1 %v11279_v5  ;;  %v322_v4 = vrot.slane %v171_v56, 1  ;;  %v327_v8 = vsel %vm255_vm0, %v325_v54, %v326_v55  ;;  %v1197_v36 = vld [vmem:[%s16793_s20 + $0x340] sm:$0xff]  ;;  %v343_v54 = vrot.slane %v184_v37, 1  ;;  %v344_v55 = vrot.slane %v186_v38, 1  ;;  %v188_v62 = vld [vmem:[%s16794_s25 + $0x228] sm:$0xfe] }
  0x4c   :  { %520 = vmatprep.mubr.f32.mxu0 %v309_v10  ;;  %665 = vmatprep.mubr.f32.mxu1 %v80_v6  ;;  %v323_v6 = vrot.slane %v173_v57, 1  ;;  %v332_v10 = vrot.slane %v178_v60, 1  ;;  %v183_v56 = vld [vmem:[%s16794_s25 + $0x200] sm:$0xfe]  ;;  %v185_v57 = vld [vmem:[%s16794_s25 + $0x210] sm:$0x1] }
  0x4d   :  { %9411 = vmatprep.subr.mxu0 %v986_v9  ;;  %v331_v9 = vrot.slane %v176_v59, 1  ;;  %9488 = vmatpush3.msra.mxu1 %v1198_v15  ;;  %v981_v59 = vld [vmem:[%s16793_s20 + $0x290] sm:$0xff]  ;;  %v1210_v15 = vld [vmem:[%s16793_s20 + $0x3a8] sm:$0xff]  ;;  %v709_v34 = vld [vmem:[%s16794_s25 + $0x18] sm:$0x3] }
  0x4e   :  { %9412 = vmatpush3.msra.mxu0 %v970_v20  ;;  %v324_v20 = vsel %vm255_vm0, %v322_v4, %v323_v6  ;;  %9489 = vmatprep.subr.mxu1 %v1213_v19  ;;  %v1211_v60 = vld [vmem:[%s16793_s20 + $0x3b0] sm:$0xff]  ;;  %v11501_v6 = vld [vmem:[%s16794_s25 + $0x1e0] sm:$0xff]  ;;  %v1194_v17 = vld [vmem:[%s16793_s20 + $0x328] sm:$0xff] }
  0x4f   :  { %521 = vmatmul.mubr.f32.gmra.mxu0 %v306_v22  ;;  %666 = vmatmul.mubr.f32.gmra.mxu1 %v79_v23  ;;  %v11430_v22 = vld [vmem:[%s16794_s25 + $0x1c8] sm:$0xff]  ;;  %v328_v23 = vrot.slane %v175_v11, 1  ;;  %v187_v11 = vld [vmem:[%s16794_s25 + $0x220] sm:$0xfe]  ;;  %v708_v37 = vld [vmem:[%s16794_s25 + $0x10] sm:$0x3] }
  0x50   :  { %525 = vmatprep.mubr.f32.mxu0 %v315_v30  ;;  %670 = vmatprep.mubr.f32.mxu1 %v11317_v24  ;;  %v337_v30 = vrot.slane %v180_v16, 1  ;;  %v11519_v16 = vld [vmem:[%s16794_s25 + $0x208] sm:$0xff]  ;;  %v1193_v38 = vld [vmem:[%s16793_s20 + $0x320] sm:$0xff] }
  0x51   :  { %9413 = vmatprep.subr.mxu0 %v985_v28  ;;  %v333_v28 = vsel %vm255_vm0, %v331_v9, %v332_v10  ;;  %v330_v41 = vsel %vm255_vm0, %v328_v23, %v329_v25  ;;  %9490 = vmatpush3.msra.mxu1 %v1197_v36  ;;  %v1195_v9 = vld [vmem:[%s16793_s20 + $0x330] sm:$0xff]  ;;  %v345_v10 = vsel %vm255_vm0, %v343_v54, %v344_v55  ;;  %v980_v23 = vld [vmem:[%s16793_s20 + $0x288] sm:$0xff]  ;;  %v1209_v25 = vld [vmem:[%s16793_s20 + $0x3a0] sm:$0xff] }
  0x52   :  { %9414 = vmatpush3.msra.mxu0 %v969_v40  ;;  %v1212_v40 = vld [vmem:[%s16793_s20 + $0x3b8] sm:$0xff]  ;;  %v706_v36 = vld [vmem:[%s16794_s25] sm:$0xfc] }
  0x53   :  { %526 = vmatmul.mubr.f32.gmra.mxu0 %v312_v42  ;;  %671 = vmatmul.mubr.f32.gmra.mxu1 %v11349_v43  ;;  %v11463_v42 = vld [vmem:[%s16794_s25 + $0x1c0] sm:$0xff] }
  0x54   :  { %530 = vmatprep.mubr.f32.mxu0 %v321_v53  ;;  %675 = vmatprep.mubr.f32.mxu1 %v11354_v44  ;;  %v339_v53 = vsel %vm255_vm0, %v337_v30, %v338_v33  ;;  %v347_v30 = vrot.slane %v189_v12, 1  ;;  %v707_v33 = vld [vmem:[%s16794_s25 + $0x8] sm:$0xfc]  ;;  %v11573_v55 = vld [vmem:[%s16794_s25 + $0x220] sm:$0xff] }
  0x55   :  { %9415 = vmatprep.subr.mxu0 %v984_v48  ;;  %v335_v48 = vrot.slane %v181_v35, 1  ;;  %9491 = vmatprep.subr.mxu1 %v1212_v40  ;;  %v964_v35 = vld [vmem:[%s16793_s20 + $0x208] sm:$0xff]  ;;  %v1208_v40 = vld [vmem:[%s16793_s20 + $0x398] sm:$0xff] }
  0x56   :  { %9416 = vmatpush3.msra.mxu0 %v968_v61  ;;  %v965_v61 = vld [vmem:[%s16793_s20 + $0x210] sm:$0xff]  ;;  %9492 = vmatpush3.msra.mxu1 %v1196_v58  ;;  %v836_v58 = vrot.slane %v708_v37, 2  ;;  %v719_v37 = vld [vmem:[%s16794_s25 + $0x68] sm:$0xfc] }
  0x57   :  { %531 = vmatmul.mubr.f32.gmra.mxu0 %v318_v1  ;;  %676 = vmatmul.mubr.f32.gmra.mxu1 %v11387_v2  ;;  %v190_v1 = vld [vmem:[%s16794_s25 + $0x238] sm:$0x1]  ;;  %v336_v4 = vsel %vm255_vm0, %v334_v47, %v335_v48  ;;  %v838_v47 = vrot.slane %v707_v33, 2  ;;  %v839_v48 = vrot.slane %v709_v34, 2  ;;  %v714_v33 = vld [vmem:[%s16794_s25 + $0x40] sm:$0xfc] }
  0x58   :  { %535 = vmatprep.mubr.f32.mxu0 %v327_v8  ;;  %680 = vmatprep.mubr.f32.mxu1 %v11392_v3  ;;  %v341_v8 = vrot.slane %v185_v57, 1  ;;  %v350_v19 = vrot.slane %v190_v1, 1  ;;  %v835_v57 = vrot.slane %v706_v36, 2  ;;  %v710_v1 = vld [vmem:[%s16794_s25 + $0x20] sm:$0xfc] }
  0x59   :  { %9417 = vmatprep.subr.mxu0 %v983_v7  ;;  %v340_v7 = vrot.slane %v183_v56, 1  ;;  %9493 = vmatprep.subr.mxu1 %v1211_v60  ;;  %v979_v56 = vld [vmem:[%s16793_s20 + $0x280] sm:$0xff]  ;;  %v711_v60 = vld [vmem:[%s16794_s25 + $0x28] sm:$0xfc]  ;;  %v716_v34 = vld [vmem:[%s16794_s25 + $0x50] sm:$0x3] }
  0x5a   :  { %9418 = vmatpush3.msra.mxu0 %v967_v18  ;;  %v349_v18 = vrot.slane %v188_v62, 1  ;;  %9494 = vmatpush3.msra.mxu1 %v1195_v9  ;;  %v963_v62 = vld [vmem:[%s16793_s20 + $0x200] sm:$0xff]  ;;  %v840_v9 = vsel %vm834_vm1, %v838_v47, %v839_v48  ;;  %v844_v12 = vrot.slane %v711_v60, 2  ;;  %v1668_v47 = vld [vmem:[%s16793_s20 + $0x4f0] sm:$0xff]  ;;  %v1667_v60 = vld [vmem:[%s16793_s20 + $0x4e8] sm:$0xff] }
  0x5b   :  { %536 = vmatmul.mubr.f32.gmra.mxu0 %v324_v20  ;;  %681 = vmatmul.mubr.f32.gmra.mxu1 %v11425_v21  ;;  %v11528_v20 = vld [vmem:[%s16794_s25 + $0x200] sm:$0xff]  ;;  %v1652_v48 = vld [vmem:[%s16793_s20 + $0x470] sm:$0xff] }
  0x5c   :  { %540 = vmatprep.mubr.f32.mxu0 %v333_v28  ;;  %685 = vmatprep.mubr.f32.mxu1 %v11430_v22  ;;  %v346_v28 = vrot.slane %v187_v11, 1  ;;  %v837_v11 = vsel %vm834_vm1, %v835_v57, %v836_v58  ;;  %v720_v58 = vld [vmem:[%s16794_s25 + $0x70] sm:$0x3] }
  0x5d   :  { %9419 = vmatprep.subr.mxu0 %v982_v26  ;;  %v342_v26 = vsel %vm255_vm0, %v340_v7, %v341_v8  ;;  %9495 = vmatprep.subr.mxu1 %v1210_v15  ;;  %v1191_v7 = vld [vmem:[%s16793_s20 + $0x310] sm:$0xff]  ;;  %v1206_v8 = vld [vmem:[%s16793_s20 + $0x388] sm:$0xff] }
  0x5e   :  { %9420 = vmatpush3.msra.mxu0 %v966_v39  ;;  %9496 = vmatpush3.msra.mxu1 %v1194_v17  ;;  %v351_v39 = vsel %vm255_vm0, %v349_v18, %v350_v19  ;;  %v348_v54 = vsel %vm255_vm0, %v346_v28, %v347_v30  ;;  %v715_v17 = vld [vmem:[%s16794_s25 + $0x48] sm:$0xfc]  ;;  %v717_v18 = vld [vmem:[%s16794_s25 + $0x58] sm:$0x3]  ;;  %v1205_v19 = vld [vmem:[%s16793_s20 + $0x380] sm:$0xff] }
  0x5f   :  { %541 = vmatmul.mubr.f32.gmra.mxu0 %v330_v41  ;;  %686 = vmatmul.mubr.f32.gmra.mxu1 %v11463_v42  ;;  %v11564_v41 = vld [vmem:[%s16794_s25 + $0x228] sm:$0xff]  ;;  %v1653_v30 = vld [vmem:[%s16793_s20 + $0x478] sm:$0xff]  ;;  %v851_v36 = vrot.slane %v717_v18, 2  ;;  %v1650_v18 = vld [vmem:[%s16793_s20 + $0x460] sm:$0xff] }
  0x60   :  { %545 = vmatprep.mubr.f32.mxu0 %v339_v53  ;;  %690 = vmatprep.mubr.f32.mxu1 %v11468_v46  ;;  %v1192_v53 = vld [vmem:[%s16793_s20 + $0x318] sm:$0xff] }
  0x61   :  { %9421 = vmatprep.subr.mxu0 %v981_v59  ;;  %9497 = vmatprep.subr.mxu1 %v1209_v25  ;;  %v1207_v59 = vld [vmem:[%s16793_s20 + $0x390] sm:$0xff]  ;;  %v1189_v25 = vld [vmem:[%s16793_s20 + $0x300] sm:$0xff] }
  0x62   :  { %9422 = vmatpush3.msra.mxu0 %v965_v61  ;;  %9498 = vmatpush3.msra.mxu1 %v1193_v38  ;;  %v713_v61 = vld [vmem:[%s16794_s25 + $0x38] sm:$0x3] }
  0x63   :  { %546 = vmatmul.mubr.f32.gmra.mxu0 %v336_v4  ;;  %691 = vmatmul.mubr.f32.gmra.mxu1 %v11501_v6  ;;  %v712_v4 = vld [vmem:[%s16794_s25 + $0x30] sm:$0x3]  ;;  %v845_v15 = vrot.slane %v713_v61, 2  ;;  %v721_v38 = vld [vmem:[%s16794_s25 + $0x78] sm:$0x3] }
  0x64   :  { %550 = vmatprep.mubr.f32.mxu0 %v345_v10  ;;  %695 = vmatprep.mubr.f32.mxu1 %v11519_v16  ;;  %v1190_v10 = vld [vmem:[%s16793_s20 + $0x308] sm:$0xff]  ;;  %v842_v28 = vrot.slane %v712_v4, 2  ;;  %v857_v57 = vrot.slane %v721_v38, 2  ;;  %v1664_v38 = vld [vmem:[%s16793_s20 + $0x4d0] sm:$0xff] }
  0x65   :  { %9423 = vmatprep.subr.mxu0 %v980_v23  ;;  %9499 = vmatprep.subr.mxu1 %v1208_v40  ;;  %v1669_v23 = vld [vmem:[%s16793_s20 + $0x4f8] sm:$0xff]  ;;  %v723_v61 = vld [vmem:[%s16794_s25 + $0x88] sm:$0xfc] }
  0x66   :  { %9424 = vmatpush3.msra.mxu0 %v964_v35  ;;  %9500 = vmatpush3.msra.mxu1 %v1192_v53  ;;  %v850_v35 = vrot.slane %v715_v17, 2  ;;  %v847_v53 = vrot.slane %v714_v33, 2  ;;  %v729_v17 = vld [vmem:[%s16794_s25 + $0xb8] sm:$0x3] }
  0x67   :  { %551 = vmatmul.mubr.f32.gmra.mxu0 %v342_v26  ;;  %696 = vmatmul.mubr.f32.gmra.mxu1 %v11528_v20  ;;  %v841_v26 = vrot.slane %v710_v1, 2  ;;  %v1666_v1 = vld [vmem:[%s16793_s20 + $0x4e0] sm:$0xff]  ;;  %v869_v33 = vrot.slane %v729_v17, 2 }
  0x68   :  { %555 = vmatprep.mubr.f32.mxu0 %v351_v39  ;;  %700 = vmatprep.mubr.f32.mxu1 %v11564_v41  ;;  %v846_v39 = vsel %vm834_vm1, %v844_v12, %v845_v15  ;;  %v862_v12 = vrot.slane %v723_v61, 2  ;;  %v2117_v61 = vld [vmem:[%s16793_s20 + $0x5f0] sm:$0xff] }
  0x69   :  { %9425 = vmatprep.subr.mxu0 %v979_v56  ;;  %9501 = vmatprep.subr.mxu1 %v1207_v59  ;;  %v843_v40 = vsel %vm834_vm1, %v841_v26, %v842_v28  ;;  %v856_v56 = vrot.slane %v719_v37, 2  ;;  %v852_v59 = vsel %vm834_vm1, %v850_v35, %v851_v36  ;;  %v1665_v26 = vld [vmem:[%s16793_s20 + $0x4d8] sm:$0xff]  ;;  %v728_v35 = vld [vmem:[%s16794_s25 + $0xb0] sm:$0x3]  ;;  %v731_v36 = vld [vmem:[%s16794_s25 + $0xc8] sm:$0xfc] }
  0x6a   :  { %9426 = vmatpush3.msra.mxu0 %v963_v62  ;;  %9502 = vmatpush3.msra.mxu1 %v1191_v7  ;;  %v725_v62 = vld [vmem:[%s16794_s25 + $0x98] sm:$0x3] }
  0x6b   :  { %556 = vmatmul.mubr.f32.gmra.mxu0 %v348_v54  ;;  %701 = vmatmul.mubr.f32.gmra.mxu1 %v11573_v55  ;;  %v848_v54 = vrot.slane %v716_v34, 2  ;;  %v863_v15 = vrot.slane %v725_v62, 2  ;;  %v1649_v28 = vld [vmem:[%s16793_s20 + $0x458] sm:$0xff] }
  0x6c   :  { %1059 = vmatprep.mubr.f32.mxu0 %v840_v9  ;;  %9503 = vmatprep.subr.mxu1 %v1206_v8  ;;  %v854_v8 = vrot.slane %v720_v58, 2  ;;  %v722_v9 = vld [vmem:[%s16794_s25 + $0x80] sm:$0xfc]  ;;  %v733_v37 = vld [vmem:[%s16794_s25 + $0xd8] sm:$0x3] }
  0x6d   :  { %9504 = vmatpush3.msra.mxu1 %v1190_v10  ;;  %9555 = vmatprep.subr.mxu0 %v1669_v23  ;;  %v849_v4 = vsel %vm834_vm1, %v847_v53, %v848_v54  ;;  %v724_v10 = vld [vmem:[%s16794_s25 + $0x90] sm:$0x3]  ;;  %v859_v23 = vrot.slane %v722_v9, 2  ;;  %v864_v34 = vsel %vm834_vm1, %v862_v12, %v863_v15  ;;  %v874_v53 = vrot.slane %v731_v36, 2  ;;  %v735_v58 = vld [vmem:[%s16794_s25 + $0xe8] sm:$0xfc] }
  0x6e   :  { %9505 = vmatprep.subr.mxu1 %v1205_v19  ;;  %1285 = vmatprep.mubr.f32.mxu1 %v11047_v29  ;;  %v718_v29 = vld [vmem:[%s16794_s25 + $0x60] sm:$0xfc]  ;;  %v2118_v19 = vld [vmem:[%s16793_s20 + $0x5f8] sm:$0xff]  ;;  %v875_v54 = vrot.slane %v733_v37, 2  ;;  %v8645_v36 = vld [vmem:[%s16794_s25 + $0x108] sm:$0xff] }
  0x6f   :  { %1060 = vmatmul.mubr.f32.vlgmr.msra.gmra.mxu0 %v837_v11  ;;  %9506 = vmatpush3.msra.mxu1 %v1189_v25  ;;  %v853_v7 = vrot.slane %v718_v29, 2  ;;  %v858_v11 = vsel %vm834_vm1, %v856_v56, %v857_v57  ;;  %v860_v25 = vrot.slane %v724_v10, 2  ;;  %v1663_v56 = vld [vmem:[%s16793_s20 + $0x4c8] sm:$0xff]  ;;  %v732_v29 = vld [vmem:[%s16794_s25 + $0xd0] sm:$0x3]  ;;  %v1646_v10 = vld [vmem:[%s16793_s20 + $0x440] sm:$0xff] }
  0x70   :  { %9556 = vmatpush3.msra.mxu0 %v1653_v30  ;;  %1286 = vmatmul.mubr.f32.vlgmr.msra.gmra.mxu1 %v11058_v32  ;;  %v1651_v32 = vld [vmem:[%s16793_s20 + $0x468] sm:$0xff]  ;;  %v741_v12 = vld [vmem:[%s16794_s25 + $0x158] sm:$0x3] }
  0x71   :  { %1064 = vmatprep.mubr.f32.mxu0 %v846_v39  ;;  %9557 = vmatprep.subr.mxu0 %v1668_v47  ;;  %v2102_v39 = vld [vmem:[%s16793_s20 + $0x578] sm:$0xff]  ;;  %v1648_v47 = vld [vmem:[%s16793_s20 + $0x450] sm:$0xff] }
  0x72   :  { %1290 = vmatprep.mubr.f32.mxu1 %v11084_v45  ;;  %9558 = vmatpush3.msra.mxu0 %v1652_v48  ;;  %v727_v45 = vld [vmem:[%s16794_s25 + $0xa8] sm:$0xfc]  ;;  %v866_v48 = vrot.slane %v728_v35, 2  ;;  %v1661_v15 = vld [vmem:[%s16793_s20 + $0x4b8] sm:$0xff] }
  0x73   :  { %1065 = vmatmul.mubr.f32.gmra.mxu0 %v843_v40  ;;  %9559 = vmatprep.subr.mxu0 %v1667_v60  ;;  %v868_v30 = vrot.slane %v727_v45, 2  ;;  %v861_v40 = vsel %vm834_vm1, %v859_v23, %v860_v25  ;;  %v737_v60 = vld [vmem:[%s16794_s25 + $0xf8] sm:$0x3]  ;;  %v2101_v45 = vld [vmem:[%s16793_s20 + $0x570] sm:$0xff]  ;;  %v738_v25 = vld [vmem:[%s16794_s25 + $0x140] sm:$0xfc] }
  0x74   :  { %1069 = vmatprep.mubr.f32.mxu0 %v852_v59  ;;  %1291 = vmatmul.mubr.f32.gmra.mxu1 %v11097_v51  ;;  %v855_v51 = vsel %vm834_vm1, %v853_v7, %v854_v8  ;;  %v1647_v59 = vld [vmem:[%s16793_s20 + $0x448] sm:$0xff]  ;;  %v734_v7 = vld [vmem:[%s16794_s25 + $0xe0] sm:$0xfc]  ;;  %v876_v8 = vsel %vm834_vm1, %v874_v53, %v875_v54  ;;  %v881_v9 = vrot.slane %v737_v60, 2  ;;  %v883_v37 = vrot.slane %v738_v25, 2 }
  0x75   :  { %9560 = vmatpush3.msra.mxu0 %v1651_v32  ;;  %1295 = vmatprep.mubr.f32.mxu1 %v11102_v52  ;;  %v726_v52 = vld [vmem:[%s16794_s25 + $0xa0] sm:$0xfc]  ;;  %v870_v57 = vsel %vm834_vm1, %v868_v30, %v869_v33  ;;  %v1660_v30 = vld [vmem:[%s16793_s20 + $0x4b0] sm:$0xff]  ;;  %v745_v33 = vld [vmem:[%s16794_s25 + $0x178] sm:$0x3] }
  0x76   :  { %9561 = vmatprep.subr.mxu0 %v1666_v1  ;;  %9635 = vmatprep.subr.mxu1 %v2118_v19  ;;  %v872_v1 = vrot.slane %v732_v29, 2  ;;  %v2100_v53 = vld [vmem:[%s16793_s20 + $0x568] sm:$0xff]  ;;  %v749_v54 = vld [vmem:[%s16794_s25 + $0x198] sm:$0x3]  ;;  %v1658_v29 = vld [vmem:[%s16793_s20 + $0x4a0] sm:$0xff] }
  0x77   :  { %1070 = vmatmul.mubr.f32.gmra.mxu0 %v849_v4  ;;  %9636 = vmatpush3.msra.mxu1 %v2102_v39  ;;  %v880_v4 = vrot.slane %v735_v58, 2  ;;  %v11889_v25 = vld [vmem:[%s16794_s25 + $0x1c0] sm:$0xfc] }
  0x78   :  { %1074 = vmatprep.mubr.f32.mxu0 %v858_v11  ;;  %9562 = vmatpush3.msra.mxu0 %v1650_v18  ;;  %v739_v11 = vld [vmem:[%s16794_s25 + $0x148] sm:$0xfc]  ;;  %v877_v18 = vrot.slane %v734_v7, 2  ;;  %v753_v7 = vld [vmem:[%s16794_s25 + $0x1b8] sm:$0x3] }
  0x79   :  { %1296 = vmatmul.mubr.f32.gmra.mxu1 %v11130_v63  ;;  %9563 = vmatprep.subr.mxu0 %v1665_v26  ;;  %v865_v63 = vrot.slane %v726_v52, 2  ;;  %v886_v23 = vrot.slane %v739_v11, 2  ;;  %v882_v26 = vsel %vm834_vm1, %v880_v4, %v881_v9  ;;  %v1644_v52 = vld [vmem:[%s16793_s20 + $0x430] sm:$0xff]  ;;  %v751_v4 = vld [vmem:[%s16794_s25 + $0x1a8] sm:$0xfc]  ;;  %v1642_v9 = vld [vmem:[%s16793_s20 + $0x420] sm:$0xff] }
  0x7a   :  { %1300 = vmatprep.mubr.f32.mxu1 %v11135_v0  ;;  %9564 = vmatpush3.msra.mxu0 %v1649_v28  ;;  %v730_v0 = vld [vmem:[%s16794_s25 + $0xc0] sm:$0xfc]  ;;  %v743_v28 = vld [vmem:[%s16794_s25 + $0x168] sm:$0xfc]  ;;  %v2098_v11 = vld [vmem:[%s16793_s20 + $0x558] sm:$0xff] }
  0x7b   :  { %1075 = vmatmul.mubr.f32.gmra.mxu0 %v855_v51  ;;  %9565 = vmatprep.subr.mxu0 %v1664_v38  ;;  %v867_v62 = vsel %vm834_vm1, %v865_v63, %v866_v48  ;;  %v871_v32 = vrot.slane %v730_v0, 2  ;;  %v887_v51 = vrot.slane %v741_v12, 2  ;;  %v892_v39 = vrot.slane %v743_v28, 2  ;;  %v744_v63 = vld [vmem:[%s16794_s25 + $0x170] sm:$0x3]  ;;  %v8644_v0 = vld [vmem:[%s16794_s25 + $0x100] sm:$0xff] }
  0x7c   :  { %1079 = vmatprep.mubr.f32.mxu0 %v864_v34  ;;  %9566 = vmatpush3.msra.mxu0 %v1648_v47  ;;  %v2116_v34 = vld [vmem:[%s16793_s20 + $0x5e8] sm:$0xff]  ;;  %v893_v47 = vrot.slane %v745_v33, 2  ;;  %v1657_v12 = vld [vmem:[%s16793_s20 + $0x498] sm:$0xff]  ;;  %v1656_v33 = vld [vmem:[%s16793_s20 + $0x490] sm:$0xff] }
  0x7d   :  { %1301 = vmatmul.mubr.f32.gmra.mxu1 %v11162_v13  ;;  %v1662_v13 = vld [vmem:[%s16793_s20 + $0x4c0] sm:$0xff]  ;;  %9567 = vmatprep.subr.mxu0 %v1663_v56  ;;  %v873_v17 = vsel %vm834_vm1, %v871_v32, %v872_v1  ;;  %v747_v48 = vld [vmem:[%s16794_s25 + $0x188] sm:$0xfc]  ;;  %v899_v32 = vrot.slane %v749_v54, 2  ;;  %v11951_v54 = vld [vmem:[%s16794_s25 + $0x210] sm:$0x3] }
  0x7e   :  { %1305 = vmatprep.mubr.f32.mxu1 %v11167_v14  ;;  %9568 = vmatpush3.msra.mxu0 %v1647_v59  ;;  %v736_v14 = vld [vmem:[%s16794_s25 + $0xf0] sm:$0x3]  ;;  %v2115_v56 = vld [vmem:[%s16793_s20 + $0x5e0] sm:$0xff]  ;;  %v890_v59 = vrot.slane %v744_v63, 2  ;;  %v898_v60 = vrot.slane %v747_v48, 2 }
  0x7f   :  { %1080 = vmatmul.mubr.f32.gmra.mxu0 %v861_v40  ;;  %9637 = vmatprep.subr.mxu1 %v2117_v61  ;;  %v878_v19 = vrot.slane %v736_v14, 2  ;;  %v742_v40 = vld [vmem:[%s16794_s25 + $0x160] sm:$0xfc]  ;;  %v11937_v63 = vld [vmem:[%s16794_s25 + $0x208] sm:$0xfc] }
  0x80   :  { %1084 = vmatprep.mubr.f32.mxu0 %v870_v57  ;;  %9569 = vmatprep.subr.mxu0 %v1662_v13  ;;  %v1643_v57 = vld [vmem:[%s16793_s20 + $0x428] sm:$0xff]  ;;  %v746_v61 = vld [vmem:[%s16794_s25 + $0x180] sm:$0xfc]  ;;  %v748_v13 = vld [vmem:[%s16794_s25 + $0x190] sm:$0x3] }
  0x81   :  { %1306 = vmatmul.mubr.f32.gmra.mxu1 %v11195_v27  ;;  %v1645_v27 = vld [vmem:[%s16793_s20 + $0x438] sm:$0xff]  ;;  %9570 = vmatpush3.msra.mxu0 %v1646_v10  ;;  %v879_v35 = vsel %vm834_vm1, %v877_v18, %v878_v19  ;;  %v2099_v1 = vld [vmem:[%s16793_s20 + $0x560] sm:$0xff]  ;;  %v895_v14 = vrot.slane %v746_v61, 2  ;;  %v896_v10 = vrot.slane %v748_v13, 2  ;;  %v900_v18 = vsel %vm834_vm1, %v898_v60, %v899_v32  ;;  %v755_v19 = vld [vmem:[%s16794_s25 + $0x1c8] sm:$0xfc] }
  0x82   :  { %1310 = vmatprep.mubr.f32.mxu1 %v11205_v31  ;;  %v740_v31 = vld [vmem:[%s16794_s25 + $0x150] sm:$0x3]  ;;  %9571 = vmatprep.subr.mxu0 %v1661_v15  ;;  %v765_v48 = vld [vmem:[%s16794_s25 + $0x218] sm:$0x3] }
  0x83   :  { %1085 = vmatmul.mubr.f32.gmra.mxu0 %v867_v62  ;;  %9638 = vmatpush3.msra.mxu1 %v2101_v45  ;;  %v884_v38 = vrot.slane %v740_v31, 2  ;;  %v894_v62 = vsel %vm834_vm1, %v892_v39, %v893_v47  ;;  %v904_v45 = vrot.slane %v751_v4, 2  ;;  %v11923_v39 = vld [vmem:[%s16794_s25 + $0x1e0] sm:$0xfc]  ;;  %v1640_v47 = vld [vmem:[%s16793_s20 + $0x410] sm:$0xff]  ;;  %v923_v32 = vrot.slane %v765_v48, 2 }
  0x84   :  { %1089 = vmatprep.mubr.f32.mxu0 %v876_v8  ;;  %9572 = vmatpush3.msra.mxu0 %v1645_v27  ;;  %v2114_v8 = vld [vmem:[%s16793_s20 + $0x5d8] sm:$0xff]  ;;  %v905_v27 = vrot.slane %v753_v7, 2  ;;  %v913_v61 = vrot.slane %v11923_v39, 2  ;;  %v920_v4 = vrot.slane %v11951_v54, 2  ;;  %v1639_v7 = vld [vmem:[%s16793_s20 + $0x408] sm:$0xff] }
  0x85   :  { %1311 = vmatmul.mubr.f32.gmra.mxu1 %v11241_v49  ;;  %v1659_v49 = vld [vmem:[%s16793_s20 + $0x4a8] sm:$0xff]  ;;  %9573 = vmatprep.subr.mxu0 %v1660_v30  ;;  %v885_v58 = vsel %vm834_vm1, %v883_v37, %v884_v38  ;;  %v2097_v30 = vld [vmem:[%s16793_s20 + $0x550] sm:$0xff]  ;;  %v761_v38 = vld [vmem:[%s16794_s25 + $0x1f8] sm:$0x3] }
  0x86   :  { %1315 = vmatprep.mubr.f32.mxu1 %v11246_v50  ;;  %v888_v50 = vsel %vm834_vm1, %v886_v23, %v887_v51  ;;  %9574 = vmatpush3.msra.mxu0 %v1644_v52  ;;  %v757_v23 = vld [vmem:[%s16794_s25 + $0x1d8] sm:$0x3]  ;;  %v897_v52 = vsel %vm834_vm1, %v895_v14, %v896_v10  ;;  %v906_v37 = vsel %vm834_vm1, %v904_v45, %v905_v27  ;;  %v917_v60 = vrot.slane %v761_v38, 2  ;;  %v1638_v45 = vld [vmem:[%s16793_s20 + $0x400] sm:$0xff] }
  0x87   :  { %1090 = vmatmul.mubr.f32.gmra.mxu0 %v873_v17  ;;  %9639 = vmatprep.subr.mxu1 %v2116_v34  ;;  %v752_v17 = vld [vmem:[%s16794_s25 + $0x1b0] sm:$0x3]  ;;  %v1641_v51 = vld [vmem:[%s16793_s20 + $0x418] sm:$0xff]  ;;  %v910_v34 = vrot.slane %v755_v19, 2  ;;  %v12155_v54 = vld [vmem:[%s16794_s25 + $0x60] sm:$0xfe] }
  0x88   :  { %1094 = vmatprep.mubr.f32.mxu0 %v882_v26  ;;  %9575 = vmatprep.subr.mxu0 %v1659_v49  ;;  %v2113_v26 = vld [vmem:[%s16793_s20 + $0x5d0] sm:$0xff]  ;;  %v902_v28 = vrot.slane %v752_v17, 2  ;;  %v911_v49 = vrot.slane %v757_v23, 2  ;;  %v12018_v27 = vld [vmem:[%s16794_s25 + $0x38] sm:$0x1] }
  0x89   :  { %1316 = vmatmul.mubr.f32.gmra.mxu1 %v11279_v5  ;;  %v889_v5 = vrot.slane %v742_v40, 2  ;;  %9576 = vmatpush3.msra.mxu0 %v1643_v57  ;;  %v11928_v40 = vld [vmem:[%s16794_s25 + $0x1f0] sm:$0x3]  ;;  %v2344_v23 = vld [vmem:[%s16793_s20 + $0x6f8] sm:$0xff] }
  0x8a   :  { %1320 = vmatprep.mubr.f32.mxu1 %v8645_v36  ;;  %9640 = vmatpush3.msra.mxu1 %v2100_v53  ;;  %v759_v36 = vld [vmem:[%s16794_s25 + $0x1e8] sm:$0xfc]  ;;  %v914_v13 = vrot.slane %v11928_v40, 2  ;;  %v12028_v17 = vld [vmem:[%s16794_s25 + $0x30] sm:$0x1] }
  0x8b   :  { %1095 = vmatmul.mubr.f32.gmra.mxu0 %v879_v35  ;;  %9641 = vmatprep.subr.mxu1 %v2115_v56  ;;  %v891_v15 = vsel %vm834_vm1, %v889_v5, %v890_v59  ;;  %v907_v35 = vrot.slane %v11889_v25, 2  ;;  %v916_v53 = vrot.slane %v759_v36, 2  ;;  %v1655_v56 = vld [vmem:[%s16793_s20 + $0x488] sm:$0xff]  ;;  %v11966_v5 = vld [vmem:[%s16794_s25 + $0x238] sm:$0x3]  ;;  %v2111_v59 = vld [vmem:[%s16793_s20 + $0x5c0] sm:$0xff] }
  0x8c   :  { %1099 = vmatprep.mubr.f32.mxu0 %v888_v50  ;;  %9577 = vmatprep.subr.mxu0 %v1658_v29  ;;  %v11971_v29 = vld [vmem:[%s16794_s25 + $0x220] sm:$0xfc]  ;;  %v929_v14 = vrot.slane %v11966_v5, 2  ;;  %v12038_v25 = vld [vmem:[%s16794_s25 + $0x28] sm:$0xfc]  ;;  %v2109_v36 = vld [vmem:[%s16793_s20 + $0x5b0] sm:$0xff] }
  0x8d   :  { %1321 = vmatmul.mubr.f32.gmra.mxu1 %v8644_v0  ;;  %9578 = vmatpush3.msra.mxu0 %v1642_v9  ;;  %v11961_v0 = vld [vmem:[%s16794_s25 + $0x228] sm:$0xfc]  ;;  %v925_v10 = vrot.slane %v11971_v29, 2  ;;  %v1962_v38 = vrot.slane %v12038_v25, 2  ;;  %v2090_v5 = vld [vmem:[%s16793_s20 + $0x518] sm:$0xff]  ;;  %v2105_v29 = vld [vmem:[%s16793_s20 + $0x590] sm:$0xff] }
  0x8e   :  { %1325 = vmatprep.mubr.f32.mxu1 %v11317_v24  ;;  %9642 = vmatpush3.msra.mxu1 %v2099_v1  ;;  %v750_v24 = vld [vmem:[%s16794_s25 + $0x1a0] sm:$0xfc]  ;;  %v928_v9 = vrot.slane %v11961_v0, 2  ;;  %v12189_v0 = vld [vmem:[%s16794_s25 + $0x70] sm:$0x3] }
  0x8f   :  { %1100 = vmatmul.mubr.f32.gmra.mxu0 %v885_v58  ;;  %9643 = vmatprep.subr.mxu1 %v2114_v8  ;;  %v901_v31 = vrot.slane %v750_v24, 2  ;;  %v2096_v58 = vld [vmem:[%s16793_s20 + $0x548] sm:$0xff]  ;;  %v11991_v8 = vld [vmem:[%s16794_s25 + $0x230] sm:$0x3]  ;;  %v12023_v24 = vld [vmem:[%s16794_s25 + $0x20] sm:$0xfe] }
  0x90   :  { %1104 = vmatprep.mubr.f32.mxu0 %v894_v62  ;;  %9579 = vmatprep.subr.mxu0 %v1657_v12  ;;  %v922_v62 = vrot.slane %v11937_v63, 2  ;;  %v12006_v12 = vld [vmem:[%s16794_s25 + $0x28] sm:$0xfe]  ;;  %v926_v19 = vrot.slane %v11991_v8, 2  ;;  %v12179_v8 = vld [vmem:[%s16794_s25 + $0x78] sm:$0x3] }
  0x91   :  { %1326 = vmatmul.mubr.f32.gmra.mxu1 %v11349_v43  ;;  %v756_v43 = vld [vmem:[%s16794_s25 + $0x1d0] sm:$0x3]  ;;  %9580 = vmatpush3.msra.mxu0 %v1641_v51  ;;  %v903_v57 = vsel %vm834_vm1, %v901_v31, %v902_v28  ;;  %v12049_v51 = vld [vmem:[%s16794_s25 + $0x20] sm:$0xfc]  ;;  %v12059_v28 = vld [vmem:[%s16794_s25 + $0x48] sm:$0xfe] }
  0x92   :  { %1330 = vmatprep.mubr.f32.mxu1 %v11354_v44  ;;  %9644 = vmatpush3.msra.mxu1 %v2098_v11  ;;  %v2112_v44 = vld [vmem:[%s16793_s20 + $0x5c8] sm:$0xff]  ;;  %v908_v50 = vrot.slane %v756_v43, 2  ;;  %v1654_v11 = vld [vmem:[%s16793_s20 + $0x480] sm:$0xff]  ;;  %v12054_v31 = vld [vmem:[%s16794_s25 + $0x30] sm:$0x3]  ;;  %v1959_v40 = vrot.slane %v12049_v51, 2 }
  0x93   :  { %1105 = vmatmul.mubr.f32.gmra.mxu0 %v891_v15  ;;  %9645 = vmatprep.subr.mxu1 %v2113_v26  ;;  %v2110_v15 = vld [vmem:[%s16793_s20 + $0x5b8] sm:$0xff]  ;;  %v2092_v63 = vld [vmem:[%s16793_s20 + $0x528] sm:$0xff]  ;;  %v1519_v48 = vrot.slane %v12059_v28, 1  ;;  %v12312_v51 = vld [vmem:[%s16794_s25 + $0xa0] sm:$0xfe] }
  0x94   :  { %1109 = vmatprep.mubr.f32.mxu0 %v900_v18  ;;  %9581 = vmatprep.subr.mxu0 %v1656_v33  ;;  %v918_v18 = vsel %vm834_vm1, %v916_v53, %v917_v60  ;;  %v12043_v26 = vld [vmem:[%s16794_s25 + $0x38] sm:$0x3]  ;;  %v12072_v33 = vld [vmem:[%s16794_s25 + $0x40] sm:$0xfe]  ;;  %v12317_v28 = vld [vmem:[%s16794_s25 + $0xb0] sm:$0x1] }
  0x95   :  { %1331 = vmatmul.mubr.f32.gmra.mxu1 %v11387_v2  ;;  %v11946_v2 = vld [vmem:[%s16794_s25 + $0x200] sm:$0xfc]  ;;  %9582 = vmatpush3.msra.mxu0 %v1640_v47  ;;  %v12067_v43 = vld [vmem:[%s16794_s25 + $0x58] sm:$0x1]  ;;  %v1963_v39 = vrot.slane %v12043_v26, 2  ;;  %v2108_v47 = vld [vmem:[%s16793_s20 + $0x5a8] sm:$0xff] }
  0x96   :  { %1335 = vmatprep.mubr.f32.mxu1 %v11392_v3  ;;  %9646 = vmatpush3.msra.mxu1 %v2097_v30  ;;  %v912_v3 = vsel %vm834_vm1, %v910_v34, %v911_v49  ;;  %v919_v1 = vrot.slane %v11946_v2, 2  ;;  %v924_v30 = vsel %vm834_vm1, %v922_v62, %v923_v32  ;;  %v1514_v34 = vrot.slane %v12018_v27, 1  ;;  %v12142_v62 = vld [vmem:[%s16794_s25 + $0x68] sm:$0xfe]  ;;  %v2106_v2 = vld [vmem:[%s16793_s20 + $0x598] sm:$0xff]  ;;  %v2103_v27 = vld [vmem:[%s16793_s20 + $0x580] sm:$0xff] }
  0x97   :  { %1110 = vmatmul.mubr.f32.gmra.mxu0 %v897_v52  ;;  %9647 = vmatprep.subr.mxu1 %v2112_v44  ;;  %v12077_v52 = vld [vmem:[%s16794_s25 + $0x50] sm:$0x1]  ;;  %v1513_v44 = vrot.slane %v12006_v12, 1  ;;  %v1510_v49 = vrot.slane %v12023_v24, 1  ;;  %v1520_v53 = vrot.slane %v12067_v43, 1  ;;  %v2087_v43 = vld [vmem:[%s16793_s20 + $0x500] sm:$0xff] }
  0x98   :  { %1114 = vmatprep.mubr.f32.mxu0 %v906_v37  ;;  %9583 = vmatprep.subr.mxu0 %v1655_v56  ;;  %v2093_v37 = vld [vmem:[%s16793_s20 + $0x530] sm:$0xff]  ;;  %v1516_v56 = vrot.slane %v12072_v33, 1  ;;  %v921_v60 = vsel %vm834_vm1, %v919_v1, %v920_v4  ;;  %v12165_v1 = vld [vmem:[%s16794_s25 + $0x68] sm:$0xfc]  ;;  %v930_v4 = vsel %vm834_vm1, %v928_v9, %v929_v14  ;;  %v12244_v12 = vld [vmem:[%s16794_s25 + $0x80] sm:$0xfe] }
  0x99   :  { %1336 = vmatmul.mubr.f32.gmra.mxu1 %v11425_v21  ;;  %v2095_v21 = vld [vmem:[%s16793_s20 + $0x540] sm:$0xff]  ;;  %9584 = vmatpush3.msra.mxu0 %v1639_v7  ;;  %v12160_v32 = vld [vmem:[%s16794_s25 + $0x70] sm:$0x1]  ;;  %v927_v7 = vsel %vm834_vm1, %v925_v10, %v926_v19  ;;  %v12287_v24 = vld [vmem:[%s16794_s25 + $0xa8] sm:$0xfe]  ;;  %v1521_v25 = vsel %vm255_vm0, %v1519_v48, %v1520_v53 }
  0x9a   :  { %1340 = vmatprep.mubr.f32.mxu1 %v11430_v22  ;;  %9648 = vmatpush3.msra.mxu1 %v2096_v58  ;;  %v909_v22 = vsel %vm834_vm1, %v907_v35, %v908_v50  ;;  %v1511_v35 = vrot.slane %v12028_v17, 1  ;;  %v1960_v50 = vrot.slane %v12054_v31, 2  ;;  %v12118_v58 = vld [vmem:[%s16794_s25 + $0x58] sm:$0x3]  ;;  %v1523_v19 = vrot.slane %v12160_v32, 1 }
  0x9b   :  { %1115 = vmatmul.mubr.f32.gmra.mxu0 %v903_v57  ;;  %9649 = vmatprep.subr.mxu1 %v2111_v59  ;;  %v1517_v57 = vrot.slane %v12077_v52, 1  ;;  %v12123_v59 = vld [vmem:[%s16794_s25 + $0x40] sm:$0xfc]  ;;  %v1969_v9 = vrot.slane %v12118_v58, 2  ;;  %v12307_v31 = vld [vmem:[%s16794_s25 + $0xb8] sm:$0x1] }
  0x9c   :  { %1119 = vmatprep.mubr.f32.mxu0 %v912_v3  ;;  %9585 = vmatprep.subr.mxu0 %v1654_v11  ;;  %v12113_v3 = vld [vmem:[%s16794_s25 + $0x48] sm:$0xfc]  ;;  %v1965_v14 = vrot.slane %v12123_v59, 2  ;;  %v1961_v17 = vsel %vm834_vm1, %v1959_v40, %v1960_v50  ;;  %v2328_v33 = vld [vmem:[%s16793_s20 + $0x678] sm:$0xff]  ;;  %v2327_v40 = vld [vmem:[%s16793_s20 + $0x670] sm:$0xff] }
  0x9d   :  { %1341 = vmatmul.mubr.f32.gmra.mxu1 %v11463_v42  ;;  %v915_v42 = vsel %vm834_vm1, %v913_v61, %v914_v13  ;;  %9586 = vmatpush3.msra.mxu0 %v1638_v45  ;;  %v2091_v61 = vld [vmem:[%s16793_s20 + $0x520] sm:$0xff]  ;;  %v12137_v13 = vld [vmem:[%s16794_s25 + $0x50] sm:$0x3]  ;;  %v8661_v11 = vld [vmem:[%s16794_s25 + $0x248] sm:$0xff]  ;;  %v1518_v26 = vsel %vm255_vm0, %v1516_v56, %v1517_v57 }
  0x9e   :  { %1345 = vmatprep.mubr.f32.mxu1 %v11468_v46  ;;  %9650 = vmatpush3.msra.mxu1 %v2095_v21  ;;  %v2094_v46 = vld [vmem:[%s16793_s20 + $0x538] sm:$0xff]  ;;  %v1968_v21 = vrot.slane %v12113_v3, 2  ;;  %v1966_v10 = vrot.slane %v12137_v13, 2  ;;  %v2342_v57 = vld [vmem:[%s16793_s20 + $0x6e8] sm:$0xff]  ;;  %v12372_v3 = vld [vmem:[%s16794_s25 + $0xb0] sm:$0x3] }
  0x9f   :  { %1120 = vmatmul.mubr.f32.gmra.mxu0 %v909_v22  ;;  %9651 = vmatprep.subr.mxu1 %v2110_v15  ;;  %v2089_v22 = vld [vmem:[%s16793_s20 + $0x510] sm:$0xff]  ;;  %v1525_v15 = vrot.slane %v12142_v62, 1  ;;  %v12417_v59 = vld [vmem:[%s16794_s25 + $0xd8] sm:$0x3] }
  0xa0   :  { %1124 = vmatprep.mubr.f32.mxu0 %v918_v18  ;;  %9715 = vmatprep.subr.mxu0 %v2344_v23  ;;  %v1522_v18 = vrot.slane %v12155_v54, 1  ;;  %v2104_v23 = vld [vmem:[%s16793_s20 + $0x588] sm:$0xff]  ;;  %v1967_v62 = vsel %vm834_vm1, %v1965_v14, %v1966_v10  ;;  %v12430_v10 = vld [vmem:[%s16794_s25 + $0xc0] sm:$0xfc] }
  0xa1   :  { %1346 = vmatmul.mubr.f32.gmra.mxu1 %v11501_v6  ;;  %v2107_v6 = vld [vmem:[%s16793_s20 + $0x5a0] sm:$0xff] }
  0xa2   :  { %9652 = vmatpush3.msra.mxu1 %v2094_v46  ;;  %1350 = vmatprep.mubr.f32.mxu1 %v11519_v16  ;;  %v12147_v16 = vld [vmem:[%s16794_s25 + $0x78] sm:$0x1] }
  0xa3   :  { %1125 = vmatmul.mubr.f32.gmra.mxu0 %v915_v42  ;;  %9653 = vmatprep.subr.mxu1 %v2109_v36  ;;  %v1526_v45 = vrot.slane %v12147_v16, 1  ;;  %v1974_v42 = vrot.slane %v12165_v1, 2  ;;  %v1972_v36 = vrot.slane %v12189_v0, 2  ;;  %v1524_v16 = vsel %vm255_vm0, %v1522_v18, %v1523_v19  ;;  %v12435_v18 = vld [vmem:[%s16794_s25 + $0xd0] sm:$0x3]  ;;  %v2341_v1 = vld [vmem:[%s16793_s20 + $0x6e0] sm:$0xff] }
  0xa4   :  { %9654 = vmatpush3.msra.mxu1 %v2093_v37  ;;  %1129 = vmatprep.mubr.f32.mxu0 %v924_v30  ;;  %v1975_v30 = vrot.slane %v12179_v8, 2  ;;  %v1515_v37 = vsel %vm255_vm0, %v1513_v44, %v1514_v34  ;;  %v12252_v44 = vld [vmem:[%s16794_s25 + $0x90] sm:$0x1]  ;;  %v12257_v34 = vld [vmem:[%s16794_s25 + $0x88] sm:$0xfc]  ;;  %v2325_v8 = vld [vmem:[%s16793_s20 + $0x660] sm:$0xff] }
  0xa5   :  { %1351 = vmatmul.mubr.f32.gmra.mxu1 %v11528_v20  ;;  %9655 = vmatprep.subr.mxu1 %v2108_v47  ;;  %v12184_v20 = vld [vmem:[%s16794_s25 + $0x60] sm:$0xfc]  ;;  %v2088_v47 = vld [vmem:[%s16793_s20 + $0x508] sm:$0xff]  ;;  %v1980_v50 = vrot.slane %v12257_v34, 2  ;;  %v1527_v58 = vsel %vm255_vm0, %v1525_v15, %v1526_v45  ;;  %v12407_v15 = vld [vmem:[%s16794_s25 + $0xd0] sm:$0x1] }
  0xa6   :  { %9656 = vmatpush3.msra.mxu1 %v2092_v63  ;;  %1355 = vmatprep.mubr.f32.mxu1 %v11564_v41  ;;  %v8660_v41 = vld [vmem:[%s16794_s25 + $0x240] sm:$0xff]  ;;  %v1971_v46 = vrot.slane %v12184_v20, 2  ;;  %v12234_v63 = vld [vmem:[%s16794_s25 + $0x88] sm:$0xfe]  ;;  %v1976_v13 = vsel %vm834_vm1, %v1974_v42, %v1975_v30  ;;  %v1984_v42 = vrot.slane %v12372_v3, 2 }
  0xa7   :  { %1130 = vmatmul.mubr.f32.gmra.mxu0 %v921_v60  ;;  %9657 = vmatprep.subr.mxu1 %v2107_v6  ;;  %v12262_v6 = vld [vmem:[%s16794_s25 + $0x98] sm:$0x3]  ;;  %v1512_v60 = vsel %vm255_vm0, %v1510_v49, %v1511_v35  ;;  %v1531_v52 = vrot.slane %v12234_v63, 1  ;;  %v1528_v35 = vrot.slane %v12244_v12, 1  ;;  %v12392_v63 = vld [vmem:[%s16794_s25 + $0xc0] sm:$0xfe] }
  0xa8   :  { %9658 = vmatpush3.msra.mxu1 %v2091_v61  ;;  %1134 = vmatprep.mubr.f32.mxu0 %v930_v4  ;;  %v1964_v61 = vsel %vm834_vm1, %v1962_v38, %v1963_v39  ;;  %v12282_v4 = vld [vmem:[%s16794_s25 + $0x90] sm:$0x3]  ;;  %v1529_v38 = vrot.slane %v12252_v44, 1  ;;  %v1981_v48 = vrot.slane %v12262_v6, 2  ;;  %v12412_v45 = vld [vmem:[%s16794_s25 + $0xc8] sm:$0xfc] }
  0xa9   :  { %1356 = vmatmul.mubr.f32.gmra.mxu1 %v11573_v55  ;;  %9659 = vmatprep.subr.mxu1 %v2106_v2  ;;  %v12239_v55 = vld [vmem:[%s16794_s25 + $0x98] sm:$0x1]  ;;  %v12277_v2 = vld [vmem:[%s16794_s25 + $0x80] sm:$0xfc]  ;;  %v2343_v39 = vld [vmem:[%s16793_s20 + $0x6f0] sm:$0xff]  ;;  %v1978_v56 = vrot.slane %v12282_v4, 2 }
  0xaa   :  { %9660 = vmatpush3.msra.mxu1 %v2090_v5  ;;  %1360 = vmatprep.mubr.f32.mxu1 %v8661_v11  ;;  %v1532_v49 = vrot.slane %v12239_v55, 1  ;;  %v1977_v53 = vrot.slane %v12277_v2, 2  ;;  %v1538_v5 = vrot.slane %v12307_v31, 1  ;;  %v1535_v11 = vrot.slane %v12317_v28, 1  ;;  %v12475_v0 = vld [vmem:[%s16794_s25 + $0xf8] sm:$0x1] }
  0xab   :  { %1135 = vmatmul.mubr.f32.gmra.mxu0 %v927_v7  ;;  %9661 = vmatprep.subr.mxu1 %v2105_v29  ;;  %v1537_v7 = vrot.slane %v12287_v24, 1  ;;  %v1534_v29 = vrot.slane %v12312_v51, 1  ;;  %v1530_v20 = vsel %vm255_vm0, %v1528_v35, %v1529_v38  ;;  %v12498_v12 = vld [vmem:[%s16794_s25 + $0xf0] sm:$0x1]  ;;  %v12503_v44 = vld [vmem:[%s16794_s25 + $0xe8] sm:$0xfc] }
  0xac   :  { %9662 = vmatpush3.msra.mxu1 %v2089_v22  ;;  %1734 = vmatprep.mubr.f32.mxu0 %v1515_v37  ;;  %v12349_v22 = vld [vmem:[%s16794_s25 + $0xa8] sm:$0xfc]  ;;  %v12362_v37 = vld [vmem:[%s16794_s25 + $0xb8] sm:$0x3]  ;;  %v1533_v54 = vsel %vm255_vm0, %v1531_v52, %v1532_v49  ;;  %v1989_v52 = vrot.slane %v12430_v10, 2  ;;  %v1990_v49 = vrot.slane %v12435_v18, 2  ;;  %v1979_v31 = vsel %vm834_vm1, %v1977_v53, %v1978_v56 }
  0xad   :  { %1361 = vmatmul.mubr.f32.gmra.mxu1 %v8660_v41  ;;  %9663 = vmatprep.subr.mxu1 %v2104_v23  ;;  %v1970_v41 = vsel %vm834_vm1, %v1968_v21, %v1969_v9  ;;  %v2326_v23 = vld [vmem:[%s16793_s20 + $0x668] sm:$0xff]  ;;  %v12387_v9 = vld [vmem:[%s16794_s25 + $0xd8] sm:$0x1]  ;;  %v1986_v32 = vrot.slane %v12349_v22, 2  ;;  %v1987_v14 = vrot.slane %v12362_v37, 2  ;;  %v1539_v34 = vsel %vm255_vm0, %v1537_v7, %v1538_v5  ;;  %v2323_v6 = vld [vmem:[%s16793_s20 + $0x650] sm:$0xff] }
  0xae   :  { %9664 = vmatpush3.msra.mxu1 %v2088_v47  ;;  %2183 = vmatprep.mubr.f32.mxu1 %v1964_v61  ;;  %v12367_v47 = vld [vmem:[%s16794_s25 + $0xa0] sm:$0xfc]  ;;  %v12382_v21 = vld [vmem:[%s16794_s25 + $0xc8] sm:$0xfe]  ;;  %v1544_v55 = vrot.slane %v12387_v9, 1  ;;  %v1541_v61 = vrot.slane %v12407_v15, 1  ;;  %v1536_v2 = vsel %vm255_vm0, %v1534_v29, %v1535_v11 }
  0xaf   :  { %1735 = vmatmul.mubr.f32.vlgmr.msra.gmra.mxu0 %v1512_v60  ;;  %9665 = vmatprep.subr.mxu1 %v2103_v27  ;;  %v1983_v19 = vrot.slane %v12367_v47, 2  ;;  %v1543_v30 = vrot.slane %v12382_v21, 1  ;;  %v2340_v27 = vld [vmem:[%s16793_s20 + $0x6d8] sm:$0xff]  ;;  %v1540_v60 = vrot.slane %v12392_v63, 1  ;;  %v12521_v38 = vld [vmem:[%s16794_s25 + $0xe0] sm:$0xfc]  ;;  %v1988_v53 = vsel %vm834_vm1, %v1986_v32, %v1987_v14 }
  0xb0   :  { %9666 = vmatpush3.msra.mxu1 %v2087_v43  ;;  %9716 = vmatpush3.msra.mxu0 %v2328_v33  ;;  %v1973_v43 = vsel %vm834_vm1, %v1971_v46, %v1972_v36  ;;  %v2324_v33 = vld [vmem:[%s16793_s20 + $0x658] sm:$0xff]  ;;  %v1982_v46 = vsel %vm834_vm1, %v1980_v50, %v1981_v48  ;;  %v2339_v36 = vld [vmem:[%s16793_s20 + $0x6d0] sm:$0xff]  ;;  %v12537_v48 = vld [vmem:[%s16794_s25 + $0x108] sm:$0xfe]  ;;  %v1550_v28 = vrot.slane %v12475_v0, 1  ;;  %v1547_v11 = vrot.slane %v12498_v12, 1 }
  0xb1   :  { %2184 = vmatmul.mubr.f32.vlgmr.msra.gmra.mxu1 %v1961_v17  ;;  %1739 = vmatprep.mubr.f32.mxu0 %v1521_v25  ;;  %v1992_v17 = vrot.slane %v12412_v45, 2  ;;  %v1993_v25 = vrot.slane %v12417_v59, 2  ;;  %v12516_v35 = vld [vmem:[%s16794_s25 + $0xf8] sm:$0x3]  ;;  %v12526_v24 = vld [vmem:[%s16794_s25 + $0xf0] sm:$0x3]  ;;  %v1545_v56 = vsel %vm255_vm0, %v1543_v30, %v1544_v55  ;;  %v1542_v3 = vsel %vm255_vm0, %v1540_v60, %v1541_v61 }
  0xb2   :  { %9717 = vmatprep.subr.mxu0 %v2343_v39  ;;  %2188 = vmatprep.mubr.f32.mxu1 %v1970_v41  ;;  %v12470_v39 = vld [vmem:[%s16794_s25 + $0xe8] sm:$0xfe]  ;;  %v2777_v4 = vld [vmem:[%s16793_s20 + $0x778] sm:$0xff]  ;;  %v12557_v7 = vld [vmem:[%s16794_s25 + $0x100] sm:$0xfe]  ;;  %v1998_v41 = vrot.slane %v12503_v44, 2  ;;  %v1991_v0 = vsel %vm834_vm1, %v1989_v52, %v1990_v49 }
  0xb3   :  { %1740 = vmatmul.mubr.f32.gmra.mxu0 %v1518_v26  ;;  %v2793_v26 = vld [vmem:[%s16793_s20 + $0x7f8] sm:$0xff]  ;;  %v1549_v50 = vrot.slane %v12470_v39, 1  ;;  %v12562_v5 = vld [vmem:[%s16794_s25 + $0x110] sm:$0x1]  ;;  %v12567_v51 = vld [vmem:[%s16794_s25 + $0x108] sm:$0xfc] }
  0xb4   :  { %9718 = vmatpush3.msra.mxu0 %v2327_v40  ;;  %1744 = vmatprep.mubr.f32.mxu0 %v1527_v58  ;;  %v12493_v40 = vld [vmem:[%s16794_s25 + $0xe0] sm:$0xfe]  ;;  %v2338_v22 = vld [vmem:[%s16793_s20 + $0x6c8] sm:$0xff]  ;;  %v1999_v37 = vrot.slane %v12516_v35, 2  ;;  %v1995_v58 = vrot.slane %v12521_v38, 2  ;;  %v1996_v21 = vrot.slane %v12526_v24, 2 }
  0xb5   :  { %9719 = vmatprep.subr.mxu0 %v2342_v57  ;;  %2189 = vmatmul.mubr.f32.gmra.mxu1 %v1967_v62  ;;  %v12542_v57 = vld [vmem:[%s16794_s25 + $0x118] sm:$0x1]  ;;  %v1546_v29 = vrot.slane %v12493_v40, 1  ;;  %v1555_v9 = vrot.slane %v12537_v48, 1  ;;  %v2337_v32 = vld [vmem:[%s16793_s20 + $0x6c0] sm:$0xff]  ;;  %v2004_v14 = vrot.slane %v12567_v51, 2  ;;  %v1551_v45 = vsel %vm255_vm0, %v1549_v50, %v1550_v28 }
  0xb6   :  { %9720 = vmatpush3.msra.mxu0 %v2326_v23  ;;  %2193 = vmatprep.mubr.f32.mxu1 %v1976_v13  ;;  %v2322_v23 = vld [vmem:[%s16793_s20 + $0x648] sm:$0xff]  ;;  %v12586_v62 = vld [vmem:[%s16794_s25 + $0x118] sm:$0x3]  ;;  %v1552_v13 = vrot.slane %v12557_v7, 1  ;;  %v2321_v30 = vld [vmem:[%s16793_s20 + $0x640] sm:$0xff]  ;;  %v1997_v28 = vsel %vm834_vm1, %v1995_v58, %v1996_v21 }
  0xb7   :  { %1745 = vmatmul.mubr.f32.gmra.mxu0 %v1524_v16  ;;  %9721 = vmatprep.subr.mxu0 %v2341_v1  ;;  %v1556_v16 = vrot.slane %v12542_v57, 1  ;;  %v2792_v1 = vld [vmem:[%s16793_s20 + $0x7f0] sm:$0xff]  ;;  %v12609_v55 = vld [vmem:[%s16794_s25 + $0x100] sm:$0xfc]  ;;  %v12619_v47 = vld [vmem:[%s16794_s25 + $0x168] sm:$0xfe] }
  0xb8   :  { %1749 = vmatprep.mubr.f32.mxu0 %v1533_v54  ;;  %9722 = vmatpush3.msra.mxu0 %v2325_v8  ;;  %v1553_v54 = vrot.slane %v12562_v5, 1  ;;  %v1985_v8 = vsel %vm834_vm1, %v1983_v19, %v1984_v42  ;;  %v1994_v19 = vsel %vm834_vm1, %v1992_v17, %v1993_v25  ;;  %v2005_v42 = vrot.slane %v12586_v62, 2  ;;  %v12640_v63 = vld [vmem:[%s16794_s25 + $0x160] sm:$0xfe]  ;;  %v2336_v15 = vld [vmem:[%s16793_s20 + $0x6b8] sm:$0xff]  ;;  %v2776_v39 = vld [vmem:[%s16793_s20 + $0x770] sm:$0xff] }
  0xb9   :  { %9795 = vmatprep.subr.mxu1 %v2793_v26  ;;  %2194 = vmatmul.mubr.f32.gmra.mxu1 %v1973_v43  ;;  %v12635_v26 = vld [vmem:[%s16794_s25 + $0x178] sm:$0x1]  ;;  %v12649_v59 = vld [vmem:[%s16794_s25 + $0x170] sm:$0x1]  ;;  %v12654_v60 = vld [vmem:[%s16794_s25 + $0x168] sm:$0xfc] }
  0xba   :  { %9723 = vmatprep.subr.mxu0 %v2340_v27  ;;  %2198 = vmatprep.mubr.f32.mxu1 %v1982_v46  ;;  %v12614_v27 = vld [vmem:[%s16794_s25 + $0x110] sm:$0x3]  ;;  %v12659_v61 = vld [vmem:[%s16794_s25 + $0x178] sm:$0x3]  ;;  %v2001_v17 = vrot.slane %v12609_v55, 2  ;;  %v1561_v43 = vrot.slane %v12619_v47, 1  ;;  %v2000_v46 = vsel %vm834_vm1, %v1998_v41, %v1999_v37  ;;  %v1554_v38 = vsel %vm255_vm0, %v1552_v13, %v1553_v54 }
  0xbb   :  { %1750 = vmatmul.mubr.f32.gmra.mxu0 %v1530_v20  ;;  %9796 = vmatpush3.msra.mxu1 %v2777_v4  ;;  %v2002_v25 = vrot.slane %v12614_v27, 2  ;;  %v1548_v20 = vsel %vm255_vm0, %v1546_v29, %v1547_v11  ;;  %v2320_v40 = vld [vmem:[%s16793_s20 + $0x638] sm:$0xff]  ;;  %v12686_v12 = vld [vmem:[%s16794_s25 + $0x170] sm:$0x3]  ;;  %v12691_v10 = vld [vmem:[%s16794_s25 + $0x188] sm:$0xfe]  ;;  %v2006_v24 = vsel %vm834_vm1, %v2004_v14, %v2005_v42 }
  0xbc   :  { %1754 = vmatprep.mubr.f32.mxu0 %v1539_v34  ;;  %9724 = vmatpush3.msra.mxu0 %v2324_v33  ;;  %v12667_v33 = vld [vmem:[%s16794_s25 + $0x160] sm:$0xfc]  ;;  %v1558_v18 = vrot.slane %v12640_v63, 1  ;;  %v1559_v52 = vrot.slane %v12649_v59, 1  ;;  %v2010_v49 = vrot.slane %v12654_v60, 2  ;;  %v2011_v44 = vrot.slane %v12659_v61, 2 }
  0xbd   :  { %9725 = vmatprep.subr.mxu0 %v2339_v36  ;;  %2199 = vmatmul.mubr.f32.gmra.mxu1 %v1979_v31  ;;  %v1562_v36 = vrot.slane %v12635_v26, 1  ;;  %v8701_v34 = vld [vmem:[%s16794_s25 + $0x198] sm:$0x1]  ;;  %v2007_v35 = vrot.slane %v12667_v33, 2  ;;  %v12705_v31 = vld [vmem:[%s16794_s25 + $0x180] sm:$0xfe] }
  0xbe   :  { %9726 = vmatpush3.msra.mxu0 %v2323_v6  ;;  %2203 = vmatprep.mubr.f32.mxu1 %v1988_v53  ;;  %v1557_v6 = vsel %vm255_vm0, %v1555_v9, %v1556_v16  ;;  %v12710_v50 = vld [vmem:[%s16794_s25 + $0x190] sm:$0x1]  ;;  %v2008_v57 = vrot.slane %v12686_v12, 2  ;;  %v1567_v4 = vrot.slane %v12691_v10, 1  ;;  %v1568_v29 = vrot.slane %v8701_v34, 1  ;;  %v2334_v41 = vld [vmem:[%s16793_s20 + $0x6a8] sm:$0xff] }
  0xbf   :  { %1755 = vmatmul.mubr.f32.gmra.mxu0 %v1536_v2  ;;  %9727 = vmatprep.subr.mxu0 %v2338_v22  ;;  %v2335_v48 = vld [vmem:[%s16793_s20 + $0x6b0] sm:$0xff]  ;;  %v12720_v2 = vld [vmem:[%s16794_s25 + $0x188] sm:$0xfc]  ;;  %v8765_v11 = vld [vmem:[%s16794_s25 + $0x198] sm:$0x3]  ;;  %v1565_v37 = vrot.slane %v12710_v50, 1  ;;  %v1563_v5 = vsel %vm255_vm0, %v1561_v43, %v1562_v36  ;;  %v1560_v55 = vsel %vm255_vm0, %v1558_v18, %v1559_v52 }
  0xc0   :  { %1759 = vmatprep.mubr.f32.mxu0 %v1545_v56  ;;  %9728 = vmatpush3.msra.mxu0 %v2322_v23  ;;  %v2319_v53 = vld [vmem:[%s16793_s20 + $0x630] sm:$0xff]  ;;  %v2791_v56 = vld [vmem:[%s16793_s20 + $0x7e8] sm:$0xff]  ;;  %v12739_v22 = vld [vmem:[%s16794_s25 + $0x180] sm:$0xfc]  ;;  %v1564_v23 = vrot.slane %v12705_v31, 1  ;;  %v2016_v51 = vrot.slane %v12720_v2, 2 }
  0xc1   :  { %9797 = vmatprep.subr.mxu1 %v2792_v1  ;;  %2204 = vmatmul.mubr.f32.gmra.mxu1 %v1985_v8  ;;  %v12757_v58 = vld [vmem:[%s16794_s25 + $0x190] sm:$0x3]  ;;  %v8703_v7 = vld [vmem:[%s16794_s25 + $0x1a8] sm:$0xfe]  ;;  %v8705_v21 = vld [vmem:[%s16794_s25 + $0x1b8] sm:$0x1]  ;;  %v2003_v1 = vsel %vm834_vm1, %v2001_v17, %v2002_v25  ;;  %v2009_v17 = vsel %vm834_vm1, %v2007_v35, %v2008_v57 }
  0xc2   :  { %9729 = vmatprep.subr.mxu0 %v2337_v32  ;;  %2208 = vmatprep.mubr.f32.mxu1 %v1994_v19  ;;  %v2775_v9 = vld [vmem:[%s16793_s20 + $0x768] sm:$0xff]  ;;  %v12773_v62 = vld [vmem:[%s16794_s25 + $0x1a0] sm:$0xfe]  ;;  %v2017_v16 = vrot.slane %v8765_v11, 2  ;;  %v2013_v13 = vrot.slane %v12739_v22, 2  ;;  %v2014_v8 = vrot.slane %v12757_v58, 2  ;;  %v1566_v25 = vsel %vm255_vm0, %v1564_v23, %v1565_v37 }
  0xc3   :  { %1760 = vmatmul.mubr.f32.gmra.mxu0 %v1542_v3  ;;  %9798 = vmatpush3.msra.mxu1 %v2776_v39  ;;  %v12779_v54 = vld [vmem:[%s16794_s25 + $0x1b0] sm:$0x1]  ;;  %v2790_v32 = vld [vmem:[%s16793_s20 + $0x7e0] sm:$0xff]  ;;  %v2318_v14 = vld [vmem:[%s16793_s20 + $0x628] sm:$0xff]  ;;  %v2012_v3 = vsel %vm834_vm1, %v2010_v49, %v2011_v44  ;;  %v1573_v19 = vrot.slane %v8703_v7, 1  ;;  %v1570_v43 = vrot.slane %v12773_v62, 1 }
  0xc4   :  { %1764 = vmatprep.mubr.f32.mxu0 %v1551_v45  ;;  %9730 = vmatpush3.msra.mxu0 %v2321_v30  ;;  %v12796_v30 = vld [vmem:[%s16794_s25 + $0x1a8] sm:$0xfc]  ;;  %v12801_v47 = vld [vmem:[%s16794_s25 + $0x1b8] sm:$0x3]  ;;  %v2333_v27 = vld [vmem:[%s16793_s20 + $0x6a0] sm:$0xff]  ;;  %v1574_v45 = vrot.slane %v8705_v21, 1 }
  0xc5   :  { %9731 = vmatprep.subr.mxu0 %v2336_v15  ;;  %2209 = vmatmul.mubr.f32.gmra.mxu1 %v1991_v0  ;;  %v2774_v42 = vld [vmem:[%s16793_s20 + $0x760] sm:$0xff]  ;;  %v12819_v63 = vld [vmem:[%s16794_s25 + $0x1b0] sm:$0x3]  ;;  %v1569_v15 = vsel %vm255_vm0, %v1567_v4, %v1568_v29  ;;  %v2789_v59 = vld [vmem:[%s16793_s20 + $0x7d8] sm:$0xff]  ;;  %v2022_v36 = vrot.slane %v12796_v30, 2 }
  0xc6   :  { %9732 = vmatpush3.msra.mxu0 %v2320_v40  ;;  %2213 = vmatprep.mubr.f32.mxu1 %v2000_v46  ;;  %v12814_v26 = vld [vmem:[%s16794_s25 + $0x1a0] sm:$0xfc]  ;;  %v8707_v60 = vld [vmem:[%s16794_s25 + $0x1c8] sm:$0xfe]  ;;  %v8709_v61 = vld [vmem:[%s16794_s25 + $0x1d8] sm:$0x1] }
  0xc7   :  { %1765 = vmatmul.mubr.f32.gmra.mxu0 %v1548_v20  ;;  %9733 = vmatprep.subr.mxu0 %v2335_v48  ;;  %v12839_v39 = vld [vmem:[%s16794_s25 + $0x1c0] sm:$0xfe]  ;;  %v12844_v0 = vld [vmem:[%s16794_s25 + $0x1d0] sm:$0x1]  ;;  %v2018_v20 = vsel %vm834_vm1, %v2016_v51, %v2017_v16  ;;  %v1571_v46 = vrot.slane %v12779_v54, 1  ;;  %v2023_v40 = vrot.slane %v12801_v47, 2 }
  0xc8   :  { %1769 = vmatprep.mubr.f32.mxu0 %v1557_v6  ;;  %9734 = vmatpush3.msra.mxu0 %v2319_v53  ;;  %v2317_v33 = vld [vmem:[%s16793_s20 + $0x620] sm:$0xff]  ;;  %v12856_v12 = vld [vmem:[%s16794_s25 + $0x1c8] sm:$0xfc]  ;;  %v2332_v10 = vld [vmem:[%s16793_s20 + $0x698] sm:$0xff]  ;;  %v2019_v18 = vrot.slane %v12814_v26, 2  ;;  %v2020_v52 = vrot.slane %v12819_v63, 2  ;;  %v1575_v6 = vsel %vm255_vm0, %v1573_v19, %v1574_v45 }
  0xc9   :  { %9799 = vmatprep.subr.mxu1 %v2791_v56  ;;  %2214 = vmatmul.mubr.f32.gmra.mxu1 %v1997_v28  ;;  %v1579_v49 = vrot.slane %v8707_v60, 1  ;;  %v1580_v44 = vrot.slane %v8709_v61, 1  ;;  %v8773_v34 = vld [vmem:[%s16794_s25 + $0x1d8] sm:$0x3]  ;;  %v1576_v31 = vrot.slane %v12839_v39, 1  ;;  %v1577_v50 = vrot.slane %v12844_v0, 1 }
  0xca   :  { %9735 = vmatprep.subr.mxu0 %v2334_v41  ;;  %2218 = vmatprep.mubr.f32.mxu1 %v2006_v24  ;;  %v2773_v35 = vld [vmem:[%s16793_s20 + $0x758] sm:$0xff]  ;;  %v2788_v48 = vld [vmem:[%s16793_s20 + $0x7d0] sm:$0xff]  ;;  %v12878_v57 = vld [vmem:[%s16794_s25 + $0x1c0] sm:$0xfc]  ;;  %v2028_v4 = vrot.slane %v12856_v12, 2  ;;  %v2015_v28 = vsel %vm834_vm1, %v2013_v13, %v2014_v8  ;;  %v2029_v29 = vrot.slane %v8773_v34, 2  ;;  %v1572_v22 = vsel %vm255_vm0, %v1570_v43, %v1571_v46 }
  0xcb   :  { %1770 = vmatmul.mubr.f32.gmra.mxu0 %v1554_v38  ;;  %9800 = vmatpush3.msra.mxu1 %v2775_v9  ;;  %v8711_v2 = vld [vmem:[%s16794_s25 + $0x1e8] sm:$0xfe]  ;;  %v8713_v53 = vld [vmem:[%s16794_s25 + $0x1f8] sm:$0x1]  ;;  %v2772_v11 = vld [vmem:[%s16793_s20 + $0x750] sm:$0xff]  ;;  %v2024_v23 = vsel %vm834_vm1, %v2022_v36, %v2023_v40  ;;  %v2025_v16 = vrot.slane %v12878_v57, 2  ;;  %v1578_v19 = vsel %vm255_vm0, %v1576_v31, %v1577_v50 }
  0xcc   :  { %1774 = vmatprep.mubr.f32.mxu0 %v1563_v5  ;;  %9801 = vmatprep.subr.mxu1 %v2790_v32  ;;  %v2316_v56 = vld [vmem:[%s16793_s20 + $0x618] sm:$0xff]  ;;  %v8772_v41 = vld [vmem:[%s16794_s25 + $0x1d0] sm:$0x3]  ;;  %v8710_v38 = vld [vmem:[%s16794_s25 + $0x1e0] sm:$0xfe]  ;;  %v1581_v5 = vsel %vm255_vm0, %v1579_v49, %v1580_v44  ;;  %v1585_v51 = vrot.slane %v8711_v2, 1 }
  0xcd   :  { %9736 = vmatpush3.msra.mxu0 %v2318_v14  ;;  %2219 = vmatmul.mubr.f32.gmra.mxu1 %v2003_v1  ;;  %v2331_v24 = vld [vmem:[%s16793_s20 + $0x690] sm:$0xff]  ;;  %v8775_v58 = vld [vmem:[%s16794_s25 + $0x1e8] sm:$0xfc]  ;;  %v8777_v7 = vld [vmem:[%s16794_s25 + $0x1f8] sm:$0x3]  ;;  %v1586_v21 = vrot.slane %v8713_v53, 1  ;;  %v2021_v1 = vsel %vm834_vm1, %v2019_v18, %v2020_v52 }
  0xce   :  { %9737 = vmatprep.subr.mxu0 %v2333_v27  ;;  %2223 = vmatprep.mubr.f32.mxu1 %v2012_v3  ;;  %v8712_v37 = vld [vmem:[%s16794_s25 + $0x1f0] sm:$0x1]  ;;  %v8715_v9 = vld [vmem:[%s16794_s25 + $0x208] sm:$0xfe]  ;;  %v8717_v62 = vld [vmem:[%s16794_s25 + $0x218] sm:$0x1] }
  0xcf   :  { %1775 = vmatmul.mubr.f32.gmra.mxu0 %v1560_v55  ;;  %9802 = vmatpush3.msra.mxu1 %v2774_v42  ;;  %v2026_v13 = vrot.slane %v8772_v41, 2  ;;  %v2787_v54 = vld [vmem:[%s16793_s20 + $0x7c8] sm:$0xff]  ;;  %v1582_v32 = vrot.slane %v8710_v38, 1  ;;  %v2315_v14 = vld [vmem:[%s16793_s20 + $0x610] sm:$0xff]  ;;  %v1583_v30 = vrot.slane %v8712_v37, 1  ;;  %v2034_v47 = vrot.slane %v8775_v58, 2 }
  0xd0   :  { %1779 = vmatprep.mubr.f32.mxu0 %v1569_v15  ;;  %9803 = vmatprep.subr.mxu1 %v2789_v59  ;;  %v2771_v8 = vld [vmem:[%s16793_s20 + $0x748] sm:$0xff]  ;;  %v2035_v27 = vrot.slane %v8777_v7, 2  ;;  %v8774_v55 = vld [vmem:[%s16794_s25 + $0x1e0] sm:$0xfc]  ;;  %v2030_v42 = vsel %vm834_vm1, %v2028_v4, %v2029_v29  ;;  %v8776_v63 = vld [vmem:[%s16794_s25 + $0x1f0] sm:$0x3]  ;;  %v1587_v60 = vsel %vm255_vm0, %v1585_v51, %v1586_v21 }
  0xd1   :  { %9738 = vmatpush3.msra.mxu0 %v2317_v33  ;;  %2224 = vmatmul.mubr.f32.gmra.mxu1 %v2009_v17  ;;  %v2330_v3 = vld [vmem:[%s16793_s20 + $0x688] sm:$0xff]  ;;  %v2786_v26 = vld [vmem:[%s16793_s20 + $0x7c0] sm:$0xff]  ;;  %v1591_v15 = vrot.slane %v8715_v9, 1  ;;  %v1592_v45 = vrot.slane %v8717_v62, 1  ;;  %v8716_v61 = vld [vmem:[%s16794_s25 + $0x210] sm:$0x1]  ;;  %v2027_v43 = vsel %vm834_vm1, %v2025_v16, %v2026_v13 }
  0xd2   :  { %9739 = vmatprep.subr.mxu0 %v2332_v10  ;;  %2228 = vmatprep.mubr.f32.mxu1 %v2018_v20  ;;  %v8714_v59 = vld [vmem:[%s16794_s25 + $0x200] sm:$0xfe]  ;;  %v8779_v17 = vld [vmem:[%s16794_s25 + $0x208] sm:$0xfc]  ;;  %v1584_v20 = vsel %vm255_vm0, %v1582_v32, %v1583_v30  ;;  %v2036_v46 = vsel %vm834_vm1, %v2034_v47, %v2035_v27  ;;  %v2031_v40 = vrot.slane %v8774_v55, 2  ;;  %v2032_v12 = vrot.slane %v8776_v63, 2 }
  0xd3   :  { %1780 = vmatmul.mubr.f32.gmra.mxu0 %v1566_v25  ;;  %9804 = vmatpush3.msra.mxu1 %v2773_v35  ;;  %v8781_v25 = vld [vmem:[%s16794_s25 + $0x218] sm:$0x3]  ;;  %v12965_v39 = vld [vmem:[%s16794_s25 + $0x200] sm:$0xfc]  ;;  %v8719_v0 = vld [vmem:[%s16794_s25 + $0x228] sm:$0xfe]  ;;  %v1593_v31 = vsel %vm255_vm0, %v1591_v15, %v1592_v45 }
  0xd4   :  { %1784 = vmatprep.mubr.f32.mxu0 %v1575_v6  ;;  %9805 = vmatprep.subr.mxu1 %v2788_v48  ;;  %v2314_v33 = vld [vmem:[%s16793_s20 + $0x608] sm:$0xff]  ;;  %v2770_v36 = vld [vmem:[%s16793_s20 + $0x740] sm:$0xff]  ;;  %v8721_v10 = vld [vmem:[%s16794_s25 + $0x238] sm:$0x1]  ;;  %v1588_v49 = vrot.slane %v8714_v59, 1  ;;  %v1589_v44 = vrot.slane %v8716_v61, 1 }
  0xd5   :  { %9740 = vmatpush3.msra.mxu0 %v2316_v56  ;;  %2229 = vmatmul.mubr.f32.gmra.mxu1 %v2015_v28  ;;  %v2329_v18 = vld [vmem:[%s16793_s20 + $0x680] sm:$0xff]  ;;  %v2785_v52 = vld [vmem:[%s16793_s20 + $0x7b8] sm:$0xff]  ;;  %v2040_v34 = vrot.slane %v8779_v17, 2  ;;  %v2041_v6 = vrot.slane %v8781_v25, 2  ;;  %v8780_v35 = vld [vmem:[%s16794_s25 + $0x210] sm:$0x3] }
  0xd6   :  { %9741 = vmatprep.subr.mxu0 %v2331_v24  ;;  %2233 = vmatprep.mubr.f32.mxu1 %v2024_v23  ;;  %v2037_v50 = vrot.slane %v12965_v39, 2  ;;  %v1597_v48 = vrot.slane %v8719_v0, 1  ;;  %v8718_v57 = vld [vmem:[%s16794_s25 + $0x220] sm:$0xfe]  ;;  %v8720_v4 = vld [vmem:[%s16794_s25 + $0x230] sm:$0x1]  ;;  %v1590_v37 = vsel %vm255_vm0, %v1588_v49, %v1589_v44 }
  0xd7   :  { %1785 = vmatmul.mubr.f32.gmra.mxu0 %v1572_v22  ;;  %9806 = vmatpush3.msra.mxu1 %v2772_v11  ;;  %v2769_v2 = vld [vmem:[%s16793_s20 + $0x738] sm:$0xff]  ;;  %v1598_v53 = vrot.slane %v8721_v10, 1  ;;  %v8783_v56 = vld [vmem:[%s16794_s25 + $0x228] sm:$0xfc]  ;;  %v2313_v29 = vld [vmem:[%s16793_s20 + $0x600] sm:$0xff]  ;;  %v2033_v11 = vsel %vm834_vm1, %v2031_v40, %v2032_v12  ;;  %v2038_v38 = vrot.slane %v8780_v35, 2  ;;  %v2042_v9 = vsel %vm834_vm1, %v2040_v34, %v2041_v6 }
  0xd8   :  { %1789 = vmatprep.mubr.f32.mxu0 %v1581_v5  ;;  %9807 = vmatprep.subr.mxu1 %v2787_v54  ;;  %v8785_v28 = vld [vmem:[%s16794_s25 + $0x238] sm:$0x3]  ;;  %v2784_v41 = vld [vmem:[%s16793_s20 + $0x7b0] sm:$0xff]  ;;  %v8723_v24 = vld [vmem:[%s16794_s25 + $0x248] sm:$0xfe]  ;;  %v1594_v7 = vrot.slane %v8718_v57, 1 }
  0xd9   :  { %9742 = vmatpush3.msra.mxu0 %v2315_v14  ;;  %2234 = vmatmul.mubr.f32.gmra.mxu1 %v2021_v1  ;;  %v8725_v22 = vld [vmem:[%s16794_s25 + $0x258] sm:$0x1]  ;;  %v2768_v58 = vld [vmem:[%s16793_s20 + $0x730] sm:$0xff]  ;;  %v1595_v5 = vrot.slane %v8720_v4, 1  ;;  %v8782_v51 = vld [vmem:[%s16794_s25 + $0x220] sm:$0xfc]  ;;  %v1599_v32 = vsel %vm255_vm0, %v1597_v48, %v1598_v53  ;;  %v2039_v47 = vsel %vm834_vm1, %v2037_v50, %v2038_v38 }
  0xda   :  { %9743 = vmatprep.subr.mxu0 %v2330_v3  ;;  %2238 = vmatprep.mubr.f32.mxu1 %v2030_v42  ;;  %v3242_v23 = vld [vmem:[%s16793_s20 + $0x8f8] sm:$0xff]  ;;  %v8784_v21 = vld [vmem:[%s16794_s25 + $0x230] sm:$0x3]  ;;  %v2046_v62 = vrot.slane %v8783_v56, 2  ;;  %v2047_v16 = vrot.slane %v8785_v28, 2  ;;  %v1603_v14 = vrot.slane %v8723_v24, 1 }
  0xdb   :  { %1790 = vmatmul.mubr.f32.gmra.mxu0 %v1578_v19  ;;  %9808 = vmatpush3.msra.mxu1 %v2771_v8  ;;  %v8722_v13 = vld [vmem:[%s16794_s25 + $0x240] sm:$0xfe]  ;;  %v8724_v54 = vld [vmem:[%s16794_s25 + $0x250] sm:$0x1]  ;;  %v1604_v1 = vrot.slane %v8725_v22, 1  ;;  %v2783_v27 = vld [vmem:[%s16793_s20 + $0x7a8] sm:$0xff]  ;;  %v1596_v42 = vsel %vm255_vm0, %v1594_v7, %v1595_v5 }
  0xdc   :  { %1794 = vmatprep.mubr.f32.mxu0 %v1587_v60  ;;  %9809 = vmatprep.subr.mxu1 %v2786_v26  ;;  %v8787_v8 = vld [vmem:[%s16794_s25 + $0x248] sm:$0xfc]  ;;  %v8789_v30 = vld [vmem:[%s16794_s25 + $0x258] sm:$0x3]  ;;  %v2043_v3 = vrot.slane %v8782_v51, 2  ;;  %v2044_v19 = vrot.slane %v8784_v21, 2  ;;  %v2048_v60 = vsel %vm834_vm1, %v2046_v62, %v2047_v16 }
  0xdd   :  { %9744 = vmatpush3.msra.mxu0 %v2314_v33  ;;  %2239 = vmatmul.mubr.f32.gmra.mxu1 %v2027_v43  ;;  %v2767_v55 = vld [vmem:[%s16793_s20 + $0x728] sm:$0xff]  ;;  %v1600_v26 = vrot.slane %v8722_v13, 1  ;;  %v1601_v63 = vrot.slane %v8724_v54, 1  ;;  %v8786_v15 = vld [vmem:[%s16794_s25 + $0x240] sm:$0xfc]  ;;  %v2052_v61 = vrot.slane %v8787_v8, 2  ;;  %v1605_v43 = vsel %vm255_vm0, %v1603_v14, %v1604_v1 }
  0xde   :  { %9745 = vmatprep.subr.mxu0 %v2329_v18  ;;  %2243 = vmatprep.mubr.f32.mxu1 %v2036_v46  ;;  %v8788_v45 = vld [vmem:[%s16794_s25 + $0x250] sm:$0x3]  ;;  %v2782_v59 = vld [vmem:[%s16793_s20 + $0x7a0] sm:$0xff]  ;;  %v2053_v17 = vrot.slane %v8789_v30, 2  ;;  %v8823_v39 = vld [vmem:[%s16794_s25 + $0x48] sm:$0xfe]  ;;  %v2045_v33 = vsel %vm834_vm1, %v2043_v3, %v2044_v19 }
  0xdf   :  { %1795 = vmatmul.mubr.f32.gmra.mxu0 %v1584_v20  ;;  %9810 = vmatpush3.msra.mxu1 %v2770_v36  ;;  %v2766_v25 = vld [vmem:[%s16793_s20 + $0x720] sm:$0xff]  ;;  %v8825_v0 = vld [vmem:[%s16794_s25 + $0x58] sm:$0x1]  ;;  %v2049_v46 = vrot.slane %v8786_v15, 2  ;;  %v2050_v36 = vrot.slane %v8788_v45, 2  ;;  %v1602_v12 = vsel %vm255_vm0, %v1600_v26, %v1601_v63  ;;  %v2764_v44 = vld [vmem:[%s16793_s20 + $0x710] sm:$0xff] }
  0xe0   :  { %1799 = vmatprep.mubr.f32.mxu0 %v1593_v31  ;;  %9811 = vmatprep.subr.mxu1 %v2785_v52  ;;  %v2781_v20 = vld [vmem:[%s16793_s20 + $0x798] sm:$0xff]  ;;  %v8822_v10 = vld [vmem:[%s16794_s25 + $0x40] sm:$0xfe]  ;;  %v8824_v18 = vld [vmem:[%s16794_s25 + $0x50] sm:$0x1]  ;;  %v2054_v49 = vsel %vm834_vm1, %v2052_v61, %v2053_v17  ;;  %v2637_v34 = vrot.slane %v8823_v39, 1 }
  0xe1   :  { %9746 = vmatpush3.msra.mxu0 %v2313_v29  ;;  %2244 = vmatmul.mubr.f32.gmra.mxu1 %v2033_v11  ;;  %v2765_v40 = vld [vmem:[%s16793_s20 + $0x718] sm:$0xff]  ;;  %v2780_v52 = vld [vmem:[%s16793_s20 + $0x790] sm:$0xff]  ;;  %v2638_v6 = vrot.slane %v8825_v0, 1  ;;  %v8791_v35 = vld [vmem:[%s16794_s25 + $0x48] sm:$0xff]  ;;  %v2051_v48 = vsel %vm834_vm1, %v2049_v46, %v2050_v36  ;;  %v2634_v53 = vrot.slane %v8822_v10, 1  ;;  %v2635_v56 = vrot.slane %v8824_v18, 1 }
  0xe2   :  { %9875 = vmatprep.subr.mxu0 %v3242_v23  ;;  %9812 = vmatpush3.msra.mxu1 %v2769_v2  ;;  %v8827_v31 = vld [vmem:[%s16794_s25 + $0x68] sm:$0xfe]  ;;  %v8829_v50 = vld [vmem:[%s16794_s25 + $0x78] sm:$0x1]  ;;  %v8790_v2 = vld [vmem:[%s16794_s25 + $0x40] sm:$0xff] }
  0xe3   :  { %1800 = vmatmul.mubr.f32.gmra.mxu0 %v1590_v37  ;;  %9813 = vmatprep.subr.mxu1 %v2784_v41  ;;  %v2779_v57 = vld [vmem:[%s16793_s20 + $0x788] sm:$0xff]  ;;  %v2778_v28 = vld [vmem:[%s16793_s20 + $0x780] sm:$0xff]  ;;  %v8828_v11 = vld [vmem:[%s16794_s25 + $0x70] sm:$0x1]  ;;  %v2639_v41 = vsel %vm255_vm0, %v2637_v34, %v2638_v6  ;;  %v2643_v38 = vrot.slane %v8827_v31, 1  ;;  %v2644_v24 = vrot.slane %v8829_v50, 1  ;;  %v2636_v51 = vsel %vm255_vm0, %v2634_v53, %v2635_v56 }
  0xe4   :  { %2248 = vmatprep.mubr.f32.mxu1 %v2042_v9  ;;  %9814 = vmatpush3.msra.mxu1 %v2768_v58  ;;  %v2763_v4 = vld [vmem:[%s16793_s20 + $0x708] sm:$0xff]  ;;  %v8826_v29 = vld [vmem:[%s16794_s25 + $0x60] sm:$0xfe]  ;;  %v8833_v23 = vld [vmem:[%s16794_s25 + $0x98] sm:$0x1]  ;;  %v2641_v13 = vrot.slane %v8828_v11, 1 }
  0xe5   :  { %1804 = vmatprep.mubr.f32.mxu0 %v1599_v32  ;;  %2249 = vmatmul.mubr.f32.gmra.mxu1 %v2039_v47  ;;  %v8831_v22 = vld [vmem:[%s16794_s25 + $0x88] sm:$0xfe]  ;;  %v2762_v7 = vld [vmem:[%s16793_s20 + $0x700] sm:$0xff]  ;;  %v3226_v5 = vld [vmem:[%s16793_s20 + $0x878] sm:$0xff]  ;;  %v2640_v16 = vrot.slane %v8826_v29, 1  ;;  %v2650_v1 = vrot.slane %v8833_v23, 1 }
  0xe6   :  { %9815 = vmatprep.subr.mxu1 %v2783_v27  ;;  %2253 = vmatprep.mubr.f32.mxu1 %v2048_v60  ;;  %v8793_v21 = vld [vmem:[%s16794_s25 + $0x68] sm:$0xff]  ;;  %v8792_v9 = vld [vmem:[%s16794_s25 + $0x60] sm:$0xff]  ;;  %v3241_v62 = vld [vmem:[%s16793_s20 + $0x8f0] sm:$0xff]  ;;  %v2649_v14 = vrot.slane %v8831_v22, 1 }
  0xe7   :  { %9816 = vmatpush3.msra.mxu1 %v2767_v55  ;;  %1805 = vmatmul.mubr.f32.gmra.mxu0 %v1596_v42  ;;  %v8830_v8 = vld [vmem:[%s16794_s25 + $0x80] sm:$0xfe]  ;;  %v8832_v30 = vld [vmem:[%s16794_s25 + $0x90] sm:$0x1]  ;;  %v2645_v55 = vsel %vm255_vm0, %v2643_v38, %v2644_v24  ;;  %v8835_v19 = vld [vmem:[%s16794_s25 + $0xa8] sm:$0xfe]  ;;  %v2642_v60 = vsel %vm255_vm0, %v2640_v16, %v2641_v13 }
  0xe8   :  { %9817 = vmatprep.subr.mxu1 %v2782_v59  ;;  %1809 = vmatprep.mubr.f32.mxu0 %v1605_v43  ;;  %v3225_v3 = vld [vmem:[%s16793_s20 + $0x870] sm:$0xff]  ;;  %v8837_v42 = vld [vmem:[%s16794_s25 + $0xb8] sm:$0x1]  ;;  %v8795_v15 = vld [vmem:[%s16794_s25 + $0x88] sm:$0xff]  ;;  %v2647_v43 = vrot.slane %v8832_v30, 1  ;;  %v2655_v46 = vrot.slane %v8835_v19, 1 }
  0xe9   :  { %9818 = vmatpush3.msra.mxu1 %v2766_v25  ;;  %v3240_v45 = vld [vmem:[%s16793_s20 + $0x8e8] sm:$0xff]  ;;  %v8794_v61 = vld [vmem:[%s16794_s25 + $0x80] sm:$0xff]  ;;  %v2646_v25 = vrot.slane %v8830_v8, 1  ;;  %v2656_v36 = vrot.slane %v8837_v42, 1  ;;  %v3238_v53 = vld [vmem:[%s16793_s20 + $0x8d8] sm:$0xff] }
  0xea   :  { %2254 = vmatmul.mubr.f32.gmra.mxu1 %v2045_v33  ;;  %9819 = vmatprep.subr.mxu1 %v2781_v20  ;;  %v3224_v17 = vld [vmem:[%s16793_s20 + $0x868] sm:$0xff]  ;;  %v2651_v20 = vsel %vm255_vm0, %v2649_v14, %v2650_v1  ;;  %v8838_v38 = vld [vmem:[%s16794_s25 + $0xc0] sm:$0xfe]  ;;  %v8840_v24 = vld [vmem:[%s16794_s25 + $0xd0] sm:$0x1] }
  0xeb   :  { %9820 = vmatpush3.msra.mxu1 %v2765_v40  ;;  %1810 = vmatmul.mubr.f32.gmra.mxu0 %v1602_v12  ;;  %v8797_v39 = vld [vmem:[%s16794_s25 + $0xa8] sm:$0xff]  ;;  %v8834_v40 = vld [vmem:[%s16794_s25 + $0xa0] sm:$0xfe]  ;;  %v8836_v12 = vld [vmem:[%s16794_s25 + $0xb0] sm:$0x1]  ;;  %v2648_v50 = vsel %vm255_vm0, %v2646_v25, %v2647_v43  ;;  %v2657_v29 = vsel %vm255_vm0, %v2655_v46, %v2656_v36  ;;  %v2658_v13 = vrot.slane %v8838_v38, 1 }
  0xec   :  { %9821 = vmatprep.subr.mxu1 %v2780_v52  ;;  %2258 = vmatprep.mubr.f32.mxu1 %v2054_v49  ;;  %v3239_v52 = vld [vmem:[%s16793_s20 + $0x8e0] sm:$0xff]  ;;  %v8839_v49 = vld [vmem:[%s16794_s25 + $0xc8] sm:$0xfe]  ;;  %v3221_v14 = vld [vmem:[%s16793_s20 + $0x850] sm:$0xff] }
  0xed   :  { %9822 = vmatpush3.msra.mxu1 %v2764_v44  ;;  %2409 = vmatprep.mubr.f32.mxu0 %v8791_v35  ;;  %v8841_v44 = vld [vmem:[%s16794_s25 + $0xd8] sm:$0x1]  ;;  %v3223_v35 = vld [vmem:[%s16793_s20 + $0x860] sm:$0xff]  ;;  %v2661_v11 = vrot.slane %v8839_v49, 1 }
  0xee   :  { %2259 = vmatmul.mubr.f32.gmra.mxu1 %v2051_v48  ;;  %9823 = vmatprep.subr.mxu1 %v2779_v57  ;;  %v9267_v37 = vpop.f32.mrf.mxu0  ;;  %v8796_v48 = vld [vmem:[%s16794_s25 + $0xa0] sm:$0xff]  ;;  %v2652_v57 = vrot.slane %v8834_v40, 1 }
  0xef   :  { %v9347_v58 = vpop.f32.mrf.mxu1  ;;  %9824 = vmatpush3.msra.mxu1 %v2763_v4  ;;  %2410 = vmatmul.mubr.f32.vlgmr.msra.gmra.mxu0 %v8790_v2  ;;  %v2653_v4 = vrot.slane %v8836_v12, 1  ;;  %v8799_v2 = vld [vmem:[%s16794_s25 + $0xc8] sm:$0xff]  ;;  %v8798_v16 = vld [vmem:[%s16794_s25 + $0xc0] sm:$0xff] }
  0xf0   :  { %9825 = vmatprep.subr.mxu1 %v2778_v28  ;;  %2858 = vmatprep.mubr.f32.mxu1 %v2639_v41  ;;  %v9268_v54 = vpop.f32.mrf.mxu0  ;;  %v2662_v41 = vrot.slane %v8841_v44, 1  ;;  %v8800_v43 = vld [vmem:[%s16794_s25 + $0xe0] sm:$0xff] }
  0xf1   :  { %v9348_v32 = vpop.f32.mrf.mxu1  ;;  %9826 = vmatpush3.msra.mxu1 %v2762_v7  ;;  %9876 = vmatpush3.msra.mxu0 %v3226_v5  ;;  %v9269_v47 = vadd.f32 %v9268_v54, %v9267_v37  ;;  %v3222_v37 = vld [vmem:[%s16793_s20 + $0x858] sm:$0xff]  ;;  %v2659_v54 = vrot.slane %v8840_v24, 1 }
  0xf2   :  { %v9349_v27 = vadd.f32 %v9348_v32, %v9347_v58  ;;  %2859 = vmatmul.mubr.f32.vlgmr.msra.gmra.mxu1 %v2636_v51  ;;  %2414 = vmatprep.mubr.f32.mxu0 %v8793_v21  ;;  %v9270_v26 = vpop.f32.mrf.mxu0  ;;  %v8843_v58 = vld [vmem:[%s16794_s25 + $0xe8] sm:$0xfe]  ;;  %v8845_v7 = vld [vmem:[%s16794_s25 + $0xf8] sm:$0x1]  ;;  %v3237_v21 = vld [vmem:[%s16793_s20 + $0x8d0] sm:$0xff]  ;;  %v2663_v30 = vsel %vm255_vm0, %v2661_v11, %v2662_v41 }
  0xf3   :  { %v9350_v63 = vpop.f32.mrf.mxu1  ;;  %2415 = vmatmul.mubr.f32.gmra.mxu0 %v8792_v9  ;;  %9877 = vmatprep.subr.mxu0 %v3241_v62  ;;  %v2654_v62 = vsel %vm255_vm0, %v2652_v57, %v2653_v4  ;;  %v8801_v32 = vld [vmem:[%s16794_s25 + $0xe8] sm:$0xff]  ;;  %v2660_v25 = vsel %vm255_vm0, %v2658_v13, %v2659_v54  ;;  %v3234_v57 = vld [vmem:[%s16793_s20 + $0x8b8] sm:$0xff]  ;;  %v3217_v54 = vld [vmem:[%s16793_s20 + $0x830] sm:$0xff] }
  0xf4   :  { %v13169_v59 = vadd.f32 %v9349_v27, %v9269_v47  ;;  %2863 = vmatprep.mubr.f32.mxu1 %v2645_v55  ;;  %9878 = vmatpush3.msra.mxu0 %v3225_v3  ;;  %v9271_v0 = vpop.f32.mrf.mxu0  ;;  %v2667_v47 = vrot.slane %v8843_v58, 1  ;;  %v2668_v27 = vrot.slane %v8845_v7, 1  ;;  %v8842_v55 = vld [vmem:[%s16794_s25 + $0xe0] sm:$0xfe]  ;;  %v8844_v3 = vld [vmem:[%s16794_s25 + $0xf0] sm:$0x1] }
  0xf5   :  { %v9351_v33 = vpop.f32.mrf.mxu1  ;;  %v9272_v10 = vadd.f32 %v9271_v0, %v9270_v26  ;;  %2419 = vmatprep.mubr.f32.mxu0 %v8795_v15  ;;  %9879 = vmatprep.subr.mxu0 %v3240_v45  ;;  %v3236_v26 = vld [vmem:[%s16793_s20 + $0x8c8] sm:$0xff]  ;;  %v8849_v15 = vld [vmem:[%s16794_s25 + $0x118] sm:$0x1]  ;;  %v2665_v0 = vrot.slane %v8844_v3, 1  ;;  %v8852_v58 = vld [vmem:[%s16794_s25 + $0x130] sm:$0x1] }
  0xf6   :  { %v9352_v18 = vadd.f32 %v9351_v33, %v9350_v63  ;;  %2864 = vmatmul.mubr.f32.gmra.mxu1 %v2642_v60  ;;  %9880 = vmatpush3.msra.mxu0 %v3224_v17  ;;  %v8847_v63 = vld [vmem:[%s16794_s25 + $0x108] sm:$0xfe]  ;;  %v2669_v40 = vsel %vm255_vm0, %v2667_v47, %v2668_v27  ;;  %v3218_v11 = vld [vmem:[%s16793_s20 + $0x838] sm:$0xff] }
  0xf7   :  { %v9273_v34 = vpop.f32.mrf.mxu0  ;;  %v9353_v6 = vpop.f32.mrf.mxu1  ;;  %2420 = vmatmul.mubr.f32.gmra.mxu0 %v8794_v61  ;;  %2868 = vmatprep.mubr.f32.mxu1 %v2651_v20  ;;  %v3220_v61 = vld [vmem:[%s16793_s20 + $0x848] sm:$0xff]  ;;  %v3235_v20 = vld [vmem:[%s16793_s20 + $0x8c0] sm:$0xff]  ;;  %v2673_v12 = vrot.slane %v8847_v63, 1 }
  0xf8   :  { %v13200_v31 = vadd.f32 %v9352_v18, %v9272_v10  ;;  %2424 = vmatprep.mubr.f32.mxu0 %v8797_v39  ;;  %9881 = vmatprep.subr.mxu0 %v3239_v52  ;;  %v2664_v39 = vrot.slane %v8842_v55, 1  ;;  %v8803_v33 = vld [vmem:[%s16794_s25 + $0x108] sm:$0xff]  ;;  %v2674_v10 = vrot.slane %v8849_v15, 1  ;;  %v8846_v18 = vld [vmem:[%s16794_s25 + $0x100] sm:$0xfe] }
  0xf9   :  { %v9274_v56 = vpop.f32.mrf.mxu0  ;;  %v9354_v28 = vpop.f32.mrf.mxu1  ;;  %9882 = vmatpush3.msra.mxu0 %v3223_v35  ;;  %v8848_v52 = vld [vmem:[%s16794_s25 + $0x110] sm:$0x1]  ;;  %v3219_v35 = vld [vmem:[%s16793_s20 + $0x840] sm:$0xff]  ;;  %v8807_v47 = vld [vmem:[%s16794_s25 + $0x188] sm:$0xff] }
  0xfa   :  { %v9275_v22 = vadd.f32 %v9274_v56, %v9273_v34  ;;  %v9355_v23 = vadd.f32 %v9354_v28, %v9353_v6  ;;  %2869 = vmatmul.mubr.f32.gmra.mxu1 %v2648_v50  ;;  %9883 = vmatprep.subr.mxu0 %v3238_v53  ;;  %v8851_v34 = vld [vmem:[%s16794_s25 + $0x128] sm:$0xfe]  ;;  %v8853_v6 = vld [vmem:[%s16794_s25 + $0x138] sm:$0x1]  ;;  %v8802_v53 = vld [vmem:[%s16794_s25 + $0x100] sm:$0xff]  ;;  %v2670_v56 = vrot.slane %v8846_v18, 1  ;;  %v2675_v24 = vsel %vm255_vm0, %v2673_v12, %v2674_v10 }
  0xfb   :  { %v9276_v5 = vpop.f32.mrf.mxu0  ;;  %v9356_v51 = vpop.f32.mrf.mxu1  ;;  %2425 = vmatmul.mubr.f32.gmra.mxu0 %v8796_v48  ;;  %2873 = vmatprep.mubr.f32.mxu1 %v2657_v29  ;;  %v2671_v28 = vrot.slane %v8848_v52, 1  ;;  %v8805_v29 = vld [vmem:[%s16794_s25 + $0x128] sm:$0xff]  ;;  %v8854_v63 = vld [vmem:[%s16794_s25 + $0x180] sm:$0xfe]  ;;  %v8856_v15 = vld [vmem:[%s16794_s25 + $0x190] sm:$0x1] }
  0xfc   :  { %v13231_v9 = vadd.f32 %v9355_v23, %v9275_v22  ;;  %2429 = vmatprep.mubr.f32.mxu0 %v8799_v2  ;;  %9884 = vmatpush3.msra.mxu0 %v3222_v37  ;;  %v2666_v2 = vsel %vm255_vm0, %v2664_v39, %v2665_v0  ;;  %v2679_v22 = vrot.slane %v8851_v34, 1  ;;  %v2680_v23 = vrot.slane %v8853_v6, 1  ;;  %v8850_v37 = vld [vmem:[%s16794_s25 + $0x120] sm:$0xfe]  ;;  %v3232_v27 = vld [vmem:[%s16793_s20 + $0x8a8] sm:$0xff] }
  0xfd   :  { %v9277_v1 = vpop.f32.mrf.mxu0  ;;  %v9357_v8 = vpop.f32.mrf.mxu1  ;;  %9885 = vmatprep.subr.mxu0 %v3237_v21  ;;  %v8857_v21 = vld [vmem:[%s16794_s25 + $0x198] sm:$0x1]  ;;  %v2683_v12 = vrot.slane %v8856_v15, 1  ;;  %v8809_v10 = vld [vmem:[%s16794_s25 + $0x1a8] sm:$0xff]  ;;  %v3215_v18 = vld [vmem:[%s16793_s20 + $0x820] sm:$0xff] }
  0xfe   :  { %v9278_v19 = vadd.f32 %v9277_v1, %v9276_v5  ;;  %v9358_v42 = vadd.f32 %v9357_v8, %v9356_v51  ;;  %2874 = vmatmul.mubr.f32.gmra.mxu1 %v2654_v62  ;;  %9886 = vmatpush3.msra.mxu0 %v3221_v14  ;;  %v8855_v51 = vld [vmem:[%s16794_s25 + $0x188] sm:$0xfe]  ;;  %v3233_v62 = vld [vmem:[%s16793_s20 + $0x8b0] sm:$0xff]  ;;  %v2672_v14 = vsel %vm255_vm0, %v2670_v56, %v2671_v28  ;;  %v8804_v1 = vld [vmem:[%s16794_s25 + $0x120] sm:$0xff]  ;;  %v2676_v8 = vrot.slane %v8850_v37, 1 }
  0xff   :  { %v9279_v45 = vpop.f32.mrf.mxu0  ;;  %v9359_v60 = vpop.f32.mrf.mxu1  ;;  %2430 = vmatmul.mubr.f32.gmra.mxu0 %v8798_v16  ;;  %2878 = vmatprep.mubr.f32.mxu1 %v2663_v30  ;;  %v2677_v30 = vrot.slane %v8852_v58, 1  ;;  %v3230_v56 = vld [vmem:[%s16793_s20 + $0x898] sm:$0xff]  ;;  %v8811_v37 = vld [vmem:[%s16794_s25 + $0x1c8] sm:$0xff]  ;;  %v3229_v58 = vld [vmem:[%s16793_s20 + $0x890] sm:$0xff] }
 0x100   :  { %v13262_v17 = vadd.f32 %v9358_v42, %v9278_v19  ;;  %2434 = vmatprep.mubr.f32.mxu0 %v8801_v32  ;;  %9887 = vmatprep.subr.mxu0 %v3236_v26  ;;  %v2681_v19 = vsel %vm255_vm0, %v2679_v22, %v2680_v23  ;;  %v2685_v42 = vrot.slane %v8855_v51, 1  ;;  %v2686_v26 = vrot.slane %v8857_v21, 1  ;;  %v8813_v15 = vld [vmem:[%s16794_s25 + $0x1e8] sm:$0xff] }
 0x101   :  { %v9280_v46 = vpop.f32.mrf.mxu0  ;;  %v9360_v36 = vpop.f32.mrf.mxu1  ;;  %9888 = vmatpush3.msra.mxu0 %v3220_v61  ;;  %v8859_v61 = vld [vmem:[%s16794_s25 + $0x1a8] sm:$0xfe] }
 0x102   :  { %v9281_v49 = vadd.f32 %v9280_v46, %v9279_v45  ;;  %v9361_v44 = vadd.f32 %v9360_v36, %v9359_v60  ;;  %2879 = vmatmul.mubr.f32.gmra.mxu1 %v2660_v25  ;;  %9889 = vmatprep.subr.mxu0 %v3235_v20  ;;  %v8861_v25 = vld [vmem:[%s16794_s25 + $0x1b8] sm:$0x1]  ;;  %v2678_v46 = vsel %vm255_vm0, %v2676_v8, %v2677_v30  ;;  %v8806_v36 = vld [vmem:[%s16794_s25 + $0x180] sm:$0xff]  ;;  %v2691_v34 = vrot.slane %v8859_v61, 1  ;;  %v3213_v30 = vld [vmem:[%s16793_s20 + $0x810] sm:$0xff] }
 0x103   :  { %v9282_v50 = vpop.f32.mrf.mxu0  ;;  %v9362_v48 = vpop.f32.mrf.mxu1  ;;  %2435 = vmatmul.mubr.f32.gmra.mxu0 %v8800_v43  ;;  %2883 = vmatprep.mubr.f32.mxu1 %v2669_v40  ;;  %v3216_v43 = vld [vmem:[%s16793_s20 + $0x828] sm:$0xff]  ;;  %v2682_v40 = vrot.slane %v8854_v63, 1  ;;  %v2692_v6 = vrot.slane %v8861_v25, 1  ;;  %v8869_v8 = vld [vmem:[%s16794_s25 + $0x1f8] sm:$0x1] }
 0x104   :  { %v13293_v4 = vadd.f32 %v9361_v44, %v9281_v49  ;;  %2439 = vmatprep.mubr.f32.mxu0 %v8803_v33  ;;  %9890 = vmatpush3.msra.mxu0 %v3219_v35  ;;  %v3231_v33 = vld [vmem:[%s16793_s20 + $0x8a0] sm:$0xff]  ;;  %v2687_v44 = vsel %vm255_vm0, %v2685_v42, %v2686_v26 }
 0x105   :  { %v9283_v41 = vpop.f32.mrf.mxu0  ;;  %v9363_v38 = vpop.f32.mrf.mxu1  ;;  %9891 = vmatprep.subr.mxu0 %v3234_v57  ;;  %v8858_v35 = vld [vmem:[%s16794_s25 + $0x1a0] sm:$0xfe]  ;;  %v2693_v51 = vsel %vm255_vm0, %v2691_v34, %v2692_v6 }
 0x106   :  { %v9284_v7 = vadd.f32 %v9283_v41, %v9282_v50  ;;  %v9364_v5 = vadd.f32 %v9363_v38, %v9362_v48  ;;  %2884 = vmatmul.mubr.f32.gmra.mxu1 %v2666_v2  ;;  %9892 = vmatpush3.msra.mxu0 %v3218_v11  ;;  %v8860_v50 = vld [vmem:[%s16794_s25 + $0x1b0] sm:$0x1]  ;;  %v8863_v2 = vld [vmem:[%s16794_s25 + $0x1c8] sm:$0xfe]  ;;  %v3214_v11 = vld [vmem:[%s16793_s20 + $0x818] sm:$0xff]  ;;  %v2684_v38 = vsel %vm255_vm0, %v2682_v40, %v2683_v12  ;;  %v2688_v22 = vrot.slane %v8858_v35, 1 }
 0x107   :  { %v9285_v16 = vpop.f32.mrf.mxu0  ;;  %v9365_v13 = vpop.f32.mrf.mxu1  ;;  %2440 = vmatmul.mubr.f32.gmra.mxu0 %v8802_v53  ;;  %2888 = vmatprep.mubr.f32.mxu1 %v2675_v24  ;;  %v8865_v53 = vld [vmem:[%s16794_s25 + $0x1d8] sm:$0x1]  ;;  %v8808_v24 = vld [vmem:[%s16794_s25 + $0x1a0] sm:$0xff]  ;;  %v2689_v23 = vrot.slane %v8860_v50, 1  ;;  %v2697_v21 = vrot.slane %v8863_v2, 1 }
 0x108   :  { %v13324_v32 = vadd.f32 %v9364_v5, %v9284_v7  ;;  %2444 = vmatprep.mubr.f32.mxu0 %v8805_v29  ;;  %9893 = vmatprep.subr.mxu0 %v3233_v62  ;;  %v2698_v62 = vrot.slane %v8865_v53, 1  ;;  %v8810_v42 = vld [vmem:[%s16794_s25 + $0x1c0] sm:$0xff]  ;;  %v8871_v40 = vld [vmem:[%s16794_s25 + $0x208] sm:$0xfe]  ;;  %v8873_v12 = vld [vmem:[%s16794_s25 + $0x218] sm:$0x1] }
 0x109   :  { %v9286_v55 = vpop.f32.mrf.mxu0  ;;  %v9366_v3 = vpop.f32.mrf.mxu1  ;;  %9894 = vmatpush3.msra.mxu0 %v3217_v54  ;;  %v8812_v6 = vld [vmem:[%s16794_s25 + $0x1e0] sm:$0xff]  ;;  %v2709_v53 = vrot.slane %v8871_v40, 1 }
 0x10a   :  { %v9287_v45 = vadd.f32 %v9286_v55, %v9285_v16  ;;  %v9367_v60 = vadd.f32 %v9366_v3, %v9365_v13  ;;  %2889 = vmatmul.mubr.f32.gmra.mxu1 %v2672_v14  ;;  %9895 = vmatprep.subr.mxu0 %v3232_v27  ;;  %v8862_v16 = vld [vmem:[%s16794_s25 + $0x1c0] sm:$0xfe]  ;;  %v8864_v13 = vld [vmem:[%s16794_s25 + $0x1d0] sm:$0x1]  ;;  %v3228_v55 = vld [vmem:[%s16793_s20 + $0x888] sm:$0xff]  ;;  %v2699_v25 = vsel %vm255_vm0, %v2697_v21, %v2698_v62 }
 0x10b   :  { %v9288_v39 = vpop.f32.mrf.mxu0  ;;  %v9368_v0 = vpop.f32.mrf.mxu1  ;;  %2445 = vmatmul.mubr.f32.gmra.mxu0 %v8804_v1  ;;  %2893 = vmatprep.mubr.f32.mxu1 %v2681_v19  ;;  %v8867_v1 = vld [vmem:[%s16794_s25 + $0x1e8] sm:$0xfe]  ;;  %v2690_v19 = vsel %vm255_vm0, %v2688_v22, %v2689_v23  ;;  %v2694_v26 = vrot.slane %v8862_v16, 1  ;;  %v2695_v63 = vrot.slane %v8864_v13, 1  ;;  %v8877_v23 = vld [vmem:[%s16794_s25 + $0x238] sm:$0x1] }
 0x10c   :  { %v13355_v20 = vadd.f32 %v9367_v60, %v9287_v45  ;;  %2449 = vmatprep.mubr.f32.mxu0 %v8807_v47  ;;  %9896 = vmatpush3.msra.mxu0 %v3216_v43  ;;  %v3212_v45 = vld [vmem:[%s16793_s20 + $0x808] sm:$0xff]  ;;  %v2703_v43 = vrot.slane %v8867_v1, 1  ;;  %v8874_v16 = vld [vmem:[%s16794_s25 + $0x220] sm:$0xfe]  ;;  %v8876_v13 = vld [vmem:[%s16794_s25 + $0x230] sm:$0x1] }
 0x10d   :  { %v9289_v52 = vpop.f32.mrf.mxu0  ;;  %v9369_v49 = vpop.f32.mrf.mxu1  ;;  %9897 = vmatprep.subr.mxu0 %v3231_v33  ;;  %v8868_v33 = vld [vmem:[%s16794_s25 + $0x1f0] sm:$0x1]  ;;  %v2696_v34 = vsel %vm255_vm0, %v2694_v26, %v2695_v63  ;;  %v8875_v22 = vld [vmem:[%s16794_s25 + $0x228] sm:$0xfe]  ;;  %v8878_v40 = vld [vmem:[%s16794_s25 + $0x240] sm:$0xfe] }
 0x10e   :  { %v9290_v48 = vadd.f32 %v9289_v52, %v9288_v39  ;;  %v9370_v57 = vadd.f32 %v9369_v49, %v9368_v0  ;;  %2894 = vmatmul.mubr.f32.gmra.mxu1 %v2678_v46  ;;  %9898 = vmatpush3.msra.mxu0 %v3215_v18  ;;  %v2704_v39 = vrot.slane %v8869_v8, 1  ;;  %v8866_v0 = vld [vmem:[%s16794_s25 + $0x1e0] sm:$0xfe]  ;;  %v2701_v50 = vrot.slane %v8868_v33, 1 }
 0x10f   :  { %v9291_v28 = vpop.f32.mrf.mxu0  ;;  %v9371_v29 = vpop.f32.mrf.mxu1  ;;  %2450 = vmatmul.mubr.f32.gmra.mxu0 %v8806_v36  ;;  %2898 = vmatprep.mubr.f32.mxu1 %v2687_v44  ;;  %v3211_v49 = vld [vmem:[%s16793_s20 + $0x800] sm:$0xff]  ;;  %v2700_v35 = vrot.slane %v8866_v0, 1  ;;  %v2715_v8 = vrot.slane %v8875_v22, 1 }
 0x110   :  { %v13386_v41 = vadd.f32 %v9370_v57, %v9290_v48  ;;  %2454 = vmatprep.mubr.f32.mxu0 %v8809_v10  ;;  %9899 = vmatprep.subr.mxu0 %v3230_v56  ;;  %v3227_v10 = vld [vmem:[%s16793_s20 + $0x880] sm:$0xff]  ;;  %v2705_v2 = vsel %vm255_vm0, %v2703_v43, %v2704_v39  ;;  %v2710_v56 = vrot.slane %v8873_v12, 1  ;;  %v8819_v43 = vld [vmem:[%s16794_s25 + $0x248] sm:$0xff]  ;;  %v8880_v12 = vld [vmem:[%s16794_s25 + $0x250] sm:$0x1] }
 0x111   :  { %v9292_v7 = vpop.f32.mrf.mxu0  ;;  %v9372_v5 = vpop.f32.mrf.mxu1  ;;  %9900 = vmatpush3.msra.mxu0 %v3214_v11 }
 0x112   :  { %v9293_v54 = vadd.f32 %v9292_v7, %v9291_v28  ;;  %v9373_v14 = vadd.f32 %v9372_v5, %v9371_v29  ;;  %2899 = vmatmul.mubr.f32.gmra.mxu1 %v2684_v38  ;;  %9901 = vmatprep.subr.mxu0 %v3229_v58  ;;  %v8870_v28 = vld [vmem:[%s16794_s25 + $0x200] sm:$0xfe]  ;;  %v8872_v29 = vld [vmem:[%s16794_s25 + $0x210] sm:$0x1]  ;;  %v2711_v1 = vsel %vm255_vm0, %v2709_v53, %v2710_v56  ;;  %v2718_v56 = vrot.slane %v8878_v40, 1 }
 0x113   :  { %v9294_v47 = vpop.f32.mrf.mxu0  ;;  %v9374_v27 = vpop.f32.mrf.mxu1  ;;  %2455 = vmatmul.mubr.f32.gmra.mxu0 %v8808_v24  ;;  %2903 = vmatprep.mubr.f32.mxu1 %v2693_v51  ;;  %v8815_v24 = vld [vmem:[%s16794_s25 + $0x208] sm:$0xff]  ;;  %v8814_v7 = vld [vmem:[%s16794_s25 + $0x200] sm:$0xff]  ;;  %v2702_v51 = vsel %vm255_vm0, %v2700_v35, %v2701_v50  ;;  %v2706_v21 = vrot.slane %v8870_v28, 1  ;;  %v2707_v62 = vrot.slane %v8872_v29, 1  ;;  %v2719_v28 = vrot.slane %v8880_v12, 1 }
 0x114   :  { %v13417_v3 = vadd.f32 %v9373_v14, %v9293_v54  ;;  %2459 = vmatprep.mubr.f32.mxu0 %v8811_v37  ;;  %9902 = vmatpush3.msra.mxu0 %v3213_v30  ;;  %v2716_v30 = vrot.slane %v8877_v23, 1  ;;  %v8821_v29 = vld [vmem:[%s16794_s25 + $0x268] sm:$0xff] }
 0x115   :  { %v9295_v60 = vpop.f32.mrf.mxu0  ;;  %v9375_v61 = vpop.f32.mrf.mxu1  ;;  %9903 = vmatprep.subr.mxu0 %v3228_v55 }
 0x116   :  { %v9296_v46 = vadd.f32 %v9295_v60, %v9294_v47  ;;  %v9376_v36 = vadd.f32 %v9375_v61, %v9374_v27  ;;  %2904 = vmatmul.mubr.f32.gmra.mxu1 %v2690_v19  ;;  %9904 = vmatpush3.msra.mxu0 %v3212_v45  ;;  %v8879_v47 = vld [vmem:[%s16794_s25 + $0x248] sm:$0xfe]  ;;  %v8881_v27 = vld [vmem:[%s16794_s25 + $0x258] sm:$0x1]  ;;  %v2713_v45 = vrot.slane %v8876_v13, 1  ;;  %v2708_v61 = vsel %vm255_vm0, %v2706_v21, %v2707_v62 }
 0x117   :  { %v9297_v18 = vpop.f32.mrf.mxu0  ;;  %v9377_v52 = vpop.f32.mrf.mxu1  ;;  %2460 = vmatmul.mubr.f32.gmra.mxu0 %v8810_v42  ;;  %2908 = vmatprep.mubr.f32.mxu1 %v2699_v25  ;;  %v8817_v42 = vld [vmem:[%s16794_s25 + $0x228] sm:$0xff]  ;;  %v8816_v25 = vld [vmem:[%s16794_s25 + $0x220] sm:$0xff]  ;;  %v2721_v39 = vrot.slane %v8879_v47, 1  ;;  %v2722_v0 = vrot.slane %v8881_v27, 1 }
 0x118   :  { %v13448_v44 = vadd.f32 %v9376_v36, %v9296_v46  ;;  %2464 = vmatprep.mubr.f32.mxu0 %v8813_v15  ;;  %9905 = vmatprep.subr.mxu0 %v3227_v10  ;;  %v2712_v15 = vrot.slane %v8874_v16, 1  ;;  %v2717_v36 = vsel %vm255_vm0, %v2715_v8, %v2716_v30  ;;  %v8883_v10 = vld [vmem:[%s16794_s25 + $0x268] sm:$0xfe]  ;;  %v8888_v16 = vld [vmem:[%s16794_s25 + $0x50] sm:$0x3] }
 0x119   :  { %v9298_v48 = vpop.f32.mrf.mxu0  ;;  %v9378_v57 = vpop.f32.mrf.mxu1  ;;  %9906 = vmatpush3.msra.mxu0 %v3211_v49  ;;  %v8885_v49 = vld [vmem:[%s16794_s25 + $0x278] sm:$0x1]  ;;  %v2723_v53 = vsel %vm255_vm0, %v2721_v39, %v2722_v0  ;;  %v2727_v23 = vrot.slane %v8883_v10, 1  ;;  %v8891_v13 = vld [vmem:[%s16794_s25 + $0x68] sm:$0xfc] }
 0x11a   :  { %v9299_v11 = vadd.f32 %v9298_v48, %v9297_v18  ;;  %v9379_v38 = vadd.f32 %v9378_v57, %v9377_v52  ;;  %2909 = vmatmul.mubr.f32.gmra.mxu1 %v2696_v34  ;;  %v8887_v34 = vld [vmem:[%s16794_s25 + $0x48] sm:$0xfc]  ;;  %v2714_v48 = vsel %vm255_vm0, %v2712_v15, %v2713_v45  ;;  %v8818_v57 = vld [vmem:[%s16794_s25 + $0x240] sm:$0xff] }
 0x11b   :  { %v9300_v37 = vpop.f32.mrf.mxu0  ;;  %v9380_v58 = vpop.f32.mrf.mxu1  ;;  %2465 = vmatmul.mubr.f32.gmra.mxu0 %v8812_v6  ;;  %2913 = vmatprep.mubr.f32.mxu1 %v2705_v2  ;;  %v8889_v6 = vld [vmem:[%s16794_s25 + $0x58] sm:$0x3] }
 0x11c   :  { %v13473_v5 = vadd.f32 %v9379_v38, %v9299_v11  ;;  %2469 = vmatprep.mubr.f32.mxu0 %v8815_v24  ;;  %v8882_v11 = vld [vmem:[%s16794_s25 + $0x260] sm:$0xfe]  ;;  %v8884_v38 = vld [vmem:[%s16794_s25 + $0x270] sm:$0x1] }
 0x11d   :  { %v9301_v54 = vpop.f32.mrf.mxu0  ;;  %v9381_v14 = vpop.f32.mrf.mxu1 }
 0x11e   :  { %v9302_v55 = vadd.f32 %v9301_v54, %v9300_v37  ;;  %v9382_v19 = vadd.f32 %v9381_v14, %v9380_v58  ;;  %2914 = vmatmul.mubr.f32.gmra.mxu1 %v2702_v51  ;;  %v2728_v37 = vrot.slane %v8885_v49, 1  ;;  %v3086_v58 = vrot.slane %v8887_v34, 2  ;;  %v8886_v51 = vld [vmem:[%s16794_s25 + $0x40] sm:$0xfc] }
 0x11f   :  { %v9303_v26 = vpop.f32.mrf.mxu0  ;;  %v9383_v63 = vpop.f32.mrf.mxu1  ;;  %2470 = vmatmul.mubr.f32.gmra.mxu0 %v8814_v7  ;;  %2918 = vmatprep.mubr.f32.mxu1 %v2711_v1  ;;  %v3087_v7 = vrot.slane %v8889_v6, 2 }
 0x120   :  { %v13492_v60 = vadd.f32 %v9382_v19, %v9302_v55  ;;  %2474 = vmatprep.mubr.f32.mxu0 %v8817_v42 }
 0x121   :  { %v9304_v33 = vpop.f32.mrf.mxu0  ;;  %v9384_v46 = vpop.f32.mrf.mxu1 }
 0x122   :  { %v9305_v18 = vadd.f32 %v9304_v33, %v9303_v26  ;;  %v9385_v52 = vadd.f32 %v9384_v46, %v9383_v63  ;;  %2919 = vmatmul.mubr.f32.gmra.mxu1 %v2708_v61 }
 0x123   :  { %v9306_v35 = vpop.f32.mrf.mxu0  ;;  %v9386_v50 = vpop.f32.mrf.mxu1  ;;  %2475 = vmatmul.mubr.f32.gmra.mxu0 %v8816_v25  ;;  %2923 = vmatprep.mubr.f32.mxu1 %v2717_v36 }
 0x124   :  { %v13524_v2 = vadd.f32 %v9385_v52, %v9305_v18  ;;  %2479 = vmatprep.mubr.f32.mxu0 %v8819_v43 }
 0x125   :  { %v9307_v24 = vpop.f32.mrf.mxu0  ;;  %v9387_v22 = vpop.f32.mrf.mxu1 }
 0x126   :  { %v9308_v21 = vadd.f32 %v9307_v24, %v9306_v35  ;;  %v9388_v62 = vadd.f32 %v9387_v22, %v9386_v50 }
 0x127   :  { %24 = vsyncpa [#allocation6], 0  ;;  %2924 = vmatmul.mubr.f32.gmra.mxu1 %v2714_v48  ;;  %v9309_v54 = vpop.f32.mrf.mxu0  ;;  %v9389_v14 = vpop.f32.mrf.mxu1  ;;  %v8893_v1 = vld [vmem:[%s16794_s25 + $0x78] sm:$0x3]  ;;  %2480 = vmatmul.mubr.f32.gmra.mxu0 %v8818_v57  ;;  %v2720_v30 = vsel %vm255_vm0, %v2718_v56, %v2719_v28  ;;  %v2724_v47 = vrot.slane %v8882_v11, 1  ;;  %v2725_v27 = vrot.slane %v8884_v38, 1  ;;  %v2729_v26 = vsel %vm255_vm0, %v2727_v23, %v2728_v37 }
 0x128   :  { %v13548_v8 = vadd.f32 %v9388_v62, %v9308_v21  ;;  %2928 = vmatprep.mubr.f32.mxu1 %v2723_v53  ;;  %2484 = vmatprep.mubr.f32.mxu0 %v8821_v29  ;;  %v8820_v42 = vld [vmem:[%s16794_s25 + $0x260] sm:$0xff]  ;;  %v3083_v63 = vrot.slane %v8886_v51, 2  ;;  %v3084_v15 = vrot.slane %v8888_v16, 2  ;;  %v3092_v45 = vrot.slane %v8891_v13, 2  ;;  %v8892_v33 = vld [vmem:[%s16794_s25 + $0x70] sm:$0x3] }
 0x129   :  { %v9310_v55 = vpop.f32.mrf.mxu0  ;;  %v9390_v19 = vpop.f32.mrf.mxu1  ;;  %v3088_v43 = vsel %vm834_vm1, %v3086_v58, %v3087_v7  ;;  %v3093_v39 = vrot.slane %v8893_v1, 2  ;;  %v8890_v0 = vld [vmem:[%s16794_s25 + $0x60] sm:$0xfc]  ;;  %v8895_v36 = vld [vmem:[%s16794_s25 + $0x88] sm:$0xfc]  ;;  %v2726_v18 = vsel %vm255_vm0, %v2724_v47, %v2725_v27  ;;  %v3090_v6 = vrot.slane %v8892_v33, 2 }
 0x12a   :  { %v9311_v61 = vadd.f32 %v9310_v55, %v9309_v54  ;;  %v9391_v25 = vadd.f32 %v9390_v19, %v9389_v14  ;;  %v8897_v40 = vld [vmem:[%s16794_s25 + $0x98] sm:$0x3]  ;;  %v3085_v49 = vsel %vm834_vm1, %v3083_v63, %v3084_v15  ;;  %v3089_v34 = vrot.slane %v8890_v0, 2  ;;  %v8894_v56 = vld [vmem:[%s16794_s25 + $0x80] sm:$0xfc]  ;;  %s16841_s28 = sld [smem:[#allocation57_spill]] }
 0x12b   :  { %2929 = vmatmul.mubr.f32.gmra.mxu1 %v2720_v30  ;;  %v9312_v46 = vpop.f32.mrf.mxu0  ;;  %v9392_v10 = vpop.f32.mrf.mxu1  ;;  %2485 = vmatmul.mubr.f32.gmra.mxu0 %v8820_v42  ;;  %v3094_v48 = vsel %vm834_vm1, %v3092_v45, %v3093_v39  ;;  %v3098_v57 = vrot.slane %v8895_v36, 2  ;;  %v3099_v53 = vrot.slane %v8897_v40, 2  ;;  %v8896_v28 = vld [vmem:[%s16794_s25 + $0x90] sm:$0x3]  ;;  %v8899_v38 = vld [vmem:[%s16794_s25 + $0xa8] sm:$0xfc] }
 0x12c   :  { %v13568_v12 = vadd.f32 %v9391_v25, %v9311_v61  ;;  %2933 = vmatprep.mubr.f32.mxu1 %v2729_v26  ;;  %3307 = vmatprep.mubr.f32.mxu0 %v3088_v43  ;;  %v8901_v24 = vld [vmem:[%s16794_s25 + $0xb8] sm:$0x3]  ;;  %v3091_v37 = vsel %vm834_vm1, %v3089_v34, %v3090_v6  ;;  %v3095_v58 = vrot.slane %v8894_v56, 2  ;;  %v3096_v7 = vrot.slane %v8896_v28, 2  ;;  %v8898_v13 = vld [vmem:[%s16794_s25 + $0xa0] sm:$0xfc] }
 0x12d   :  { %v9313_v52 = vpop.f32.mrf.mxu0  ;;  %v9393_v50 = vpop.f32.mrf.mxu1  ;;  %v3100_v21 = vsel %vm834_vm1, %v3098_v57, %v3099_v53  ;;  %v3104_v62 = vrot.slane %v8899_v38, 2  ;;  %v3105_v16 = vrot.slane %v8901_v24, 2  ;;  %v8900_v54 = vld [vmem:[%s16794_s25 + $0xb0] sm:$0x3]  ;;  %v8903_v1 = vld [vmem:[%s16794_s25 + $0xc8] sm:$0xfc] }
 0x12e   :  { %v9314_v35 = vadd.f32 %v9313_v52, %v9312_v46  ;;  %v9394_v29 = vadd.f32 %v9393_v50, %v9392_v10  ;;  %v8905_v30 = vld [vmem:[%s16794_s25 + $0xd8] sm:$0x3]  ;;  %v3097_v19 = vsel %vm834_vm1, %v3095_v58, %v3096_v7  ;;  %v3101_v42 = vrot.slane %v8898_v13, 2  ;;  %v8902_v43 = vld [vmem:[%s16794_s25 + $0xc0] sm:$0xfc]  ;;  %s10691_s24 = smov 32  }
 0x12f   :  { %2934 = vmatmul.mubr.f32.gmra.mxu1 %v2726_v18  ;;  %v9427_v11 = vpop.f32.mrf.mxu0  ;;  %3308 = vmatmul.mubr.f32.vlgmr.msra.gmra.mxu0 %v3085_v49  ;;  %v3102_v26 = vrot.slane %v8900_v54, 2  ;;  %v3106_v45 = vsel %vm834_vm1, %v3104_v62, %v3105_v16  ;;  %v3110_v61 = vrot.slane %v8903_v1, 2  ;;  %v3111_v25 = vrot.slane %v8905_v30, 2  ;;  %v8907_v33 = vld [vmem:[%s16794_s25 + $0xe8] sm:$0xfc]  ;;  %s10692_s27 = smov 16  }
 0x130   :  { %v13585_v22 = vadd.f32 %v9394_v29, %v9314_v35  ;;  %3312 = vmatprep.mubr.f32.mxu0 %v3094_v48  ;;  %v9507_v14 = vpop.f32.mrf.mxu1  ;;  %v8909_v46 = vld [vmem:[%s16794_s25 + $0xf8] sm:$0x3]  ;;  %v3107_v49 = vrot.slane %v8902_v43, 2  ;;  %v3116_v48 = vrot.slane %v8907_v33, 2  ;;  %v8906_v53 = vld [vmem:[%s16794_s25 + $0xe0] sm:$0xfc] }
 0x131   :  { %v9428_v23 = vpop.f32.mrf.mxu0  ;;  %v3103_v52 = vsel %vm834_vm1, %v3101_v42, %v3102_v26  ;;  %v3112_v50 = vsel %vm834_vm1, %v3110_v61, %v3111_v25  ;;  %v3117_v57 = vrot.slane %v8909_v46, 2  ;;  %v8911_v29 = vld [vmem:[%s16794_s25 + $0x108] sm:$0xfc]  ;;  %v3113_v7 = vrot.slane %v8906_v53, 2  ;;  %s10693_s0 = smov 48   ;;  %s10694_s3 = smov 64  }
 0x132   :  { %v9429_v51 = vadd.f32 %v9428_v23, %v9427_v11  ;;  %v9508_v55 = vpop.f32.mrf.mxu1  ;;  %v8913_v11 = vld [vmem:[%s16794_s25 + $0x118] sm:$0x3]  ;;  %v3122_v13 = vrot.slane %v8911_v29, 2  ;;  %vm3443_vm2 = vcmask 523264   ;;  %vm3445_vm3 = vcmask 517120   ;;  %s10695_s1 = smov 80  }
 0x133   :  { %v9430_v27 = vpop.f32.mrf.mxu0  ;;  %3313 = vmatmul.mubr.f32.gmra.mxu0 %v3091_v37  ;;  %v9509_v63 = vadd.f32 %v9508_v55, %v9507_v14  ;;  %v3118_v16 = vsel %vm834_vm1, %v3116_v48, %v3117_v57  ;;  %v3123_v54 = vrot.slane %v8913_v11, 2  ;;  %v8910_v14 = vld [vmem:[%s16794_s25 + $0x100] sm:$0xfc]  ;;  %vm5607_vm4 = vcmask 130048   ;;  %s10696_s29 = smov 96   ;;  %s10697_s22 = smov 112  }
 0x134   :  { %v1140_v47 = vadd.f32 %v9429_v51, %v13169_v59  ;;  %3317 = vmatprep.mubr.f32.mxu0 %v3100_v21  ;;  %v8904_v59 = vld [vmem:[%s16794_s25 + $0xd0] sm:$0x3]  ;;  %v9510_v0 = vpop.f32.mrf.mxu1  ;;  %vm5647_vm5 = vcmask 1041409   ;;  %vm5649_vm6 = vcmask 1043459   ;;  %vm5651_vm7 = vcmask 1045509  }
 0x135   :  { %v9431_v15 = vpop.f32.mrf.mxu0  ;;  %v3108_v34 = vrot.slane %v8904_v59, 2  ;;  %v3124_v43 = vsel %vm834_vm1, %v3122_v13, %v3123_v54  ;;  %vm5653_vm8 = vcmask 1047559   ;;  %vm5656_vm9 = vcmask 123904  }
 0x136   :  { %v9432_v39 = vadd.f32 %v9431_v15, %v9430_v27  ;;  %v13616_v36 = vadd.f32 %v9509_v63, %v1140_v47  ;;  %v9511_v18 = vpop.f32.mrf.mxu1  ;;  %v8915_v47 = vld [vmem:[%s16794_s25 + $0x128] sm:$0xfc]  ;;  %v8917_v27 = vld [vmem:[%s16794_s25 + $0x138] sm:$0x3]  ;;  %v3119_v15 = vrot.slane %v8910_v14, 2  ;;  %vm5686_vm10 = vcmask 255104  }
 0x137   :  { %v9433_v40 = vpop.f32.mrf.mxu0  ;;  %3318 = vmatmul.mubr.f32.gmra.mxu0 %v3097_v19  ;;  %v9512_v6 = vadd.f32 %v9511_v18, %v9510_v0  ;;  %v3109_v58 = vsel %vm834_vm1, %v3107_v49, %v3108_v34  ;;  %v3128_v59 = vrot.slane %v8915_v47, 2  ;;  %v8914_v0 = vld [vmem:[%s16794_s25 + $0x120] sm:$0xfc]  ;;  %vm5716_vm11 = vcmask 386304  }
 0x138   :  { %v1141_v10 = vadd.f32 %v9432_v39, %v13200_v31  ;;  %3322 = vmatprep.mubr.f32.mxu0 %v3106_v45  ;;  %v8908_v31 = vld [vmem:[%s16794_s25 + $0xf0] sm:$0x3]  ;;  %v3129_v39 = vrot.slane %v8917_v27, 2  ;;  %vm5746_vm12 = vcmask 517504   ;;  %vm5776_vm13 = vcmask 648704  }
 0x139   :  { %v9434_v35 = vpop.f32.mrf.mxu0  ;;  %v9513_v28 = vpop.f32.mrf.mxu1  ;;  %v3114_v51 = vrot.slane %v8908_v31, 2  ;;  %vm5806_vm14 = vcmask 779904   ;;  %vm5836_vm15 = vcmask 911104   ;;  %vm5866_vm0 = vcmask 1042304  }
 0x13a   :  { %v9435_v56 = vadd.f32 %v9434_v35, %v9433_v40  ;;  %v13633_v38 = vadd.f32 %v9512_v6, %v1141_v10  ;;  %v8919_v40 = vld [vmem:[%s16794_s25 + $0x188] sm:$0xfc]  ;;  %v8921_v10 = vld [vmem:[%s16794_s25 + $0x198] sm:$0x3]  ;;  %v3125_v35 = vrot.slane %v8914_v0, 2  ;;  %v3130_v53 = vsel %vm834_vm1, %v3128_v59, %v3129_v39 }
 0x13b   :  { %v9436_v24 = vpop.f32.mrf.mxu0  ;;  %3323 = vmatmul.mubr.f32.gmra.mxu0 %v3103_v52  ;;  %v9514_v37 = vpop.f32.mrf.mxu1  ;;  %v3115_v63 = vsel %vm834_vm1, %v3113_v7, %v3114_v51  ;;  %v3134_v31 = vrot.slane %v8919_v40, 2 }
 0x13c   :  { %v1142_v23 = vadd.f32 %v9435_v56, %v13231_v9  ;;  %3327 = vmatprep.mubr.f32.mxu0 %v3112_v50  ;;  %v9515_v21 = vadd.f32 %v9514_v37, %v9513_v28  ;;  %v8912_v9 = vld [vmem:[%s16794_s25 + $0x110] sm:$0x3]  ;;  %v3135_v56 = vrot.slane %v8921_v10, 2  ;;  %v8918_v28 = vld [vmem:[%s16794_s25 + $0x180] sm:$0xfc] }
 0x13d   :  { %v9437_v62 = vpop.f32.mrf.mxu0  ;;  %v9516_v30 = vpop.f32.mrf.mxu1  ;;  %v3120_v45 = vrot.slane %v8912_v9, 2 }
 0x13e   :  { %v9438_v1 = vadd.f32 %v9437_v62, %v9436_v24  ;;  %v13650_v55 = vadd.f32 %v9515_v21, %v1142_v23  ;;  %v8923_v24 = vld [vmem:[%s16794_s25 + $0x1a8] sm:$0xfc]  ;;  %v8925_v23 = vld [vmem:[%s16794_s25 + $0x1b8] sm:$0x3]  ;;  %v3131_v62 = vrot.slane %v8918_v28, 2  ;;  %v3136_v14 = vsel %vm834_vm1, %v3134_v31, %v3135_v56 }
 0x13f   :  { %v9439_v19 = vpop.f32.mrf.mxu0  ;;  %3328 = vmatmul.mubr.f32.gmra.mxu0 %v3109_v58  ;;  %v9517_v26 = vpop.f32.mrf.mxu1  ;;  %v3121_v6 = vsel %vm834_vm1, %v3119_v15, %v3120_v45  ;;  %v3140_v9 = vrot.slane %v8923_v24, 2 }
 0x140   :  { %v1143_v42 = vadd.f32 %v9438_v1, %v13262_v17  ;;  %3332 = vmatprep.mubr.f32.mxu0 %v3118_v16  ;;  %v9518_v61 = vadd.f32 %v9517_v26, %v9516_v30  ;;  %v8916_v17 = vld [vmem:[%s16794_s25 + $0x130] sm:$0x3]  ;;  %v3141_v1 = vrot.slane %v8925_v23, 2  ;;  %v8922_v30 = vld [vmem:[%s16794_s25 + $0x1a0] sm:$0xfc] }
 0x141   :  { %v9440_v25 = vpop.f32.mrf.mxu0  ;;  %v9519_v46 = vpop.f32.mrf.mxu1  ;;  %v3126_v50 = vrot.slane %v8916_v17, 2 }
 0x142   :  { %v9441_v33 = vadd.f32 %v9440_v25, %v9439_v19  ;;  %v13667_v18 = vadd.f32 %v9518_v61, %v1143_v42  ;;  %v8927_v19 = vld [vmem:[%s16794_s25 + $0x1c8] sm:$0xfc]  ;;  %v8929_v42 = vld [vmem:[%s16794_s25 + $0x1d8] sm:$0x3]  ;;  %v3137_v25 = vrot.slane %v8922_v30, 2  ;;  %v3142_v0 = vsel %vm834_vm1, %v3140_v9, %v3141_v1 }
 0x143   :  { %v9442_v52 = vpop.f32.mrf.mxu0  ;;  %3333 = vmatmul.mubr.f32.gmra.mxu0 %v3115_v63  ;;  %v9520_v34 = vpop.f32.mrf.mxu1  ;;  %v3127_v21 = vsel %vm834_vm1, %v3125_v35, %v3126_v50  ;;  %v3146_v17 = vrot.slane %v8927_v19, 2 }
 0x144   :  { %v1144_v49 = vadd.f32 %v9441_v33, %v13293_v4  ;;  %3337 = vmatprep.mubr.f32.mxu0 %v3124_v43  ;;  %v9521_v48 = vadd.f32 %v9520_v34, %v9519_v46  ;;  %v8920_v4 = vld [vmem:[%s16794_s25 + $0x190] sm:$0x3]  ;;  %v3147_v33 = vrot.slane %v8929_v42, 2  ;;  %v8926_v46 = vld [vmem:[%s16794_s25 + $0x1c0] sm:$0xfc] }
 0x145   :  { %v9443_v57 = vpop.f32.mrf.mxu0  ;;  %v9522_v11 = vpop.f32.mrf.mxu1  ;;  %v3132_v16 = vrot.slane %v8920_v4, 2 }
 0x146   :  { %v9444_v29 = vadd.f32 %v9443_v57, %v9442_v52  ;;  %v13684_v37 = vadd.f32 %v9521_v48, %v1144_v49  ;;  %v8931_v52 = vld [vmem:[%s16794_s25 + $0x1e8] sm:$0xfc]  ;;  %v8933_v49 = vld [vmem:[%s16794_s25 + $0x1f8] sm:$0x3]  ;;  %v3143_v57 = vrot.slane %v8926_v46, 2  ;;  %v3148_v28 = vsel %vm834_vm1, %v3146_v17, %v3147_v33 }
 0x147   :  { %v9445_v58 = vpop.f32.mrf.mxu0  ;;  %3338 = vmatmul.mubr.f32.gmra.mxu0 %v3121_v6  ;;  %v9523_v51 = vpop.f32.mrf.mxu1  ;;  %v3133_v61 = vsel %vm834_vm1, %v3131_v62, %v3132_v16  ;;  %v3152_v4 = vrot.slane %v8931_v52, 2 }
 0x148   :  { %v1145_v7 = vadd.f32 %v9444_v29, %v13324_v32  ;;  %3342 = vmatprep.mubr.f32.mxu0 %v3130_v53  ;;  %v9524_v13 = vadd.f32 %v9523_v51, %v9522_v11  ;;  %v8924_v32 = vld [vmem:[%s16794_s25 + $0x1b0] sm:$0x3]  ;;  %v3153_v29 = vrot.slane %v8933_v49, 2  ;;  %v8930_v11 = vld [vmem:[%s16794_s25 + $0x1e0] sm:$0xfc] }
 0x149   :  { %v9446_v54 = vpop.f32.mrf.mxu0  ;;  %v9525_v27 = vpop.f32.mrf.mxu1  ;;  %v3138_v43 = vrot.slane %v8924_v32, 2 }
 0x14a   :  { %v9447_v47 = vadd.f32 %v9446_v54, %v9445_v58  ;;  %v13701_v26 = vadd.f32 %v9524_v13, %v1145_v7  ;;  %v8935_v58 = vld [vmem:[%s16794_s25 + $0x208] sm:$0xfc]  ;;  %v8937_v7 = vld [vmem:[%s16794_s25 + $0x218] sm:$0x3]  ;;  %v3149_v54 = vrot.slane %v8930_v11, 2  ;;  %v3154_v30 = vsel %vm834_vm1, %v3152_v4, %v3153_v29 }
 0x14b   :  { %v9448_v63 = vpop.f32.mrf.mxu0  ;;  %3343 = vmatmul.mubr.f32.gmra.mxu0 %v3127_v21  ;;  %v9526_v45 = vpop.f32.mrf.mxu1  ;;  %v3139_v48 = vsel %vm834_vm1, %v3137_v25, %v3138_v43  ;;  %v3158_v32 = vrot.slane %v8935_v58, 2 }
 0x14c   :  { %v1146_v15 = vadd.f32 %v9447_v47, %v13355_v20  ;;  %3347 = vmatprep.mubr.f32.mxu0 %v3136_v14  ;;  %v9527_v59 = vadd.f32 %v9526_v45, %v9525_v27  ;;  %v8928_v20 = vld [vmem:[%s16794_s25 + $0x1d0] sm:$0x3]  ;;  %v3159_v47 = vrot.slane %v8937_v7, 2  ;;  %v8934_v27 = vld [vmem:[%s16794_s25 + $0x200] sm:$0xfc] }
 0x14d   :  { %v9449_v39 = vpop.f32.mrf.mxu0  ;;  %v9528_v10 = vpop.f32.mrf.mxu1  ;;  %v3144_v53 = vrot.slane %v8928_v20, 2 }
 0x14e   :  { %v9450_v40 = vadd.f32 %v9449_v39, %v9448_v63  ;;  %v13718_v34 = vadd.f32 %v9527_v59, %v1146_v15  ;;  %v8939_v63 = vld [vmem:[%s16794_s25 + $0x228] sm:$0xfc]  ;;  %v8941_v15 = vld [vmem:[%s16794_s25 + $0x238] sm:$0x3]  ;;  %v3155_v39 = vrot.slane %v8934_v27, 2  ;;  %v3160_v46 = vsel %vm834_vm1, %v3158_v32, %v3159_v47 }
 0x14f   :  { %v9451_v6 = vpop.f32.mrf.mxu0  ;;  %3348 = vmatmul.mubr.f32.gmra.mxu0 %v3133_v61  ;;  %v9529_v50 = vpop.f32.mrf.mxu1  ;;  %v3145_v13 = vsel %vm834_vm1, %v3143_v57, %v3144_v53  ;;  %v3164_v20 = vrot.slane %v8939_v63, 2  ;;  %v3549_v32 = vld [vmem:[%s16769_s4 + $0x78] sm:$0xff]  ;;  %v8948_v63 = vld [vmem:[%s16794_s25 + $0x270] sm:$0x3] }
 0x150   :  { %v1147_v35 = vadd.f32 %v9450_v40, %v13386_v41  ;;  %3352 = vmatprep.mubr.f32.mxu0 %v3142_v0  ;;  %v9530_v31 = vadd.f32 %v9529_v50, %v9528_v10  ;;  %v8932_v41 = vld [vmem:[%s16794_s25 + $0x1f0] sm:$0x3]  ;;  %v3165_v40 = vrot.slane %v8941_v15, 2  ;;  %v8938_v10 = vld [vmem:[%s16794_s25 + $0x220] sm:$0xfc]  ;;  %10234 = vmatprep.subr.mxu1 %v3549_v32 }
 0x151   :  { %v9452_v56 = vpop.f32.mrf.mxu0  ;;  %v9531_v23 = vpop.f32.mrf.mxu1  ;;  %v3150_v14 = vrot.slane %v8932_v41, 2  ;;  %10235 = vmatpush3.msra.mxu1 %v3549_v32 }
 0x152   :  { %v9453_v24 = vadd.f32 %v9452_v56, %v9451_v6  ;;  %v13735_v51 = vadd.f32 %v9530_v31, %v1147_v35  ;;  %v8943_v6 = vld [vmem:[%s16794_s25 + $0x248] sm:$0xfc]  ;;  %v8945_v35 = vld [vmem:[%s16794_s25 + $0x258] sm:$0x3]  ;;  %v3161_v56 = vrot.slane %v8938_v10, 2  ;;  %v3166_v11 = vsel %vm834_vm1, %v3164_v20, %v3165_v40 }
 0x153   :  { %v9454_v21 = vpop.f32.mrf.mxu0  ;;  %3353 = vmatmul.mubr.f32.gmra.mxu0 %v3139_v48  ;;  %v9532_v16 = vpop.f32.mrf.mxu1  ;;  %v3151_v59 = vsel %vm834_vm1, %v3149_v54, %v3150_v14  ;;  %v3170_v41 = vrot.slane %v8943_v6, 2 }
 0x154   :  { %v1148_v62 = vadd.f32 %v9453_v24, %v13417_v3  ;;  %3357 = vmatprep.mubr.f32.mxu0 %v3148_v28  ;;  %v9533_v9 = vadd.f32 %v9532_v16, %v9531_v23  ;;  %v8936_v3 = vld [vmem:[%s16794_s25 + $0x210] sm:$0x3]  ;;  %v3171_v24 = vrot.slane %v8945_v35, 2  ;;  %v8942_v23 = vld [vmem:[%s16794_s25 + $0x240] sm:$0xfc] }
 0x155   :  { %v9455_v1 = vpop.f32.mrf.mxu0  ;;  %v9534_v42 = vpop.f32.mrf.mxu1  ;;  %v3156_v0 = vrot.slane %v8936_v3, 2 }
 0x156   :  { %v9456_v19 = vadd.f32 %v9455_v1, %v9454_v21  ;;  %v13752_v45 = vadd.f32 %v9533_v9, %v1148_v62  ;;  %v8947_v21 = vld [vmem:[%s16794_s25 + $0x268] sm:$0xfc]  ;;  %v8949_v62 = vld [vmem:[%s16794_s25 + $0x278] sm:$0x3]  ;;  %v3167_v1 = vrot.slane %v8942_v23, 2  ;;  %v3172_v3 = vsel %vm834_vm1, %v3170_v41, %v3171_v24 }
 0x157   :  { %v9457_v61 = vpop.f32.mrf.mxu0  ;;  %3358 = vmatmul.mubr.f32.gmra.mxu0 %v3145_v13  ;;  %v9535_v43 = vpop.f32.mrf.mxu1  ;;  %v3157_v31 = vsel %vm834_vm1, %v3155_v39, %v3156_v0 }
 0x158   :  { %v1149_v25 = vadd.f32 %v9456_v19, %v13448_v44  ;;  %3362 = vmatprep.mubr.f32.mxu0 %v3154_v30  ;;  %v9536_v17 = vadd.f32 %v9535_v43, %v9534_v42  ;;  %v8940_v44 = vld [vmem:[%s16794_s25 + $0x230] sm:$0x3]  ;;  %v3176_v19 = vrot.slane %v8947_v21, 2  ;;  %v3177_v42 = vrot.slane %v8949_v62, 2  ;;  %v3547_v62 = vld [vmem:[%s16769_s4 + $0x68] sm:$0xff] }
 0x159   :  { %v9458_v33 = vpop.f32.mrf.mxu0  ;;  %v9537_v49 = vpop.f32.mrf.mxu1  ;;  %v3162_v28 = vrot.slane %v8940_v44, 2 }
 0x15a   :  { %v9459_v52 = vadd.f32 %v9458_v33, %v9457_v61  ;;  %v13769_v50 = vadd.f32 %v9536_v17, %v1149_v25  ;;  %v3174_v33 = vrot.slane %v8948_v63, 2  ;;  %v3178_v40 = vsel %vm834_vm1, %v3176_v19, %v3177_v42  ;;  %v3957_v42 = vld [vmem:[%s16769_s4 + $0xa8] sm:$0xff] }
 0x15b   :  { %v9460_v48 = vpop.f32.mrf.mxu0  ;;  %3363 = vmatmul.mubr.f32.gmra.mxu0 %v3151_v59  ;;  %v9538_v53 = vpop.f32.mrf.mxu1  ;;  %v3163_v9 = vsel %vm834_vm1, %v3161_v56, %v3162_v28 }
 0x15c   :  { %v1150_v57 = vadd.f32 %v9459_v52, %v13473_v5  ;;  %3367 = vmatprep.mubr.f32.mxu0 %v3160_v46  ;;  %v9539_v4 = vadd.f32 %v9538_v53, %v9537_v49  ;;  %v8944_v5 = vld [vmem:[%s16794_s25 + $0x250] sm:$0x3] }
 0x15d   :  { %v9461_v29 = vpop.f32.mrf.mxu0  ;;  %v9540_v7 = vpop.f32.mrf.mxu1  ;;  %v3168_v30 = vrot.slane %v8944_v5, 2 }
 0x15e   :  { %v9462_v58 = vadd.f32 %v9461_v29, %v9460_v48  ;;  %v13786_v16 = vadd.f32 %v9539_v4, %v1150_v57  ;;  %v3548_v48 = vld [vmem:[%s16769_s4 + $0x70] sm:$0xff] }
 0x15f   :  { %v9463_v13 = vpop.f32.mrf.mxu0  ;;  %3368 = vmatmul.mubr.f32.gmra.mxu0 %v3157_v31  ;;  %v9541_v14 = vpop.f32.mrf.mxu1  ;;  %v3169_v0 = vsel %vm834_vm1, %v3167_v1, %v3168_v30  ;;  %10236 = vmatprep.subr.mxu1 %v3548_v48 }
 0x160   :  { %v1151_v54 = vadd.f32 %v9462_v58, %v13492_v60  ;;  %3372 = vmatprep.mubr.f32.mxu0 %v3166_v11  ;;  %v9542_v47 = vadd.f32 %v9541_v14, %v9540_v7  ;;  %v8946_v60 = vld [vmem:[%s16794_s25 + $0x260] sm:$0xfc]  ;;  %10237 = vmatpush3.msra.mxu1 %v3548_v48 }
 0x161   :  { %v9464_v27 = vpop.f32.mrf.mxu0  ;;  %v9543_v61 = vpop.f32.mrf.mxu1  ;;  %v3173_v17 = vrot.slane %v8946_v60, 2  ;;  %10238 = vmatprep.subr.mxu1 %v3547_v62 }
 0x162   :  { %v9465_v15 = vadd.f32 %v9464_v27, %v9463_v13  ;;  %v13800_v25 = vadd.f32 %v9542_v47, %v1151_v54  ;;  %10239 = vmatpush3.msra.mxu1 %v3547_v62  ;;  %v3958_v47 = vld [vmem:[%s16769_s4 + $0xb0] sm:$0xff] }
 0x163   :  { %v9466_v43 = vpop.f32.mrf.mxu0  ;;  %3373 = vmatmul.mubr.f32.gmra.mxu0 %v3163_v9  ;;  %v9544_v39 = vpop.f32.mrf.mxu1  ;;  %v3959_v9 = vld [vmem:[%s16769_s4 + $0xb8] sm:$0xff] }
 0x164   :  { %v1152_v59 = vadd.f32 %v9465_v15, %v13524_v2  ;;  %3377 = vmatprep.mubr.f32.mxu0 %v3172_v3  ;;  %v9545_v46 = vadd.f32 %v9544_v39, %v9543_v61  ;;  %v3175_v2 = vsel %vm834_vm1, %v3173_v17, %v3174_v33  ;;  %10314 = vmatprep.subr.mxu0 %v3959_v9  ;;  %v3546_v15 = vld [vmem:[%s16769_s4 + $0x60] sm:$0xff]  ;;  %v3955_v17 = vld [vmem:[%s16769_s4 + $0x98] sm:$0xff]  ;;  %vm8202_vm1 = vcmask 1044480  }
 0x165   :  { %v9467_v20 = vpop.f32.mrf.mxu0  ;;  %v9546_v44 = vpop.f32.mrf.mxu1  ;;  %10315 = vmatpush3.msra.mxu0 %v3959_v9  ;;  %v3956_v61 = vld [vmem:[%s16769_s4 + $0xa0] sm:$0xff]  ;;  %10240 = vmatprep.subr.mxu1 %v3546_v15 }
 0x166   :  { %v9468_v10 = vadd.f32 %v9467_v20, %v9466_v43  ;;  %v13805_v52 = vadd.f32 %v9545_v46, %v1152_v59  ;;  %10316 = vmatprep.subr.mxu0 %v3958_v47  ;;  %v16787_v59 = vmov 0.0   ;;  %10241 = vmatpush3.msra.mxu1 %v3546_v15 }
 0x167   :  { %v9469_v49 = vpop.f32.mrf.mxu0  ;;  %3378 = vmatmul.mubr.f32.gmra.mxu0 %v3169_v0  ;;  %v9547_v35 = vpop.f32.mrf.mxu1  ;;  %3447 = vst.msk [vmem:[#allocation2 + $0x10] sm:$0xff] %vm3443_vm2, %v16787_v59  ;;  %3444 = vst.msk [vmem:[#allocation2] sm:$0xff] %vm3443_vm2, %v16787_v59  ;;  %v3545_v0 = vld [vmem:[%s16769_s4 + $0x58] sm:$0xff] }
 0x168   :  { %v1153_v6 = vadd.f32 %v9468_v10, %v13548_v8  ;;  %3382 = vmatprep.mubr.f32.mxu0 %v3178_v40  ;;  %v9548_v57 = vadd.f32 %v9547_v35, %v9546_v44  ;;  %10317 = vmatpush3.msra.mxu0 %v3958_v47  ;;  %3448 = vst.msk [vmem:[#allocation2 + $0x18] sm:$0x3] %vm3445_vm3, %v16787_v59  ;;  %3446 = vst.msk [vmem:[#allocation2 + $0x8] sm:$0x3] %vm3445_vm3, %v16787_v59  ;;  %v3544_v40 = vld [vmem:[%s16769_s4 + $0x50] sm:$0xff]  ;;  %v3953_v35 = vld [vmem:[%s16769_s4 + $0x88] sm:$0xff] }
 0x169   :  { %v9470_v53 = vpop.f32.mrf.mxu0  ;;  %v9549_v56 = vpop.f32.mrf.mxu1  ;;  %10318 = vmatprep.subr.mxu0 %v3957_v42  ;;  %3449 = vst.msk [vmem:[#allocation2 + $0x20] sm:$0xff] %vm3443_vm2, %v16787_v59  ;;  %3451 = vst.msk [vmem:[#allocation2 + $0x30] sm:$0xff] %vm3443_vm2, %v16787_v59  ;;  %10242 = vmatprep.subr.mxu1 %v3545_v0  ;;  %v3954_v10 = vld [vmem:[%s16769_s4 + $0x90] sm:$0xff] }
 0x16a   :  { %v9471_v31 = vadd.f32 %v9470_v53, %v9469_v49  ;;  %v13812_v28 = vadd.f32 %v9548_v57, %v1153_v6  ;;  %10319 = vmatpush3.msra.mxu0 %v3957_v42  ;;  %3450 = vst.msk [vmem:[#allocation2 + $0x28] sm:$0x3] %vm3445_vm3, %v16787_v59  ;;  %3452 = vst.msk [vmem:[#allocation2 + $0x38] sm:$0x3] %vm3445_vm3, %v16787_v59  ;;  %10243 = vmatpush3.msra.mxu1 %v3545_v0  ;;  %v3542_v53 = vld [vmem:[%s16769_s4 + $0x40] sm:$0xff] }
 0x16b   :  { %v9472_v4 = vpop.f32.mrf.mxu0  ;;  %3383 = vmatmul.mubr.f32.gmra.mxu0 %v3175_v2  ;;  %v9550_v29 = vpop.f32.mrf.mxu1  ;;  %3453 = vst.msk [vmem:[#allocation2 + $0x40] sm:$0xff] %vm3443_vm2, %v16787_v59  ;;  %3455 = vst.msk [vmem:[#allocation2 + $0x50] sm:$0xff] %vm3443_vm2, %v16787_v59  ;;  %10320 = vmatprep.subr.mxu0 %v3956_v61 }
 0x16c   :  { %v1154_v8 = vadd.f32 %v9471_v31, %v13568_v12  ;;  %v9551_v11 = vadd.f32 %v9550_v29, %v9549_v56  ;;  %3454 = vst.msk [vmem:[#allocation2 + $0x48] sm:$0x3] %vm3445_vm3, %v16787_v59  ;;  %3456 = vst.msk [vmem:[#allocation2 + $0x58] sm:$0x3] %vm3445_vm3, %v16787_v59  ;;  %10321 = vmatpush3.msra.mxu0 %v3956_v61  ;;  %10244 = vmatprep.subr.mxu1 %v3544_v40  ;;  %v3952_v31 = vld [vmem:[%s16769_s4 + $0x80] sm:$0xff] }
 0x16d   :  { %v9473_v41 = vpop.f32.mrf.mxu0  ;;  %v9552_v23 = vpop.f32.mrf.mxu1  ;;  %3457 = vst.msk [vmem:[#allocation2 + $0x60] sm:$0xff] %vm3443_vm2, %v16787_v59  ;;  %3459 = vst.msk [vmem:[#allocation2 + $0x70] sm:$0xff] %vm3443_vm2, %v16787_v59  ;;  %10322 = vmatprep.subr.mxu0 %v3955_v17  ;;  %10245 = vmatpush3.msra.mxu1 %v3544_v40 }
 0x16e   :  { %v9474_v24 = vadd.f32 %v9473_v41, %v9472_v4  ;;  %v13815_v5 = vadd.f32 %v9551_v11, %v1154_v8  ;;  %3458 = vst.msk [vmem:[#allocation2 + $0x68] sm:$0x3] %vm3445_vm3, %v16787_v59  ;;  %3460 = vst.msk [vmem:[#allocation2 + $0x78] sm:$0x3] %vm3445_vm3, %v16787_v59  ;;  %10323 = vmatpush3.msra.mxu0 %v3955_v17 }
 0x16f   :  { %v9587_v58 = vpop.f32.mrf.mxu0  ;;  %v9553_v21 = vpop.f32.mrf.mxu1  ;;  %3461 = vst.msk [vmem:[#allocation2 + $0x80] sm:$0xff] %vm3443_vm2, %v16787_v59  ;;  %3463 = vst.msk [vmem:[#allocation2 + $0x90] sm:$0xff] %vm3443_vm2, %v16787_v59  ;;  %10324 = vmatprep.subr.mxu0 %v3954_v10  ;;  %v3526_v4 = vld [vmem:[#allocation2 + $0x1] sm:$0xff] }
 0x170   :  { %v1155_v7 = vadd.f32 %v9474_v24, %v13585_v22  ;;  %v9554_v13 = vadd.f32 %v9553_v21, %v9552_v23  ;;  %3462 = vst.msk [vmem:[#allocation2 + $0x88] sm:$0x3] %vm3445_vm3, %v16787_v59  ;;  %3464 = vst.msk [vmem:[#allocation2 + $0x98] sm:$0x3] %vm3445_vm3, %v16787_v59  ;;  %10325 = vmatpush3.msra.mxu0 %v3954_v10  ;;  %v3936_v8 = vld [vmem:[#allocation2 + $0x2] sm:$0xff]  ;;  %10250 = vmatprep.mubr.msk.f32.mxu1 %vm3443_vm2, %v3526_v4 }
 0x171   :  { %v9588_v54 = vpop.f32.mrf.mxu0  ;;  %v13821_v12 = vpop.f32.mrf.mxu1  ;;  %3465 = vst.msk [vmem:[#allocation2 + $0xa0] sm:$0xff] %vm3443_vm2, %v16787_v59  ;;  %3467 = vst.msk [vmem:[#allocation2 + $0xb0] sm:$0xff] %vm3443_vm2, %v16787_v59  ;;  %10326 = vmatprep.subr.mxu0 %v3953_v35  ;;  %10330 = vmatprep.mubr.msk.f32.mxu0 %vm3443_vm2, %v3936_v8 }
 0x172   :  { %v9589_v14 = vadd.f32 %v9588_v54, %v9587_v58  ;;  %v13826_v1 = vadd.f32 %v9554_v13, %v1155_v7  ;;  %3466 = vst.msk [vmem:[#allocation2 + $0xa8] sm:$0x3] %vm3445_vm3, %v16787_v59  ;;  %3468 = vst.msk [vmem:[#allocation2 + $0xb8] sm:$0x3] %vm3445_vm3, %v16787_v59  ;;  %10327 = vmatpush3.msra.mxu0 %v3953_v35 }
 0x173   :  { %v9590_v30 = vpop.f32.mrf.mxu0  ;;  %v13831_v32 = vpop.f32.mrf.mxu1  ;;  %3469 = vst.msk [vmem:[#allocation2 + $0xc0] sm:$0xff] %vm3443_vm2, %v16787_v59  ;;  %3471 = vst.msk [vmem:[#allocation2 + $0xd0] sm:$0xff] %vm3443_vm2, %v16787_v59  ;;  %10328 = vmatprep.subr.mxu0 %v3952_v31 }
 0x174   :  { %v13829_v22 = vadd.f32 %v9589_v14, %v13616_v36  ;;  %3470 = vst.msk [vmem:[#allocation2 + $0xc8] sm:$0x3] %vm3445_vm3, %v16787_v59  ;;  %3472 = vst.msk [vmem:[#allocation2 + $0xd8] sm:$0x3] %vm3445_vm3, %v16787_v59  ;;  %10329 = vmatpush3.msra.mxu0 %v3952_v31 }
 0x175   :  { %v9591_v27 = vpop.f32.mrf.mxu0  ;;  %v13836_v19 = vpop.f32.mrf.mxu1  ;;  %3473 = vst.msk [vmem:[#allocation2 + $0xe0] sm:$0xff] %vm3443_vm2, %v16787_v59  ;;  %3475 = vst.msk [vmem:[#allocation2 + $0xf0] sm:$0xff] %vm3443_vm2, %v16787_v59 }
 0x176   :  { %v9592_v3 = vadd.f32 %v9591_v27, %v9590_v30  ;;  %3474 = vst.msk [vmem:[#allocation2 + $0xe8] sm:$0x3] %vm3445_vm3, %v16787_v59  ;;  %3476 = vst.msk [vmem:[#allocation2 + $0xf8] sm:$0x3] %vm3445_vm3, %v16787_v59 }
 0x177   :  { %v9593_v60 = vpop.f32.mrf.mxu0  ;;  %v13844_v63 = vpop.f32.mrf.mxu1  ;;  %3477 = vst.msk [vmem:[#allocation2 + $0x100] sm:$0xff] %vm3443_vm2, %v16787_v59  ;;  %3479 = vst.msk [vmem:[#allocation2 + $0x110] sm:$0xff] %vm3443_vm2, %v16787_v59 }
 0x178   :  { %v13842_v36 = vadd.f32 %v9592_v3, %v13633_v38  ;;  %3478 = vst.msk [vmem:[#allocation2 + $0x108] sm:$0x3] %vm3445_vm3, %v16787_v59  ;;  %3480 = vst.msk [vmem:[#allocation2 + $0x118] sm:$0x3] %vm3445_vm3, %v16787_v59 }
 0x179   :  { %v9594_v43 = vpop.f32.mrf.mxu0  ;;  %3481 = vst.msk [vmem:[#allocation2 + $0x120] sm:$0xff] %vm3443_vm2, %v16787_v59  ;;  %3483 = vst.msk [vmem:[#allocation2 + $0x130] sm:$0xff] %vm3443_vm2, %v16787_v59  ;;  %v13932_v39 = vpop.f32.mrf.mxu1 }
 0x17a   :  { %3482 = vst.msk [vmem:[#allocation2 + $0x128] sm:$0x3] %vm3445_vm3, %v16787_v59  ;;  %3484 = vst.msk [vmem:[#allocation2 + $0x138] sm:$0x3] %vm3445_vm3, %v16787_v59  ;;  %v9595_v38 = vadd.f32 %v9594_v43, %v9593_v60  ;;  %vm8198_vm3 = vcmask 39936  }
 0x17b   :  { %v9596_v33 = vpop.f32.mrf.mxu0  ;;  %v13943_v20 = vpop.f32.mrf.mxu1 }
 0x17c   :  { %v13941_v46 = vadd.f32 %v9595_v38, %v13650_v55  ;;  %v3543_v55 = vld [vmem:[%s16769_s4 + $0x48] sm:$0xff] }
 0x17d   :  { %v9597_v44 = vpop.f32.mrf.mxu0  ;;  %v13951_v6 = vpop.f32.mrf.mxu1  ;;  %10246 = vmatprep.subr.mxu1 %v3543_v55 }
 0x17e   :  { %v9598_v49 = vadd.f32 %v9597_v44, %v9596_v33  ;;  %10247 = vmatpush3.msra.mxu1 %v3543_v55 }
 0x17f   :  { %v9599_v2 = vpop.f32.mrf.mxu0  ;;  %v13962_v57 = vpop.f32.mrf.mxu1  ;;  %10248 = vmatprep.subr.mxu1 %v3542_v53 }
 0x180   :  { %v13960_v48 = vadd.f32 %v9598_v49, %v13667_v18  ;;  %10249 = vmatpush3.msra.mxu1 %v3542_v53 }
 0x181   :  { %v9600_v56 = vpop.f32.mrf.mxu0  ;;  %v13970_v18 = vpop.f32.mrf.mxu1 }
 0x182   :  { %v9601_v29 = vadd.f32 %v9600_v56, %v9599_v2 }
 0x183   :  { %v9602_v11 = vpop.f32.mrf.mxu0  ;;  %v13977_v24 = vpop.f32.mrf.mxu1 }
 0x184   :  { %v13975_v41 = vadd.f32 %v9601_v29, %v13684_v37 }
 0x185   :  { %v9603_v23 = vpop.f32.mrf.mxu0  ;;  %v13979_v7 = vpop.f32.mrf.mxu1 }
 0x186   :  { %v9604_v58 = vadd.f32 %v9603_v23, %v9602_v11 }
 0x187   :  { %v9605_v21 = vpop.f32.mrf.mxu0  ;;  %v13984_v13 = vpop.f32.mrf.mxu1 }
 0x188   :  { %v13982_v62 = vadd.f32 %v9604_v58, %v13701_v26 }
 0x189   :  { %v9606_v54 = vpop.f32.mrf.mxu0  ;;  %v13986_v9 = vpop.f32.mrf.mxu1 }
 0x18a   :  { %v9607_v14 = vadd.f32 %v9606_v54, %v9605_v21 }
 0x18b   :  { %v9608_v30 = vpop.f32.mrf.mxu0  ;;  %v13991_v47 = vpop.f32.mrf.mxu1 }
 0x18c   :  { %v13989_v37 = vadd.f32 %v9607_v14, %v13718_v34 }
 0x18d   :  { %v9609_v27 = vpop.f32.mrf.mxu0  ;;  %v13993_v42 = vpop.f32.mrf.mxu1 }
 0x18e   :  { %v9610_v3 = vadd.f32 %v9609_v27, %v9608_v30 }
 0x18f   :  { %v9611_v60 = vpop.f32.mrf.mxu0  ;;  %v13998_v15 = vpop.f32.mrf.mxu1 }
 0x190   :  { %v13996_v26 = vadd.f32 %v9610_v3, %v13735_v51 }
 0x191   :  { %v9612_v61 = vpop.f32.mrf.mxu0  ;;  %v14000_v38 = vpop.f32.mrf.mxu1 }
 0x192   :  { %16795 = vst [vmem:[#allocation8_spill] sm:$0xff] %v13996_v26  ;;  %v9613_v43 = vadd.f32 %v9612_v61, %v9611_v60  ;;  %16796 = vst [vmem:[#allocation9_spill] sm:$0xff] %v14000_v38 }
 0x193   :  { %v9614_v0 = vpop.f32.mrf.mxu0  ;;  %v14005_v17 = vpop.f32.mrf.mxu1 }
 0x194   :  { %v14003_v34 = vadd.f32 %v9613_v43, %v13752_v45  ;;  %16798 = vst [vmem:[#allocation11_spill] sm:$0xff] %v14005_v17 }
 0x195   :  { %v9615_v33 = vpop.f32.mrf.mxu0  ;;  %v14007_v10 = vpop.f32.mrf.mxu1 }
 0x196   :  { %16797 = vst [vmem:[#allocation10_spill] sm:$0xff] %v14003_v34  ;;  %v9616_v40 = vadd.f32 %v9615_v33, %v9614_v0  ;;  %16799 = vst [vmem:[#allocation12_spill] sm:$0xff] %v14007_v10 }
 0x197   :  { %v9617_v44 = vpop.f32.mrf.mxu0  ;;  %v14012_v49 = vpop.f32.mrf.mxu1 }
 0x198   :  { %v14010_v51 = vadd.f32 %v9616_v40, %v13769_v50  ;;  %16801 = vst [vmem:[#allocation14_spill] sm:$0xff] %v14012_v49 }
 0x199   :  { %v9618_v55 = vpop.f32.mrf.mxu0  ;;  %v14014_v2 = vpop.f32.mrf.mxu1 }
 0x19a   :  { %16800 = vst [vmem:[#allocation13_spill] sm:$0xff] %v14010_v51  ;;  %v9619_v35 = vadd.f32 %v9618_v55, %v9617_v44  ;;  %16802 = vst [vmem:[#allocation15_spill] sm:$0xff] %v14014_v2 }
 0x19b   :  { %v9620_v53 = vpop.f32.mrf.mxu0  ;;  %v14019_v31 = vpop.f32.mrf.mxu1 }
 0x19c   :  { %v14017_v45 = vadd.f32 %v9619_v35, %v13786_v16  ;;  %16804 = vst [vmem:[#allocation17_spill] sm:$0xff] %v14019_v31 }
 0x19d   :  { %v9621_v56 = vpop.f32.mrf.mxu0  ;;  %v14021_v8 = vpop.f32.mrf.mxu1 }
 0x19e   :  { %16803 = vst [vmem:[#allocation16_spill] sm:$0xff] %v14017_v45  ;;  %v9622_v4 = vadd.f32 %v9621_v56, %v9620_v53  ;;  %16805 = vst [vmem:[#allocation18_spill] sm:$0xff] %v14021_v8 }
 0x19f   :  { %v9623_v29 = vpop.f32.mrf.mxu0  ;;  %v14026_v11 = vpop.f32.mrf.mxu1 }
 0x1a0   :  { %v14024_v50 = vadd.f32 %v9622_v4, %v13800_v25  ;;  %16807 = vst [vmem:[#allocation20_spill] sm:$0xff] %v14026_v11  ;;  %v14040_v25 = vld [vmem:[%s16769_s4 + $0x38] sm:$0xff] }
 0x1a1   :  { %v9624_v23 = vpop.f32.mrf.mxu0  ;;  %v14028_v21 = vpop.f32.mrf.mxu1  ;;  %10274 = vmatprep.subr.mxu1 %v14040_v25 }
 0x1a2   :  { %16806 = vst [vmem:[#allocation19_spill] sm:$0xff] %v14024_v50  ;;  %v9625_v58 = vadd.f32 %v9624_v23, %v9623_v29  ;;  %16808 = vst [vmem:[#allocation21_spill] sm:$0xff] %v14028_v21 }
 0x1a3   :  { %v9626_v54 = vpop.f32.mrf.mxu0  ;;  %v14033_v14 = vpop.f32.mrf.mxu1 }
 0x1a4   :  { %v14031_v16 = vadd.f32 %v9625_v58, %v13805_v52  ;;  %16810 = vst [vmem:[#allocation23_spill] sm:$0xff] %v14033_v14 }
 0x1a5   :  { %v9627_v30 = vpop.f32.mrf.mxu0  ;;  %v14035_v3 = vpop.f32.mrf.mxu1 }
 0x1a6   :  { %16809 = vst [vmem:[#allocation22_spill] sm:$0xff] %v14031_v16  ;;  %v9628_v27 = vadd.f32 %v9627_v30, %v9626_v54  ;;  %16811 = vst [vmem:[#allocation24_spill] sm:$0xff] %v14035_v3 }
 0x1a7   :  { %v9629_v60 = vpop.f32.mrf.mxu0  ;;  %v14046_v43 = vpop.f32.mrf.mxu1 }
 0x1a8   :  { %v14044_v61 = vadd.f32 %v9628_v27, %v13812_v28  ;;  %16813 = vst [vmem:[#allocation26_spill] sm:$0xff] %v14046_v43  ;;  %v14060_v28 = vld [vmem:[%s16769_s4 + $0x138] sm:$0xff] }
 0x1a9   :  { %v9630_v52 = vpop.f32.mrf.mxu0  ;;  %10394 = vmatprep.subr.mxu0 %v14060_v28 }
 0x1aa   :  { %16812 = vst [vmem:[#allocation25_spill] sm:$0xff] %v14044_v61  ;;  %v9631_v0 = vadd.f32 %v9630_v52, %v9629_v60  ;;  %v14048_v33 = vpop.f32.mrf.mxu1 }
 0x1ab   :  { %16814 = vst [vmem:[#allocation27_spill] sm:$0xff] %v14048_v33  ;;  %v9632_v40 = vpop.f32.mrf.mxu0 }
 0x1ac   :  { %v14051_v44 = vadd.f32 %v9631_v0, %v13815_v5  ;;  %v14053_v55 = vpop.f32.mrf.mxu1 }
 0x1ad   :  { %16816 = vst [vmem:[#allocation29_spill] sm:$0xff] %v14053_v55  ;;  %v9633_v35 = vpop.f32.mrf.mxu0 }
 0x1ae   :  { %16815 = vst [vmem:[#allocation28_spill] sm:$0xff] %v14051_v44  ;;  %v9634_v53 = vadd.f32 %v9633_v35, %v9632_v40  ;;  %v14055_v56 = vpop.f32.mrf.mxu1 }
 0x1af   :  { %16817 = vst [vmem:[#allocation30_spill] sm:$0xff] %v14055_v56  ;;  %v9747_v4 = vpop.f32.mrf.mxu0 }
 0x1b0   :  { %v14064_v29 = vadd.f32 %v9634_v53, %v13826_v1  ;;  %v14066_v23 = vpop.f32.mrf.mxu1 }
 0x1b1   :  { %16819 = vst [vmem:[#allocation32_spill] sm:$0xff] %v14066_v23  ;;  %v9748_v5 = vpop.f32.mrf.mxu0 }
 0x1b2   :  { %16818 = vst [vmem:[#allocation31_spill] sm:$0xff] %v14064_v29  ;;  %v9827_v58 = vpop.f32.mrf.mxu1 }
 0x1b3   :  { %v9750_v54 = vpop.f32.mrf.mxu0 }
 0x1b4   :  { %v9828_v30 = vpop.f32.mrf.mxu1 }
 0x1b5   :  { %v9751_v27 = vpop.f32.mrf.mxu0 }
 0x1b6   :  { %v9830_v60 = vpop.f32.mrf.mxu1 }
 0x1b7   :  { %v9753_v52 = vpop.f32.mrf.mxu0 }
 0x1b8   :  { %v9831_v0 = vpop.f32.mrf.mxu1 }
 0x1b9   :  { %v9754_v40 = vpop.f32.mrf.mxu0 }
 0x1ba   :  { %v14068_v35 = vpop.f32.mrf.mxu1 }
 0x1bb   :  { %v14070_v59 = vpop.f32.mrf.mxu0 }
 0x1bc   :  { %v9834_v44 = vpop.f32.mrf.mxu1 }
 0x1bd   :  { %v14072_v56 = vpop.f32.mrf.mxu0 }
 0x1be   :  { %v14078_v29 = vpop.f32.mrf.mxu1 }
 0x1bf   :  { %v14074_v1 = vpop.f32.mrf.mxu0 }
 0x1c0   :  { %v14084_v33 = vpop.f32.mrf.mxu1 }
 0x1c1   :  { %v14076_v53 = vpop.f32.mrf.mxu0 }
 0x1c2   :  { %v14090_v3 = vpop.f32.mrf.mxu1 }
 0x1c3   :  { %v14080_v23 = vpop.f32.mrf.mxu0 }
 0x1c4   :  { %v14096_v21 = vpop.f32.mrf.mxu1 }
 0x1c5   :  { %v14082_v55 = vpop.f32.mrf.mxu0 }
 0x1c6   :  { %v14102_v8 = vpop.f32.mrf.mxu1 }
 0x1c7   :  { %v14086_v61 = vpop.f32.mrf.mxu0 }
 0x1c8   :  { %v14108_v2 = vpop.f32.mrf.mxu1 }
 0x1c9   :  { %v14088_v43 = vpop.f32.mrf.mxu0 }
 0x1ca   :  { %v14114_v10 = vpop.f32.mrf.mxu1 }
 0x1cb   :  { %v14092_v16 = vpop.f32.mrf.mxu0 }
 0x1cc   :  { %16820 = vst [vmem:[#allocation33_spill] sm:$0xff] %v14092_v16 }
 0x1cd   :  { %v14094_v14 = vpop.f32.mrf.mxu0 }
 0x1ce   :  { %16821 = vst [vmem:[#allocation34_spill] sm:$0xff] %v14094_v14  ;;  %v9749_v14 = vadd.f32 %v9748_v5, %v9747_v4 }
 0x1cf   :  { %v14098_v50 = vpop.f32.mrf.mxu0 }
 0x1d0   :  { %16822 = vst [vmem:[#allocation35_spill] sm:$0xff] %v14098_v50  ;;  %v14120_v50 = vpop.f32.mrf.mxu1 }
 0x1d1   :  { %v14100_v11 = vpop.f32.mrf.mxu0  ;;  %16830 = vst [vmem:[#allocation43_spill] sm:$0xff] %v14120_v50 }
 0x1d2   :  { %16823 = vst [vmem:[#allocation36_spill] sm:$0xff] %v14100_v11 }
 0x1d3   :  { %v14104_v45 = vpop.f32.mrf.mxu0 }
 0x1d4   :  { %16824 = vst [vmem:[#allocation37_spill] sm:$0xff] %v14104_v45  ;;  %v14126_v45 = vpop.f32.mrf.mxu1 }
 0x1d5   :  { %v14106_v31 = vpop.f32.mrf.mxu0  ;;  %16833 = vst [vmem:[#allocation46_spill] sm:$0xff] %v14126_v45  ;;  %v9829_v45 = vadd.f32 %v9828_v30, %v9827_v58  ;;  %v9681_v58 = vadd.f32 %v13977_v24, %v13970_v18 }
 0x1d6   :  { %16825 = vst [vmem:[#allocation38_spill] sm:$0xff] %v14106_v31 }
 0x1d7   :  { %v14110_v51 = vpop.f32.mrf.mxu0 }
 0x1d8   :  { %16826 = vst [vmem:[#allocation39_spill] sm:$0xff] %v14110_v51  ;;  %v14132_v51 = vpop.f32.mrf.mxu1 }
 0x1d9   :  { %v14112_v49 = vpop.f32.mrf.mxu0  ;;  %16836 = vst [vmem:[#allocation49_spill] sm:$0xff] %v14132_v51 }
 0x1da   :  { %16827 = vst [vmem:[#allocation40_spill] sm:$0xff] %v14112_v49  ;;  %v14140_v16 = vpop.f32.mrf.mxu1 }
 0x1db   :  { %v14116_v34 = vpop.f32.mrf.mxu0  ;;  %16839 = vst [vmem:[#allocation52_spill] sm:$0xff] %v14140_v16 }
 0x1dc   :  { %16828 = vst [vmem:[#allocation41_spill] sm:$0xff] %v14116_v34  ;;  %v9669_v34 = vadd.f32 %v13831_v32, %v13821_v12  ;;  %v9675_v12 = vadd.f32 %v13943_v20, %v13932_v39  ;;  %v14151_v32 = vpop.f32.mrf.mxu1  ;;  %v9678_v20 = vadd.f32 %v13962_v57, %v13951_v6 }
 0x1dd   :  { %v14118_v17 = vpop.f32.mrf.mxu0 }
 0x1de   :  { %16829 = vst [vmem:[#allocation42_spill] sm:$0xff] %v14118_v17  ;;  %v2267_v6 = vadd.f32 %v9678_v20, %v13960_v48  ;;  %v9684_v48 = vadd.f32 %v13984_v13, %v13979_v7  ;;  %v9687_v13 = vadd.f32 %v13991_v47, %v13986_v9  ;;  %v4424_v9 = vld [vmem:[%s16769_s4 + $0x130] sm:$0xff]  ;;  %v9844_v47 = vadd.f32 %v14108_v2, %v14102_v8 }
 0x1df   :  { %v14122_v11 = vpop.f32.mrf.mxu0 }
 0x1e0   :  { %16831 = vst [vmem:[#allocation44_spill] sm:$0xff] %v14122_v11  ;;  %v2269_v7 = vadd.f32 %v9684_v48, %v13982_v62 }
 0x1e1   :  { %v14124_v38 = vpop.f32.mrf.mxu0 }
 0x1e2   :  { %16832 = vst [vmem:[#allocation45_spill] sm:$0xff] %v14124_v38  ;;  %v2264_v38 = vadd.f32 %v9669_v34, %v13829_v22  ;;  %v9832_v34 = vadd.f32 %v9831_v0, %v9830_v60 }
 0x1e3   :  { %v14128_v31 = vpop.f32.mrf.mxu0 }
 0x1e4   :  { %16834 = vst [vmem:[#allocation47_spill] sm:$0xff] %v14128_v31  ;;  %v9672_v31 = vadd.f32 %v13844_v63, %v13836_v19  ;;  %v2490_v51 = vadd.f32 %v9749_v14, %v2264_v38  ;;  %v2266_v19 = vadd.f32 %v9675_v12, %v13941_v46  ;;  %v14155_v63 = vpop.f32.mrf.mxu1  ;;  %v14160_v38 = vld [vmem:[%s16841_s28] ss:$0 sm:$0xff]  ;;  %v9758_v46 = vadd.f32 %v14072_v56, %v14070_v59 }
 0x1e5   :  { %v14130_v26 = vpop.f32.mrf.mxu0  ;;  %v9838_v59 = vadd.f32 %v14084_v33, %v14078_v29  ;;  %v2268_v56 = vadd.f32 %v9681_v58, %v13975_v41  ;;  %v9764_v33 = vadd.f32 %v14082_v55, %v14080_v23 }
 0x1e6   :  { %16835 = vst [vmem:[#allocation48_spill] sm:$0xff] %v14130_v26  ;;  %v2265_v5 = vadd.f32 %v9672_v31, %v13842_v36  ;;  %v2939_v16 = vadd.f32 %v9829_v45, %v2490_v51  ;;  %v9835_v51 = vadd.f32 %v9834_v44, %v14068_v35 }
 0x1e7   :  { %v14134_v49 = vpop.f32.mrf.mxu0  ;;  %v2495_v23 = vadd.f32 %v9764_v33, %v2269_v7  ;;  %v16850_v7 = vld [vmem:[#allocation46_spill] sm:$0xff] }
 0x1e8   :  { %16837 = vst [vmem:[#allocation50_spill] sm:$0xff] %v14134_v49  ;;  %v9752_v49 = vadd.f32 %v9751_v27, %v9750_v54  ;;  %v14170_v54 = vpop.f32.mrf.mxu1  ;;  %v2493_v27 = vadd.f32 %v9758_v46, %v2267_v6  ;;  %v16843_v46 = vld [vmem:[#allocation33_spill] sm:$0xff] }
 0x1e9   :  { %v14138_v17 = vpop.f32.mrf.mxu0 }
 0x1ea   :  { %16838 = vst [vmem:[#allocation51_spill] sm:$0xff] %v14138_v17  ;;  %v9755_v17 = vadd.f32 %v9754_v40, %v9753_v52  ;;  %v2491_v22 = vadd.f32 %v9752_v49, %v2265_v5  ;;  %v14182_v60 = vpop.f32.mrf.mxu1 }
 0x1eb   :  { %v14142_v11 = vpop.f32.mrf.mxu0 }
 0x1ec   :  { %16840 = vst [vmem:[#allocation53_spill] sm:$0xff] %v14142_v11  ;;  %v2492_v31 = vadd.f32 %v9755_v17, %v2266_v19  ;;  %v2940_v45 = vadd.f32 %v9832_v34, %v2491_v22  ;;  %v9767_v34 = vadd.f32 %v14088_v43, %v14086_v61  ;;  %v2270_v61 = vadd.f32 %v9687_v13, %v13989_v37  ;;  %v4423_v37 = vld [vmem:[%s16769_s4 + $0x128] sm:$0xff]  ;;  %v16851_v13 = vld [vmem:[#allocation49_spill] sm:$0xff] }
 0x1ed   :  { %v14147_v26 = vpop.f32.mrf.mxu0  ;;  %v9690_v43 = vadd.f32 %v13998_v15, %v13993_v42  ;;  %v16842_v15 = vld [vmem:[#allocation43_spill] sm:$0xff] }
 0x1ee   :  { %v2496_v42 = vadd.f32 %v9767_v34, %v2270_v61  ;;  %v16854_v34 = vld [vmem:[#allocation14_spill] sm:$0xff]  ;;  %v3520_v61 = vld [vmem:[%s16769_s4 + $0x10] sm:$0xff] }
 0x1ef   :  { %v9907_v4 = vpop.f32.mrf.mxu0 }
 0x1f1   :  { %v9908_v11 = vpop.f32.mrf.mxu0 }
 0x1f2   :  { %v9909_v50 = vadd.f32 %v9908_v11, %v9907_v4  ;;  %v14193_v4 = vpop.f32.mrf.mxu1 }
 0x1f3   :  { %v9910_v39 = vpop.f32.mrf.mxu0 }
 0x1f4   :  { %v3388_v36 = vadd.f32 %v9909_v50, %v2939_v16  ;;  %v2941_v50 = vadd.f32 %v9835_v51, %v2492_v31  ;;  %v9761_v16 = vadd.f32 %v14076_v53, %v14074_v1  ;;  %v9841_v1 = vadd.f32 %v14096_v21, %v14090_v3  ;;  %v3524_v3 = vld [vmem:[%s16769_s4 + $0x30] sm:$0xff]  ;;  %v14218_v31 = vpop.f32.mrf.mxu1 }
 0x1f5   :  { %v9911_v49 = vpop.f32.mrf.mxu0  ;;  %v2942_v53 = vadd.f32 %v9838_v59, %v2493_v27  ;;  %v16847_v27 = vld [vmem:[#allocation11_spill] sm:$0xff] }
 0x1f6   :  { %v3411_v11 = vadd.f32 %v14160_v38, %v3388_v36  ;;  %v9912_v14 = vadd.f32 %v9911_v49, %v9910_v39  ;;  %v2494_v35 = vadd.f32 %v9761_v16, %v2268_v56  ;;  %v3523_v49 = vld [vmem:[%s16769_s4 + $0x28] sm:$0xff] }
 0x1f7   :  { %v9913_v30 = vpop.f32.mrf.mxu0 }
 0x1f8   :  { %v3427_v57 = vmax.f32 %v3411_v11, 0.0  ;;  %v3389_v17 = vadd.f32 %v9912_v14, %v2940_v45  ;;  %v2943_v55 = vadd.f32 %v9841_v1, %v2494_v35  ;;  %v9847_v45 = vadd.f32 %v16842_v15, %v14114_v10  ;;  %v3522_v10 = vld [vmem:[%s16769_s4 + $0x20] sm:$0xff]  ;;  %v16848_v35 = vld [vmem:[#allocation35_spill] sm:$0xff]  ;;  %v16849_v1 = vld [vmem:[#allocation36_spill] sm:$0xff] }
 0x1f9   :  { %v9914_v44 = vpop.f32.mrf.mxu0  ;;  %v9773_v33 = vadd.f32 %v16849_v1, %v16848_v35 }
 0x1fa   :  { %3486 = vst.msk [vmem:[#allocation2 + $0x11] sm:$0xff] %vm3443_vm2, %v3427_v57  ;;  %v3412_v18 = vadd.f32 %v14160_v38, %v3389_v17  ;;  %v9915_v24 = vadd.f32 %v9914_v44, %v9913_v30  ;;  %v2944_v30 = vadd.f32 %v9844_v47, %v2495_v23  ;;  %v4422_v17 = vld [vmem:[%s16769_s4 + $0x120] sm:$0xff]  ;;  %v16853_v23 = vld [vmem:[#allocation12_spill] sm:$0xff] }
 0x1fb   :  { %v9916_v52 = vpop.f32.mrf.mxu0  ;;  %v16846_v44 = vld [vmem:[#allocation9_spill] sm:$0xff] }
 0x1fc   :  { %v3428_v0 = vmax.f32 %v3412_v18, 0.0  ;;  %v3390_v40 = vadd.f32 %v9915_v24, %v2941_v50  ;;  %v16845_v50 = vld [vmem:[#allocation8_spill] sm:$0xff]  ;;  %v9693_v59 = vadd.f32 %v16847_v27, %v16846_v44  ;;  %v14251_v18 = vpop.f32.mrf.mxu1 }
 0x1fd   :  { %v9917_v29 = vpop.f32.mrf.mxu0  ;;  %v2271_v16 = vadd.f32 %v9690_v43, %v16845_v50  ;;  %v4420_v43 = vld [vmem:[%s16769_s4 + $0x110] sm:$0xff] }
 0x1fe   :  { %3487 = vst.msk [vmem:[#allocation2 + $0x21] sm:$0xff] %vm3443_vm2, %v3428_v0  ;;  %v3413_v41 = vadd.f32 %v14160_v38, %v3390_v40  ;;  %v9918_v12 = vadd.f32 %v9917_v29, %v9916_v52  ;;  %v3521_v52 = vld [vmem:[%s16769_s4 + $0x18] sm:$0xff]  ;;  %v2945_v0 = vadd.f32 %v9847_v45, %v2496_v42 }
 0x1ff   :  { %v9919_v5 = vpop.f32.mrf.mxu0 }
 0x200   :  { %v3429_v22 = vmax.f32 %v3413_v41, 0.0  ;;  %v3391_v21 = vadd.f32 %v9918_v12, %v2942_v53  ;;  %v4421_v12 = vld [vmem:[%s16769_s4 + $0x118] sm:$0xff] }
 0x201   :  { %v9920_v19 = vpop.f32.mrf.mxu0  ;;  %v14200_v39 = vld [vmem:[#allocation2 + $0x11] sm:$0xff] }
 0x202   :  { %v14202_v62 = vld [vmem:[#allocation2 + $0x12] sm:$0xff]  ;;  %3488 = vst.msk [vmem:[#allocation2 + $0x31] sm:$0xff] %vm3443_vm2, %v3429_v22  ;;  %v3414_v20 = vadd.f32 %v14160_v38, %v3391_v21  ;;  %v9921_v36 = vadd.f32 %v9920_v19, %v9919_v5  ;;  %10251 = vmatmul.mubr.msk.f32.vlgmr.msra.gmra.mxu1 %vm3443_vm2, %v14200_v39  ;;  %v9850_v5 = vadd.f32 %v16851_v13, %v16850_v7 }
 0x203   :  { %10331 = vmatmul.mubr.msk.f32.vlgmr.msra.gmra.mxu0 %vm3443_vm2, %v14202_v62  ;;  %v9922_v51 = vpop.f32.mrf.mxu0  ;;  %10275 = vmatpush3.msra.mxu1 %v14040_v25  ;;  %v16844_v25 = vld [vmem:[#allocation34_spill] sm:$0xff]  ;;  %v9696_v19 = vadd.f32 %v16854_v34, %v16853_v23 }
 0x204   :  { %10395 = vmatpush3.msra.mxu0 %v14060_v28  ;;  %v3430_v2 = vmax.f32 %v3414_v20, 0.0  ;;  %v3392_v8 = vadd.f32 %v9921_v36, %v2943_v55  ;;  %10276 = vmatprep.subr.mxu1 %v3524_v3  ;;  %v9770_v11 = vadd.f32 %v16844_v25, %v16843_v46 }
 0x205   :  { %10396 = vmatprep.subr.mxu0 %v4424_v9  ;;  %v9923_v28 = vpop.f32.mrf.mxu0  ;;  %v14232_v14 = vld [vmem:[#allocation2 + $0x21] sm:$0xff]  ;;  %10277 = vmatpush3.msra.mxu1 %v3524_v3 }
 0x206   :  { %v14234_v58 = vld [vmem:[#allocation2 + $0x22] sm:$0xff]  ;;  %10397 = vmatpush3.msra.mxu0 %v4424_v9  ;;  %3489 = vst.msk [vmem:[#allocation2 + $0x41] sm:$0xff] %vm3443_vm2, %v3430_v2  ;;  %v3415_v6 = vadd.f32 %v14160_v38, %v3392_v8  ;;  %v9924_v57 = vadd.f32 %v9923_v28, %v9922_v51  ;;  %10253 = vmatprep.mubr.msk.f32.mxu1 %vm3443_vm2, %v14232_v14  ;;  %v14276_v9 = vpop.f32.mrf.mxu1  ;;  %v16855_v2 = vld [vmem:[#allocation52_spill] sm:$0xff] }
 0x207   :  { %10333 = vmatprep.mubr.msk.f32.mxu0 %vm3443_vm2, %v14234_v58  ;;  %v9925_v24 = vpop.f32.mrf.mxu0  ;;  %10278 = vmatprep.subr.mxu1 %v3523_v49  ;;  %v2497_v40 = vadd.f32 %v9770_v11, %v2271_v16  ;;  %v16852_v3 = vld [vmem:[#allocation10_spill] sm:$0xff]  ;;  %v9853_v8 = vadd.f32 %v14151_v32, %v16855_v2 }
 0x208   :  { %10398 = vmatprep.subr.mxu0 %v4423_v37  ;;  %v3431_v56 = vmax.f32 %v3415_v6, 0.0  ;;  %v3393_v48 = vadd.f32 %v9924_v57, %v2944_v30  ;;  %10279 = vmatpush3.msra.mxu1 %v3523_v49  ;;  %v2272_v55 = vadd.f32 %v9693_v59, %v16852_v3  ;;  %v16856_v49 = vld [vmem:[#allocation37_spill] sm:$0xff]  ;;  %v3519_v32 = vld [vmem:[%s16769_s4 + $0x8] sm:$0xff]  ;;  %v14307_v16 = vpop.f32.mrf.mxu1  ;;  %v16865_v3 = vld [vmem:[#allocation20_spill] sm:$0xff] }
 0x209   :  { %10399 = vmatpush3.msra.mxu0 %v4423_v37  ;;  %v9926_v29 = vpop.f32.mrf.mxu0  ;;  %v14258_v53 = vld [vmem:[#allocation2 + $0x31] sm:$0xff]  ;;  %10280 = vmatprep.subr.mxu1 %v3522_v10  ;;  %v16857_v37 = vld [vmem:[#allocation38_spill] sm:$0xff]  ;;  %v2946_v25 = vadd.f32 %v9850_v5, %v2497_v40  ;;  %v16858_v6 = vld [vmem:[#allocation13_spill] sm:$0xff] }
 0x20a   :  { %v14260_v41 = vld [vmem:[#allocation2 + $0x32] sm:$0xff]  ;;  %10400 = vmatprep.subr.mxu0 %v4422_v17  ;;  %3490 = vst.msk [vmem:[#allocation2 + $0x51] sm:$0xff] %vm3443_vm2, %v3431_v56  ;;  %v3416_v22 = vadd.f32 %v14160_v38, %v3393_v48  ;;  %v9927_v21 = vadd.f32 %v9926_v29, %v9925_v24  ;;  %10254 = vmatmul.mubr.msk.f32.gmra.mxu1 %vm3443_vm2, %v14258_v53  ;;  %v4419_v30 = vld [vmem:[%s16769_s4 + $0x108] sm:$0xff]  ;;  %v3518_v24 = vld [vmem:[%s16769_s4] sm:$0xff]  ;;  %v14332_v23 = vpop.f32.mrf.mxu1 }
 0x20b   :  { %10334 = vmatmul.mubr.msk.f32.gmra.mxu0 %vm3443_vm2, %v14260_v41  ;;  %v9928_v47 = vpop.f32.mrf.mxu0  ;;  %10281 = vmatpush3.msra.mxu1 %v3522_v10  ;;  %v2498_v51 = vadd.f32 %v9773_v33, %v2272_v55  ;;  %v9776_v42 = vadd.f32 %v16857_v37, %v16856_v49  ;;  %v2273_v57 = vadd.f32 %v9696_v19, %v16858_v6  ;;  %v16859_v10 = vld [vmem:[#allocation15_spill] sm:$0xff]  ;;  %v4418_v29 = vld [vmem:[%s16769_s4 + $0x100] sm:$0xff]  ;;  %v16863_v5 = vld [vmem:[#allocation16_spill] sm:$0xff] }
 0x20c   :  { %10401 = vmatpush3.msra.mxu0 %v4422_v17  ;;  %v3432_v20 = vmax.f32 %v3416_v22, 0.0  ;;  %v3394_v36 = vadd.f32 %v9927_v21, %v2945_v0  ;;  %10282 = vmatprep.subr.mxu1 %v3521_v52  ;;  %v16860_v17 = vld [vmem:[#allocation17_spill] sm:$0xff]  ;;  %v16862_v0 = vld [vmem:[#allocation40_spill] sm:$0xff]  ;;  %v16864_v21 = vld [vmem:[#allocation18_spill] sm:$0xff] }
 0x20d   :  { %10402 = vmatprep.subr.mxu0 %v4421_v12  ;;  %v9929_v15 = vpop.f32.mrf.mxu0  ;;  %v14288_v45 = vld [vmem:[#allocation2 + $0x41] sm:$0xff]  ;;  %10283 = vmatpush3.msra.mxu1 %v3521_v52  ;;  %v9699_v50 = vadd.f32 %v16860_v17, %v16859_v10  ;;  %v2947_v56 = vadd.f32 %v9853_v8, %v2498_v51  ;;  %v2499_v48 = vadd.f32 %v9776_v42, %v2273_v57  ;;  %v16861_v52 = vld [vmem:[#allocation39_spill] sm:$0xff]  ;;  %v14337_v19 = vld [vmem:[%s16769_s4 + $0xf8] sm:$0xff] }
 0x20e   :  { %v14290_v46 = vld [vmem:[#allocation2 + $0x42] sm:$0xff]  ;;  %10403 = vmatpush3.msra.mxu0 %v4421_v12  ;;  %3491 = vst.msk [vmem:[#allocation2 + $0x61] sm:$0xff] %vm3443_vm2, %v3432_v20  ;;  %v3417_v11 = vadd.f32 %v14160_v38, %v3394_v36  ;;  %v9930_v28 = vadd.f32 %v9929_v15, %v9928_v47  ;;  %10256 = vmatprep.mubr.msk.f32.mxu1 %vm3443_vm2, %v14288_v45  ;;  %v14342_v47 = vld [vmem:[%s16769_s4 + $0x1b8] sm:$0xff] }
 0x20f   :  { %10336 = vmatprep.mubr.msk.f32.mxu0 %vm3443_vm2, %v14290_v46  ;;  %v9931_v44 = vpop.f32.mrf.mxu0  ;;  %10284 = vmatprep.subr.mxu1 %v3520_v61  ;;  %v9779_v40 = vadd.f32 %v16862_v0, %v16861_v52  ;;  %v9856_v12 = vadd.f32 %v14170_v54, %v14155_v63  ;;  %v2274_v22 = vadd.f32 %v9699_v50, %v16863_v5  ;;  %v3534_v10 = vld [vmem:[#allocation2 + $0xa1] sm:$0xff] }
 0x210   :  { %10404 = vmatprep.subr.mxu0 %v4420_v43  ;;  %v3433_v27 = vmax.f32 %v3417_v11, 0.0  ;;  %v3395_v59 = vadd.f32 %v9930_v28, %v2946_v25  ;;  %10285 = vmatpush3.msra.mxu1 %v3520_v61  ;;  %v9702_v55 = vadd.f32 %v16865_v3, %v16864_v21  ;;  %v9859_v36 = vadd.f32 %v14193_v4, %v14182_v60  ;;  %v16866_v61 = vld [vmem:[#allocation41_spill] sm:$0xff]  ;;  %v16868_v60 = vld [vmem:[#allocation19_spill] sm:$0xff]  ;;  %v3944_v17 = vld [vmem:[#allocation2 + $0xa2] sm:$0xff] }
 0x211   :  { %10405 = vmatpush3.msra.mxu0 %v4420_v43  ;;  %v9932_v35 = vpop.f32.mrf.mxu0  ;;  %v14314_v1 = vld [vmem:[#allocation2 + $0x51] sm:$0xff]  ;;  %10286 = vmatprep.subr.mxu1 %v3519_v32  ;;  %v2500_v20 = vadd.f32 %v9779_v40, %v2274_v22  ;;  %v16867_v43 = vld [vmem:[#allocation42_spill] sm:$0xff]  ;;  %v2948_v37 = vadd.f32 %v9856_v12, %v2499_v48  ;;  %v16869_v25 = vld [vmem:[#allocation21_spill] sm:$0xff]  ;;  %v9862_v0 = vadd.f32 %v14251_v18, %v14218_v31 }
 0x212   :  { %v14316_v33 = vld [vmem:[#allocation2 + $0x52] sm:$0xff]  ;;  %10406 = vmatprep.subr.mxu0 %v4419_v30  ;;  %3492 = vst.msk [vmem:[#allocation2 + $0x71] sm:$0xff] %vm3443_vm2, %v3433_v27  ;;  %v3418_v7 = vadd.f32 %v14160_v38, %v3395_v59  ;;  %v9933_v13 = vadd.f32 %v9932_v35, %v9931_v44  ;;  %10257 = vmatmul.mubr.msk.f32.gmra.mxu1 %vm3443_vm2, %v14314_v1  ;;  %v16870_v11 = vld [vmem:[#allocation23_spill] sm:$0xff]  ;;  %v16872_v59 = vld [vmem:[#allocation45_spill] sm:$0xff] }
 0x213   :  { %10337 = vmatmul.mubr.msk.f32.gmra.mxu0 %vm3443_vm2, %v14316_v33  ;;  %v9934_v34 = vpop.f32.mrf.mxu0  ;;  %10287 = vmatpush3.msra.mxu1 %v3519_v32  ;;  %v9782_v51 = vadd.f32 %v16867_v43, %v16866_v61  ;;  %v2275_v4 = vadd.f32 %v9702_v55, %v16868_v60  ;;  %v9705_v28 = vadd.f32 %v16870_v11, %v16869_v25  ;;  %v9867_v32 = vpop.f32.mrf.mxu1  ;;  %v16871_v27 = vld [vmem:[#allocation44_spill] sm:$0xff] }
 0x214   :  { %10407 = vmatpush3.msra.mxu0 %v4419_v30  ;;  %v3434_v63 = vmax.f32 %v3418_v7, 0.0  ;;  %v3396_v54 = vadd.f32 %v9933_v13, %v2947_v56  ;;  %10288 = vmatprep.subr.mxu1 %v3518_v24  ;;  %v2949_v50 = vadd.f32 %v9859_v36, %v2500_v20  ;;  %v16874_v7 = vld [vmem:[#allocation24_spill] sm:$0xff]  ;;  %v16875_v13 = vld [vmem:[#allocation26_spill] sm:$0xff]  ;;  %v9865_v55 = vadd.f32 %v14307_v16, %v14276_v9 }
 0x215   :  { %10408 = vmatprep.subr.mxu0 %v4418_v29  ;;  %v9935_v2 = vpop.f32.mrf.mxu0  ;;  %v14348_v8 = vld [vmem:[#allocation2 + $0x61] sm:$0xff]  ;;  %10289 = vmatpush3.msra.mxu1 %v3518_v24  ;;  %v2501_v44 = vadd.f32 %v9782_v51, %v2275_v4  ;;  %v9785_v24 = vadd.f32 %v16872_v59, %v16871_v27  ;;  %v9708_v5 = vadd.f32 %v16875_v13, %v16874_v7  ;;  %v9869_v22 = vpop.f32.mrf.mxu1  ;;  %v16883_v59 = vld [vmem:[#allocation28_spill] sm:$0xff] }
 0x216   :  { %v14350_v49 = vld [vmem:[#allocation2 + $0x62] sm:$0xff]  ;;  %10409 = vmatpush3.msra.mxu0 %v4418_v29  ;;  %3493 = vst.msk [vmem:[#allocation2 + $0x81] sm:$0xff] %vm3443_vm2, %v3434_v63  ;;  %v3419_v42 = vadd.f32 %v14160_v38, %v3396_v54  ;;  %v9936_v15 = vadd.f32 %v9935_v2, %v9934_v34  ;;  %10259 = vmatprep.mubr.msk.f32.mxu1 %vm3443_vm2, %v14348_v8  ;;  %v16876_v34 = vld [vmem:[#allocation47_spill] sm:$0xff]  ;;  %v16877_v63 = vld [vmem:[#allocation48_spill] sm:$0xff] }
 0x217   :  { %10339 = vmatprep.mubr.msk.f32.mxu0 %vm3443_vm2, %v14350_v49  ;;  %v9937_v30 = vpop.f32.mrf.mxu0  ;;  %10354 = vmatprep.subr.mxu1 %v14337_v19  ;;  %v16873_v29 = vld [vmem:[#allocation22_spill] sm:$0xff]  ;;  %v9788_v54 = vadd.f32 %v16877_v63, %v16876_v34  ;;  %v2950_v36 = vadd.f32 %v9862_v0, %v2501_v44  ;;  %v16878_v51 = vld [vmem:[#allocation25_spill] sm:$0xff]  ;;  %v9870_v60 = vpop.f32.mrf.mxu1  ;;  %v16885_v0 = vld [vmem:[#allocation32_spill] sm:$0xff] }
 0x218   :  { %10474 = vmatprep.subr.mxu0 %v14342_v47  ;;  %v3435_v6 = vmax.f32 %v3419_v42, 0.0  ;;  %v3397_v57 = vadd.f32 %v9936_v15, %v2948_v37  ;;  %v2276_v12 = vadd.f32 %v9705_v28, %v16873_v29  ;;  %v2277_v2 = vadd.f32 %v9708_v5, %v16878_v51  ;;  %v16879_v37 = vld [vmem:[#allocation27_spill] sm:$0xff]  ;;  %v16880_v42 = vld [vmem:[#allocation29_spill] sm:$0xff]  ;;  %v16881_v28 = vld [vmem:[#allocation50_spill] sm:$0xff] }
 0x219   :  { %v9938_v56 = vpop.f32.mrf.mxu0  ;;  %v14365_v48 = vld [vmem:[#allocation2 + $0x71] sm:$0xff]  ;;  %v9711_v15 = vadd.f32 %v16880_v42, %v16879_v37  ;;  %v9871_v7 = vadd.f32 %v9870_v60, %v9869_v22  ;;  %v16886_v13 = vld [vmem:[#allocation53_spill] sm:$0xff] }
 0x21a   :  { %v14367_v52 = vld [vmem:[#allocation2 + $0x72] sm:$0xff]  ;;  %3494 = vst.msk [vmem:[#allocation2 + $0xb1] sm:$0xff] %vm3443_vm2, %v3435_v6  ;;  %v3420_v40 = vadd.f32 %v14160_v38, %v3397_v57  ;;  %v9939_v35 = vadd.f32 %v9938_v56, %v9937_v30  ;;  %10260 = vmatmul.mubr.msk.f32.gmra.mxu1 %vm3443_vm2, %v14365_v48  ;;  %v2502_v3 = vadd.f32 %v9785_v24, %v2276_v12  ;;  %v16882_v30 = vld [vmem:[#allocation51_spill] sm:$0xff]  ;;  %v16884_v56 = vld [vmem:[#allocation30_spill] sm:$0xff] }
 0x21b   :  { %10340 = vmatmul.mubr.msk.f32.gmra.mxu0 %vm3443_vm2, %v14367_v52  ;;  %v9940_v21 = vpop.f32.mrf.mxu0  ;;  %10262 = vmatprep.mubr.msk.f32.mxu1 %vm3443_vm2, %v3534_v10  ;;  %v2503_v16 = vadd.f32 %v9788_v54, %v2277_v2  ;;  %v9791_v6 = vadd.f32 %v16882_v30, %v16881_v28  ;;  %v2278_v24 = vadd.f32 %v9711_v15, %v16883_v59  ;;  %v16887_v22 = vld [vmem:[#allocation31_spill] sm:$0xff] }
 0x21c   :  { %10342 = vmatprep.mubr.msk.f32.mxu0 %vm3443_vm2, %v3944_v17  ;;  %v3436_v31 = vmax.f32 %v3420_v40, 0.0  ;;  %v3398_v18 = vadd.f32 %v9939_v35, %v2949_v50  ;;  %v2951_v9 = vadd.f32 %v9865_v55, %v2502_v3  ;;  %v9868_v50 = vadd.f32 %v9867_v32, %v14332_v23  ;;  %v9872_v35 = vpop.f32.mrf.mxu1 }
 0x21d   :  { %v9941_v20 = vpop.f32.mrf.mxu0  ;;  %v9714_v40 = vadd.f32 %v16885_v0, %v16884_v56  ;;  %v2504_v32 = vadd.f32 %v9791_v6, %v2278_v24  ;;  %v9794_v5 = vadd.f32 %v14147_v26, %v16886_v13  ;;  %v4891_v13 = vld [vmem:[%s16769_s4 + $0x1b0] sm:$0xff] }
 0x21e   :  { %3495 = vst.msk [vmem:[#allocation2 + $0xc1] sm:$0xff] %vm3443_vm2, %v3436_v31  ;;  %v3421_v61 = vadd.f32 %v14160_v38, %v3398_v18  ;;  %v9942_v43 = vadd.f32 %v9941_v20, %v9940_v21  ;;  %v2952_v3 = vadd.f32 %v9868_v50, %v2503_v16  ;;  %v9873_v26 = vpop.f32.mrf.mxu1 }
 0x21f   :  { %v9943_v4 = vpop.f32.mrf.mxu0  ;;  %v2279_v63 = vadd.f32 %v9714_v40, %v16887_v22  ;;  %v9874_v42 = vadd.f32 %v9873_v26, %v9872_v35  ;;  %v14526_v22 = vld [vmem:[#allocation2 + $0x70] sm:$0xff]  ;;  %v4889_v26 = vld [vmem:[%s16769_s4 + $0x1a0] sm:$0xff] }
 0x220   :  { %v3437_v25 = vmax.f32 %v3421_v61, 0.0  ;;  %v3399_v11 = vadd.f32 %v9942_v43, %v2950_v36  ;;  %v2953_v61 = vadd.f32 %v9871_v7, %v2504_v32  ;;  %v14479_v32 = vld [vmem:[#allocation2 + $0x20] sm:$0xff]  ;;  %v4190_v7 = vld [vmem:[%s16769_s4 + $0xe8] sm:$0xff] }
 0x221   :  { %v9944_v57 = vpop.f32.mrf.mxu0  ;;  %v14393_v10 = vld [vmem:[#allocation2 + $0xb1] sm:$0xff]  ;;  %v2505_v43 = vadd.f32 %v9794_v5, %v2279_v63  ;;  %v4189_v5 = vld [vmem:[%s16769_s4 + $0xe0] sm:$0xff] }
 0x222   :  { %v14395_v17 = vld [vmem:[#allocation2 + $0xb2] sm:$0xff]  ;;  %3496 = vst.msk [vmem:[#allocation2 + $0xd1] sm:$0xff] %vm3443_vm2, %v3437_v25  ;;  %v3422_v44 = vadd.f32 %v14160_v38, %v3399_v11  ;;  %v9945_v27 = vadd.f32 %v9944_v57, %v9943_v4  ;;  %10263 = vmatmul.mubr.msk.f32.gmra.mxu1 %vm3443_vm2, %v14393_v10  ;;  %v14528_v63 = vld [vmem:[#allocation2 + $0x81] sm:$0xff] }
 0x223   :  { %10343 = vmatmul.mubr.msk.f32.gmra.mxu0 %vm3443_vm2, %v14395_v17  ;;  %v9946_v29 = vpop.f32.mrf.mxu0  ;;  %v2954_v30 = vadd.f32 %v9874_v42, %v2505_v43  ;;  %v4186_v43 = vld [vmem:[%s16769_s4 + $0xc8] sm:$0xff] }
 0x224   :  { %v3438_v12 = vmax.f32 %v3422_v44, 0.0  ;;  %v3400_v23 = vadd.f32 %v9945_v27, %v2951_v9 }
 0x225   :  { %v9947_v21 = vpop.f32.mrf.mxu0  ;;  %v14409_v31 = vld [vmem:[#allocation2 + $0xc1] sm:$0xff] }
 0x226   :  { %v14411_v18 = vld [vmem:[#allocation2 + $0xc2] sm:$0xff]  ;;  %3497 = vst.msk [vmem:[#allocation2 + $0xe1] sm:$0xff] %vm3443_vm2, %v3438_v12  ;;  %v3423_v55 = vadd.f32 %v14160_v38, %v3400_v23  ;;  %v9948_v34 = vadd.f32 %v9947_v21, %v9946_v29  ;;  %10265 = vmatprep.mubr.msk.f32.mxu1 %vm3443_vm2, %v14409_v31  ;;  %v14470_v12 = vld [vmem:[#allocation2 + $0x10] sm:$0xff] }
 0x227   :  { %10345 = vmatprep.mubr.msk.f32.mxu0 %vm3443_vm2, %v14411_v18  ;;  %v9949_v54 = vpop.f32.mrf.mxu0  ;;  %v4191_v23 = vld [vmem:[%s16769_s4 + $0xf0] sm:$0xff]  ;;  %v4890_v21 = vld [vmem:[%s16769_s4 + $0x1a8] sm:$0xff] }
 0x228   :  { %v3439_v20 = vmax.f32 %v3423_v55, 0.0  ;;  %v3401_v36 = vadd.f32 %v9948_v34, %v2952_v3  ;;  %v14517_v3 = vld [vmem:[#allocation2 + $0x60] sm:$0xff]  ;;  %v4188_v34 = vld [vmem:[%s16769_s4 + $0xd8] sm:$0xff] }
 0x229   :  { %v9950_v51 = vpop.f32.mrf.mxu0  ;;  %v14420_v2 = vld [vmem:[#allocation2 + $0xd1] sm:$0xff]  ;;  %v3510_v55 = vld [vmem:[#allocation2 + $0xa0] sm:$0xff] }
 0x22a   :  { %v14422_v37 = vld [vmem:[#allocation2 + $0xd2] sm:$0xff]  ;;  %3498 = vst.msk [vmem:[#allocation2 + $0xf1] sm:$0xff] %vm3443_vm2, %v3439_v20  ;;  %v3424_v15 = vadd.f32 %v14160_v38, %v3401_v36  ;;  %v9951_v60 = vadd.f32 %v9950_v51, %v9949_v54  ;;  %10266 = vmatmul.mubr.msk.f32.gmra.mxu1 %vm3443_vm2, %v14420_v2 }
 0x22b   :  { %10346 = vmatmul.mubr.msk.f32.gmra.mxu0 %vm3443_vm2, %v14422_v37  ;;  %v9952_v4 = vpop.f32.mrf.mxu0  ;;  %v14540_v54 = vld [vmem:[#allocation2 + $0xb0] sm:$0xff]  ;;  %v4888_v36 = vld [vmem:[%s16769_s4 + $0x198] sm:$0xff] }
 0x22c   :  { %v3440_v25 = vmax.f32 %v3424_v15, 0.0  ;;  %v3402_v11 = vadd.f32 %v9951_v60, %v2953_v61  ;;  %v4187_v20 = vld [vmem:[%s16769_s4 + $0xd0] sm:$0xff]  ;;  %v4185_v60 = vld [vmem:[%s16769_s4 + $0xc0] sm:$0xff] }
 0x22d   :  { %v9953_v9 = vpop.f32.mrf.mxu0  ;;  %v14430_v16 = vld [vmem:[#allocation2 + $0xe1] sm:$0xff]  ;;  %v14558_v61 = vld [vmem:[#allocation2 + $0xd0] sm:$0xff] }
 0x22e   :  { %v14432_v28 = vld [vmem:[#allocation2 + $0xe2] sm:$0xff]  ;;  %3499 = vst.msk [vmem:[#allocation2 + $0x101] sm:$0xff] %vm3443_vm2, %v3440_v25  ;;  %v3425_v6 = vadd.f32 %v14160_v38, %v3402_v11  ;;  %v9954_v57 = vadd.f32 %v9953_v9, %v9952_v4  ;;  %10268 = vmatprep.mubr.msk.f32.mxu1 %vm3443_vm2, %v14430_v16  ;;  %v4887_v51 = vld [vmem:[%s16769_s4 + $0x190] sm:$0xff] }
 0x22f   :  { %10348 = vmatprep.mubr.msk.f32.mxu0 %vm3443_vm2, %v14432_v28  ;;  %v14570_v42 = vld [vmem:[#allocation2 + $0xe0] sm:$0xff]  ;;  %v4886_v4 = vld [vmem:[%s16769_s4 + $0x188] sm:$0xff] }
 0x230   :  { %v3441_v50 = vmax.f32 %v3425_v6, 0.0  ;;  %v3403_v44 = vadd.f32 %v9954_v57, %v2954_v30  ;;  %v4885_v11 = vld [vmem:[%s16769_s4 + $0x180] sm:$0xff]  ;;  %v4658_v6 = vld [vmem:[%s16769_s4 + $0x178] sm:$0xff]  ;;  %v4657_v57 = vld [vmem:[%s16769_s4 + $0x170] sm:$0xff] }
 0x231   :  { %v14440_v27 = vld [vmem:[#allocation2 + $0xf1] sm:$0xff] }
 0x232   :  { %v14442_v59 = vld [vmem:[#allocation2 + $0xf2] sm:$0xff]  ;;  %3500 = vst.msk [vmem:[#allocation2 + $0x111] sm:$0xff] %vm3443_vm2, %v3441_v50  ;;  %v3426_v24 = vadd.f32 %v14160_v38, %v3403_v44  ;;  %10269 = vmatmul.mubr.msk.f32.gmra.mxu1 %vm3443_vm2, %v14440_v27  ;;  %v3502_v38 = vld [vmem:[#allocation2] sm:$0xff]  ;;  %v4656_v44 = vld [vmem:[%s16769_s4 + $0x168] sm:$0xff] }
 0x233   :  { %10349 = vmatmul.mubr.msk.f32.gmra.mxu0 %vm3443_vm2, %v14442_v59  ;;  %v14576_v15 = vld [vmem:[#allocation2 + $0xf0] sm:$0xff]  ;;  %v5358_v50 = vld [vmem:[%s16769_s4 + $0x238] sm:$0xff] }
 0x234   :  { %v3442_v56 = vmax.f32 %v3426_v24, 0.0  ;;  %v5357_v24 = vld [vmem:[%s16769_s4 + $0x230] sm:$0xff] }
 0x235   :  { %v14450_v0 = vld [vmem:[#allocation2 + $0x101] sm:$0xff] }
 0x236   :  { %v14452_v40 = vld [vmem:[#allocation2 + $0x102] sm:$0xff]  ;;  %3501 = vst.msk [vmem:[#allocation2 + $0x121] sm:$0xff] %vm3443_vm2, %v3442_v56  ;;  %10271 = vmatprep.mubr.msk.f32.mxu1 %vm3443_vm2, %v14450_v0 }
 0x237   :  { %10351 = vmatprep.mubr.msk.f32.mxu0 %vm3443_vm2, %v14452_v40  ;;  %v14588_v25 = vld [vmem:[#allocation2 + $0x100] sm:$0xff] }
 0x238   :  { %v4655_v56 = vld [vmem:[%s16769_s4 + $0x160] sm:$0xff] }
 0x239   :  { %v14459_v35 = vld [vmem:[#allocation2 + $0x111] sm:$0xff] }
 0x23a   :  { %v14461_v29 = vld [vmem:[#allocation2 + $0x112] sm:$0xff]  ;;  %10272 = vmatmul.mubr.msk.f32.gmra.mxu1 %vm3443_vm2, %v14459_v35 }
 0x23b   :  { %10352 = vmatmul.mubr.msk.f32.gmra.mxu0 %vm3443_vm2, %v14461_v29  ;;  %10290 = vmatprep.mubr.msk.f32.mxu1 %vm3443_vm2, %v3502_v38  ;;  %v14597_v9 = vld [vmem:[#allocation2 + $0x110] sm:$0xff]  ;;  %v4875_v38 = vld [vmem:[#allocation2 + $0x80] sm:$0xff] }
 0x23c   :  { %10410 = vmatprep.mubr.msk.f32.mxu0 %vm3443_vm2, %v14200_v39  ;;  %v14486_v39 = vld [vmem:[#allocation2 + $0x30] sm:$0xff] }
 0x23d   :  { %v14599_v30 = vld [vmem:[#allocation2 + $0x121] sm:$0xff] }
 0x23e   :  { %10291 = vmatmul.mubr.msk.f32.vlgmr.msra.gmra.mxu1 %vm3443_vm2, %v14470_v12 }
 0x23f   :  { %10411 = vmatmul.mubr.msk.f32.vlgmr.msra.gmra.mxu0 %vm3443_vm2, %v14232_v14  ;;  %10293 = vmatprep.mubr.msk.f32.mxu1 %vm3443_vm2, %v14479_v32 }
 0x240   :  { %10355 = vmatpush3.msra.mxu1 %v14337_v19  ;;  %10413 = vmatprep.mubr.msk.f32.mxu0 %vm3443_vm2, %v14258_v53  ;;  %v14499_v19 = vld [vmem:[#allocation2 + $0x40] sm:$0xff] }
 0x241   :  { %10356 = vmatprep.subr.mxu1 %v4191_v23  ;;  %10475 = vmatpush3.msra.mxu0 %v14342_v47  ;;  %v14505_v47 = vld [vmem:[#allocation2 + $0x50] sm:$0xff] }
 0x242   :  { %10357 = vmatpush3.msra.mxu1 %v4191_v23  ;;  %10476 = vmatprep.subr.mxu0 %v4891_v13  ;;  %v4876_v23 = vld [vmem:[#allocation2 + $0x90] sm:$0xff] }
 0x243   :  { %10294 = vmatmul.mubr.msk.f32.gmra.mxu1 %vm3443_vm2, %v14486_v39  ;;  %10414 = vmatmul.mubr.msk.f32.gmra.mxu0 %vm3443_vm2, %v14288_v45 }
 0x244   :  { %10296 = vmatprep.mubr.msk.f32.mxu1 %vm3443_vm2, %v14499_v19  ;;  %10416 = vmatprep.mubr.msk.f32.mxu0 %vm3443_vm2, %v14314_v1 }
 0x245   :  { %10358 = vmatprep.subr.mxu1 %v4190_v7  ;;  %10477 = vmatpush3.msra.mxu0 %v4891_v13  ;;  %v5354_v13 = vld [vmem:[%s16769_s4 + $0x218] sm:$0xff] }
 0x246   :  { %10359 = vmatpush3.msra.mxu1 %v4190_v7  ;;  %10478 = vmatprep.subr.mxu0 %v4890_v21  ;;  %v4653_v7 = vld [vmem:[%s16769_s4 + $0x150] sm:$0xff] }
 0x247   :  { %10297 = vmatmul.mubr.msk.f32.gmra.mxu1 %vm3443_vm2, %v14505_v47  ;;  %10417 = vmatmul.mubr.msk.f32.gmra.mxu0 %vm3443_vm2, %v14348_v8 }
 0x248   :  { %10299 = vmatprep.mubr.msk.f32.mxu1 %vm3443_vm2, %v14517_v3  ;;  %10419 = vmatprep.mubr.msk.f32.mxu0 %vm3443_vm2, %v14365_v48 }
 0x249   :  { %10360 = vmatprep.subr.mxu1 %v4189_v5  ;;  %10479 = vmatpush3.msra.mxu0 %v4890_v21  ;;  %v4883_v21 = vld [vmem:[#allocation2 + $0x120] sm:$0xff] }
 0x24a   :  { %10361 = vmatpush3.msra.mxu1 %v4189_v5  ;;  %10480 = vmatprep.subr.mxu0 %v4889_v26  ;;  %v4651_v5 = vld [vmem:[%s16769_s4 + $0x140] sm:$0xff] }
 0x24b   :  { %10300 = vmatmul.mubr.msk.f32.gmra.mxu1 %vm3443_vm2, %v14526_v22  ;;  %10420 = vmatmul.mubr.msk.f32.gmra.mxu0 %vm3443_vm2, %v14528_v63 }
 0x24c   :  { %10422 = vmatprep.mubr.msk.f32.mxu0 %vm3443_vm2, %v14393_v10  ;;  %10302 = vmatprep.mubr.msk.f32.mxu1 %vm3443_vm2, %v3510_v55  ;;  %v14552_v10 = vld [vmem:[#allocation2 + $0xc0] sm:$0xff]  ;;  %v4884_v55 = vld [vmem:[#allocation2 + $0x130] sm:$0xff] }
 0x24d   :  { %10362 = vmatprep.subr.mxu1 %v4188_v34  ;;  %10481 = vmatpush3.msra.mxu0 %v4889_v26  ;;  %v5124_v26 = vld [vmem:[%s16769_s4 + $0x1f0] sm:$0xff] }
 0x24e   :  { %10363 = vmatpush3.msra.mxu1 %v4188_v34  ;;  %10482 = vmatprep.subr.mxu0 %v4888_v36  ;;  %v5351_v34 = vld [vmem:[%s16769_s4 + $0x200] sm:$0xff] }
 0x24f   :  { %10303 = vmatmul.mubr.msk.f32.gmra.mxu1 %vm3443_vm2, %v14540_v54  ;;  %10423 = vmatmul.mubr.msk.f32.gmra.mxu0 %vm3443_vm2, %v14409_v31 }
 0x250   :  { %10305 = vmatprep.mubr.msk.f32.mxu1 %vm3443_vm2, %v14552_v10  ;;  %10425 = vmatprep.mubr.msk.f32.mxu0 %vm3443_vm2, %v14420_v2 }
 0x251   :  { %10364 = vmatprep.subr.mxu1 %v4187_v20  ;;  %10483 = vmatpush3.msra.mxu0 %v4888_v36 }
 0x252   :  { %10365 = vmatpush3.msra.mxu1 %v4187_v20  ;;  %10484 = vmatprep.subr.mxu0 %v4887_v51 }
 0x253   :  { %10306 = vmatmul.mubr.msk.f32.gmra.mxu1 %vm3443_vm2, %v14558_v61  ;;  %10426 = vmatmul.mubr.msk.f32.gmra.mxu0 %vm3443_vm2, %v14430_v16 }
 0x254   :  { %10308 = vmatprep.mubr.msk.f32.mxu1 %vm3443_vm2, %v14570_v42  ;;  %10428 = vmatprep.mubr.msk.f32.mxu0 %vm3443_vm2, %v14440_v27 }
 0x255   :  { %10366 = vmatprep.subr.mxu1 %v4186_v43  ;;  %10485 = vmatpush3.msra.mxu0 %v4887_v51 }
 0x256   :  { %10367 = vmatpush3.msra.mxu1 %v4186_v43  ;;  %10486 = vmatprep.subr.mxu0 %v4886_v4 }
 0x257   :  { %10309 = vmatmul.mubr.msk.f32.gmra.mxu1 %vm3443_vm2, %v14576_v15  ;;  %10429 = vmatmul.mubr.msk.f32.gmra.mxu0 %vm3443_vm2, %v14450_v0 }
 0x258   :  { %10311 = vmatprep.mubr.msk.f32.mxu1 %vm3443_vm2, %v14588_v25  ;;  %10431 = vmatprep.mubr.msk.f32.mxu0 %vm3443_vm2, %v14459_v35 }
 0x259   :  { %10368 = vmatprep.subr.mxu1 %v4185_v60  ;;  %10487 = vmatpush3.msra.mxu0 %v4886_v4 }
 0x25a   :  { %10369 = vmatpush3.msra.mxu1 %v4185_v60  ;;  %10488 = vmatprep.subr.mxu0 %v4885_v11 }
 0x25b   :  { %10312 = vmatmul.mubr.msk.f32.gmra.mxu1 %vm3443_vm2, %v14597_v9  ;;  %10432 = vmatmul.mubr.msk.f32.gmra.mxu0 %vm3443_vm2, %v14599_v30 }
 0x25c   :  { %10370 = vmatprep.mubr.msk.f32.mxu1 %vm3443_vm2, %v14470_v12  ;;  %10490 = vmatprep.mubr.msk.f32.mxu0 %vm3443_vm2, %v14479_v32  ;;  %v5356_v12 = vld [vmem:[%s16769_s4 + $0x228] sm:$0xff] }
 0x25d   :  { %10434 = vmatprep.subr.mxu1 %v4658_v6  ;;  %10489 = vmatpush3.msra.mxu0 %v4885_v11 }
 0x25e   :  { %10554 = vmatprep.subr.mxu0 %v5358_v50 }
 0x25f   :  { %10371 = vmatmul.mubr.msk.f32.vlgmr.msra.gmra.mxu1 %vm3443_vm2, %v14479_v32  ;;  %10491 = vmatmul.mubr.msk.f32.vlgmr.msra.gmra.mxu0 %vm3443_vm2, %v14486_v39  ;;  %v4654_v32 = vld [vmem:[%s16769_s4 + $0x158] sm:$0xff] }
 0x260   :  { %10373 = vmatprep.mubr.msk.f32.mxu1 %vm3443_vm2, %v14486_v39  ;;  %10435 = vmatpush3.msra.mxu1 %v4658_v6  ;;  %v5355_v39 = vld [vmem:[%s16769_s4 + $0x220] sm:$0xff] }
 0x261   :  { %10493 = vmatprep.mubr.msk.f32.mxu0 %vm3443_vm2, %v14499_v19  ;;  %10436 = vmatprep.subr.mxu1 %v4657_v57 }
 0x262   :  { %10437 = vmatpush3.msra.mxu1 %v4657_v57  ;;  %10555 = vmatpush3.msra.mxu0 %v5358_v50 }
 0x263   :  { %10374 = vmatmul.mubr.msk.f32.gmra.mxu1 %vm3443_vm2, %v14499_v19  ;;  %10494 = vmatmul.mubr.msk.f32.gmra.mxu0 %vm3443_vm2, %v14505_v47  ;;  %v4652_v19 = vld [vmem:[%s16769_s4 + $0x148] sm:$0xff] }
 0x264   :  { %10376 = vmatprep.mubr.msk.f32.mxu1 %vm3443_vm2, %v14505_v47  ;;  %10496 = vmatprep.mubr.msk.f32.mxu0 %vm3443_vm2, %v14517_v3  ;;  %v5353_v47 = vld [vmem:[%s16769_s4 + $0x210] sm:$0xff] }
 0x265   :  { %10438 = vmatprep.subr.mxu1 %v4656_v44  ;;  %10556 = vmatprep.subr.mxu0 %v5357_v24 }
 0x266   :  { %10439 = vmatpush3.msra.mxu1 %v4656_v44  ;;  %10557 = vmatpush3.msra.mxu0 %v5357_v24 }
 0x267   :  { %10377 = vmatmul.mubr.msk.f32.gmra.mxu1 %vm3443_vm2, %v14517_v3  ;;  %10497 = vmatmul.mubr.msk.f32.gmra.mxu0 %vm3443_vm2, %v14526_v22  ;;  %v5352_v3 = vld [vmem:[%s16769_s4 + $0x208] sm:$0xff] }
 0x268   :  { %10379 = vmatprep.mubr.msk.f32.mxu1 %vm3443_vm2, %v14526_v22  ;;  %10499 = vmatprep.mubr.msk.f32.mxu0 %vm3443_vm2, %v4875_v38  ;;  %v5125_v22 = vld [vmem:[%s16769_s4 + $0x1f8] sm:$0xff] }
 0x269   :  { %10440 = vmatprep.subr.mxu1 %v4655_v56  ;;  %10558 = vmatprep.subr.mxu0 %v5356_v12 }
 0x26a   :  { %10441 = vmatpush3.msra.mxu1 %v4655_v56  ;;  %10559 = vmatpush3.msra.mxu0 %v5356_v12 }
 0x26b   :  { %10380 = vmatmul.mubr.msk.f32.gmra.mxu1 %vm3443_vm2, %v4875_v38  ;;  %10500 = vmatmul.mubr.msk.f32.gmra.mxu0 %vm3443_vm2, %v4876_v23 }
 0x26c   :  { %10382 = vmatprep.mubr.msk.f32.mxu1 %vm3443_vm2, %v14540_v54  ;;  %10502 = vmatprep.mubr.msk.f32.mxu0 %vm3443_vm2, %v14552_v10 }
 0x26d   :  { %10442 = vmatprep.subr.mxu1 %v4654_v32  ;;  %10560 = vmatprep.subr.mxu0 %v5355_v39 }
 0x26e   :  { %10443 = vmatpush3.msra.mxu1 %v4654_v32  ;;  %10561 = vmatpush3.msra.mxu0 %v5355_v39 }
 0x26f   :  { %10383 = vmatmul.mubr.msk.f32.gmra.mxu1 %vm3443_vm2, %v14552_v10  ;;  %10503 = vmatmul.mubr.msk.f32.gmra.mxu0 %vm3443_vm2, %v14558_v61 }
 0x270   :  { %10385 = vmatprep.mubr.msk.f32.mxu1 %vm3443_vm2, %v14558_v61  ;;  %10505 = vmatprep.mubr.msk.f32.mxu0 %vm3443_vm2, %v14570_v42 }
 0x271   :  { %10444 = vmatprep.subr.mxu1 %v4653_v7  ;;  %10562 = vmatprep.subr.mxu0 %v5354_v13 }
 0x272   :  { %10445 = vmatpush3.msra.mxu1 %v4653_v7  ;;  %10563 = vmatpush3.msra.mxu0 %v5354_v13 }
 0x273   :  { %10386 = vmatmul.mubr.msk.f32.gmra.mxu1 %vm3443_vm2, %v14570_v42  ;;  %10506 = vmatmul.mubr.msk.f32.gmra.mxu0 %vm3443_vm2, %v14576_v15 }
 0x274   :  { %10388 = vmatprep.mubr.msk.f32.mxu1 %vm3443_vm2, %v14576_v15  ;;  %10508 = vmatprep.mubr.msk.f32.mxu0 %vm3443_vm2, %v14588_v25 }
 0x275   :  { %10446 = vmatprep.subr.mxu1 %v4652_v19  ;;  %10564 = vmatprep.subr.mxu0 %v5353_v47 }
 0x276   :  { %10447 = vmatpush3.msra.mxu1 %v4652_v19  ;;  %10565 = vmatpush3.msra.mxu0 %v5353_v47 }
 0x277   :  { %10389 = vmatmul.mubr.msk.f32.gmra.mxu1 %vm3443_vm2, %v14588_v25  ;;  %10509 = vmatmul.mubr.msk.f32.gmra.mxu0 %vm3443_vm2, %v14597_v9 }
 0x278   :  { %10391 = vmatprep.mubr.msk.f32.mxu1 %vm3443_vm2, %v14597_v9  ;;  %10511 = vmatprep.mubr.msk.f32.mxu0 %vm3443_vm2, %v4883_v21 }
 0x279   :  { %10448 = vmatprep.subr.mxu1 %v4651_v5  ;;  %10566 = vmatprep.subr.mxu0 %v5352_v3 }
 0x27a   :  { %10449 = vmatpush3.msra.mxu1 %v4651_v5  ;;  %10567 = vmatpush3.msra.mxu0 %v5352_v3 }
 0x27b   :  { %10392 = vmatmul.mubr.msk.f32.gmra.mxu1 %vm3443_vm2, %v4883_v21  ;;  %10512 = vmatmul.mubr.msk.f32.gmra.mxu0 %vm3443_vm2, %v4884_v55 }
 0x27c   :  { %10450 = vmatprep.mubr.msk.f32.mxu1 %vm3443_vm2, %v14202_v62  ;;  %10570 = vmatprep.mubr.msk.f32.mxu0 %vm3443_vm2, %v14234_v58  ;;  %v5123_v62 = vld [vmem:[%s16769_s4 + $0x1e8] sm:$0xff] }
 0x27d   :  { %10568 = vmatprep.subr.mxu0 %v5351_v34  ;;  %10514 = vmatprep.subr.mxu1 %v5125_v22 }
 0x27e   :  { %10569 = vmatpush3.msra.mxu0 %v5351_v34 }
 0x27f   :  { %10451 = vmatmul.mubr.msk.f32.vlgmr.msra.gmra.mxu1 %vm3443_vm2, %v14234_v58  ;;  %10571 = vmatmul.mubr.msk.f32.vlgmr.msra.gmra.mxu0 %vm3443_vm2, %v14260_v41  ;;  %v5122_v58 = vld [vmem:[%s16769_s4 + $0x1e0] sm:$0xff] }
 0x280   :  { %10453 = vmatprep.mubr.msk.f32.mxu1 %vm3443_vm2, %v14260_v41  ;;  %10515 = vmatpush3.msra.mxu1 %v5125_v22  ;;  %v5341_v41 = vld [vmem:[#allocation2 + $0x82] sm:$0xff] }
 0x281   :  { %10573 = vmatprep.mubr.msk.f32.mxu0 %vm3443_vm2, %v14290_v46  ;;  %10516 = vmatprep.subr.mxu1 %v5124_v26 }
 0x282   :  { %10517 = vmatpush3.msra.mxu1 %v5124_v26 }
 0x283   :  { %10454 = vmatmul.mubr.msk.f32.gmra.mxu1 %vm3443_vm2, %v14290_v46  ;;  %10574 = vmatmul.mubr.msk.f32.gmra.mxu0 %vm3443_vm2, %v14316_v33  ;;  %v5342_v46 = vld [vmem:[#allocation2 + $0x92] sm:$0xff] }
 0x284   :  { %10456 = vmatprep.mubr.msk.f32.mxu1 %vm3443_vm2, %v14316_v33  ;;  %10576 = vmatprep.mubr.msk.f32.mxu0 %vm3443_vm2, %v14350_v49  ;;  %v5121_v33 = vld [vmem:[%s16769_s4 + $0x1d8] sm:$0xff] }
 0x285   :  { %10518 = vmatprep.subr.mxu1 %v5123_v62 }
 0x286   :  { %10519 = vmatpush3.msra.mxu1 %v5123_v62 }
 0x287   :  { %10457 = vmatmul.mubr.msk.f32.gmra.mxu1 %vm3443_vm2, %v14350_v49  ;;  %10577 = vmatmul.mubr.msk.f32.gmra.mxu0 %vm3443_vm2, %v14367_v52  ;;  %v5120_v49 = vld [vmem:[%s16769_s4 + $0x1d0] sm:$0xff] }
 0x288   :  { %10459 = vmatprep.mubr.msk.f32.mxu1 %vm3443_vm2, %v14367_v52  ;;  %10579 = vmatprep.mubr.msk.f32.mxu0 %vm3443_vm2, %v5341_v41  ;;  %v5119_v52 = vld [vmem:[%s16769_s4 + $0x1c8] sm:$0xff] }
 0x289   :  { %10520 = vmatprep.subr.mxu1 %v5122_v58 }
 0x28a   :  { %10521 = vmatpush3.msra.mxu1 %v5122_v58 }
 0x28b   :  { %10460 = vmatmul.mubr.msk.f32.gmra.mxu1 %vm3443_vm2, %v5341_v41  ;;  %10580 = vmatmul.mubr.msk.f32.gmra.mxu0 %vm3443_vm2, %v5342_v46 }
 0x28c   :  { %10462 = vmatprep.mubr.msk.f32.mxu1 %vm3443_vm2, %v14395_v17  ;;  %10582 = vmatprep.mubr.msk.f32.mxu0 %vm3443_vm2, %v14411_v18  ;;  %v5118_v17 = vld [vmem:[%s16769_s4 + $0x1c0] sm:$0xff] }
 0x28d   :  { %10522 = vmatprep.subr.mxu1 %v5121_v33 }
 0x28e   :  { %10523 = vmatpush3.msra.mxu1 %v5121_v33 }
 0x28f   :  { %10463 = vmatmul.mubr.msk.f32.gmra.mxu1 %vm3443_vm2, %v14411_v18  ;;  %10583 = vmatmul.mubr.msk.f32.gmra.mxu0 %vm3443_vm2, %v14422_v37  ;;  %v5349_v18 = vld [vmem:[#allocation2 + $0x122] sm:$0xff] }
 0x290   :  { %10465 = vmatprep.mubr.msk.f32.mxu1 %vm3443_vm2, %v14422_v37  ;;  %10585 = vmatprep.mubr.msk.f32.mxu0 %vm3443_vm2, %v14432_v28  ;;  %v5350_v37 = vld [vmem:[#allocation2 + $0x132] sm:$0xff] }
 0x291   :  { %10524 = vmatprep.subr.mxu1 %v5120_v49 }
 0x292   :  { %10525 = vmatpush3.msra.mxu1 %v5120_v49 }
 0x293   :  { %10466 = vmatmul.mubr.msk.f32.gmra.mxu1 %vm3443_vm2, %v14432_v28  ;;  %10586 = vmatmul.mubr.msk.f32.gmra.mxu0 %vm3443_vm2, %v14442_v59  ;;  %v5109_v28 = vld [vmem:[#allocation2 + $0x91] sm:$0xff] }
 0x294   :  { %10468 = vmatprep.mubr.msk.f32.mxu1 %vm3443_vm2, %v14442_v59  ;;  %10588 = vmatprep.mubr.msk.f32.mxu0 %vm3443_vm2, %v14452_v40 }
 0x295   :  { %10526 = vmatprep.subr.mxu1 %v5119_v52 }
 0x296   :  { %10527 = vmatpush3.msra.mxu1 %v5119_v52 }
 0x297   :  { %10469 = vmatmul.mubr.msk.f32.gmra.mxu1 %vm3443_vm2, %v14452_v40  ;;  %10589 = vmatmul.mubr.msk.f32.gmra.mxu0 %vm3443_vm2, %v14461_v29 }
 0x298   :  { %10471 = vmatprep.mubr.msk.f32.mxu1 %vm3443_vm2, %v14461_v29  ;;  %10591 = vmatprep.mubr.msk.f32.mxu0 %vm3443_vm2, %v5349_v18 }
 0x299   :  { %10528 = vmatprep.subr.mxu1 %v5118_v17 }
 0x29a   :  { %10529 = vmatpush3.msra.mxu1 %v5118_v17 }
 0x29b   :  { %10472 = vmatmul.mubr.msk.f32.gmra.mxu1 %vm3443_vm2, %v5349_v18  ;;  %10592 = vmatmul.mubr.msk.f32.gmra.mxu0 %vm3443_vm2, %v5350_v37 }
 0x29c   :  { %10530 = vmatprep.mubr.msk.f32.mxu1 %vm3443_vm2, %v14232_v14  ;;  %v5117_v14 = vld [vmem:[#allocation2 + $0x131] sm:$0xff] }
 0x29f   :  { %10531 = vmatmul.mubr.msk.f32.vlgmr.msra.gmra.mxu1 %vm3443_vm2, %v14258_v53 }
 0x2a0   :  { %10533 = vmatprep.mubr.msk.f32.mxu1 %vm3443_vm2, %v14288_v45 }
 0x2a3   :  { %10534 = vmatmul.mubr.msk.f32.gmra.mxu1 %vm3443_vm2, %v14314_v1 }
 0x2a4   :  { %10536 = vmatprep.mubr.msk.f32.mxu1 %vm3443_vm2, %v14348_v8 }
 0x2a7   :  { %10537 = vmatmul.mubr.msk.f32.gmra.mxu1 %vm3443_vm2, %v14365_v48 }
 0x2a8   :  { %10539 = vmatprep.mubr.msk.f32.mxu1 %vm3443_vm2, %v14528_v63 }
 0x2ab   :  { %10540 = vmatmul.mubr.msk.f32.gmra.mxu1 %vm3443_vm2, %v5109_v28 }
 0x2ac   :  { %10542 = vmatprep.mubr.msk.f32.mxu1 %vm3443_vm2, %v14409_v31 }
 0x2af   :  { %10543 = vmatmul.mubr.msk.f32.gmra.mxu1 %vm3443_vm2, %v14420_v2 }
 0x2b0   :  { %10545 = vmatprep.mubr.msk.f32.mxu1 %vm3443_vm2, %v14430_v16 }
 0x2b3   :  { %10546 = vmatmul.mubr.msk.f32.gmra.mxu1 %vm3443_vm2, %v14440_v27 }
 0x2b4   :  { %10548 = vmatprep.mubr.msk.f32.mxu1 %vm3443_vm2, %v14450_v0 }
 0x2b7   :  { %10549 = vmatmul.mubr.msk.f32.gmra.mxu1 %vm3443_vm2, %v14459_v35 }
 0x2b8   :  { %10551 = vmatprep.mubr.msk.f32.mxu1 %vm3443_vm2, %v14599_v30 }
 0x2bb   :  { %10552 = vmatmul.mubr.msk.f32.gmra.mxu1 %vm3443_vm2, %v5117_v14 }
 0x2c2   :  { %v10252_v53 = vpop.f32.mrf.mxu1 }
 0x2c3   :  { %v10332_v45 = vpop.f32.mrf.mxu0 }
 0x2c4   :  { %v3664_v1 = vpop.f32.mrf.mxu1 }
 0x2c5   :  { %v4074_v8 = vpop.f32.mrf.mxu0 }
 0x2ca   :  { %v10255_v48 = vpop.f32.mrf.mxu1 }
 0x2cb   :  { %v10335_v31 = vpop.f32.mrf.mxu0 }
 0x2cc   :  { %v3674_v2 = vpop.f32.mrf.mxu1 }
 0x2cd   :  { %v4084_v16 = vpop.f32.mrf.mxu0 }
 0x2d2   :  { %v10258_v27 = vpop.f32.mrf.mxu1 }
 0x2d3   :  { %v10338_v59 = vpop.f32.mrf.mxu0 }
 0x2d4   :  { %v3684_v0 = vpop.f32.mrf.mxu1 }
 0x2d5   :  { %v4094_v40 = vpop.f32.mrf.mxu0 }
 0x2da   :  { %v10261_v29 = vpop.f32.mrf.mxu1 }
 0x2db   :  { %v10341_v35 = vpop.f32.mrf.mxu0 }
 0x2dc   :  { %v3694_v63 = vpop.f32.mrf.mxu1 }
 0x2dd   :  { %v4104_v54 = vpop.f32.mrf.mxu0 }
 0x2e2   :  { %v10264_v20 = vpop.f32.mrf.mxu1 }
 0x2e3   :  { %v10344_v36 = vpop.f32.mrf.mxu0 }
 0x2e4   :  { %v3704_v10 = vpop.f32.mrf.mxu1 }
 0x2e5   :  { %v4114_v61 = vpop.f32.mrf.mxu0 }
 0x2ea   :  { %v10267_v43 = vpop.f32.mrf.mxu1 }
 0x2eb   :  { %v10347_v51 = vpop.f32.mrf.mxu0 }
 0x2ec   :  { %v3714_v42 = vpop.f32.mrf.mxu1 }
 0x2ed   :  { %v4124_v15 = vpop.f32.mrf.mxu0 }
 0x2f2   :  { %v10270_v60 = vpop.f32.mrf.mxu1 }
 0x2f3   :  { %v10350_v4 = vpop.f32.mrf.mxu0 }
 0x2f4   :  { %v3724_v25 = vpop.f32.mrf.mxu1 }
 0x2f5   :  { %v14823_v11 = vpop.f32.mrf.mxu0 }
 0x2fa   :  { %v10273_v9 = vpop.f32.mrf.mxu1 }
 0x2fb   :  { %v14825_v30 = vpop.f32.mrf.mxu0 }
 0x2fc   :  { %v14827_v6 = vpop.f32.mrf.mxu1 }
 0x2fd   :  { %v14829_v57 = vpop.f32.mrf.mxu0 }
 0x2fe   :  { %v10292_v50 = vpop.f32.mrf.mxu1 }
 0x2ff   :  { %v14831_v44 = vpop.f32.mrf.mxu0  ;;  %v3863_v24 = vadd.f32 %v10292_v50, %v10252_v53 }
 0x300   :  { %v3857_v56 = vpop.f32.mrf.mxu1 }
 0x301   :  { %v14833_v38 = vpop.f32.mrf.mxu0  ;;  %v3858_v12 = vadd.f32 %v3857_v56, %v3664_v1  ;;  %v14835_v23 = vadd.f32 %v10332_v45, %v3863_v24 }
 0x303   :  { %v10295_v32 = vpop.f32.mrf.mxu1  ;;  %v14837_v39 = vpop.f32.mrf.mxu0  ;;  %v14839_v13 = vadd.f32 %v4074_v8, %v3858_v12 }
 0x304   :  { %v3873_v7 = vadd.f32 %v10295_v32, %v10255_v48 }
 0x305   :  { %v3867_v19 = vpop.f32.mrf.mxu1  ;;  %v14841_v47 = vpop.f32.mrf.mxu0 }
 0x306   :  { %v3868_v5 = vadd.f32 %v3867_v19, %v3674_v2  ;;  %v14843_v21 = vadd.f32 %v10335_v31, %v3873_v7 }
 0x307   :  { %v10298_v3 = vpop.f32.mrf.mxu1  ;;  %v14845_v55 = vpop.f32.mrf.mxu0 }
 0x308   :  { %v3883_v34 = vadd.f32 %v10298_v3, %v10258_v27  ;;  %v14847_v22 = vadd.f32 %v4084_v16, %v3868_v5 }
 0x309   :  { %v3877_v26 = vpop.f32.mrf.mxu1  ;;  %v14849_v62 = vpop.f32.mrf.mxu0 }
 0x30a   :  { %v3878_v58 = vadd.f32 %v3877_v26, %v3684_v0  ;;  %v14851_v41 = vadd.f32 %v10338_v59, %v3883_v34 }
 0x30b   :  { %v10301_v46 = vpop.f32.mrf.mxu1  ;;  %v14853_v33 = vpop.f32.mrf.mxu0 }
 0x30c   :  { %v3893_v49 = vadd.f32 %v10301_v46, %v10261_v29  ;;  %v14855_v52 = vadd.f32 %v4094_v40, %v3878_v58 }
 0x30d   :  { %v3887_v17 = vpop.f32.mrf.mxu1  ;;  %v14857_v18 = vpop.f32.mrf.mxu0 }
 0x30e   :  { %v3888_v37 = vadd.f32 %v3887_v17, %v3694_v63  ;;  %v14859_v28 = vadd.f32 %v10341_v35, %v3893_v49 }
 0x30f   :  { %v10304_v14 = vpop.f32.mrf.mxu1  ;;  %v14861_v53 = vpop.f32.mrf.mxu0 }
 0x310   :  { %v3903_v45 = vadd.f32 %v10304_v14, %v10264_v20  ;;  %v14863_v1 = vadd.f32 %v4104_v54, %v3888_v37 }
 0x311   :  { %v3897_v8 = vpop.f32.mrf.mxu1  ;;  %v14865_v48 = vpop.f32.mrf.mxu0 }
 0x312   :  { %v3898_v31 = vadd.f32 %v3897_v8, %v3704_v10  ;;  %v14867_v2 = vadd.f32 %v10344_v36, %v3903_v45 }
 0x313   :  { %v10307_v16 = vpop.f32.mrf.mxu1  ;;  %v14869_v27 = vpop.f32.mrf.mxu0 }
 0x314   :  { %16888 = vst [vmem:[#allocation43_spill] sm:$0xff] %v14869_v27  ;;  %v3913_v59 = vadd.f32 %v10307_v16, %v10267_v43  ;;  %v14871_v0 = vadd.f32 %v4114_v61, %v3898_v31 }
 0x315   :  { %v3907_v40 = vpop.f32.mrf.mxu1  ;;  %v14873_v29 = vpop.f32.mrf.mxu0 }
 0x316   :  { %16889 = vst [vmem:[#allocation33_spill] sm:$0xff] %v14873_v29  ;;  %v3908_v35 = vadd.f32 %v3907_v40, %v3714_v42  ;;  %v14875_v63 = vadd.f32 %v10347_v51, %v3913_v59 }
 0x317   :  { %v10310_v54 = vpop.f32.mrf.mxu1  ;;  %v14877_v20 = vpop.f32.mrf.mxu0 }
 0x318   :  { %16890 = vst [vmem:[#allocation34_spill] sm:$0xff] %v14877_v20  ;;  %v3923_v50 = vadd.f32 %v10310_v54, %v10270_v60  ;;  %v14879_v24 = vadd.f32 %v4124_v15, %v3908_v35 }
 0x319   :  { %v3917_v36 = vpop.f32.mrf.mxu1  ;;  %v14881_v10 = vpop.f32.mrf.mxu0 }
 0x31a   :  { %16891 = vst [vmem:[#allocation8_spill] sm:$0xff] %v14881_v10  ;;  %v3918_v56 = vadd.f32 %v3917_v36, %v3724_v25  ;;  %v14883_v12 = vadd.f32 %v10350_v4, %v3923_v50 }
 0x31b   :  { %v10313_v61 = vpop.f32.mrf.mxu1  ;;  %v14885_v43 = vpop.f32.mrf.mxu0 }
 0x31c   :  { %16892 = vst [vmem:[#allocation9_spill] sm:$0xff] %v14883_v12  ;;  %16893 = vst [vmem:[#allocation11_spill] sm:$0xff] %v14885_v43  ;;  %v3933_v32 = vadd.f32 %v10313_v61, %v10273_v9  ;;  %v14888_v42 = vadd.f32 %v14823_v11, %v3918_v56 }
 0x31d   :  { %v3927_v51 = vpop.f32.mrf.mxu1  ;;  %v14890_v7 = vpop.f32.mrf.mxu0 }
 0x31e   :  { %16894 = vst [vmem:[#allocation35_spill] sm:$0xff] %v14888_v42  ;;  %16895 = vst [vmem:[#allocation36_spill] sm:$0xff] %v14890_v7  ;;  %v3928_v60 = vadd.f32 %v3927_v51, %v14827_v6  ;;  %v14894_v15 = vadd.f32 %v14825_v30, %v3933_v32 }
 0x31f   :  { %v10372_v19 = vpop.f32.mrf.mxu1  ;;  %v14896_v5 = vpop.f32.mrf.mxu0 }
 0x320   :  { %16896 = vst [vmem:[#allocation46_spill] sm:$0xff] %v14894_v15  ;;  %v14899_v4 = vadd.f32 %v14829_v57, %v3928_v60  ;;  %v4387_v29 = vadd.f32 %v10372_v19, %v14835_v23 }
 0x321   :  { %v4307_v25 = vpop.f32.mrf.mxu1  ;;  %v14901_v3 = vpop.f32.mrf.mxu0 }
 0x322   :  { %16897 = vst [vmem:[#allocation49_spill] sm:$0xff] %v14899_v4  ;;  %v4386_v42 = vadd.f32 %v4307_v25, %v14839_v13  ;;  %v4620_v12 = vadd.f32 %v14831_v44, %v4387_v29 }
 0x323   :  { %v10375_v9 = vpop.f32.mrf.mxu1  ;;  %v14903_v11 = vpop.f32.mrf.mxu0 }
 0x325   :  { %v4317_v34 = vpop.f32.mrf.mxu1  ;;  %v14905_v26 = vpop.f32.mrf.mxu0 }
 0x327   :  { %v10378_v58 = vpop.f32.mrf.mxu1  ;;  %v14907_v6 = vpop.f32.mrf.mxu0 }
 0x328   :  { %v4391_v23 = vadd.f32 %v10378_v58, %v14851_v41 }
 0x329   :  { %v4327_v30 = vpop.f32.mrf.mxu1  ;;  %v14909_v46 = vpop.f32.mrf.mxu0 }
 0x32a   :  { %v4624_v41 = vadd.f32 %v14845_v55, %v4391_v23 }
 0x32b   :  { %v10381_v49 = vpop.f32.mrf.mxu1  ;;  %v14911_v17 = vpop.f32.mrf.mxu0 }
 0x32c   :  { %16898 = vst [vmem:[#allocation10_spill] sm:$0xff] %v14911_v17 }
 0x32d   :  { %v4337_v57 = vpop.f32.mrf.mxu1  ;;  %v14913_v37 = vpop.f32.mrf.mxu0 }
 0x32e   :  { %16899 = vst [vmem:[#allocation12_spill] sm:$0xff] %v14913_v37 }
 0x32f   :  { %v14915_v14 = vpop.f32.mrf.mxu1  ;;  %v14917_v45 = vpop.f32.mrf.mxu0 }
 0x330   :  { %16900 = vst [vmem:[#allocation14_spill] sm:$0xff] %v14917_v45 }
 0x331   :  { %v14919_v8 = vpop.f32.mrf.mxu1  ;;  %v14921_v31 = vpop.f32.mrf.mxu0 }
 0x332   :  { %16901 = vst [vmem:[#allocation52_spill] sm:$0xff] %v14921_v31 }
 0x333   :  { %v14923_v16 = vpop.f32.mrf.mxu1  ;;  %v14925_v59 = vpop.f32.mrf.mxu0 }
 0x334   :  { %16902 = vst [vmem:[#allocation37_spill] sm:$0xff] %v14925_v59 }
 0x335   :  { %v14927_v40 = vpop.f32.mrf.mxu1  ;;  %v14929_v35 = vpop.f32.mrf.mxu0 }
 0x336   :  { %16903 = vst [vmem:[#allocation38_spill] sm:$0xff] %v14929_v35 }
 0x337   :  { %v14931_v54 = vpop.f32.mrf.mxu1  ;;  %v14933_v50 = vpop.f32.mrf.mxu0 }
 0x338   :  { %16904 = vst [vmem:[#allocation13_spill] sm:$0xff] %v14931_v54  ;;  %16905 = vst [vmem:[#allocation15_spill] sm:$0xff] %v14933_v50  ;;  %v4389_v54 = vadd.f32 %v10375_v9, %v14843_v21  ;;  %v4390_v21 = vadd.f32 %v4327_v30, %v14855_v52  ;;  %v4392_v52 = vadd.f32 %v4337_v57, %v14863_v1 }
 0x339   :  { %v14935_v36 = vpop.f32.mrf.mxu1  ;;  %v14937_v56 = vpop.f32.mrf.mxu0 }
 0x33a   :  { %16906 = vst [vmem:[#allocation17_spill] sm:$0xff] %v14935_v36  ;;  %16907 = vst [vmem:[#allocation39_spill] sm:$0xff] %v14937_v56 }
 0x33b   :  { %v14939_v61 = vpop.f32.mrf.mxu1  ;;  %v14941_v32 = vpop.f32.mrf.mxu0 }
 0x33c   :  { %16908 = vst [vmem:[#allocation40_spill] sm:$0xff] %v14939_v61  ;;  %16909 = vst [vmem:[#allocation16_spill] sm:$0xff] %v14941_v32 }
 0x33d   :  { %v14943_v51 = vpop.f32.mrf.mxu1  ;;  %v14945_v60 = vpop.f32.mrf.mxu0 }
 0x33e   :  { %16910 = vst [vmem:[#allocation18_spill] sm:$0xff] %v14943_v51  ;;  %16911 = vst [vmem:[#allocation20_spill] sm:$0xff] %v14945_v60 }
 0x33f   :  { %v10452_v7 = vpop.f32.mrf.mxu1  ;;  %v10572_v59 = vpop.f32.mrf.mxu0 }
 0x341   :  { %v4773_v43 = vpop.f32.mrf.mxu1  ;;  %v5473_v4 = vpop.f32.mrf.mxu0 }
 0x343   :  { %v10455_v35 = vpop.f32.mrf.mxu1  ;;  %v10575_v20 = vpop.f32.mrf.mxu0 }
 0x345   :  { %v4783_v10 = vpop.f32.mrf.mxu1  ;;  %v14947_v56 = vpop.f32.mrf.mxu0 }
 0x347   :  { %v10458_v31 = vpop.f32.mrf.mxu1  ;;  %v14953_v51 = vpop.f32.mrf.mxu0 }
 0x348   :  { %16913 = vst [vmem:[#allocation42_spill] sm:$0xff] %v14953_v51  ;;  %v4853_v51 = vadd.f32 %v10452_v7, %v4620_v12 }
 0x349   :  { %v4793_v50 = vpop.f32.mrf.mxu1  ;;  %v14961_v37 = vpop.f32.mrf.mxu0 }
 0x34b   :  { %v10461_v15 = vpop.f32.mrf.mxu1  ;;  %v14972_v19 = vpop.f32.mrf.mxu0 }
 0x34d   :  { %v4803_v45 = vpop.f32.mrf.mxu1  ;;  %v14984_v12 = vpop.f32.mrf.mxu0 }
 0x34f   :  { %v14949_v61 = vpop.f32.mrf.mxu1  ;;  %v14998_v1 = vpop.f32.mrf.mxu0 }
 0x351   :  { %v14951_v32 = vpop.f32.mrf.mxu1  ;;  %v15010_v23 = vpop.f32.mrf.mxu0 }
 0x352   :  { %16912 = vst [vmem:[#allocation41_spill] sm:$0xff] %v14951_v32  ;;  %v4388_v32 = vadd.f32 %v4317_v34, %v14847_v22  ;;  %v5087_v22 = vadd.f32 %v14896_v5, %v4853_v51  ;;  %v4857_v34 = vadd.f32 %v10458_v31, %v4624_v41  ;;  %v16919_v41 = vld [vmem:[#allocation13_spill] sm:$0xff] }
 0x353   :  { %v14955_v60 = vpop.f32.mrf.mxu1 }
 0x354   :  { %16914 = vst [vmem:[#allocation19_spill] sm:$0xff] %v14955_v60  ;;  %v4619_v60 = vadd.f32 %v14833_v38, %v4386_v42  ;;  %v4621_v29 = vadd.f32 %v14841_v47, %v4388_v32  ;;  %v4393_v38 = vadd.f32 %v10381_v49, %v14859_v28  ;;  %v14992_v47 = vld [vmem:[%s16770_s5] ss:$0 sm:$0xff]  ;;  %s10700_s5 = smov [#allocation5]  }
 0x355   :  { %v14958_v36 = vpop.f32.mrf.mxu1 }
 0x356   :  { %v4852_v25 = vadd.f32 %v4773_v43, %v4619_v60  ;;  %v4854_v7 = vadd.f32 %v4783_v10, %v4621_v29  ;;  %v4395_v10 = vadd.f32 %v14915_v14, %v14867_v2  ;;  %v5091_v14 = vadd.f32 %v14907_v6, %v4857_v34  ;;  %v16917_v29 = vld [vmem:[#allocation42_spill] sm:$0xff] }
 0x357   :  { %v14963_v27 = vpop.f32.mrf.mxu1 }
 0x358   :  { %16915 = vst [vmem:[#allocation21_spill] sm:$0xff] %v14963_v27  ;;  %v4622_v27 = vadd.f32 %v14837_v39, %v4389_v54  ;;  %v5086_v39 = vadd.f32 %v14901_v3, %v4852_v25  ;;  %v4626_v3 = vadd.f32 %v14853_v33, %v4393_v38  ;;  %v4625_v54 = vadd.f32 %v14857_v18, %v4392_v52 }
 0x359   :  { %v14967_v17 = vpop.f32.mrf.mxu1  ;;  %v4396_v25 = vadd.f32 %v14927_v40, %v14879_v24  ;;  %v16921_v40 = vld [vmem:[#allocation43_spill] sm:$0xff] }
 0x35a   :  { %v4855_v44 = vadd.f32 %v10455_v35, %v4622_v27  ;;  %v4623_v27 = vadd.f32 %v14849_v62, %v4390_v21  ;;  %v5088_v35 = vadd.f32 %v14905_v26, %v4854_v7  ;;  %v4858_v60 = vadd.f32 %v4803_v45, %v4625_v54  ;;  %v16920_v7 = vld [vmem:[#allocation41_spill] sm:$0xff] }
 0x35b   :  { %v14974_v13 = vpop.f32.mrf.mxu1  ;;  %v4628_v26 = vadd.f32 %v14861_v53, %v4395_v10 }
 0x35c   :  { %v5089_v58 = vadd.f32 %v14903_v11, %v4855_v44  ;;  %v4856_v30 = vadd.f32 %v4793_v50, %v4623_v27  ;;  %v4859_v11 = vadd.f32 %v10461_v15, %v4626_v3 }
 0x35d   :  { %v14978_v9 = vpop.f32.mrf.mxu1 }
 0x35e   :  { %v5090_v15 = vadd.f32 %v14909_v46, %v4856_v30  ;;  %v16925_v30 = vld [vmem:[#allocation19_spill] sm:$0xff] }
 0x35f   :  { %v10532_v42 = vpop.f32.mrf.mxu1 }
 0x360   :  { %v5320_v43 = vadd.f32 %v10532_v42, %v5087_v22 }
 0x361   :  { %v5240_v28 = vpop.f32.mrf.mxu1 }
 0x362   :  { %v5553_v5 = vadd.f32 %v10572_v59, %v5320_v43  ;;  %v5319_v55 = vadd.f32 %v5240_v28, %v5086_v39  ;;  %v4394_v59 = vadd.f32 %v14919_v8, %v14871_v0  ;;  %v10587_v43 = vpop.f32.mrf.mxu0  ;;  %v16922_v39 = vld [vmem:[#allocation12_spill] sm:$0xff] }
 0x363   :  { %v10535_v62 = vpop.f32.mrf.mxu1  ;;  %v5092_v52 = vadd.f32 %v16922_v39, %v4858_v60 }
 0x364   :  { %v5576_v49 = vadd.f32 %v14992_v47, %v5553_v5  ;;  %v5552_v57 = vadd.f32 %v5473_v4, %v5319_v55  ;;  %v5322_v31 = vadd.f32 %v10535_v62, %v5089_v58  ;;  %v4397_v4 = vadd.f32 %v14923_v16, %v14875_v63  ;;  %v16916_v16 = vld [vmem:[#allocation10_spill] sm:$0xff]  ;;  %v16923_v55 = vld [vmem:[#allocation35_spill] sm:$0xff]  ;;  %v16924_v58 = vld [vmem:[#allocation17_spill] sm:$0xff] }
 0x365   :  { %v5250_v2 = vpop.f32.mrf.mxu1  ;;  %v4861_v63 = vadd.f32 %v14949_v61, %v4628_v26  ;;  %v4627_v53 = vadd.f32 %v14865_v48, %v4394_v59  ;;  %v5093_v21 = vadd.f32 %v16916_v16, %v4859_v11  ;;  %v4398_v10 = vadd.f32 %v16924_v58, %v16923_v55  ;;  %v16926_v62 = vld [vmem:[#allocation33_spill] sm:$0xff]  ;;  %v16931_v26 = vld [vmem:[#allocation52_spill] sm:$0xff] }
 0x366   :  { %v5592_v33 = vmax.f32 %v5576_v49, 0.0  ;;  %v5575_v50 = vadd.f32 %v14992_v47, %v5552_v57  ;;  %v5555_v32 = vadd.f32 %v10575_v20, %v5322_v31  ;;  %v5321_v51 = vadd.f32 %v5250_v2, %v5088_v35  ;;  %v16927_v31 = vld [vmem:[#allocation14_spill] sm:$0xff] }
 0x367   :  { %v10538_v0 = vpop.f32.mrf.mxu1  ;;  %v4860_v24 = vadd.f32 %v16920_v7, %v4627_v53  ;;  %v4630_v61 = vadd.f32 %v16921_v40, %v4397_v4  ;;  %v4629_v49 = vadd.f32 %v16926_v62, %v4396_v25  ;;  %v5095_v35 = vadd.f32 %v16927_v31, %v4861_v63  ;;  %v16934_v63 = vld [vmem:[#allocation21_spill] sm:$0xff] }
 0x368   :  { %5609 = vst.msk [vmem:[#allocation3 + $0x8] sm:$0xff] %vm5607_vm4, %v5592_v33  ;;  %v5591_v18 = vmax.f32 %v5575_v50, 0.0  ;;  %v5578_v6 = vadd.f32 %v14992_v47, %v5555_v32  ;;  %v5554_v8 = vadd.f32 %v14947_v56, %v5321_v51  ;;  %v5324_v20 = vadd.f32 %v10538_v0, %v5091_v14  ;;  %v16918_v56 = vld [vmem:[#allocation9_spill] sm:$0xff]  ;;  %v16929_v14 = vld [vmem:[#allocation40_spill] sm:$0xff]  ;;  %v5523_v32 = vpop.f32.mrf.mxu0  ;;  %v16930_v51 = vld [vmem:[#allocation34_spill] sm:$0xff] }
 0x369   :  { %v5260_v45 = vpop.f32.mrf.mxu1  ;;  %v4399_v42 = vadd.f32 %v16919_v41, %v16918_v56  ;;  %v4863_v3 = vadd.f32 %v16925_v30, %v4630_v61  ;;  %v4862_v50 = vadd.f32 %v14958_v36, %v4629_v49  ;;  %v5094_v0 = vadd.f32 %v16931_v26, %v4860_v24  ;;  %v16935_v36 = vld [vmem:[#allocation8_spill] sm:$0xff]  ;;  %v16937_v41 = vld [vmem:[#allocation11_spill] sm:$0xff]  ;;  %v16938_v24 = vld [vmem:[#allocation38_spill] sm:$0xff] }
 0x36a   :  { %5608 = vst.msk [vmem:[#allocation3] sm:$0xff] %vm5607_vm4, %v5591_v18  ;;  %v5594_v46 = vmax.f32 %v5578_v6, 0.0  ;;  %v5577_v44 = vadd.f32 %v14992_v47, %v5554_v8  ;;  %v5557_v22 = vadd.f32 %v16917_v29, %v5324_v20  ;;  %v5323_v38 = vadd.f32 %v5260_v45, %v5090_v15  ;;  %v16932_v8 = vld [vmem:[#allocation49_spill] sm:$0xff]  ;;  %v16933_v20 = vld [vmem:[#allocation18_spill] sm:$0xff] }
 0x36b   :  { %v10541_v48 = vpop.f32.mrf.mxu1  ;;  %v4632_v4 = vadd.f32 %v16930_v51, %v4399_v42  ;;  %v4400_v25 = vadd.f32 %v16933_v20, %v16932_v8  ;;  %v4631_v45 = vadd.f32 %v16935_v36, %v4398_v10  ;;  %v5096_v40 = vadd.f32 %v16938_v24, %v4862_v50  ;;  %v7511_v50 = vld [vmem:[%s16771_s6 + $0xf8] sm:$0xff]  ;;  %v7509_v26 = vld [vmem:[%s16771_s6 + $0xe8] sm:$0xff] }
 0x36c   :  { %5611 = vst.msk [vmem:[#allocation3 + $0x18] sm:$0xff] %vm5607_vm4, %v5594_v46  ;;  %v5593_v34 = vmax.f32 %v5577_v44, 0.0  ;;  %v5580_v27 = vadd.f32 %v14992_v47, %v5557_v22  ;;  %v5556_v28 = vadd.f32 %v14961_v37, %v5323_v38  ;;  %v5326_v5 = vadd.f32 %v10541_v48, %v5093_v21  ;;  %v16928_v37 = vld [vmem:[#allocation46_spill] sm:$0xff]  ;;  %v16936_v21 = vld [vmem:[#allocation37_spill] sm:$0xff]  ;;  %7792 = vmatprep.subr.mxu1 %v7511_v50 }
 0x36d   :  { %v5270_v57 = vpop.f32.mrf.mxu1  ;;  %v4401_v33 = vadd.f32 %v16929_v14, %v16928_v37  ;;  %v4865_v53 = vadd.f32 %v16934_v63, %v4632_v4  ;;  %v5097_v46 = vadd.f32 %v16936_v21, %v4863_v3  ;;  %v4864_v56 = vadd.f32 %v14967_v17, %v4631_v45  ;;  %v16943_v4 = vld [vmem:[#allocation20_spill] sm:$0xff]  ;;  %v7504_v50 = vld [vmem:[%s16771_s6 + $0xc0] sm:$0xff] }
 0x36e   :  { %5610 = vst.msk [vmem:[#allocation3 + $0x10] sm:$0xff] %vm5607_vm4, %v5593_v34  ;;  %v5596_v59 = vmax.f32 %v5580_v27, 0.0  ;;  %v5579_v11 = vadd.f32 %v14992_v47, %v5556_v28  ;;  %v5559_v54 = vadd.f32 %v14972_v19, %v5326_v5  ;;  %v5325_v2 = vadd.f32 %v5270_v57, %v5092_v52  ;;  %v16940_v5 = vld [vmem:[#allocation15_spill] sm:$0xff]  ;;  %v7507_v21 = vld [vmem:[%s16771_s6 + $0xd8] sm:$0xff] }
 0x36f   :  { %v10544_v60 = vpop.f32.mrf.mxu1  ;;  %v4634_v42 = vadd.f32 %v16937_v41, %v4401_v33  ;;  %v5099_v17 = vadd.f32 %v16940_v5, %v4865_v53  ;;  %v7574_v63 = vld [vmem:[%s16771_s6 + $0x2f0] sm:$0xff] }
 0x370   :  { %5613 = vst.msk [vmem:[#allocation3 + $0x28] sm:$0xff] %vm5607_vm4, %v5596_v59  ;;  %v5595_v15 = vmax.f32 %v5579_v11, 0.0  ;;  %v5582_v18 = vadd.f32 %v14992_v47, %v5559_v54  ;;  %v5558_v6 = vadd.f32 %v14984_v12, %v5325_v2  ;;  %v5328_v19 = vadd.f32 %v10544_v60, %v5095_v35  ;;  %v10590_v12 = vpop.f32.mrf.mxu0  ;;  %v16942_v54 = vld [vmem:[#allocation16_spill] sm:$0xff] }
 0x371   :  { %v5280_v16 = vpop.f32.mrf.mxu1  ;;  %v4867_v34 = vadd.f32 %v14974_v13, %v4634_v42 }
 0x372   :  { %5612 = vst.msk [vmem:[#allocation3 + $0x20] sm:$0xff] %vm5607_vm4, %v5595_v15  ;;  %v5598_v44 = vmax.f32 %v5582_v18, 0.0  ;;  %v5581_v29 = vadd.f32 %v14992_v47, %v5558_v6  ;;  %v5561_v22 = vadd.f32 %v14998_v1, %v5328_v19  ;;  %v5327_v38 = vadd.f32 %v5280_v16, %v5094_v0  ;;  %v16939_v1 = vld [vmem:[#allocation36_spill] sm:$0xff]  ;;  %v5533_v3 = vpop.f32.mrf.mxu0 }
 0x373   :  { %v10547_v7 = vpop.f32.mrf.mxu1  ;;  %v4633_v27 = vadd.f32 %v16939_v1, %v4400_v25  ;;  %v5101_v2 = vadd.f32 %v16942_v54, %v4867_v34  ;;  %v7575_v19 = vld [vmem:[%s16771_s6 + $0x2f8] sm:$0xff]  ;;  %v7508_v25 = vld [vmem:[%s16771_s6 + $0xe0] sm:$0xff] }
 0x374   :  { %5615 = vst.msk [vmem:[#allocation3 + $0x38] sm:$0xff] %vm5607_vm4, %v5598_v44  ;;  %v5597_v61 = vmax.f32 %v5581_v29, 0.0  ;;  %v5584_v48 = vadd.f32 %v14992_v47, %v5561_v22  ;;  %v5560_v39 = vadd.f32 %v15010_v23, %v5327_v38  ;;  %v5330_v52 = vadd.f32 %v10547_v7, %v5097_v46  ;;  %v16941_v23 = vld [vmem:[#allocation39_spill] sm:$0xff]  ;;  %v10593_v37 = vpop.f32.mrf.mxu0  ;;  %7863 = vmatprep.subr.mxu0 %v7575_v19 }
 0x375   :  { %v5290_v28 = vpop.f32.mrf.mxu1  ;;  %v4866_v62 = vadd.f32 %v14978_v9, %v4633_v27  ;;  %v5098_v57 = vadd.f32 %v16941_v23, %v4864_v56  ;;  %7864 = vmatpush1.msra.mxu0 %v7574_v63  ;;  %v9116_v46 = vld.sshfl [vmem:[#allocation3 + $0xa] sm:$0x1 pattern:$0x76325410] }
 0x376   :  { %5614 = vst.msk [vmem:[#allocation3 + $0x30] sm:$0xff] %vm5607_vm4, %v5597_v61  ;;  %v5600_v55 = vmax.f32 %v5584_v48, 0.0  ;;  %v5583_v58 = vadd.f32 %v14992_v47, %v5560_v39  ;;  %v5563_v10 = vadd.f32 %v10587_v43, %v5330_v52  ;;  %v5329_v30 = vadd.f32 %v5290_v28, %v5096_v40  ;;  %v5543_v20 = vpop.f32.mrf.mxu0  ;;  %v9114_v56 = vld.sshfl [vmem:[#allocation3 + $0x9] sm:$0x1 pattern:$0x76325410] }
 0x377   :  { %v10550_v49 = vpop.f32.mrf.mxu1  ;;  %v5100_v60 = vadd.f32 %v16943_v4, %v4866_v62  ;;  %v9118_v7 = vld.sshfl [vmem:[#allocation3 + $0xb] sm:$0x1 pattern:$0x76325410]  ;;  %v7572_v62 = vld [vmem:[%s16771_s6 + $0x2e0] sm:$0xff] }
 0x378   :  { %5617 = vst.msk [vmem:[#allocation3 + $0x48] sm:$0xff] %vm5607_vm4, %v5600_v55  ;;  %v5599_v13 = vmax.f32 %v5583_v58, 0.0  ;;  %v5586_v31 = vadd.f32 %v14992_v47, %v5563_v10  ;;  %v5562_v35 = vadd.f32 %v5523_v32, %v5329_v30  ;;  %v5332_v59 = vadd.f32 %v10550_v49, %v5099_v17  ;;  %v7510_v32 = vld [vmem:[%s16771_s6 + $0xf0] sm:$0xff]  ;;  %v7573_v40 = vld [vmem:[%s16771_s6 + $0x2e8] sm:$0xff] }
 0x379   :  { %v5300_v11 = vpop.f32.mrf.mxu1  ;;  %7793 = vmatpush1.msra.mxu1 %v7510_v32  ;;  %v9098_v34 = vld.sshfl [vmem:[#allocation3 + $0x1] sm:$0x1 pattern:$0x76325410]  ;;  %7865 = vmatprep.subr.mxu0 %v7573_v40  ;;  %v7506_v55 = vld [vmem:[%s16771_s6 + $0xd0] sm:$0xff] }
 0x37a   :  { %5616 = vst.msk [vmem:[#allocation3 + $0x40] sm:$0xff] %vm5607_vm4, %v5599_v13  ;;  %v5602_v43 = vmax.f32 %v5586_v31, 0.0  ;;  %v5585_v14 = vadd.f32 %v14992_v47, %v5562_v35  ;;  %v5565_v9 = vadd.f32 %v10590_v12, %v5332_v59  ;;  %v5331_v33 = vadd.f32 %v5300_v11, %v5098_v57  ;;  %7794 = vmatprep.subr.mxu1 %v7509_v26  ;;  %v9120_v31 = vld.sshfl [vmem:[#allocation3 + $0xc] sm:$0x1 pattern:$0x76325410] }
 0x37b   :  { %v10553_v51 = vpop.f32.mrf.mxu1  ;;  %7795 = vmatpush1.msra.mxu1 %v7508_v25  ;;  %7866 = vmatpush1.msra.mxu0 %v7572_v62  ;;  %v7505_v59 = vld [vmem:[%s16771_s6 + $0xc8] sm:$0xff]  ;;  %v7571_v11 = vld [vmem:[%s16771_s6 + $0x2d8] sm:$0xff]  ;;  %v9102_v32 = vld.sshfl [vmem:[#allocation3 + $0x3] sm:$0x1 pattern:$0x76325410] }
 0x37c   :  { %5619 = vst.msk [vmem:[#allocation3 + $0x58] sm:$0xff] %vm5607_vm4, %v5602_v43  ;;  %v5601_v0 = vmax.f32 %v5585_v14, 0.0  ;;  %v5588_v15 = vadd.f32 %v14992_v47, %v5565_v9  ;;  %v5564_v18 = vadd.f32 %v5533_v3, %v5331_v33  ;;  %v5334_v6 = vadd.f32 %v10553_v51, %v5101_v2  ;;  %7796 = vmatprep.subr.mxu1 %v7507_v21  ;;  %v9100_v14 = vld.sshfl [vmem:[#allocation3 + $0x2] sm:$0x1 pattern:$0x76325410] }
 0x37d   :  { %v5310_v8 = vpop.f32.mrf.mxu1  ;;  %7797 = vmatpush1.msra.mxu1 %v7506_v55  ;;  %v9122_v9 = vld.sshfl [vmem:[#allocation3 + $0xd] sm:$0x1 pattern:$0x76325410]  ;;  %7867 = vmatprep.subr.mxu0 %v7571_v11  ;;  %v7568_v40 = vld [vmem:[%s16771_s6 + $0x2c0] sm:$0xff]  ;;  %v7567_v55 = vld [vmem:[%s16771_s6 + $0x2b8] sm:$0xff] }
 0x37e   :  { %5618 = vst.msk [vmem:[#allocation3 + $0x50] sm:$0xff] %vm5607_vm4, %v5601_v0  ;;  %v5604_v53 = vmax.f32 %v5588_v15, 0.0  ;;  %v5587_v36 = vadd.f32 %v14992_v47, %v5564_v18  ;;  %v5333_v45 = vadd.f32 %v5310_v8, %v5100_v60  ;;  %v5567_v16 = vadd.f32 %v10593_v37, %v5334_v6  ;;  %7798 = vmatprep.subr.mxu1 %v7505_v59  ;;  %v9124_v63 = vld.sshfl [vmem:[#allocation3 + $0xe] sm:$0x1 pattern:$0x76325410] }
 0x37f   :  { %v9117_v44 = vld.sshfl [vmem:[#allocation3 + $0x4a] sm:$0x1 pattern:$0x76325410]  ;;  %7799 = vmatpush1.msra.mxu1 %v7504_v50  ;;  %v7566_v59 = vld [vmem:[%s16771_s6 + $0x2b0] sm:$0xff]  ;;  %v7499_v11 = vld [vmem:[%s16771_s6 + $0x98] sm:$0xff] }
 0x380   :  { %5621 = vst.msk [vmem:[#allocation3 + $0x68] sm:$0xff] %vm5607_vm4, %v5604_v53  ;;  %v5603_v29 = vmax.f32 %v5587_v36, 0.0  ;;  %v5590_v22 = vadd.f32 %v14992_v47, %v5567_v16  ;;  %v5566_v38 = vadd.f32 %v5543_v20, %v5333_v45  ;;  %v5944_v12 = vrot.slane %v9117_v44, 7  ;;  %v7570_v36 = vld [vmem:[%s16771_s6 + $0x2d0] sm:$0xff] }
 0x381   :  { %v9115_v41 = vld.sshfl [vmem:[#allocation3 + $0x49] sm:$0x1 pattern:$0x76325410]  ;;  %7868 = vmatpush1.msra.mxu0 %v7570_v36 }
 0x382   :  { %v5915_v42 = vrot.slane %v9115_v41, 7  ;;  %v9119_v24 = vld.sshfl [vmem:[#allocation3 + $0x4b] sm:$0x1 pattern:$0x76325410]  ;;  %5620 = vst.msk [vmem:[#allocation3 + $0x60] sm:$0xff] %vm5607_vm4, %v5603_v29  ;;  %v5589_v48 = vadd.f32 %v14992_v47, %v5566_v38  ;;  %v5945_v39 = vsel %vm5647_vm5, %v5944_v12, %v9116_v46 }
 0x383   :  { %v5606_v61 = vmax.f32 %v5590_v22, 0.0  ;;  %v5973_v52 = vrot.slane %v9119_v24, 7  ;;  %v9099_v1 = vld.sshfl [vmem:[#allocation3 + $0x41] sm:$0x1 pattern:$0x76325410]  ;;  %v5946_v27 = vsel %vm5649_vm6, %v5944_v12, %v5945_v39 }
 0x384   :  { %v5916_v28 = vsel %vm5647_vm5, %v5915_v42, %v9114_v56  ;;  %v5678_v5 = vrot.slane %v9099_v1, 7  ;;  %v9121_v17 = vld.sshfl [vmem:[#allocation3 + $0x4c] sm:$0x1 pattern:$0x76325410]  ;;  %v5605_v58 = vmax.f32 %v5589_v48, 0.0  ;;  %v5947_v47 = vsel %vm5651_vm7, %v5944_v12, %v5946_v27 }
 0x385   :  { %5623 = vst.msk [vmem:[#allocation3 + $0x78] sm:$0xff] %vm5607_vm4, %v5606_v61  ;;  %v5917_v10 = vsel %vm5649_vm6, %v5915_v42, %v5916_v28  ;;  %v5974_v30 = vsel %vm5647_vm5, %v5973_v52, %v9118_v7  ;;  %v9101_v3 = vld.sshfl [vmem:[#allocation3 + $0x42] sm:$0x1 pattern:$0x76325410]  ;;  %v5948_v49 = vsel %vm5653_vm8, %v5944_v12, %v5947_v47  ;;  %v6002_v43 = vrot.slane %v9121_v17, 7 }
 0x386   :  { %v5918_v23 = vsel %vm5651_vm7, %v5915_v42, %v5917_v10  ;;  %v5975_v57 = vsel %vm5649_vm6, %v5973_v52, %v5974_v30  ;;  %v5679_v13 = vsel %vm5647_vm5, %v5678_v5, %v9098_v34  ;;  %v9123_v35 = vld.sshfl [vmem:[#allocation3 + $0x4d] sm:$0x1 pattern:$0x76325410]  ;;  %5622 = vst.msk [vmem:[#allocation3 + $0x70] sm:$0xff] %vm5607_vm4, %v5605_v58  ;;  %5949 = vrot.lane.b32.xlu1 %v5948_v49, %s10691_s24  ;;  %v5708_v4 = vrot.slane %v9101_v3, 7 }
 0x387   :  { %v5919_v54 = vsel %vm5653_vm8, %v5915_v42, %v5918_v23  ;;  %v5976_v2 = vsel %vm5651_vm7, %v5973_v52, %v5975_v57  ;;  %v5680_v37 = vsel %vm5649_vm6, %v5678_v5, %v5679_v13  ;;  %v9103_v33 = vld.sshfl [vmem:[#allocation3 + $0x43] sm:$0x1 pattern:$0x76325410]  ;;  %v15140_v60 = vrot.slane %v9123_v35, 7  ;;  %v7503_v29 = vld [vmem:[%s16771_s6 + $0xb8] sm:$0xff] }
 0x388   :  { %5920 = vrot.lane.b32.xlu0 %v5919_v54, %s10692_s27  ;;  %v5681_v51 = vsel %vm5651_vm7, %v5678_v5, %v5680_v37  ;;  %v9125_v26 = vld.sshfl [vmem:[#allocation3 + $0x4e] sm:$0x1 pattern:$0x76325410]  ;;  %v5977_v0 = vsel %vm5653_vm8, %v5973_v52, %v5976_v2  ;;  %v6003_v15 = vsel %vm5647_vm5, %v6002_v43, %v9120_v31  ;;  %v15144_v18 = vrot.slane %v9103_v33, 7  ;;  %v7502_v41 = vld [vmem:[%s16771_s6 + $0xb0] sm:$0xff]  ;;  %7800 = vmatprep.subr.mxu1 %v7503_v29 }
 0x389   :  { %v15146_v6 = vrot.slane %v9125_v26, 7  ;;  %v9105_v19 = vld.sshfl [vmem:[#allocation3 + $0x44] sm:$0x1 pattern:$0x76325410]  ;;  %v6004_v8 = vsel %vm5649_vm6, %v6002_v43, %v6003_v15  ;;  %v5709_v20 = vsel %vm5647_vm5, %v5708_v4, %v9100_v14  ;;  %v6032_v25 = vsel %vm5647_vm5, %v15140_v60, %v9122_v9  ;;  %v7569_v22 = vld [vmem:[%s16771_s6 + $0x2c8] sm:$0xff]  ;;  %7801 = vmatpush1.msra.mxu1 %v7502_v41 }
 0x38a   :  { %v15152_v53 = vrot.slane %v9105_v19, 7  ;;  %5978 = vrot.lane.b32.xlu1 %v5977_v0, %s10693_s0  ;;  %v5682_v45 = vsel %vm5653_vm8, %v5678_v5, %v5681_v51  ;;  %v6005_v16 = vsel %vm5651_vm7, %v6002_v43, %v6004_v8  ;;  %v5710_v21 = vsel %vm5649_vm6, %v5708_v4, %v5709_v20  ;;  %v9147_v44 = vld.sshfl [vmem:[#allocation3 + $0x59] sm:$0x1 pattern:$0x76325410]  ;;  %7869 = vmatprep.subr.mxu0 %v7569_v22  ;;  %v7501_v1 = vld [vmem:[%s16771_s6 + $0xa8] sm:$0xff] }
 0x38b   :  { %v5739_v46 = vsel %vm5647_vm5, %v15144_v18, %v9102_v32  ;;  %v5711_v38 = vsel %vm5651_vm7, %v5708_v4, %v5710_v21  ;;  %v6033_v12 = vsel %vm5649_vm6, %v15140_v60, %v6032_v25  ;;  %v9107_v56 = vld.sshfl [vmem:[#allocation3 + $0x45] sm:$0x1 pattern:$0x76325410]  ;;  %v6061_v7 = vsel %vm5647_vm5, %v15146_v6, %v9124_v63  ;;  %7870 = vmatpush1.msra.mxu0 %v7568_v40  ;;  %v7498_v14 = vld [vmem:[%s16771_s6 + $0x90] sm:$0xff]  ;;  %v7497_v25 = vld [vmem:[%s16771_s6 + $0x88] sm:$0xff] }
 0x38c   :  { %5683 = vrot.lane.b32.xlu0 %v5682_v45, %s10692_s27  ;;  %v5740_v42 = vsel %vm5649_vm6, %v15144_v18, %v5739_v46  ;;  %v9104_v24 = vld.sshfl [vmem:[#allocation3 + $0x4] sm:$0x1 pattern:$0x76325410]  ;;  %v6006_v61 = vsel %vm5653_vm8, %v6002_v43, %v6005_v16  ;;  %v15186_v52 = vrot.slane %v9147_v44, 7  ;;  %v5712_v27 = vsel %vm5653_vm8, %v5708_v4, %v5711_v38  ;;  %7802 = vmatprep.subr.mxu1 %v7501_v1  ;;  %v7565_v43 = vld [vmem:[%s16771_s6 + $0x2a8] sm:$0xff] }
 0x38d   :  { %v5769_v48 = vsel %vm5647_vm5, %v15152_v53, %v9104_v24  ;;  %v9146_v39 = vld.sshfl [vmem:[#allocation3 + $0x19] sm:$0x1 pattern:$0x76325410]  ;;  %v6034_v28 = vsel %vm5651_vm7, %v15140_v60, %v6033_v12  ;;  %v15195_v5 = vrot.slane %v9107_v56, 7  ;;  %v5741_v58 = vsel %vm5651_vm7, %v15144_v18, %v5740_v42  ;;  %v7500_v23 = vld [vmem:[%s16771_s6 + $0xa0] sm:$0xff]  ;;  %7871 = vmatprep.subr.mxu0 %v7567_v55 }
 0x38e   :  { %v9149_v34 = vld.sshfl [vmem:[#allocation3 + $0x5a] sm:$0x1 pattern:$0x76325410]  ;;  %6007 = vrot.lane.b32.xlu1 %v6006_v61, %s10694_s3  ;;  %v6062_v47 = vsel %vm5649_vm6, %v15146_v6, %v6061_v7  ;;  %v5770_v30 = vsel %vm5649_vm6, %v15152_v53, %v5769_v48  ;;  %v6376_v3 = vsel %vm5647_vm5, %v15186_v52, %v9146_v39  ;;  %v6035_v57 = vsel %vm5653_vm8, %v15140_v60, %v6034_v28  ;;  %v7564_v19 = vld [vmem:[%s16771_s6 + $0x2a0] sm:$0xff]  ;;  %v7562_v22 = vld [vmem:[%s16771_s6 + $0x290] sm:$0xff] }
 0x38f   :  { %v9109_v17 = vld.sshfl [vmem:[#allocation3 + $0x46] sm:$0x1 pattern:$0x76325410]  ;;  %v15209_v62 = vrot.slane %v9149_v34, 7  ;;  %v5742_v54 = vsel %vm5653_vm8, %v15144_v18, %v5741_v58  ;;  %v6063_v2 = vsel %vm5651_vm7, %v15146_v6, %v6062_v47  ;;  %v5771_v9 = vsel %vm5651_vm7, %v15152_v53, %v5770_v30  ;;  %7803 = vmatpush1.msra.mxu1 %v7500_v23  ;;  %7872 = vmatpush1.msra.mxu0 %v7566_v59  ;;  %v7563_v63 = vld [vmem:[%s16771_s6 + $0x298] sm:$0xff] }
 0x390   :  { %5713 = vrot.lane.b32.xlu0 %v5712_v27, %s10691_s24  ;;  %v9106_v10 = vld.sshfl [vmem:[#allocation3 + $0x5] sm:$0x1 pattern:$0x76325410]  ;;  %v15218_v35 = vrot.slane %v9109_v17, 7  ;;  %v6377_v33 = vsel %vm5649_vm6, %v15186_v52, %v6376_v3  ;;  %7804 = vmatprep.subr.mxu1 %v7499_v11  ;;  %v6064_v26 = vsel %vm5653_vm8, %v15146_v6, %v6063_v2  ;;  %v5772_v8 = vsel %vm5653_vm8, %v15152_v53, %v5771_v9  ;;  %v7495_v42 = vld [vmem:[%s16771_s6 + $0x78] sm:$0xff] }
 0x391   :  { %v9151_v49 = vld.sshfl [vmem:[#allocation3 + $0x5b] sm:$0x1 pattern:$0x76325410]  ;;  %v5799_v13 = vsel %vm5647_vm5, %v15195_v5, %v9106_v10  ;;  %7873 = vmatprep.subr.mxu0 %v7565_v43  ;;  %7805 = vmatpush1.msra.mxu1 %v7498_v14  ;;  %v6378_v6 = vsel %vm5651_vm7, %v15186_v52, %v6377_v33  ;;  %v7496_v16 = vld [vmem:[%s16771_s6 + $0x80] sm:$0xff]  ;;  %v7561_v7 = vld [vmem:[%s16771_s6 + $0x288] sm:$0xff] }
 0x392   :  { %v9148_v31 = vld.sshfl [vmem:[#allocation3 + $0x1a] sm:$0x1 pattern:$0x76325410]  ;;  %6036 = vrot.lane.b32.xlu1 %v6035_v57, %s10695_s1  ;;  %v5800_v51 = vsel %vm5649_vm6, %v15195_v5, %v5799_v13  ;;  %v15246_v60 = vrot.slane %v9151_v49, 7  ;;  %7874 = vmatpush1.msra.mxu0 %v7564_v19  ;;  %v6379_v38 = vsel %vm5653_vm8, %v15186_v52, %v6378_v6  ;;  %v7494_v48 = vld [vmem:[%s16771_s6 + $0x70] sm:$0xff] }
 0x393   :  { %v9111_v37 = vld.sshfl [vmem:[#allocation3 + $0x47] sm:$0x1 pattern:$0x76325410]  ;;  %v6405_v4 = vsel %vm5647_vm5, %v15209_v62, %v9148_v31  ;;  %v5801_v36 = vsel %vm5651_vm7, %v15195_v5, %v5800_v51  ;;  %7806 = vmatprep.subr.mxu1 %v7497_v25  ;;  %7875 = vmatprep.subr.mxu0 %v7563_v63  ;;  %v7493_v27 = vld [vmem:[%s16771_s6 + $0x68] sm:$0xff]  ;;  %v7559_v58 = vld [vmem:[%s16771_s6 + $0x278] sm:$0xff] }
 0x394   :  { %5743 = vrot.lane.b32.xlu0 %v5742_v54, %s10693_s0  ;;  %v9108_v50 = vld.sshfl [vmem:[#allocation3 + $0x6] sm:$0x1 pattern:$0x76325410]  ;;  %v15252_v15 = vrot.slane %v9111_v37, 7  ;;  %v6406_v53 = vsel %vm5649_vm6, %v15209_v62, %v6405_v4  ;;  %v5802_v24 = vsel %vm5653_vm8, %v15195_v5, %v5801_v36  ;;  %7807 = vmatpush1.msra.mxu1 %v7496_v16  ;;  %v7558_v13 = vld [vmem:[%s16771_s6 + $0x270] sm:$0xff] }
 0x395   :  { %v9153_v32 = vld.sshfl [vmem:[#allocation3 + $0x5c] sm:$0x1 pattern:$0x76325410]  ;;  %v5829_v0 = vsel %vm5647_vm5, %v15218_v35, %v9108_v50  ;;  %v6407_v40 = vsel %vm5651_vm7, %v15209_v62, %v6406_v53  ;;  %v7560_v39 = vld [vmem:[%s16771_s6 + $0x280] sm:$0xff]  ;;  %7876 = vmatpush1.msra.mxu0 %v7562_v22  ;;  %7808 = vmatprep.subr.mxu1 %v7495_v42  ;;  %v7557_v2 = vld [vmem:[%s16771_s6 + $0x268] sm:$0xff] }
 0x396   :  { %v9133_v18 = vld.sshfl [vmem:[#allocation3 + $0x52] sm:$0x1 pattern:$0x76325410]  ;;  %6065 = vrot.lane.b32.xlu1 %v6064_v26, %s10696_s29  ;;  %v5830_v21 = vsel %vm5649_vm6, %v15218_v35, %v5829_v0  ;;  %v15280_v44 = vrot.slane %v9153_v32, 7  ;;  %7877 = vmatprep.subr.mxu0 %v7561_v7  ;;  %v6408_v47 = vsel %vm5653_vm8, %v15209_v62, %v6407_v40  ;;  %v7492_v49 = vld [vmem:[%s16771_s6 + $0x60] sm:$0xff] }
 0x397   :  { %v9150_v20 = vld.sshfl [vmem:[#allocation3 + $0x1b] sm:$0x1 pattern:$0x76325410]  ;;  %v15282_v29 = vrot.slane %v9133_v18, 7  ;;  %v5831_v52 = vsel %vm5651_vm7, %v15218_v35, %v5830_v21  ;;  %7809 = vmatpush1.msra.mxu1 %v7494_v48  ;;  %7878 = vmatpush1.msra.mxu0 %v7560_v39  ;;  %v7490_v33 = vld [vmem:[%s16771_s6 + $0x50] sm:$0xff] }
 0x398   :  { %5773 = vrot.lane.b32.xlu0 %v5772_v8, %s10694_s3  ;;  %v9110_v45 = vld.sshfl [vmem:[#allocation3 + $0x7] sm:$0x1 pattern:$0x76325410]  ;;  %v6434_v46 = vsel %vm5647_vm5, %v15246_v60, %v9150_v20  ;;  %v5832_v23 = vsel %vm5653_vm8, %v15218_v35, %v5831_v52  ;;  %v7491_v31 = vld [vmem:[%s16771_s6 + $0x58] sm:$0xff]  ;;  %7810 = vmatprep.subr.mxu1 %v7493_v27  ;;  %v7489_v26 = vld [vmem:[%s16771_s6 + $0x48] sm:$0xff] }
 0x399   :  { %v5859_v12 = vsel %vm5647_vm5, %v15252_v15, %v9110_v45  ;;  %v9152_v56 = vld.sshfl [vmem:[#allocation3 + $0x1c] sm:$0x1 pattern:$0x76325410]  ;;  %v6435_v34 = vsel %vm5649_vm6, %v15246_v60, %v6434_v46  ;;  %7879 = vmatprep.subr.mxu0 %v7559_v58  ;;  %7811 = vmatpush1.msra.mxu1 %v7492_v49  ;;  %v7556_v32 = vld [vmem:[%s16771_s6 + $0x260] sm:$0xff]  ;;  %v7554_v63 = vld [vmem:[%s16771_s6 + $0x250] sm:$0xff] }
 0x39a   :  { %v9155_v41 = vld.sshfl [vmem:[#allocation3 + $0x5d] sm:$0x1 pattern:$0x76325410]  ;;  %6380 = vrot.lane.b32.xlu1 %v6379_v38, %s10692_s27  ;;  %v5860_v28 = vsel %vm5649_vm6, %v15252_v15, %v5859_v12  ;;  %v6463_v5 = vsel %vm5647_vm5, %v15280_v44, %v9152_v56  ;;  %v6436_v62 = vsel %vm5651_vm7, %v15246_v60, %v6435_v34  ;;  %7880 = vmatpush1.msra.mxu0 %v7558_v13  ;;  %v7488_v8 = vld [vmem:[%s16771_s6 + $0x40] sm:$0xff]  ;;  %v7553_v12 = vld [vmem:[%s16771_s6 + $0x248] sm:$0xff] }
 0x39b   :  { %v9135_v61 = vld.sshfl [vmem:[#allocation3 + $0x53] sm:$0x1 pattern:$0x76325410]  ;;  %v15320_v17 = vrot.slane %v9155_v41, 7  ;;  %v5861_v59 = vsel %vm5651_vm7, %v15252_v15, %v5860_v28  ;;  %v6464_v35 = vsel %vm5649_vm6, %v15280_v44, %v6463_v5  ;;  %v6437_v50 = vsel %vm5653_vm8, %v15246_v60, %v6436_v62  ;;  %7812 = vmatprep.subr.mxu1 %v7491_v31  ;;  %7881 = vmatprep.subr.mxu0 %v7557_v2  ;;  %v7555_v19 = vld [vmem:[%s16771_s6 + $0x258] sm:$0xff] }
 0x39c   :  { %5803 = vrot.lane.b32.xlu0 %v5802_v24, %s10695_s1  ;;  %v9132_v1 = vld.sshfl [vmem:[#allocation3 + $0x12] sm:$0x1 pattern:$0x76325410]  ;;  %v15329_v30 = vrot.slane %v9135_v61, 7  ;;  %v5862_v0 = vsel %vm5653_vm8, %v15252_v15, %v5861_v59  ;;  %v6465_v60 = vsel %vm5651_vm7, %v15280_v44, %v6464_v35  ;;  %7813 = vmatpush1.msra.mxu1 %v7490_v33  ;;  %v7487_v21 = vld [vmem:[%s16771_s6 + $0x38] sm:$0xff] }
 0x39d   :  { %v9157_v55 = vld.sshfl [vmem:[#allocation3 + $0x5e] sm:$0x1 pattern:$0x76325410]  ;;  %v6175_v10 = vsel %vm5647_vm5, %v15282_v29, %v9132_v1  ;;  %7882 = vmatpush1.msra.mxu0 %v7556_v32  ;;  %7814 = vmatprep.subr.mxu1 %v7489_v26  ;;  %v6466_v46 = vsel %vm5653_vm8, %v15280_v44, %v6465_v60  ;;  %v7486_v56 = vld [vmem:[%s16771_s6 + $0x30] sm:$0xff]  ;;  %v7552_v7 = vld [vmem:[%s16771_s6 + $0x240] sm:$0xff] }
 0x39e   :  { %v9137_v3 = vld.sshfl [vmem:[#allocation3 + $0x54] sm:$0x1 pattern:$0x76325410]  ;;  %6409 = vrot.lane.b32.xlu1 %v6408_v47, %s10691_s24  ;;  %v15350_v54 = vrot.slane %v9157_v55, 7  ;;  %v6176_v37 = vsel %vm5649_vm6, %v15282_v29, %v6175_v10  ;;  %7883 = vmatprep.subr.mxu0 %v7555_v19  ;;  %v7485_v24 = vld [vmem:[%s16771_s6 + $0x28] sm:$0xff] }
 0x39f   :  { %v9154_v57 = vld.sshfl [vmem:[#allocation3 + $0x1d] sm:$0x1 pattern:$0x76325410]  ;;  %v15359_v14 = vrot.slane %v9137_v3, 7  ;;  %v6177_v6 = vsel %vm5651_vm7, %v15282_v29, %v6176_v37  ;;  %7815 = vmatpush1.msra.mxu1 %v7488_v8  ;;  %7884 = vmatpush1.msra.mxu0 %v7554_v63  ;;  %v7484_v28 = vld [vmem:[%s16771_s6 + $0x20] sm:$0xff] }
 0x3a0   :  { %5833 = vrot.lane.b32.xlu0 %v5832_v23, %s10696_s29  ;;  %v9134_v11 = vld.sshfl [vmem:[#allocation3 + $0x13] sm:$0x1 pattern:$0x76325410]  ;;  %v6492_v43 = vsel %vm5647_vm5, %v15320_v17, %v9154_v57  ;;  %v6178_v41 = vsel %vm5653_vm8, %v15282_v29, %v6177_v6  ;;  %7816 = vmatprep.subr.mxu1 %v7487_v21  ;;  %v7551_v39 = vld [vmem:[%s16771_s6 + $0x238] sm:$0xff]  ;;  %v7549_v23 = vld [vmem:[%s16771_s6 + $0x228] sm:$0xff] }
 0x3a1   :  { %v9131_v9 = vld.sshfl [vmem:[#allocation3 + $0x51] sm:$0x1 pattern:$0x76325410]  ;;  %v6204_v51 = vsel %vm5647_vm5, %v15329_v30, %v9134_v11  ;;  %v6493_v15 = vsel %vm5649_vm6, %v15320_v17, %v6492_v43  ;;  %7885 = vmatprep.subr.mxu0 %v7553_v12  ;;  %7817 = vmatpush1.msra.mxu1 %v7486_v56  ;;  %v7483_v10 = vld [vmem:[%s16771_s6 + $0x18] sm:$0xff]  ;;  %v7548_v59 = vld [vmem:[%s16771_s6 + $0x220] sm:$0xff] }
 0x3a2   :  { %v9139_v4 = vld.sshfl [vmem:[#allocation3 + $0x55] sm:$0x1 pattern:$0x76325410]  ;;  %6438 = vrot.lane.b32.xlu1 %v6437_v50, %s10693_s0  ;;  %v15390_v25 = vrot.slane %v9131_v9, 7  ;;  %v6205_v36 = vsel %vm5649_vm6, %v15329_v30, %v6204_v51  ;;  %v6494_v44 = vsel %vm5651_vm7, %v15320_v17, %v6493_v15  ;;  %7886 = vmatpush1.msra.mxu0 %v7552_v7  ;;  %v7481_v43 = vld [vmem:[%s16771_s6 + $0x8] sm:$0xff] }
 0x3a3   :  { %v9156_v18 = vld.sshfl [vmem:[#allocation3 + $0x1e] sm:$0x1 pattern:$0x76325410]  ;;  %v15399_v45 = vrot.slane %v9139_v4, 7  ;;  %v6206_v40 = vsel %vm5651_vm7, %v15329_v30, %v6205_v36  ;;  %v6495_v5 = vsel %vm5653_vm8, %v15320_v17, %v6494_v44  ;;  %7818 = vmatprep.subr.mxu1 %v7485_v24  ;;  %v7550_v47 = vld [vmem:[%s16771_s6 + $0x230] sm:$0xff]  ;;  %7887 = vmatprep.subr.mxu0 %v7551_v39 }
 0x3a4   :  { %5863 = vrot.lane.b32.xlu0 %v5862_v0, %s10697_s22  ;;  %v9136_v20 = vld.sshfl [vmem:[#allocation3 + $0x14] sm:$0x1 pattern:$0x76325410]  ;;  %v6521_v53 = vsel %vm5647_vm5, %v15350_v54, %v9156_v18  ;;  %v6207_v3 = vsel %vm5653_vm8, %v15329_v30, %v6206_v40  ;;  %7819 = vmatpush1.msra.mxu1 %v7484_v28  ;;  %v7547_v51 = vld [vmem:[%s16771_s6 + $0x218] sm:$0xff]  ;;  %v7480_v4 = vld [vmem:[%s16771_s6] sm:$0xff] }
 0x3a5   :  { %v9127_v16 = vld.sshfl [vmem:[#allocation3 + $0x4f] sm:$0x1 pattern:$0x76325410]  ;;  %v6233_v22 = vsel %vm5647_vm5, %v15359_v14, %v9136_v20  ;;  %v6522_v29 = vsel %vm5649_vm6, %v15350_v54, %v6521_v53  ;;  %v7482_v62 = vld [vmem:[%s16771_s6 + $0x10] sm:$0xff]  ;;  %7888 = vmatpush1.msra.mxu0 %v7550_v47  ;;  %7820 = vmatprep.subr.mxu1 %v7483_v10  ;;  %v7543_v60 = vld [vmem:[%s16771_s6 + $0x1f8] sm:$0xff] }
 0x3a6   :  { %v9141_v38 = vld.sshfl [vmem:[#allocation3 + $0x56] sm:$0x1 pattern:$0x76325410]  ;;  %6467 = vrot.lane.b32.xlu1 %v6466_v46, %s10694_s3  ;;  %v15430_v48 = vrot.slane %v9127_v16, 7  ;;  %v6234_v52 = vsel %vm5649_vm6, %v15359_v14, %v6233_v22  ;;  %v6523_v17 = vsel %vm5651_vm7, %v15350_v54, %v6522_v29  ;;  %7889 = vmatprep.subr.mxu0 %v7549_v23  ;;  %v7545_v6 = vld [vmem:[%s16771_s6 + $0x208] sm:$0xff] }
 0x3a7   :  { %v9130_v42 = vld.sshfl [vmem:[#allocation3 + $0x11] sm:$0x1 pattern:$0x76325410]  ;;  %v15439_v1 = vrot.slane %v9141_v38, 7  ;;  %v6235_v57 = vsel %vm5651_vm7, %v15359_v14, %v6234_v52  ;;  %v6524_v9 = vsel %vm5653_vm8, %v15350_v54, %v6523_v17  ;;  %7821 = vmatpush1.msra.mxu1 %v7482_v62  ;;  %7890 = vmatpush1.msra.mxu0 %v7548_v59  ;;  %v7544_v22 = vld [vmem:[%s16771_s6 + $0x200] sm:$0xff] }
 0x3a8   :  { %6179 = vrot.lane.b32.xlu0 %v6178_v41, %s10691_s24  ;;  %v9138_v61 = vld.sshfl [vmem:[#allocation3 + $0x15] sm:$0x1 pattern:$0x76325410]  ;;  %v6146_v34 = vsel %vm5647_vm5, %v15390_v25, %v9130_v42  ;;  %v6236_v32 = vsel %vm5653_vm8, %v15359_v14, %v6235_v57  ;;  %7822 = vmatprep.subr.mxu1 %v7481_v43  ;;  %v7541_v38 = vld [vmem:[%s16771_s6 + $0x1e8] sm:$0xff]  ;;  %v7607_v41 = vld [vmem:[%s16771_s6 + $0x3f8] sm:$0xff] }
 0x3a9   :  { %v9159_v27 = vld.sshfl [vmem:[#allocation3 + $0x5f] sm:$0x1 pattern:$0x76325410]  ;;  %v6262_v55 = vsel %vm5647_vm5, %v15399_v45, %v9138_v61  ;;  %v6147_v30 = vsel %vm5649_vm6, %v15390_v25, %v6146_v34  ;;  %v7546_v0 = vld [vmem:[%s16771_s6 + $0x210] sm:$0xff]  ;;  %7891 = vmatprep.subr.mxu0 %v7547_v51  ;;  %7823 = vmatpush1.msra.mxu1 %v7480_v4  ;;  %v7540_v44 = vld [vmem:[%s16771_s6 + $0x1e0] sm:$0xff] }
 0x3aa   :  { %v9143_v58 = vld.sshfl [vmem:[#allocation3 + $0x57] sm:$0x1 pattern:$0x76325410]  ;;  %6496 = vrot.lane.b32.xlu1 %v6495_v5, %s10695_s1  ;;  %v15470_v31 = vrot.slane %v9159_v27, 7  ;;  %v6263_v35 = vsel %vm5649_vm6, %v15399_v45, %v6262_v55  ;;  %v6148_v54 = vsel %vm5651_vm7, %v15390_v25, %v6147_v30  ;;  %7892 = vmatpush1.msra.mxu0 %v7546_v0  ;;  %v7539_v34 = vld [vmem:[%s16771_s6 + $0x1d8] sm:$0xff] }
 0x3ab   :  { %v9126_v49 = vld.sshfl [vmem:[#allocation3 + $0xf] sm:$0x1 pattern:$0x76325410]  ;;  %v15479_v2 = vrot.slane %v9143_v58, 7  ;;  %v6264_v18 = vsel %vm5651_vm7, %v15399_v45, %v6263_v35  ;;  %v7542_v53 = vld [vmem:[%s16771_s6 + $0x1f0] sm:$0xff]  ;;  %v6149_v16 = vsel %vm5653_vm8, %v15390_v25, %v6148_v54  ;;  %7824 = vmatprep.subr.mxu1 %v7543_v60  ;;  %7893 = vmatprep.subr.mxu0 %v7545_v6 }
 0x3ac   :  { %6208 = vrot.lane.b32.xlu0 %v6207_v3, %s10693_s0  ;;  %v9140_v13 = vld.sshfl [vmem:[#allocation3 + $0x16] sm:$0x1 pattern:$0x76325410]  ;;  %v6090_v11 = vsel %vm5647_vm5, %v15430_v48, %v9126_v49  ;;  %v6265_v12 = vsel %vm5653_vm8, %v15399_v45, %v6264_v18  ;;  %7825 = vmatpush2.msra.mxu1 %v7542_v53  ;;  %v7605_v55 = vld [vmem:[%s16771_s6 + $0x3e8] sm:$0xff]  ;;  %v7604_v3 = vld [vmem:[%s16771_s6 + $0x3e0] sm:$0xff] }
 0x3ad   :  { %v9179_v37 = vld.sshfl [vmem:[#allocation3 + $0x69] sm:$0x1 pattern:$0x76325410]  ;;  %v6291_v33 = vsel %vm5647_vm5, %v15439_v1, %v9140_v13  ;;  %v6091_v14 = vsel %vm5649_vm6, %v15430_v48, %v6090_v11  ;;  %v7606_v40 = vld [vmem:[%s16771_s6 + $0x3f0] sm:$0xff]  ;;  %7894 = vmatpush1.msra.mxu0 %v7544_v22  ;;  %7826 = vmatprep.subr.mxu1 %v7541_v38  ;;  %v7603_v57 = vld [vmem:[%s16771_s6 + $0x3d8] sm:$0xff] }
 0x3ae   :  { %v9163_v50 = vld.sshfl [vmem:[#allocation3 + $0x61] sm:$0x1 pattern:$0x76325410]  ;;  %6525 = vrot.lane.b32.xlu1 %v6524_v9, %s10696_s29  ;;  %v15510_v8 = vrot.slane %v9179_v37, 7  ;;  %v6292_v15 = vsel %vm5649_vm6, %v15439_v1, %v6291_v33  ;;  %v6092_v25 = vsel %vm5651_vm7, %v15430_v48, %v6091_v14  ;;  %7895 = vmatprep.subr.mxu0 %v7607_v41  ;;  %v7538_v58 = vld [vmem:[%s16771_s6 + $0x1d0] sm:$0xff] }
 0x3af   :  { %v9158_v26 = vld.sshfl [vmem:[#allocation3 + $0x1f] sm:$0x1 pattern:$0x76325410]  ;;  %v15519_v63 = vrot.slane %v9163_v50, 7  ;;  %v6293_v42 = vsel %vm5651_vm7, %v15439_v1, %v6292_v15  ;;  %v6093_v27 = vsel %vm5653_vm8, %v15430_v48, %v6092_v25  ;;  %7827 = vmatpush2.msra.mxu1 %v7540_v44  ;;  %7896 = vmatpush2.msra.mxu0 %v7606_v40  ;;  %v7537_v17 = vld [vmem:[%s16771_s6 + $0x1c8] sm:$0xff] }
 0x3b0   :  { %6237 = vrot.lane.b32.xlu0 %v6236_v32, %s10694_s3  ;;  %v9142_v19 = vld.sshfl [vmem:[#allocation3 + $0x17] sm:$0x1 pattern:$0x76325410]  ;;  %v6550_v20 = vsel %vm5647_vm5, %v15470_v31, %v9158_v26  ;;  %v6294_v47 = vsel %vm5653_vm8, %v15439_v1, %v6293_v42  ;;  %7828 = vmatprep.subr.mxu1 %v7539_v34  ;;  %v7536_v11 = vld [vmem:[%s16771_s6 + $0x1c0] sm:$0xff]  ;;  %v7535_v50 = vld [vmem:[%s16771_s6 + $0x1b8] sm:$0xff] }
 0x3b1   :  { %v9181_v36 = vld.sshfl [vmem:[#allocation3 + $0x6a] sm:$0x1 pattern:$0x76325410]  ;;  %v6320_v21 = vsel %vm5647_vm5, %v15479_v2, %v9142_v19  ;;  %v6551_v45 = vsel %vm5649_vm6, %v15470_v31, %v6550_v20  ;;  %7897 = vmatprep.subr.mxu0 %v7605_v55  ;;  %7829 = vmatpush2.msra.mxu1 %v7538_v58  ;;  %v7602_v33 = vld [vmem:[%s16771_s6 + $0x3d0] sm:$0xff]  ;;  %v7600_v18 = vld [vmem:[%s16771_s6 + $0x3c0] sm:$0xff] }
 0x3b2   :  { %v9165_v46 = vld.sshfl [vmem:[#allocation3 + $0x62] sm:$0x1 pattern:$0x76325410]  ;;  %6150 = vrot.lane.b32.xlu1 %v6149_v16, %s10692_s27  ;;  %v15550_v24 = vrot.slane %v9181_v36, 7  ;;  %v6321_v29 = vsel %vm5649_vm6, %v15479_v2, %v6320_v21  ;;  %v6552_v48 = vsel %vm5651_vm7, %v15470_v31, %v6551_v45  ;;  %7898 = vmatpush2.msra.mxu0 %v7604_v3  ;;  %v7601_v32 = vld [vmem:[%s16771_s6 + $0x3c8] sm:$0xff] }
 0x3b3   :  { %v9178_v56 = vld.sshfl [vmem:[#allocation3 + $0x29] sm:$0x1 pattern:$0x76325410]  ;;  %v15559_v39 = vrot.slane %v9165_v46, 7  ;;  %v6322_v49 = vsel %vm5651_vm7, %v15479_v2, %v6321_v29  ;;  %v6553_v37 = vsel %vm5653_vm8, %v15470_v31, %v6552_v48  ;;  %7830 = vmatprep.subr.mxu1 %v7537_v17  ;;  %7899 = vmatprep.subr.mxu0 %v7603_v57  ;;  %v7534_v54 = vld [vmem:[%s16771_s6 + $0x1b0] sm:$0xff] }
 0x3b4   :  { %6266 = vrot.lane.b32.xlu0 %v6265_v12, %s10695_s1  ;;  %v9162_v7 = vld.sshfl [vmem:[#allocation3 + $0x21] sm:$0x1 pattern:$0x76325410]  ;;  %v6836_v61 = vsel %vm5647_vm5, %v15510_v8, %v9178_v56  ;;  %v6323_v51 = vsel %vm5653_vm8, %v15479_v2, %v6322_v49  ;;  %7831 = vmatpush2.msra.mxu1 %v7536_v11  ;;  %v7533_v20 = vld [vmem:[%s16771_s6 + $0x1a8] sm:$0xff]  ;;  %v7599_v21 = vld [vmem:[%s16771_s6 + $0x3b8] sm:$0xff] }
 0x3b5   :  { %v9183_v52 = vld.sshfl [vmem:[#allocation3 + $0x6b] sm:$0x1 pattern:$0x76325410]  ;;  %v6606_v28 = vsel %vm5647_vm5, %v15519_v63, %v9162_v7  ;;  %v6837_v1 = vsel %vm5649_vm6, %v15510_v8, %v6836_v61  ;;  %7900 = vmatpush2.msra.mxu0 %v7602_v33  ;;  %7832 = vmatprep.subr.mxu1 %v7535_v50  ;;  %v7532_v46 = vld [vmem:[%s16771_s6 + $0x1a0] sm:$0xff]  ;;  %v7598_v12 = vld [vmem:[%s16771_s6 + $0x3b0] sm:$0xff] }
 0x3b6   :  { %v9167_v5 = vld.sshfl [vmem:[#allocation3 + $0x63] sm:$0x1 pattern:$0x76325410]  ;;  %6094 = vrot.lane.b32.xlu1 %v6093_v27, %s10697_s22  ;;  %v15590_v62 = vrot.slane %v9183_v52, 7  ;;  %v6607_v30 = vsel %vm5649_vm6, %v15519_v63, %v6606_v28  ;;  %v6838_v31 = vsel %vm5651_vm7, %v15510_v8, %v6837_v1  ;;  %7901 = vmatprep.subr.mxu0 %v7601_v32  ;;  %v7531_v25 = vld [vmem:[%s16771_s6 + $0x198] sm:$0xff] }
 0x3b7   :  { %v9180_v10 = vld.sshfl [vmem:[#allocation3 + $0x2a] sm:$0x1 pattern:$0x76325410]  ;;  %v15599_v59 = vrot.slane %v9167_v5, 7  ;;  %v6608_v26 = vsel %vm5651_vm7, %v15519_v63, %v6607_v30  ;;  %v6839_v36 = vsel %vm5653_vm8, %v15510_v8, %v6838_v31  ;;  %7833 = vmatpush2.msra.mxu1 %v7534_v54  ;;  %7902 = vmatpush2.msra.mxu0 %v7600_v18  ;;  %v7530_v61 = vld [vmem:[%s16771_s6 + $0x190] sm:$0xff] }
 0x3b8   :  { %6295 = vrot.lane.b32.xlu0 %v6294_v47, %s10696_s29  ;;  %v9164_v23 = vld.sshfl [vmem:[#allocation3 + $0x22] sm:$0x1 pattern:$0x76325410]  ;;  %v6865_v13 = vsel %vm5647_vm5, %v15550_v24, %v9180_v10  ;;  %v6609_v22 = vsel %vm5653_vm8, %v15519_v63, %v6608_v26  ;;  %7834 = vmatprep.subr.mxu1 %v7533_v20  ;;  %v7597_v42 = vld [vmem:[%s16771_s6 + $0x3a8] sm:$0xff]  ;;  %v7595_v47 = vld [vmem:[%s16771_s6 + $0x398] sm:$0xff] }
 0x3b9   :  { %v9185_v35 = vld.sshfl [vmem:[#allocation3 + $0x6c] sm:$0x1 pattern:$0x76325410]  ;;  %v6635_v43 = vsel %vm5647_vm5, %v15559_v39, %v9164_v23  ;;  %v6866_v2 = vsel %vm5649_vm6, %v15550_v24, %v6865_v13  ;;  %7903 = vmatprep.subr.mxu0 %v7599_v21  ;;  %7835 = vmatpush2.msra.mxu1 %v7532_v46  ;;  %v7596_v28 = vld [vmem:[%s16771_s6 + $0x3a0] sm:$0xff]  ;;  %v7594_v49 = vld [vmem:[%s16771_s6 + $0x390] sm:$0xff] }
 0x3ba   :  { %v9169_v9 = vld.sshfl [vmem:[#allocation3 + $0x64] sm:$0x1 pattern:$0x76325410]  ;;  %6554 = vrot.lane.b32.xlu1 %v6553_v37, %s10697_s22  ;;  %v15630_v60 = vrot.slane %v9185_v35, 7  ;;  %v6636_v14 = vsel %vm5649_vm6, %v15559_v39, %v6635_v43  ;;  %v6867_v8 = vsel %vm5651_vm7, %v15550_v24, %v6866_v2  ;;  %7904 = vmatpush2.msra.mxu0 %v7598_v12  ;;  %v7529_v5 = vld [vmem:[%s16771_s6 + $0x188] sm:$0xff] }
 0x3bb   :  { %v9182_v4 = vld.sshfl [vmem:[#allocation3 + $0x2b] sm:$0x1 pattern:$0x76325410]  ;;  %v15639_v6 = vrot.slane %v9169_v9, 7  ;;  %v6637_v56 = vsel %vm5651_vm7, %v15559_v39, %v6636_v14  ;;  %v6868_v52 = vsel %vm5653_vm8, %v15550_v24, %v6867_v8  ;;  %7836 = vmatprep.subr.mxu1 %v7531_v25  ;;  %7905 = vmatprep.subr.mxu0 %v7597_v42  ;;  %v7528_v48 = vld [vmem:[%s16771_s6 + $0x180] sm:$0xff] }
 0x3bc   :  { %6324 = vrot.lane.b32.xlu0 %v6323_v51, %s10697_s22  ;;  %v9166_v0 = vld.sshfl [vmem:[#allocation3 + $0x23] sm:$0x1 pattern:$0x76325410]  ;;  %v6894_v19 = vsel %vm5647_vm5, %v15590_v62, %v9182_v4  ;;  %v6638_v55 = vsel %vm5653_vm8, %v15559_v39, %v6637_v56  ;;  %7837 = vmatpush2.msra.mxu1 %v7530_v61  ;;  %v7527_v13 = vld [vmem:[%s16771_s6 + $0x178] sm:$0xff]  ;;  %v7593_v43 = vld [vmem:[%s16771_s6 + $0x388] sm:$0xff] }
 0x3bd   :  { %v9187_v15 = vld.sshfl [vmem:[#allocation3 + $0x6d] sm:$0x1 pattern:$0x76325410]  ;;  %v6664_v53 = vsel %vm5647_vm5, %v15599_v59, %v9166_v0  ;;  %v6895_v63 = vsel %vm5649_vm6, %v15590_v62, %v6894_v19  ;;  %7906 = vmatpush2.msra.mxu0 %v7596_v28  ;;  %7838 = vmatprep.subr.mxu1 %v7529_v5  ;;  %v7526_v9 = vld [vmem:[%s16771_s6 + $0x170] sm:$0xff]  ;;  %v7592_v51 = vld [vmem:[%s16771_s6 + $0x380] sm:$0xff] }
 0x3be   :  { %v9171_v16 = vld.sshfl [vmem:[#allocation3 + $0x65] sm:$0x1 pattern:$0x76325410]  ;;  %6840 = vrot.lane.b32.xlu1 %v6839_v36, %s10692_s27  ;;  %v15670_v44 = vrot.slane %v9187_v15, 7  ;;  %v6665_v45 = vsel %vm5649_vm6, %v15599_v59, %v6664_v53  ;;  %v6896_v24 = vsel %vm5651_vm7, %v15590_v62, %v6895_v63  ;;  %7907 = vmatprep.subr.mxu0 %v7595_v47  ;;  %v7525_v31 = vld [vmem:[%s16771_s6 + $0x168] sm:$0xff] }
 0x3bf   :  { %v9184_v38 = vld.sshfl [vmem:[#allocation3 + $0x2c] sm:$0x1 pattern:$0x76325410]  ;;  %v15679_v40 = vrot.slane %v9171_v16, 7  ;;  %v6666_v10 = vsel %vm5651_vm7, %v15599_v59, %v6665_v45  ;;  %v6897_v35 = vsel %vm5653_vm8, %v15590_v62, %v6896_v24  ;;  %7839 = vmatpush2.msra.mxu1 %v7528_v48  ;;  %7908 = vmatpush2.msra.mxu0 %v7594_v49  ;;  %v7591_v26 = vld [vmem:[%s16771_s6 + $0x378] sm:$0xff] }
 0x3c0   :  { %6610 = vrot.lane.b32.xlu0 %v6609_v22, %s10692_s27  ;;  %v9168_v41 = vld.sshfl [vmem:[#allocation3 + $0x24] sm:$0x1 pattern:$0x76325410]  ;;  %v6923_v7 = vsel %vm5647_vm5, %v15630_v60, %v9184_v38  ;;  %v6667_v33 = vsel %vm5653_vm8, %v15599_v59, %v6666_v10  ;;  %7840 = vmatprep.subr.mxu1 %v7527_v13  ;;  %v7590_v53 = vld [vmem:[%s16771_s6 + $0x370] sm:$0xff]  ;;  %v7523_v16 = vld [vmem:[%s16771_s6 + $0x158] sm:$0xff] }
 0x3c1   :  { %v9189_v29 = vld.sshfl [vmem:[#allocation3 + $0x6e] sm:$0x1 pattern:$0x76325410]  ;;  %v6693_v34 = vsel %vm5647_vm5, %v15639_v6, %v9168_v41  ;;  %v6924_v39 = vsel %vm5649_vm6, %v15630_v60, %v6923_v7  ;;  %7909 = vmatprep.subr.mxu0 %v7593_v43  ;;  %7841 = vmatpush2.msra.mxu1 %v7526_v9  ;;  %v7524_v19 = vld [vmem:[%s16771_s6 + $0x160] sm:$0xff]  ;;  %v7522_v8 = vld [vmem:[%s16771_s6 + $0x150] sm:$0xff] }
 0x3c2   :  { %v9173_v27 = vld.sshfl [vmem:[#allocation3 + $0x66] sm:$0x1 pattern:$0x76325410]  ;;  %6869 = vrot.lane.b32.xlu1 %v6868_v52, %s10691_s24  ;;  %v15710_v17 = vrot.slane %v9189_v29, 7  ;;  %v6694_v1 = vsel %vm5649_vm6, %v15639_v6, %v6693_v34  ;;  %v6925_v62 = vsel %vm5651_vm7, %v15630_v60, %v6924_v39  ;;  %7910 = vmatpush2.msra.mxu0 %v7592_v51  ;;  %v7589_v22 = vld [vmem:[%s16771_s6 + $0x368] sm:$0xff] }
 0x3c3   :  { %v9186_v58 = vld.sshfl [vmem:[#allocation3 + $0x2d] sm:$0x1 pattern:$0x76325410]  ;;  %v15719_v57 = vrot.slane %v9173_v27, 7  ;;  %v6695_v4 = vsel %vm5651_vm7, %v15639_v6, %v6694_v1  ;;  %v6926_v15 = vsel %vm5653_vm8, %v15630_v60, %v6925_v62  ;;  %7842 = vmatprep.subr.mxu1 %v7525_v31  ;;  %7911 = vmatprep.subr.mxu0 %v7591_v26  ;;  %v7588_v56 = vld [vmem:[%s16771_s6 + $0x360] sm:$0xff] }
 0x3c4   :  { %6639 = vrot.lane.b32.xlu0 %v6638_v55, %s10691_s24  ;;  %v9170_v3 = vld.sshfl [vmem:[#allocation3 + $0x25] sm:$0x1 pattern:$0x76325410]  ;;  %v6952_v23 = vsel %vm5647_vm5, %v15670_v44, %v9186_v58  ;;  %v6696_v21 = vsel %vm5653_vm8, %v15639_v6, %v6695_v4  ;;  %7843 = vmatpush2.msra.mxu1 %v7524_v19  ;;  %v7521_v29 = vld [vmem:[%s16771_s6 + $0x148] sm:$0xff]  ;;  %v7587_v34 = vld [vmem:[%s16771_s6 + $0x358] sm:$0xff] }
 0x3c5   :  { %v9191_v30 = vld.sshfl [vmem:[#allocation3 + $0x6f] sm:$0x1 pattern:$0x76325410]  ;;  %v6722_v11 = vsel %vm5647_vm5, %v15679_v40, %v9170_v3  ;;  %v6953_v59 = vsel %vm5649_vm6, %v15670_v44, %v6952_v23  ;;  %7912 = vmatpush2.msra.mxu0 %v7590_v53  ;;  %7844 = vmatprep.subr.mxu1 %v7523_v16  ;;  %v7520_v27 = vld [vmem:[%s16771_s6 + $0x140] sm:$0xff]  ;;  %v7586_v55 = vld [vmem:[%s16771_s6 + $0x350] sm:$0xff] }
 0x3c6   :  { %v9175_v37 = vld.sshfl [vmem:[#allocation3 + $0x67] sm:$0x1 pattern:$0x76325410]  ;;  %6898 = vrot.lane.b32.xlu1 %v6897_v35, %s10693_s0  ;;  %v15750_v54 = vrot.slane %v9191_v30, 7  ;;  %v6723_v2 = vsel %vm5649_vm6, %v15679_v40, %v6722_v11  ;;  %v6954_v60 = vsel %vm5651_vm7, %v15670_v44, %v6953_v59  ;;  %7913 = vmatprep.subr.mxu0 %v7589_v22  ;;  %v7519_v24 = vld [vmem:[%s16771_s6 + $0x138] sm:$0xff] }
 0x3c7   :  { %v9188_v50 = vld.sshfl [vmem:[#allocation3 + $0x2e] sm:$0x1 pattern:$0x76325410]  ;;  %v15759_v18 = vrot.slane %v9175_v37, 7  ;;  %v6724_v38 = vsel %vm5651_vm7, %v15679_v40, %v6723_v2  ;;  %v6955_v61 = vsel %vm5653_vm8, %v15670_v44, %v6954_v60  ;;  %7845 = vmatpush2.msra.mxu1 %v7522_v8  ;;  %7914 = vmatpush2.msra.mxu0 %v7588_v56  ;;  %v7518_v30 = vld [vmem:[%s16771_s6 + $0x130] sm:$0xff] }
 0x3c8   :  { %6668 = vrot.lane.b32.xlu0 %v6667_v33, %s10693_s0  ;;  %v9172_v32 = vld.sshfl [vmem:[#allocation3 + $0x26] sm:$0x1 pattern:$0x76325410]  ;;  %v6981_v0 = vsel %vm5647_vm5, %v15710_v17, %v9188_v50  ;;  %v6725_v28 = vsel %vm5653_vm8, %v15679_v40, %v6724_v38  ;;  %7846 = vmatprep.subr.mxu1 %v7521_v29  ;;  %v7585_v39 = vld [vmem:[%s16771_s6 + $0x348] sm:$0xff]  ;;  %v7583_v51 = vld [vmem:[%s16771_s6 + $0x338] sm:$0xff] }
 0x3c9   :  { %v9211_v14 = vld.sshfl [vmem:[#allocation3 + $0x79] sm:$0x1 pattern:$0x76325410]  ;;  %v6751_v20 = vsel %vm5647_vm5, %v15719_v57, %v9172_v32  ;;  %v6982_v6 = vsel %vm5649_vm6, %v15710_v17, %v6981_v0  ;;  %7915 = vmatprep.subr.mxu0 %v7587_v34  ;;  %7847 = vmatpush2.msra.mxu1 %v7520_v27  ;;  %v7584_v37 = vld [vmem:[%s16771_s6 + $0x340] sm:$0xff]  ;;  %v7517_v43 = vld [vmem:[%s16771_s6 + $0x128] sm:$0xff] }
 0x3ca   :  { %v9195_v36 = vld.sshfl [vmem:[#allocation3 + $0x71] sm:$0x1 pattern:$0x76325410]  ;;  %6927 = vrot.lane.b32.xlu1 %v6926_v15, %s10694_s3  ;;  %v15790_v25 = vrot.slane %v9211_v14, 7  ;;  %v6752_v63 = vsel %vm5649_vm6, %v15719_v57, %v6751_v20  ;;  %v6983_v5 = vsel %vm5651_vm7, %v15710_v17, %v6982_v6  ;;  %7916 = vmatpush2.msra.mxu0 %v7586_v55  ;;  %v7516_v31 = vld [vmem:[%s16771_s6 + $0x120] sm:$0xff] }
 0x3cb   :  { %v9190_v46 = vld.sshfl [vmem:[#allocation3 + $0x2f] sm:$0x1 pattern:$0x76325410]  ;;  %v15801_v45 = vrot.slane %v9195_v36, 7  ;;  %v6753_v58 = vsel %vm5651_vm7, %v15719_v57, %v6752_v63  ;;  %v6984_v13 = vsel %vm5653_vm8, %v15710_v17, %v6983_v5  ;;  %7848 = vmatprep.subr.mxu1 %v7519_v24  ;;  %7917 = vmatprep.subr.mxu0 %v7585_v39  ;;  %v7582_v32 = vld [vmem:[%s16771_s6 + $0x330] sm:$0xff] }
 0x3cc   :  { %6697 = vrot.lane.b32.xlu0 %v6696_v21, %s10694_s3  ;;  %v9174_v12 = vld.sshfl [vmem:[#allocation3 + $0x27] sm:$0x1 pattern:$0x76325410]  ;;  %v7010_v41 = vsel %vm5647_vm5, %v15750_v54, %v9190_v46  ;;  %v6754_v9 = vsel %vm5653_vm8, %v15719_v57, %v6753_v58  ;;  %7849 = vmatpush2.msra.mxu1 %v7518_v30  ;;  %v7515_v14 = vld [vmem:[%s16771_s6 + $0x118] sm:$0xff]  ;;  %v7581_v16 = vld [vmem:[%s16771_s6 + $0x328] sm:$0xff] }
 0x3cd   :  { %v6780_v42 = vsel %vm5647_vm5, %v15759_v18, %v9174_v12  ;;  %v9213_v7 = vld.sshfl [vmem:[#allocation3 + $0x7a] sm:$0x1 pattern:$0x76325410]  ;;  %v7011_v40 = vsel %vm5649_vm6, %v15750_v54, %v7010_v41  ;;  %7918 = vmatpush2.msra.mxu0 %v7584_v37  ;;  %7850 = vmatprep.subr.mxu1 %v7517_v43  ;;  %v7514_v21 = vld [vmem:[%s16771_s6 + $0x110] sm:$0xff]  ;;  %v7580_v8 = vld [vmem:[%s16771_s6 + $0x320] sm:$0xff] }
 0x3ce   :  { %v9197_v52 = vld.sshfl [vmem:[#allocation3 + $0x72] sm:$0x1 pattern:$0x76325410]  ;;  %6956 = vrot.lane.b32.xlu1 %v6955_v61, %s10695_s1  ;;  %v6781_v47 = vsel %vm5649_vm6, %v15759_v18, %v6780_v42  ;;  %v15832_v10 = vrot.slane %v9213_v7, 7  ;;  %v7012_v17 = vsel %vm5651_vm7, %v15750_v54, %v7011_v40  ;;  %7919 = vmatprep.subr.mxu0 %v7583_v51  ;;  %v7513_v38 = vld [vmem:[%s16771_s6 + $0x108] sm:$0xff] }
 0x3cf   :  { %v9210_v44 = vld.sshfl [vmem:[#allocation3 + $0x39] sm:$0x1 pattern:$0x76325410]  ;;  %v15841_v1 = vrot.slane %v9197_v52, 7  ;;  %v6782_v33 = vsel %vm5651_vm7, %v15759_v18, %v6781_v47  ;;  %v7013_v19 = vsel %vm5653_vm8, %v15750_v54, %v7012_v17  ;;  %7851 = vmatpush2.msra.mxu1 %v7516_v31  ;;  %7920 = vmatpush2.msra.mxu0 %v7582_v32  ;;  %v7512_v29 = vld [vmem:[%s16771_s6 + $0x100] sm:$0xff] }
 0x3d0   :  { %6726 = vrot.lane.b32.xlu0 %v6725_v28, %s10695_s1  ;;  %v9194_v48 = vld.sshfl [vmem:[#allocation3 + $0x31] sm:$0x1 pattern:$0x76325410]  ;;  %v7296_v3 = vsel %vm5647_vm5, %v15790_v25, %v9210_v44  ;;  %v6783_v15 = vsel %vm5653_vm8, %v15759_v18, %v6782_v33  ;;  %7852 = vmatprep.subr.mxu1 %v7515_v14  ;;  %v7579_v63 = vld [vmem:[%s16771_s6 + $0x318] sm:$0xff]  ;;  %v7577_v24 = vld [vmem:[%s16771_s6 + $0x308] sm:$0xff] }
 0x3d1   :  { %v7066_v49 = vsel %vm5647_vm5, %v15801_v45, %v9194_v48  ;;  %v9215_v23 = vld.sshfl [vmem:[#allocation3 + $0x7b] sm:$0x1 pattern:$0x76325410]  ;;  %v7297_v57 = vsel %vm5649_vm6, %v15790_v25, %v7296_v3  ;;  %7921 = vmatprep.subr.mxu0 %v7581_v16  ;;  %7853 = vmatpush2.msra.mxu1 %v7514_v21  ;;  %v7578_v28 = vld [vmem:[%s16771_s6 + $0x310] sm:$0xff]  ;;  %v7576_v48 = vld [vmem:[%s16771_s6 + $0x300] sm:$0xff] }
 0x3d2   :  { %v9212_v35 = vld.sshfl [vmem:[#allocation3 + $0x3a] sm:$0x1 pattern:$0x76325410]  ;;  %6985 = vrot.lane.b32.xlu1 %v6984_v13, %s10696_s29  ;;  %v7067_v4 = vsel %vm5649_vm6, %v15801_v45, %v7066_v49  ;;  %v15877_v2 = vrot.slane %v9215_v23, 7  ;;  %v7298_v54 = vsel %vm5651_vm7, %v15790_v25, %v7297_v57  ;;  %7922 = vmatpush2.msra.mxu0 %v7580_v8 }
 0x3d3   :  { %v9199_v11 = vld.sshfl [vmem:[#allocation3 + $0x73] sm:$0x1 pattern:$0x76325410]  ;;  %v7325_v26 = vsel %vm5647_vm5, %v15832_v10, %v9212_v35  ;;  %v7068_v18 = vsel %vm5651_vm7, %v15801_v45, %v7067_v4  ;;  %v7299_v61 = vsel %vm5653_vm8, %v15790_v25, %v7298_v54  ;;  %7854 = vmatprep.subr.mxu1 %v7513_v38  ;;  %v7639_v5 = vld [vmem:[%s16771_s6 + $0x4f8] sm:$0xff]  ;;  %7923 = vmatprep.subr.mxu0 %v7579_v63 }
 0x3d4   :  { %v9196_v62 = vld.sshfl [vmem:[#allocation3 + $0x32] sm:$0x1 pattern:$0x76325410]  ;;  %6755 = vrot.lane.b32.xlu0 %v6754_v9, %s10696_s29  ;;  %v15879_v0 = vrot.slane %v9199_v11, 7  ;;  %v7326_v6 = vsel %vm5649_vm6, %v15832_v10, %v7325_v26  ;;  %v7069_v52 = vsel %vm5653_vm8, %v15801_v45, %v7068_v18  ;;  %7855 = vmatpush2.msra.mxu1 %v7512_v29  ;;  %v7703_v49 = vld [vmem:[%s16771_s6 + $0x6f8] sm:$0xff] }
 0x3d5   :  { %v9217_v50 = vld.sshfl [vmem:[#allocation3 + $0x7c] sm:$0x1 pattern:$0x76325410]  ;;  %v7095_v20 = vsel %vm5647_vm5, %v15841_v1, %v9196_v62  ;;  %v7327_v25 = vsel %vm5651_vm7, %v15832_v10, %v7326_v6  ;;  %7924 = vmatpush2.msra.mxu0 %v7578_v28  ;;  %7934 = vmatprep.subr.mxu1 %v7639_v5 }
 0x3d6   :  { %v9201_v59 = vld.sshfl [vmem:[#allocation3 + $0x74] sm:$0x1 pattern:$0x76325410]  ;;  %7014 = vrot.lane.b32.xlu1 %v7013_v19, %s10697_s22  ;;  %v15901_v46 = vrot.slane %v9217_v50, 7  ;;  %v7096_v41 = vsel %vm5649_vm6, %v15841_v1, %v7095_v20  ;;  %v7328_v23 = vsel %vm5653_vm8, %v15832_v10, %v7327_v25  ;;  %7925 = vmatprep.subr.mxu0 %v7577_v24 }
 0x3d7   :  { %v9214_v36 = vld.sshfl [vmem:[#allocation3 + $0x3b] sm:$0x1 pattern:$0x76325410]  ;;  %v15903_v22 = vrot.slane %v9201_v59, 7  ;;  %v7097_v58 = vsel %vm5651_vm7, %v15841_v1, %v7096_v41  ;;  %7926 = vmatpush2.msra.mxu0 %v7576_v48 }
 0x3d8   :  { %v9219_v53 = vld.sshfl [vmem:[#allocation3 + $0x7d] sm:$0x1 pattern:$0x76325410]  ;;  %6784 = vrot.lane.b32.xlu0 %v6783_v15, %s10697_s22  ;;  %v7354_v42 = vsel %vm5647_vm5, %v15877_v2, %v9214_v36  ;;  %v7098_v37 = vsel %vm5653_vm8, %v15841_v1, %v7097_v58  ;;  %8005 = vmatprep.subr.mxu0 %v7703_v49 }
 0x3d9   :  { %v9198_v60 = vld.sshfl [vmem:[#allocation3 + $0x33] sm:$0x1 pattern:$0x76325410]  ;;  %v15914_v56 = vrot.slane %v9219_v53, 7  ;;  %v7355_v40 = vsel %vm5649_vm6, %v15877_v2, %v7354_v42 }
 0x3da   :  { %v9216_v12 = vld.sshfl [vmem:[#allocation3 + $0x3c] sm:$0x1 pattern:$0x76325410]  ;;  %v7124_v34 = vsel %vm5647_vm5, %v15879_v0, %v9198_v60  ;;  %7300 = vrot.lane.b32.xlu1 %v7299_v61, %s10692_s27  ;;  %v7356_v43 = vsel %vm5651_vm7, %v15877_v2, %v7355_v40 }
 0x3db   :  { %v9200_v7 = vld.sshfl [vmem:[#allocation3 + $0x34] sm:$0x1 pattern:$0x76325410]  ;;  %v7383_v45 = vsel %vm5647_vm5, %v15901_v46, %v9216_v12  ;;  %v7125_v39 = vsel %vm5649_vm6, %v15879_v0, %v7124_v34  ;;  %v7357_v57 = vsel %vm5653_vm8, %v15877_v2, %v7356_v43 }
 0x3dc   :  { %v9203_v27 = vld.sshfl [vmem:[#allocation3 + $0x75] sm:$0x1 pattern:$0x76325410]  ;;  %v7153_v44 = vsel %vm5647_vm5, %v15903_v22, %v9200_v7  ;;  %7070 = vrot.lane.b32.xlu0 %v7069_v52, %s10692_s27  ;;  %v7384_v30 = vsel %vm5649_vm6, %v15901_v46, %v7383_v45  ;;  %v7126_v17 = vsel %vm5651_vm7, %v15879_v0, %v7125_v39 }
 0x3dd   :  { %v9218_v55 = vld.sshfl [vmem:[#allocation3 + $0x3d] sm:$0x1 pattern:$0x76325410]  ;;  %v15960_v3 = vrot.slane %v9203_v27, 7  ;;  %v7154_v13 = vsel %vm5649_vm6, %v15903_v22, %v7153_v44  ;;  %v7385_v62 = vsel %vm5651_vm7, %v15901_v46, %v7384_v30  ;;  %v7127_v14 = vsel %vm5653_vm8, %v15879_v0, %v7126_v17 }
 0x3de   :  { %v7412_v47 = vsel %vm5647_vm5, %v15914_v56, %v9218_v55  ;;  %v9202_v35 = vld.sshfl [vmem:[#allocation3 + $0x35] sm:$0x1 pattern:$0x76325410]  ;;  %7329 = vrot.lane.b32.xlu1 %v7328_v23, %s10691_s24  ;;  %v7155_v1 = vsel %vm5651_vm7, %v15903_v22, %v7154_v13  ;;  %v7386_v2 = vsel %vm5653_vm8, %v15901_v46, %v7385_v62 }
 0x3df   :  { %v9221_v11 = vld.sshfl [vmem:[#allocation3 + $0x7e] sm:$0x1 pattern:$0x76325410]  ;;  %v7413_v10 = vsel %vm5649_vm6, %v15914_v56, %v7412_v47  ;;  %v7182_v50 = vsel %vm5647_vm5, %v15960_v3, %v9202_v35  ;;  %v7156_v36 = vsel %vm5653_vm8, %v15903_v22, %v7155_v1 }
 0x3e0   :  { %v9205_v9 = vld.sshfl [vmem:[#allocation3 + $0x76] sm:$0x1 pattern:$0x76325410]  ;;  %7099 = vrot.lane.b32.xlu0 %v7098_v37, %s10691_s24  ;;  %v15987_v51 = vrot.slane %v9221_v11, 7  ;;  %v7414_v4 = vsel %vm5651_vm7, %v15914_v56, %v7413_v10  ;;  %v7183_v53 = vsel %vm5649_vm6, %v15960_v3, %v7182_v50 }
 0x3e1   :  { %v9223_v33 = vld.sshfl [vmem:[#allocation3 + $0x7f] sm:$0x1 pattern:$0x76325410]  ;;  %v15993_v32 = vrot.slane %v9205_v9, 7  ;;  %v7415_v0 = vsel %vm5653_vm8, %v15914_v56, %v7414_v4  ;;  %v7184_v56 = vsel %vm5651_vm7, %v15960_v3, %v7183_v53 }
 0x3e2   :  { %v9207_v31 = vld.sshfl [vmem:[#allocation3 + $0x77] sm:$0x1 pattern:$0x76325410]  ;;  %7358 = vrot.lane.b32.xlu1 %v7357_v57, %s10693_s0  ;;  %v16009_v18 = vrot.slane %v9223_v33, 7  ;;  %v7185_v58 = vsel %vm5653_vm8, %v15960_v3, %v7184_v56 }
 0x3e3   :  { %v9220_v59 = vld.sshfl [vmem:[#allocation3 + $0x3e] sm:$0x1 pattern:$0x76325410]  ;;  %v16014_v38 = vrot.slane %v9207_v31, 7 }
 0x3e4   :  { %v9113_v26 = vld.sshfl [vmem:[#allocation3 + $0x48] sm:$0x1 pattern:$0x76325410]  ;;  %7128 = vrot.lane.b32.xlu0 %v7127_v14, %s10693_s0  ;;  %v7441_v54 = vsel %vm5647_vm5, %v15987_v51, %v9220_v59 }
 0x3e5   :  { %v9204_v19 = vld.sshfl [vmem:[#allocation3 + $0x36] sm:$0x1 pattern:$0x76325410]  ;;  %v5888_v15 = vrot.slane %v9113_v26, 7  ;;  %v7442_v52 = vsel %vm5649_vm6, %v15987_v51, %v7441_v54 }
 0x3e6   :  { %v9097_v20 = vld.sshfl [vmem:[#allocation3 + $0x40] sm:$0x1 pattern:$0x76325410]  ;;  %v7211_v46 = vsel %vm5647_vm5, %v15993_v32, %v9204_v19  ;;  %7387 = vrot.lane.b32.xlu1 %v7386_v2, %s10694_s3  ;;  %v7443_v49 = vsel %vm5651_vm7, %v15987_v51, %v7442_v52 }
 0x3e7   :  { %v9112_v16 = vld.sshfl [vmem:[#allocation3 + $0x8] sm:$0x1 pattern:$0x76325410]  ;;  %v5646_v21 = vrot.slane %v9097_v20, 7  ;;  %v7212_v25 = vsel %vm5649_vm6, %v15993_v32, %v7211_v46  ;;  %v7444_v1 = vsel %vm5653_vm8, %v15987_v51, %v7443_v49 }
 0x3e8   :  { %v5889_v60 = vsel %vm5647_vm5, %v5888_v15, %v9112_v16  ;;  %v9096_v8 = vld.sshfl [vmem:[#allocation3] sm:$0x1 pattern:$0x76325410]  ;;  %7157 = vrot.lane.b32.xlu0 %v7156_v36, %s10694_s3  ;;  %v7213_v35 = vsel %vm5651_vm7, %v15993_v32, %v7212_v25 }
 0x3e9   :  { %v9222_v22 = vld.sshfl [vmem:[#allocation3 + $0x3f] sm:$0x1 pattern:$0x76325410]  ;;  %v5890_v6 = vsel %vm5649_vm6, %v5888_v15, %v5889_v60  ;;  %v5648_v12 = vsel %vm5647_vm5, %v5646_v21, %v9096_v8  ;;  %v7214_v57 = vsel %vm5653_vm8, %v15993_v32, %v7213_v35  ;;  %v10698_v35 = vmov 1983009808  }
 0x3ea   :  { %v9145_v63 = vld.sshfl [vmem:[#allocation3 + $0x58] sm:$0x1 pattern:$0x76325410]  ;;  %v5891_v42 = vsel %vm5651_vm7, %v5888_v15, %v5890_v6  ;;  %v5650_v7 = vsel %vm5649_vm6, %v5646_v21, %v5648_v12  ;;  %v7470_v45 = vsel %vm5647_vm5, %v16009_v18, %v9222_v22  ;;  %7416 = vrot.lane.b32.xlu1 %v7415_v0, %s10695_s1 }
 0x3eb   :  { %v9206_v41 = vld.sshfl [vmem:[#allocation3 + $0x37] sm:$0x1 pattern:$0x76325410]  ;;  %v6348_v29 = vrot.slane %v9145_v63, 7  ;;  %v5892_v34 = vsel %vm5653_vm8, %v5888_v15, %v5891_v42  ;;  %v5652_v27 = vsel %vm5651_vm7, %v5646_v21, %v5650_v7  ;;  %v7471_v11 = vsel %vm5649_vm6, %v16009_v18, %v7470_v45 }
 0x3ec   :  { %v9129_v61 = vld.sshfl [vmem:[#allocation3 + $0x50] sm:$0x1 pattern:$0x76325410]  ;;  %5894 = vst.msk [vmem:[#allocation4 + $0x2] sm:$0x3] %vm5656_vm9, %v5892_v34  ;;  %v5654_v44 = vsel %vm5653_vm8, %v5646_v21, %v5652_v27  ;;  %v7240_v40 = vsel %vm5647_vm5, %v16014_v38, %v9206_v41  ;;  %7186 = vrot.lane.b32.xlu0 %v7185_v58, %s10695_s1  ;;  %v7472_v4 = vsel %vm5651_vm7, %v16009_v18, %v7471_v11  ;;  %v7752_v11 = vunpack.c.l.s4 %v10698_v35 }
 0x3ed   :  { %v9144_v28 = vld.sshfl [vmem:[#allocation3 + $0x18] sm:$0x1 pattern:$0x76325410]  ;;  %v6118_v5 = vrot.slane %v9129_v61, 7  ;;  %v7241_v9 = vsel %vm5649_vm6, %v16014_v38, %v7240_v40  ;;  %v7473_v36 = vsel %vm5653_vm8, %v16009_v18, %v7472_v4 }
 0x3ee   :  { %v6349_v55 = vsel %vm5647_vm5, %v6348_v29, %v9144_v28  ;;  %v9128_v24 = vld.sshfl [vmem:[#allocation3 + $0x10] sm:$0x1 pattern:$0x76325410]  ;;  %5657 = vst.msk [vmem:[#allocation4] sm:$0x3] %vm5656_vm9, %v5654_v44  ;;  %7445 = vrot.lane.b32.xlu1 %v7444_v1, %s10696_s29  ;;  %v7242_v51 = vsel %vm5651_vm7, %v16014_v38, %v7241_v9  ;;  %v7753_v9 = vunpack.c.0.s8 %v7752_v11 }
 0x3ef   :  { %v6350_v47 = vsel %vm5649_vm6, %v6348_v29, %v6349_v55  ;;  %v6119_v48 = vsel %vm5647_vm5, %v6118_v5, %v9128_v24  ;;  %v9177_v39 = vld.sshfl [vmem:[#allocation3 + $0x68] sm:$0x1 pattern:$0x76325410]  ;;  %v7243_v21 = vsel %vm5653_vm8, %v16014_v38, %v7242_v51  ;;  %v7619_v35 = vld [vmem:[%s16771_s6 + $0x458] sm:$0xff] }
 0x3f0   :  { %v6351_v23 = vsel %vm5651_vm7, %v6348_v29, %v6350_v47  ;;  %v6120_v30 = vsel %vm5649_vm6, %v6118_v5, %v6119_v48  ;;  %v9176_v3 = vld.sshfl [vmem:[#allocation3 + $0x28] sm:$0x1 pattern:$0x76325410]  ;;  %v6808_v13 = vrot.slane %v9177_v39, 7  ;;  %7215 = vrot.lane.b32.xlu0 %v7214_v57, %s10696_s29  ;;  %s16945_s29 = sld [smem:[#allocation55_spill]] }
 0x3f1   :  { %v6352_v37 = vsel %vm5653_vm8, %v6348_v29, %v6351_v23  ;;  %v6121_v43 = vsel %vm5651_vm7, %v6118_v5, %v6120_v30  ;;  %v9161_v10 = vld.sshfl [vmem:[#allocation3 + $0x60] sm:$0x1 pattern:$0x76325410]  ;;  %v7685_v11 = vld [vmem:[%s16771_s6 + $0x668] sm:$0xff] }
 0x3f2   :  { %6354 = vst.msk [vmem:[#allocation4 + $0x6] sm:$0x3] %vm5656_vm9, %v6352_v37  ;;  %v6122_v17 = vsel %vm5653_vm8, %v6118_v5, %v6121_v43  ;;  %v6809_v33 = vsel %vm5647_vm5, %v6808_v13, %v9176_v3  ;;  %v6578_v62 = vrot.slane %v9161_v10, 7  ;;  %7474 = vrot.lane.b32.xlu1 %v7473_v36, %s10697_s22 }
 0x3f3   :  { %6124 = vst.msk [vmem:[#allocation4 + $0x4] sm:$0x3] %vm5656_vm9, %v6122_v17  ;;  %v6810_v50 = vsel %vm5649_vm6, %v6808_v13, %v6809_v33  ;;  %v9160_v31 = vld.sshfl [vmem:[#allocation3 + $0x20] sm:$0x1 pattern:$0x76325410] }
 0x3f4   :  { %v6811_v59 = vsel %vm5651_vm7, %v6808_v13, %v6810_v50  ;;  %v6579_v26 = vsel %vm5647_vm5, %v6578_v62, %v9160_v31  ;;  %v9209_v15 = vld.sshfl [vmem:[#allocation3 + $0x78] sm:$0x1 pattern:$0x76325410]  ;;  %7244 = vrot.lane.b32.xlu0 %v7243_v21, %s10697_s22 }
 0x3f5   :  { %v6812_v14 = vsel %vm5653_vm8, %v6808_v13, %v6811_v59  ;;  %v6580_v19 = vsel %vm5649_vm6, %v6578_v62, %v6579_v26  ;;  %v9208_v20 = vld.sshfl [vmem:[#allocation3 + $0x38] sm:$0x1 pattern:$0x76325410]  ;;  %v7268_v2 = vrot.slane %v9209_v15, 7  ;;  %v7738_v13 = vlaneseq }
 0x3f6   :  { %6814 = vst.msk [vmem:[#allocation4 + $0xa] sm:$0x3] %vm5656_vm9, %v6812_v14  ;;  %v6581_v32 = vsel %vm5651_vm7, %v6578_v62, %v6580_v19  ;;  %v9193_v16 = vld.sshfl [vmem:[#allocation3 + $0x70] sm:$0x1 pattern:$0x76325410] }
 0x3f7   :  { %v6582_v53 = vsel %vm5653_vm8, %v6578_v62, %v6581_v32  ;;  %v7269_v0 = vsel %vm5647_vm5, %v7268_v2, %v9208_v20  ;;  %v7038_v54 = vrot.slane %v9193_v16, 7  ;;  %v9192_v8 = vld.sshfl [vmem:[#allocation3 + $0x30] sm:$0x1 pattern:$0x76325410]  ;;  %v16123_v10 = vshrl.u32 %v7738_v13, 7 }
 0x3f8   :  { %6584 = vst.msk [vmem:[#allocation4 + $0x8] sm:$0x3] %vm5656_vm9, %v6582_v53  ;;  %v7270_v60 = vsel %vm5649_vm6, %v7268_v2, %v7269_v0  ;;  %v5950_v63 = vpop.permute.xlu1 %5949  ;;  %v7638_v19 = vld [vmem:[%s16771_s6 + $0x4f0] sm:$0xff]  ;;  %v7637_v32 = vld [vmem:[%s16771_s6 + $0x4e8] sm:$0xff]  ;;  %v7636_v20 = vld [vmem:[%s16771_s6 + $0x4e0] sm:$0xff] }
 0x3f9   :  { %v7271_v18 = vsel %vm5651_vm7, %v7268_v2, %v7270_v60  ;;  %v7039_v46 = vsel %vm5647_vm5, %v7038_v54, %v9192_v8  ;;  %v16128_v62 = vsub.s32 %v7753_v9, %v16123_v10  ;;  %v7635_v53 = vld [vmem:[%s16771_s6 + $0x4d8] sm:$0xff]  ;;  %v7701_v16 = vld [vmem:[%s16771_s6 + $0x6e8] sm:$0xff]  ;;  %v7634_v0 = vld [vmem:[%s16771_s6 + $0x4d0] sm:$0xff]  ;;  %vm10699_vm5 = vmmov 0  }
 0x3fa   :  { %v7272_v22 = vsel %vm5653_vm8, %v7268_v2, %v7271_v18  ;;  %v7040_v6 = vsel %vm5649_vm6, %v7038_v54, %v7039_v46  ;;  %v5921_v56 = vpop.permute.xlu0 %5920  ;;  %v7702_v2 = vld [vmem:[%s16771_s6 + $0x6f0] sm:$0xff]  ;;  %v7633_v60 = vld [vmem:[%s16771_s6 + $0x4c8] sm:$0xff]  ;;  %v7699_v8 = vld [vmem:[%s16771_s6 + $0x6d8] sm:$0xff] }
 0x3fb   :  { %7274 = vst.msk [vmem:[#allocation4 + $0xe] sm:$0x3] %vm5656_vm9, %v7272_v22  ;;  %v7041_v38 = vsel %vm5651_vm7, %v7038_v54, %v7040_v6  ;;  %v7632_v18 = vld [vmem:[%s16771_s6 + $0x4c0] sm:$0xff]  ;;  %v7698_v46 = vld [vmem:[%s16771_s6 + $0x6d0] sm:$0xff]  ;;  %v7631_v6 = vld [vmem:[%s16771_s6 + $0x4b8] sm:$0xff] }
 0x3fc   :  { %v7042_v12 = vsel %vm5653_vm8, %v7038_v54, %v7041_v38  ;;  %5923 = vst.msk [vmem:[#allocation4 + $0x2] sm:$0x3] %vm5686_vm10, %v5921_v56  ;;  %v5979_v41 = vpop.permute.xlu1 %5978  ;;  %v7700_v54 = vld [vmem:[%s16771_s6 + $0x6e0] sm:$0xff]  ;;  %v7697_v38 = vld [vmem:[%s16771_s6 + $0x6c8] sm:$0xff] }
 0x3fd   :  { %7044 = vst.msk [vmem:[#allocation4 + $0xc] sm:$0x3] %vm5656_vm9, %v7042_v12  ;;  %v7696_v56 = vld [vmem:[%s16771_s6 + $0x6c0] sm:$0xff] }
 0x3fe   :  { %5952 = vst.msk [vmem:[#allocation4 + $0x2] sm:$0x3] %vm5716_vm11, %v5950_v63  ;;  %v5684_v42 = vpop.permute.xlu0 %5683  ;;  %v7630_v63 = vld [vmem:[%s16771_s6 + $0x4b0] sm:$0xff]  ;;  %v7684_v9 = vld [vmem:[%s16771_s6 + $0x660] sm:$0xff] }
 0x3ff   :  { %5981 = vst.msk [vmem:[#allocation4 + $0x2] sm:$0x3] %vm5746_vm12, %v5979_v41  ;;  %v7629_v41 = vld [vmem:[%s16771_s6 + $0x4a8] sm:$0xff] }
 0x400   :  { %5687 = vst.msk [vmem:[#allocation4] sm:$0x3] %vm5686_vm10, %v5684_v42  ;;  %v6008_v7 = vpop.permute.xlu1 %6007  ;;  %v7695_v42 = vld [vmem:[%s16771_s6 + $0x6b8] sm:$0xff] }
 0x401   :  { %6010 = vst.msk [vmem:[#allocation4 + $0x2] sm:$0x3] %vm5776_vm13, %v6008_v7  ;;  %v7628_v7 = vld [vmem:[%s16771_s6 + $0x4a0] sm:$0xff] }
 0x402   :  { %v5714_v29 = vpop.permute.xlu0 %5713 }
 0x403   :  { %5717 = vst.msk [vmem:[#allocation4] sm:$0x3] %vm5716_vm11, %v5714_v29  ;;  %v7694_v29 = vld [vmem:[%s16771_s6 + $0x6b0] sm:$0xff] }
 0x404   :  { %v6037_v61 = vpop.permute.xlu1 %6036 }
 0x405   :  { %6039 = vst.msk [vmem:[#allocation4 + $0x2] sm:$0x3] %vm5806_vm14, %v6037_v61 }
 0x406   :  { %v5744_v52 = vpop.permute.xlu0 %5743 }
 0x407   :  { %5747 = vst.msk [vmem:[#allocation4] sm:$0x3] %vm5746_vm12, %v5744_v52  ;;  %v7627_v52 = vld [vmem:[%s16771_s6 + $0x498] sm:$0xff] }
 0x408   :  { %v6066_v34 = vpop.permute.xlu1 %6065 }
 0x409   :  { %6068 = vst.msk [vmem:[#allocation4 + $0x2] sm:$0x3] %vm5836_vm15, %v6066_v34  ;;  %v7693_v34 = vld [vmem:[%s16771_s6 + $0x6a8] sm:$0xff] }
 0x40a   :  { %v5774_v27 = vpop.permute.xlu0 %5773 }
 0x40b   :  { %5777 = vst.msk [vmem:[#allocation4] sm:$0x3] %vm5776_vm13, %v5774_v27 }
 0x40c   :  { %v6381_v28 = vpop.permute.xlu1 %6380 }
 0x40d   :  { %6383 = vst.msk [vmem:[#allocation4 + $0x6] sm:$0x3] %vm5686_vm10, %v6381_v28  ;;  %v7626_v28 = vld [vmem:[%s16771_s6 + $0x490] sm:$0xff] }
 0x40e   :  { %v5804_v5 = vpop.permute.xlu0 %5803 }
 0x40f   :  { %5807 = vst.msk [vmem:[#allocation4] sm:$0x3] %vm5806_vm14, %v5804_v5  ;;  %v7692_v5 = vld [vmem:[%s16771_s6 + $0x6a0] sm:$0xff] }
 0x410   :  { %v6410_v25 = vpop.permute.xlu1 %6409 }
 0x411   :  { %6412 = vst.msk [vmem:[#allocation4 + $0x6] sm:$0x3] %vm5716_vm11, %v6410_v25  ;;  %v7625_v25 = vld [vmem:[%s16771_s6 + $0x488] sm:$0xff] }
 0x412   :  { %v5834_v45 = vpop.permute.xlu0 %5833 }
 0x413   :  { %5837 = vst.msk [vmem:[#allocation4] sm:$0x3] %vm5836_vm15, %v5834_v45  ;;  %v7691_v45 = vld [vmem:[%s16771_s6 + $0x698] sm:$0xff] }
 0x414   :  { %v6439_v44 = vpop.permute.xlu1 %6438 }
 0x415   :  { %6441 = vst.msk [vmem:[#allocation4 + $0x6] sm:$0x3] %vm5746_vm12, %v6439_v44  ;;  %v7624_v44 = vld [vmem:[%s16771_s6 + $0x480] sm:$0xff] }
 0x416   :  { %v5864_v55 = vpop.permute.xlu0 %5863 }
 0x417   :  { %5867 = vst.msk [vmem:[#allocation4] sm:$0x3] %vm5866_vm0, %v5864_v55  ;;  %v7690_v55 = vld [vmem:[%s16771_s6 + $0x690] sm:$0xff] }
 0x418   :  { %v6468_v24 = vpop.permute.xlu1 %6467 }
 0x419   :  { %6470 = vst.msk [vmem:[#allocation4 + $0x6] sm:$0x3] %vm5776_vm13, %v6468_v24 }
 0x41a   :  { %v6180_v58 = vpop.permute.xlu0 %6179 }
 0x41c   :  { %v6497_v40 = vpop.permute.xlu1 %6496 }
 0x41d   :  { %6499 = vst.msk [vmem:[#allocation4 + $0x6] sm:$0x3] %vm5806_vm14, %v6497_v40  ;;  %v7689_v40 = vld [vmem:[%s16771_s6 + $0x688] sm:$0xff] }
 0x41e   :  { %v6209_v47 = vpop.permute.xlu0 %6208 }
 0x420   :  { %v6526_v48 = vpop.permute.xlu1 %6525 }
 0x421   :  { %6528 = vst.msk [vmem:[#allocation4 + $0x6] sm:$0x3] %vm5836_vm15, %v6526_v48  ;;  %v7622_v48 = vld [vmem:[%s16771_s6 + $0x470] sm:$0xff] }
 0x422   :  { %v6238_v39 = vpop.permute.xlu0 %6237 }
 0x424   :  { %v6151_v49 = vpop.permute.xlu1 %6150 }
 0x425   :  { %6153 = vst.msk [vmem:[#allocation4 + $0x4] sm:$0x3] %vm5686_vm10, %v6151_v49  ;;  %v7621_v49 = vld [vmem:[%s16771_s6 + $0x468] sm:$0xff] }
 0x426   :  { %v6267_v23 = vpop.permute.xlu0 %6266  ;;  %6182 = vst.msk [vmem:[#allocation4 + $0x4] sm:$0x3] %vm5716_vm11, %v6180_v58  ;;  %v7623_v58 = vld [vmem:[%s16771_s6 + $0x478] sm:$0xff] }
 0x427   :  { %6211 = vst.msk [vmem:[#allocation4 + $0x4] sm:$0x3] %vm5746_vm12, %v6209_v47 }
 0x428   :  { %6240 = vst.msk [vmem:[#allocation4 + $0x4] sm:$0x3] %vm5776_vm13, %v6238_v39  ;;  %v6095_v30 = vpop.permute.xlu1 %6094  ;;  %v7688_v39 = vld [vmem:[%s16771_s6 + $0x680] sm:$0xff] }
 0x429   :  { %6269 = vst.msk [vmem:[#allocation4 + $0x4] sm:$0x3] %vm5806_vm14, %v6267_v23  ;;  %v7687_v23 = vld [vmem:[%s16771_s6 + $0x678] sm:$0xff] }
 0x42a   :  { %6097 = vst.msk [vmem:[#allocation4 + $0x2] sm:$0x3] %vm5866_vm0, %v6095_v30  ;;  %v6296_v3 = vpop.permute.xlu0 %6295  ;;  %v7620_v30 = vld [vmem:[%s16771_s6 + $0x460] sm:$0xff] }
 0x42b   :  { %6298 = vst.msk [vmem:[#allocation4 + $0x4] sm:$0x3] %vm5836_vm15, %v6296_v3  ;;  %v7686_v3 = vld [vmem:[%s16771_s6 + $0x670] sm:$0xff] }
 0x42c   :  { %v6555_v37 = vpop.permute.xlu1 %6554 }
 0x42d   :  { %6557 = vst.msk [vmem:[#allocation4 + $0x6] sm:$0x3] %vm5866_vm0, %v6555_v37 }
 0x42e   :  { %v6325_v43 = vpop.permute.xlu0 %6324 }
 0x42f   :  { %6327 = vst.msk [vmem:[#allocation4 + $0x4] sm:$0x3] %vm5866_vm0, %v6325_v43  ;;  %v7618_v43 = vld [vmem:[%s16771_s6 + $0x450] sm:$0xff] }
 0x430   :  { %v6841_v17 = vpop.permute.xlu1 %6840 }
 0x431   :  { %6843 = vst.msk [vmem:[#allocation4 + $0xa] sm:$0x3] %vm5686_vm10, %v6841_v17  ;;  %v7617_v17 = vld [vmem:[%s16771_s6 + $0x448] sm:$0xff] }
 0x432   :  { %v6611_v33 = vpop.permute.xlu0 %6610 }
 0x433   :  { %6613 = vst.msk [vmem:[#allocation4 + $0x8] sm:$0x3] %vm5686_vm10, %v6611_v33  ;;  %v7683_v33 = vld [vmem:[%s16771_s6 + $0x658] sm:$0xff] }
 0x434   :  { %v6870_v1 = vpop.permute.xlu1 %6869 }
 0x435   :  { %6872 = vst.msk [vmem:[#allocation4 + $0xa] sm:$0x3] %vm5716_vm11, %v6870_v1  ;;  %v7616_v1 = vld [vmem:[%s16771_s6 + $0x440] sm:$0xff] }
 0x436   :  { %v6640_v50 = vpop.permute.xlu0 %6639  ;;  %v7478_v31 = vld [vmem:[#allocation4] sm:$0xff] }
 0x437   :  { %6642 = vst.msk [vmem:[#allocation4 + $0x8] sm:$0x3] %vm5716_vm11, %v6640_v50  ;;  %v7757_v57 = vrot.slane %v7478_v31, %v16128_v62  ;;  %v7750_v4 = vcombine.high %v7478_v31, %v7478_v31  ;;  %v7682_v50 = vld [vmem:[%s16771_s6 + $0x650] sm:$0xff] }
 0x438   :  { %v6899_v59 = vpop.permute.xlu1 %6898 }
 0x439   :  { %v7765_v26 = vcombine.high %v7757_v57, %v7757_v57  ;;  %v7764_v51 = vrot.slane %v7750_v4, %v16128_v62  ;;  %6901 = vst.msk [vmem:[#allocation4 + $0xa] sm:$0x3] %vm5746_vm12, %v6899_v59  ;;  %v7681_v4 = vld [vmem:[%s16771_s6 + $0x648] sm:$0xff] }
 0x43a   :  { %v6669_v14 = vpop.permute.xlu0 %6668 }
 0x43b   :  { %6671 = vst.msk [vmem:[#allocation4 + $0x8] sm:$0x3] %vm5746_vm12, %v6669_v14  ;;  %7856 = vmatprep.mubr.f32.mxu1 %v7765_v26  ;;  %v7766_v15 = vcombine.high %v7764_v51, %v7764_v51  ;;  %v7614_v26 = vld [vmem:[%s16771_s6 + $0x430] sm:$0xff]  ;;  %v7613_v14 = vld [vmem:[%s16771_s6 + $0x428] sm:$0xff] }
 0x43c   :  { %7857 = vmatmul.mubr.f32.vlgmr.msra.gmra.mxu1 %v7757_v57  ;;  %v6928_v36 = vpop.permute.xlu1 %6927  ;;  %v7615_v57 = vld [vmem:[%s16771_s6 + $0x438] sm:$0xff] }
 0x43d   :  { %7935 = vmatpush1.msra.mxu1 %v7638_v19  ;;  %7927 = vmatprep.mubr.f32.mxu0 %v7766_v15  ;;  %6930 = vst.msk [vmem:[#allocation4 + $0xa] sm:$0x3] %vm5776_vm13, %v6928_v36  ;;  %v7679_v19 = vld [vmem:[%s16771_s6 + $0x638] sm:$0xff]  ;;  %v7612_v15 = vld [vmem:[%s16771_s6 + $0x420] sm:$0xff]  ;;  %v7677_v36 = vld [vmem:[%s16771_s6 + $0x628] sm:$0xff] }
 0x43e   :  { %7936 = vmatprep.subr.mxu1 %v7637_v32  ;;  %v6698_v21 = vpop.permute.xlu0 %6697  ;;  %7928 = vmatmul.mubr.f32.vlgmr.msra.gmra.mxu0 %v7764_v51  ;;  %v7680_v51 = vld [vmem:[%s16771_s6 + $0x640] sm:$0xff]  ;;  %v7678_v32 = vld [vmem:[%s16771_s6 + $0x630] sm:$0xff] }
 0x43f   :  { %6700 = vst.msk [vmem:[#allocation4 + $0x8] sm:$0x3] %vm5776_vm13, %v6698_v21  ;;  %7937 = vmatpush1.msra.mxu1 %v7636_v20  ;;  %8006 = vmatpush1.msra.mxu0 %v7702_v2  ;;  %v7611_v2 = vld [vmem:[%s16771_s6 + $0x418] sm:$0xff]  ;;  %v7676_v21 = vld [vmem:[%s16771_s6 + $0x620] sm:$0xff] }
 0x440   :  { %7938 = vmatprep.subr.mxu1 %v7635_v53  ;;  %8007 = vmatprep.subr.mxu0 %v7701_v16  ;;  %v6957_v22 = vpop.permute.xlu1 %6956  ;;  %v7610_v16 = vld [vmem:[%s16771_s6 + $0x410] sm:$0xff] }
 0x441   :  { %7939 = vmatpush1.msra.mxu1 %v7634_v0  ;;  %8008 = vmatpush1.msra.mxu0 %v7700_v54  ;;  %6959 = vst.msk [vmem:[#allocation4 + $0xa] sm:$0x3] %vm5806_vm14, %v6957_v22  ;;  %v7609_v0 = vld [vmem:[%s16771_s6 + $0x408] sm:$0xff]  ;;  %v7675_v54 = vld [vmem:[%s16771_s6 + $0x618] sm:$0xff] }
 0x442   :  { %7940 = vmatprep.subr.mxu1 %v7633_v60  ;;  %8009 = vmatprep.subr.mxu0 %v7699_v8  ;;  %v6727_v12 = vpop.permute.xlu0 %6726  ;;  %v7608_v60 = vld [vmem:[%s16771_s6 + $0x400] sm:$0xff]  ;;  %v7674_v8 = vld [vmem:[%s16771_s6 + $0x610] sm:$0xff]  ;;  %v7673_v22 = vld [vmem:[%s16771_s6 + $0x608] sm:$0xff] }
 0x443   :  { %6729 = vst.msk [vmem:[#allocation4 + $0x8] sm:$0x3] %vm5806_vm14, %v6727_v12  ;;  %7941 = vmatpush1.msra.mxu1 %v7632_v18  ;;  %8010 = vmatpush1.msra.mxu0 %v7698_v46  ;;  %v7671_v46 = vld [vmem:[%s16771_s6 + $0x5f8] sm:$0xff]  ;;  %v7672_v12 = vld [vmem:[%s16771_s6 + $0x600] sm:$0xff] }
 0x444   :  { %7942 = vmatprep.subr.mxu1 %v7631_v6  ;;  %8011 = vmatprep.subr.mxu0 %v7697_v38  ;;  %v6986_v61 = vpop.permute.xlu1 %6985  ;;  %v7670_v38 = vld [vmem:[%s16771_s6 + $0x5f0] sm:$0xff] }
 0x445   :  { %7943 = vmatpush1.msra.mxu1 %v7630_v63  ;;  %8012 = vmatpush1.msra.mxu0 %v7696_v56  ;;  %6988 = vst.msk [vmem:[#allocation4 + $0xa] sm:$0x3] %vm5836_vm15, %v6986_v61  ;;  %v7669_v63 = vld [vmem:[%s16771_s6 + $0x5e8] sm:$0xff]  ;;  %v7735_v56 = vld [vmem:[%s16771_s6 + $0x7f8] sm:$0xff] }
 0x446   :  { %7944 = vmatprep.subr.mxu1 %v7629_v41  ;;  %8013 = vmatprep.subr.mxu0 %v7695_v42  ;;  %v6756_v27 = vpop.permute.xlu0 %6755  ;;  %v7668_v41 = vld [vmem:[%s16771_s6 + $0x5e0] sm:$0xff]  ;;  %v7734_v42 = vld [vmem:[%s16771_s6 + $0x7f0] sm:$0xff]  ;;  %v7733_v61 = vld [vmem:[%s16771_s6 + $0x7e8] sm:$0xff] }
 0x447   :  { %6758 = vst.msk [vmem:[#allocation4 + $0x8] sm:$0x3] %vm5836_vm15, %v6756_v27  ;;  %7945 = vmatpush1.msra.mxu1 %v7628_v7  ;;  %8014 = vmatpush1.msra.mxu0 %v7694_v29  ;;  %v7667_v29 = vld [vmem:[%s16771_s6 + $0x5d8] sm:$0xff]  ;;  %v7732_v27 = vld [vmem:[%s16771_s6 + $0x7e0] sm:$0xff] }
 0x448   :  { %7946 = vmatprep.subr.mxu1 %v7627_v52  ;;  %8015 = vmatprep.subr.mxu0 %v7693_v34  ;;  %v7015_v24 = vpop.permute.xlu1 %7014  ;;  %v7666_v34 = vld [vmem:[%s16771_s6 + $0x5d0] sm:$0xff] }
 0x449   :  { %7947 = vmatpush1.msra.mxu1 %v7626_v28  ;;  %8016 = vmatpush1.msra.mxu0 %v7692_v5  ;;  %7017 = vst.msk [vmem:[#allocation4 + $0xa] sm:$0x3] %vm5866_vm0, %v7015_v24  ;;  %v7665_v28 = vld [vmem:[%s16771_s6 + $0x5c8] sm:$0xff]  ;;  %v7731_v5 = vld [vmem:[%s16771_s6 + $0x7d8] sm:$0xff] }
 0x44a   :  { %7948 = vmatprep.subr.mxu1 %v7625_v25  ;;  %8017 = vmatprep.subr.mxu0 %v7691_v45  ;;  %v6785_v47 = vpop.permute.xlu0 %6784  ;;  %v7664_v25 = vld [vmem:[%s16771_s6 + $0x5c0] sm:$0xff]  ;;  %v7730_v45 = vld [vmem:[%s16771_s6 + $0x7d0] sm:$0xff]  ;;  %v7729_v24 = vld [vmem:[%s16771_s6 + $0x7c8] sm:$0xff] }
 0x44b   :  { %6787 = vst.msk [vmem:[#allocation4 + $0x8] sm:$0x3] %vm5866_vm0, %v6785_v47  ;;  %7949 = vmatpush1.msra.mxu1 %v7624_v44  ;;  %8018 = vmatpush1.msra.mxu0 %v7690_v55  ;;  %v7663_v55 = vld [vmem:[%s16771_s6 + $0x5b8] sm:$0xff]  ;;  %v7728_v47 = vld [vmem:[%s16771_s6 + $0x7c0] sm:$0xff] }
 0x44c   :  { %7950 = vmatprep.subr.mxu1 %v7623_v58  ;;  %8019 = vmatprep.subr.mxu0 %v7689_v40  ;;  %v7301_v13 = vpop.permute.xlu1 %7300  ;;  %v7662_v40 = vld [vmem:[%s16771_s6 + $0x5b0] sm:$0xff] }
 0x44d   :  { %7951 = vmatpush1.msra.mxu1 %v7622_v48  ;;  %8020 = vmatpush1.msra.mxu0 %v7688_v39  ;;  %7303 = vst.msk [vmem:[#allocation4 + $0xe] sm:$0x3] %vm5686_vm10, %v7301_v13  ;;  %v7661_v48 = vld [vmem:[%s16771_s6 + $0x5a8] sm:$0xff]  ;;  %v7727_v39 = vld [vmem:[%s16771_s6 + $0x7b8] sm:$0xff] }
 0x44e   :  { %7952 = vmatprep.subr.mxu1 %v7621_v49  ;;  %8021 = vmatprep.subr.mxu0 %v7687_v23  ;;  %v7071_v37 = vpop.permute.xlu0 %7070  ;;  %v7660_v49 = vld [vmem:[%s16771_s6 + $0x5a0] sm:$0xff]  ;;  %v7726_v23 = vld [vmem:[%s16771_s6 + $0x7b0] sm:$0xff]  ;;  %v7725_v13 = vld [vmem:[%s16771_s6 + $0x7a8] sm:$0xff] }
 0x44f   :  { %7073 = vst.msk [vmem:[#allocation4 + $0xc] sm:$0x3] %vm5686_vm10, %v7071_v37  ;;  %7953 = vmatpush1.msra.mxu1 %v7620_v30  ;;  %8022 = vmatpush1.msra.mxu0 %v7686_v3  ;;  %v7659_v3 = vld [vmem:[%s16771_s6 + $0x598] sm:$0xff]  ;;  %v7724_v37 = vld [vmem:[%s16771_s6 + $0x7a0] sm:$0xff] }
 0x450   :  { %7954 = vmatprep.subr.mxu1 %v7619_v35  ;;  %8023 = vmatprep.subr.mxu0 %v7685_v11  ;;  %v7330_v31 = vpop.permute.xlu1 %7329  ;;  %v7658_v11 = vld [vmem:[%s16771_s6 + $0x590] sm:$0xff] }
 0x451   :  { %7955 = vmatpush1.msra.mxu1 %v7618_v43  ;;  %8024 = vmatpush1.msra.mxu0 %v7684_v9  ;;  %7332 = vst.msk [vmem:[#allocation4 + $0xe] sm:$0x3] %vm5716_vm11, %v7330_v31  ;;  %v7657_v43 = vld [vmem:[%s16771_s6 + $0x588] sm:$0xff]  ;;  %v7723_v9 = vld [vmem:[%s16771_s6 + $0x798] sm:$0xff]  ;;  %v7654_v31 = vld [vmem:[%s16771_s6 + $0x570] sm:$0xff] }
 0x452   :  { %7956 = vmatprep.subr.mxu1 %v7617_v17  ;;  %8025 = vmatprep.subr.mxu0 %v7683_v33  ;;  %v7100_v59 = vpop.permute.xlu0 %7099  ;;  %v7656_v17 = vld [vmem:[%s16771_s6 + $0x580] sm:$0xff]  ;;  %v7722_v33 = vld [vmem:[%s16771_s6 + $0x790] sm:$0xff] }
 0x453   :  { %7102 = vst.msk [vmem:[#allocation4 + $0xc] sm:$0x3] %vm5716_vm11, %v7100_v59  ;;  %7957 = vmatpush1.msra.mxu1 %v7616_v1  ;;  %8026 = vmatpush1.msra.mxu0 %v7682_v50  ;;  %v7655_v1 = vld [vmem:[%s16771_s6 + $0x578] sm:$0xff]  ;;  %v7721_v50 = vld [vmem:[%s16771_s6 + $0x788] sm:$0xff] }
 0x454   :  { %7958 = vmatprep.subr.mxu1 %v7615_v57  ;;  %8027 = vmatprep.subr.mxu0 %v7681_v4  ;;  %v7359_v20 = vpop.permute.xlu1 %7358  ;;  %v7720_v57 = vld [vmem:[%s16771_s6 + $0x780] sm:$0xff]  ;;  %v7653_v4 = vld [vmem:[%s16771_s6 + $0x568] sm:$0xff]  ;;  %v7719_v59 = vld [vmem:[%s16771_s6 + $0x778] sm:$0xff] }
 0x455   :  { %7959 = vmatpush1.msra.mxu1 %v7614_v26  ;;  %8028 = vmatpush1.msra.mxu0 %v7680_v51  ;;  %7361 = vst.msk [vmem:[#allocation4 + $0xe] sm:$0x3] %vm5746_vm12, %v7359_v20  ;;  %v7652_v26 = vld [vmem:[%s16771_s6 + $0x560] sm:$0xff]  ;;  %v7718_v51 = vld [vmem:[%s16771_s6 + $0x770] sm:$0xff] }
 0x456   :  { %7960 = vmatprep.subr.mxu1 %v7613_v14  ;;  %8029 = vmatprep.subr.mxu0 %v7679_v19  ;;  %v7129_v53 = vpop.permute.xlu0 %7128  ;;  %v7651_v14 = vld [vmem:[%s16771_s6 + $0x558] sm:$0xff]  ;;  %v7717_v19 = vld [vmem:[%s16771_s6 + $0x768] sm:$0xff] }
 0x457   :  { %7131 = vst.msk [vmem:[#allocation4 + $0xc] sm:$0x3] %vm5746_vm12, %v7129_v53  ;;  %7961 = vmatpush1.msra.mxu1 %v7612_v15  ;;  %8030 = vmatpush1.msra.mxu0 %v7678_v32  ;;  %v7650_v15 = vld [vmem:[%s16771_s6 + $0x550] sm:$0xff]  ;;  %v7716_v32 = vld [vmem:[%s16771_s6 + $0x760] sm:$0xff] }
 0x458   :  { %7962 = vmatprep.subr.mxu1 %v7611_v2  ;;  %8031 = vmatprep.subr.mxu0 %v7677_v36  ;;  %v7388_v18 = vpop.permute.xlu1 %7387  ;;  %v7649_v2 = vld [vmem:[%s16771_s6 + $0x548] sm:$0xff]  ;;  %v7715_v36 = vld [vmem:[%s16771_s6 + $0x758] sm:$0xff] }
 0x459   :  { %7963 = vmatpush1.msra.mxu1 %v7610_v16  ;;  %8032 = vmatpush1.msra.mxu0 %v7676_v21  ;;  %7390 = vst.msk [vmem:[#allocation4 + $0xe] sm:$0x3] %vm5776_vm13, %v7388_v18  ;;  %v7648_v21 = vld [vmem:[%s16771_s6 + $0x540] sm:$0xff]  ;;  %v7713_v18 = vld [vmem:[%s16771_s6 + $0x748] sm:$0xff] }
 0x45a   :  { %7964 = vmatprep.subr.mxu1 %v7609_v0  ;;  %8033 = vmatprep.subr.mxu0 %v7675_v54  ;;  %v7158_v6 = vpop.permute.xlu0 %7157  ;;  %v7714_v0 = vld [vmem:[%s16771_s6 + $0x750] sm:$0xff]  ;;  %v7647_v54 = vld [vmem:[%s16771_s6 + $0x538] sm:$0xff] }
 0x45b   :  { %7160 = vst.msk [vmem:[#allocation4 + $0xc] sm:$0x3] %vm5776_vm13, %v7158_v6  ;;  %7965 = vmatpush1.msra.mxu1 %v7608_v60  ;;  %8034 = vmatpush1.msra.mxu0 %v7674_v8 }
 0x45c   :  { %7966 = vmatprep.subr.mxu1 %v7671_v46  ;;  %8035 = vmatprep.subr.mxu0 %v7673_v22  ;;  %v7417_v7 = vpop.permute.xlu1 %7416  ;;  %v7646_v46 = vld [vmem:[%s16771_s6 + $0x530] sm:$0xff]  ;;  %v7712_v22 = vld [vmem:[%s16771_s6 + $0x740] sm:$0xff] }
 0x45d   :  { %7967 = vmatpush2.msra.mxu1 %v7670_v38  ;;  %8036 = vmatpush1.msra.mxu0 %v7672_v12  ;;  %7419 = vst.msk [vmem:[#allocation4 + $0xe] sm:$0x3] %vm5806_vm14, %v7417_v7  ;;  %v7711_v38 = vld [vmem:[%s16771_s6 + $0x738] sm:$0xff]  ;;  %v7644_v12 = vld [vmem:[%s16771_s6 + $0x520] sm:$0xff] }
 0x45e   :  { %7968 = vmatprep.subr.mxu1 %v7669_v63  ;;  %8037 = vmatprep.subr.mxu0 %v7735_v56  ;;  %v7187_v52 = vpop.permute.xlu0 %7186  ;;  %v7710_v63 = vld [vmem:[%s16771_s6 + $0x730] sm:$0xff]  ;;  %v7643_v56 = vld [vmem:[%s16771_s6 + $0x518] sm:$0xff]  ;;  %v7708_v7 = vld [vmem:[%s16771_s6 + $0x720] sm:$0xff] }
 0x45f   :  { %7189 = vst.msk [vmem:[#allocation4 + $0xc] sm:$0x3] %vm5806_vm14, %v7187_v52  ;;  %7969 = vmatpush2.msra.mxu1 %v7668_v41  ;;  %8038 = vmatpush2.msra.mxu0 %v7734_v42  ;;  %v7709_v41 = vld [vmem:[%s16771_s6 + $0x728] sm:$0xff]  ;;  %v7642_v42 = vld [vmem:[%s16771_s6 + $0x510] sm:$0xff]  ;;  %v7640_v52 = vld [vmem:[%s16771_s6 + $0x500] sm:$0xff] }
 0x460   :  { %7970 = vmatprep.subr.mxu1 %v7667_v29  ;;  %8039 = vmatprep.subr.mxu0 %v7733_v61  ;;  %v7446_v44 = vpop.permute.xlu1 %7445  ;;  %v7641_v29 = vld [vmem:[%s16771_s6 + $0x508] sm:$0xff]  ;;  %v7707_v61 = vld [vmem:[%s16771_s6 + $0x718] sm:$0xff] }
 0x461   :  { %7971 = vmatpush2.msra.mxu1 %v7666_v34  ;;  %8040 = vmatpush2.msra.mxu0 %v7732_v27  ;;  %7448 = vst.msk [vmem:[#allocation4 + $0xe] sm:$0x3] %vm5836_vm15, %v7446_v44  ;;  %v7706_v34 = vld [vmem:[%s16771_s6 + $0x710] sm:$0xff]  ;;  %v7705_v27 = vld [vmem:[%s16771_s6 + $0x708] sm:$0xff] }
 0x462   :  { %7972 = vmatprep.subr.mxu1 %v7665_v28  ;;  %8041 = vmatprep.subr.mxu0 %v7731_v5  ;;  %v7216_v58 = vpop.permute.xlu0 %7215  ;;  %v7704_v28 = vld [vmem:[%s16771_s6 + $0x700] sm:$0xff]  ;;  %v16944_v5 = vmov 0.0   ;;  %v8108_v44 = vld [vmem:[%s16773_s8 + $0xf0] sm:$0xff] }
 0x463   :  { %7218 = vst.msk [vmem:[#allocation4 + $0xc] sm:$0x3] %vm5836_vm15, %v7216_v58  ;;  %7973 = vmatpush2.msra.mxu1 %v7664_v25  ;;  %8042 = vmatpush2.msra.mxu0 %v7730_v45  ;;  %v8109_v25 = vld [vmem:[%s16773_s8 + $0xf8] sm:$0xff]  ;;  %v8091_v58 = vld [vmem:[%s16773_s8 + $0x68] sm:$0xff] }
 0x464   :  { %7974 = vmatprep.subr.mxu1 %v7663_v55  ;;  %8043 = vmatprep.subr.mxu0 %v7729_v24  ;;  %v7475_v30 = vpop.permute.xlu1 %7474  ;;  %v8093_v45 = vld [vmem:[%s16773_s8 + $0x78] sm:$0xff]  ;;  %v8092_v55 = vld [vmem:[%s16773_s8 + $0x70] sm:$0xff]  ;;  %v8107_v24 = vld [vmem:[%s16773_s8 + $0xe8] sm:$0xff] }
 0x465   :  { %7975 = vmatpush2.msra.mxu1 %v7662_v40  ;;  %8044 = vmatpush2.msra.mxu0 %v7728_v47  ;;  %7477 = vst.msk [vmem:[#allocation4 + $0xe] sm:$0x3] %vm5866_vm0, %v7475_v30  ;;  %v8106_v40 = vld [vmem:[%s16773_s8 + $0xe0] sm:$0xff]  ;;  %v8103_v30 = vld [vmem:[%s16773_s8 + $0xc8] sm:$0xff] }
 0x466   :  { %7976 = vmatprep.subr.mxu1 %v7661_v48  ;;  %8045 = vmatprep.subr.mxu0 %v7727_v39  ;;  %v7245_v35 = vpop.permute.xlu0 %7244  ;;  %v8090_v47 = vld [vmem:[%s16773_s8 + $0x60] sm:$0xff]  ;;  %v8105_v48 = vld [vmem:[%s16773_s8 + $0xd8] sm:$0xff] }
 0x467   :  { %7247 = vst.msk [vmem:[#allocation4 + $0xc] sm:$0x3] %vm5866_vm0, %v7245_v35  ;;  %7977 = vmatpush2.msra.mxu1 %v7660_v49  ;;  %8046 = vmatpush2.msra.mxu0 %v7726_v23  ;;  %v8089_v39 = vld [vmem:[%s16773_s8 + $0x58] sm:$0xff]  ;;  %v8104_v49 = vld [vmem:[%s16773_s8 + $0xd0] sm:$0xff]  ;;  %v8086_v35 = vld [vmem:[%s16773_s8 + $0x40] sm:$0xff] }
 0x468   :  { %7978 = vmatprep.subr.mxu1 %v7659_v3  ;;  %8047 = vmatprep.subr.mxu0 %v7725_v13  ;;  %v8088_v23 = vld [vmem:[%s16773_s8 + $0x50] sm:$0xff]  ;;  %v8087_v3 = vld [vmem:[%s16773_s8 + $0x48] sm:$0xff]  ;;  %v8102_v13 = vld [vmem:[%s16773_s8 + $0xc0] sm:$0xff] }
 0x469   :  { %7979 = vmatpush2.msra.mxu1 %v7658_v11  ;;  %8048 = vmatpush2.msra.mxu0 %v7724_v37  ;;  %v8101_v11 = vld [vmem:[%s16773_s8 + $0xb8] sm:$0xff] }
 0x46a   :  { %7980 = vmatprep.subr.mxu1 %v7657_v43  ;;  %8049 = vmatprep.subr.mxu0 %v7723_v9  ;;  %v8085_v37 = vld [vmem:[%s16773_s8 + $0x38] sm:$0xff]  ;;  %v8100_v43 = vld [vmem:[%s16773_s8 + $0xb0] sm:$0xff] }
 0x46b   :  { %7981 = vmatpush2.msra.mxu1 %v7656_v17  ;;  %8050 = vmatpush2.msra.mxu0 %v7722_v33  ;;  %v8084_v9 = vld [vmem:[%s16773_s8 + $0x30] sm:$0xff]  ;;  %v8099_v17 = vld [vmem:[%s16773_s8 + $0xa8] sm:$0xff] }
 0x46c   :  { %7982 = vmatprep.subr.mxu1 %v7655_v1  ;;  %8051 = vmatprep.subr.mxu0 %v7721_v50  ;;  %v8083_v33 = vld [vmem:[%s16773_s8 + $0x28] sm:$0xff]  ;;  %v8098_v1 = vld [vmem:[%s16773_s8 + $0xa0] sm:$0xff] }
 0x46d   :  { %7983 = vmatpush2.msra.mxu1 %v7654_v31  ;;  %8052 = vmatpush2.msra.mxu0 %v7720_v57  ;;  %v8082_v50 = vld [vmem:[%s16773_s8 + $0x20] sm:$0xff]  ;;  %v8097_v31 = vld [vmem:[%s16773_s8 + $0x98] sm:$0xff] }
 0x46e   :  { %7984 = vmatprep.subr.mxu1 %v7653_v4  ;;  %8053 = vmatprep.subr.mxu0 %v7719_v59  ;;  %v7479_v20 = vld [vmem:[#allocation4 + $0x8] sm:$0xff]  ;;  %v8081_v57 = vld [vmem:[%s16773_s8 + $0x18] sm:$0xff]  ;;  %v8096_v4 = vld [vmem:[%s16773_s8 + $0x90] sm:$0xff] }
 0x46f   :  { %7985 = vmatpush2.msra.mxu1 %v7652_v26  ;;  %8054 = vmatpush2.msra.mxu0 %v7718_v51  ;;  %v7774_v53 = vrot.slane %v7479_v20, %v16128_v62  ;;  %v7767_v16 = vcombine.high %v7479_v20, %v7479_v20  ;;  %v8080_v59 = vld [vmem:[%s16773_s8 + $0x10] sm:$0xff]  ;;  %v8095_v26 = vld [vmem:[%s16773_s8 + $0x88] sm:$0xff]  ;;  %v7744_v20 = vsub.s32 1, %v16123_v10 }
 0x470   :  { %7986 = vmatprep.subr.mxu1 %v7651_v14  ;;  %8055 = vmatprep.subr.mxu0 %v7717_v19  ;;  %v8079_v51 = vld [vmem:[%s16773_s8 + $0x8] sm:$0xff]  ;;  %v8094_v14 = vld [vmem:[%s16773_s8 + $0x80] sm:$0xff] }
 0x471   :  { %7987 = vmatpush2.msra.mxu1 %v7650_v15  ;;  %8056 = vmatpush2.msra.mxu0 %v7716_v32  ;;  %v7782_v60 = vcombine.high %v7774_v53, %v7774_v53  ;;  %v7781_v8 = vrot.slane %v7767_v16, %v16128_v62  ;;  %v7645_v62 = vld [vmem:[%s16771_s6 + $0x528] sm:$0xff]  ;;  %v8078_v19 = vld [vmem:[%s16773_s8] sm:$0xff]  ;;  %v7740_v15 = vsub.s32 0, %v16123_v10 }
 0x472   :  { %7988 = vmatprep.subr.mxu1 %v7649_v2  ;;  %8057 = vmatprep.subr.mxu0 %v7715_v36  ;;  %v7736_v32 = vld [vmem:[%s16772_s7] sm:$0x3] }
 0x473   :  { %7989 = vmatpush2.msra.mxu1 %v7648_v21  ;;  %8058 = vmatpush2.msra.mxu0 %v7714_v0  ;;  %v7783_v6 = vcombine.high %v7781_v8, %v7781_v8  ;;  %v7741_v36 = vrot.slane %v7736_v32, %v7740_v15 }
 0x474   :  { %7990 = vmatprep.subr.mxu1 %v7647_v54  ;;  %7998 = vmatprep.mubr.f32.mxu1 %v7782_v60 }
 0x475   :  { %8059 = vmatprep.subr.mxu0 %v7713_v18  ;;  %7991 = vmatpush2.msra.mxu1 %v7646_v46 }
 0x476   :  { %8060 = vmatpush2.msra.mxu0 %v7712_v22  ;;  %7992 = vmatprep.subr.mxu1 %v7645_v62 }
 0x477   :  { %8061 = vmatprep.subr.mxu0 %v7711_v38  ;;  %8069 = vmatprep.mubr.f32.mxu0 %v7783_v6 }
 0x478   :  { %7993 = vmatpush2.msra.mxu1 %v7644_v12  ;;  %8062 = vmatpush2.msra.mxu0 %v7710_v63 }
 0x479   :  { %7994 = vmatprep.subr.mxu1 %v7643_v56  ;;  %8063 = vmatprep.subr.mxu0 %v7709_v41 }
 0x47a   :  { %7995 = vmatpush2.msra.mxu1 %v7642_v42  ;;  %8064 = vmatpush2.msra.mxu0 %v7708_v7  ;;  %v8195_v42 = vld [vmem:[%s16775_s10 + $0x38] sm:$0xff]  ;;  %v8194_v7 = vld [vmem:[%s16775_s10 + $0x30] sm:$0xff] }
 0x47b   :  { %7996 = vmatprep.subr.mxu1 %v7641_v29  ;;  %8065 = vmatprep.subr.mxu0 %v7707_v61  ;;  %v8193_v29 = vld [vmem:[%s16775_s10 + $0x28] sm:$0xff]  ;;  %v8192_v61 = vld [vmem:[%s16775_s10 + $0x20] sm:$0xff] }
 0x47c   :  { %7997 = vmatpush2.msra.mxu1 %v7640_v52  ;;  %8066 = vmatpush2.msra.mxu0 %v7706_v34  ;;  %v8191_v52 = vld [vmem:[%s16775_s10 + $0x18] sm:$0xff]  ;;  %v8190_v34 = vld [vmem:[%s16775_s10 + $0x10] sm:$0xff] }
 0x47d   :  { %7999 = vmatmul.mubr.f32.vlgmr.msra.gmra.mxu1 %v7774_v53  ;;  %8067 = vmatprep.subr.mxu0 %v7705_v27  ;;  %v7745_v53 = vrot.slane %v7736_v32, %v7744_v20  ;;  %v8197_v27 = vld [vmem:[%s16776_s11] sm:$0x1f]  ;;  %v8534_v32 = vld [vmem:[%s16782_s17 + $0x8] sm:$0xff] }
 0x47e   :  { %8068 = vmatpush2.msra.mxu0 %v7704_v28  ;;  %10171 = vmatprep.subr.mxu1 %v8109_v25  ;;  %v8196_v28 = vld [vmem:[%s16945_s29] sm:$0x3]  ;;  %v8189_v25 = vld [vmem:[%s16775_s10 + $0x8] sm:$0xff] }
 0x47f   :  { %8070 = vmatmul.mubr.f32.vlgmr.msra.gmra.mxu0 %v7781_v8  ;;  %10594 = vmatprep.subr.mxu0 %v16944_v5  ;;  %v8533_v20 = vld [vmem:[%s16782_s17] sm:$0xff]  ;;  %s8622_s17 = sshll.u32 %s10700_s5, 4  ;;  %s8623_s17 = int_to_ptr.vmem [resolvable:$true] %s8622_s17 }
 0x480   :  { %10172 = vmatpush3.msra.mxu1 %v8093_v45  ;;  %10595 = vmatpush3.msk.msra.mxu0 %vm8202_vm1, %v8197_v27  ;;  %v8365_v45 = vld [vmem:[%s16778_s13 + $0x38] sm:$0xff]  ;;  %s10668_s24 = scalar_lea.vmem %s8623_s17, 32  ;;  %p10673_p1 = scmp.lt.s32.totalorder %s8623_s17, %s8623_s17 }
 0x481   :  { %10173 = vmatprep.subr.mxu1 %v8108_v44  ;;  %10596 = vmatprep.mubr.msk.f32.mxu0 %vm10699_vm5, %v16944_v5  ;;  %v8188_v44 = vld [vmem:[%s16775_s10] sm:$0xff]  ;;  %p10669_p0 = scmp.ne.s32.totalorder %s8623_s17, %s10668_s24  ;;  %p10674_p2 = scmp.lt.s32.totalorder %s10668_s24, %s10668_s24 }
 0x482   :  { %10174 = vmatpush3.msra.mxu1 %v8092_v55  ;;  %10618 = vmatprep.subr.mxu0 %v16944_v5  ;;  %v8364_v55 = vld [vmem:[%s16778_s13 + $0x30] sm:$0xff] }
 0x483   :  { %10175 = vmatprep.subr.mxu1 %v8107_v24  ;;  %10597 = vmatmul.mubr.msk.f32.vlgmr.msra.gmra.mxu0 %vm8198_vm3, %v8196_v28  ;;  %v8363_v24 = vld [vmem:[%s16778_s13 + $0x28] sm:$0xff]  ;;  %p10675_p3 = por %p10674_p2, %p10673_p1 }
 0x484   :  { %10176 = vmatpush3.msra.mxu1 %v8091_v58  ;;  %10619 = vmatpush3.msra.mxu0 %v8365_v45  ;;  %v8362_v58 = vld [vmem:[%s16778_s13 + $0x20] sm:$0xff] }
 0x485   :  { %10177 = vmatprep.subr.mxu1 %v8106_v40  ;;  %10620 = vmatprep.subr.mxu0 %v16944_v5  ;;  %p10676_p4 = pnand %p10675_p3, %p10669_p0 }
 0x486   :  { %10178 = vmatpush3.msra.mxu1 %v8090_v47  ;;  %10621 = vmatpush3.msra.mxu0 %v8364_v55  ;;  %v9224_v47 = vld [vmem:[%s16774_s9] ss:$0 sm:$0xff] }
 0x487   :  { %10179 = vmatprep.subr.mxu1 %v8105_v48  ;;  %10634 = vmatprep.mubr.msk.f32.mxu0 %vm10699_vm5, %v16944_v5 }
 0x488   :  { %10180 = vmatpush3.msra.mxu1 %v8089_v39  ;;  %10622 = vmatprep.subr.mxu0 %v16944_v5 }
 0x489   :  { %10181 = vmatprep.subr.mxu1 %v8104_v49  ;;  %10623 = vmatpush3.msra.mxu0 %v8363_v24 }
 0x48a   :  { %10182 = vmatpush3.msra.mxu1 %v8088_v23  ;;  %10624 = vmatprep.subr.mxu0 %v16944_v5 }
 0x48b   :  { %10183 = vmatprep.subr.mxu1 %v8103_v30  ;;  %10625 = vmatpush3.msra.mxu0 %v8362_v58 }
 0x48c   :  { %10184 = vmatpush3.msra.mxu1 %v8087_v3  ;;  %10626 = vmatprep.subr.mxu0 %v16944_v5 }
 0x48d   :  { %10185 = vmatprep.subr.mxu1 %v8102_v13  ;;  %v8361_v13 = vld [vmem:[%s16778_s13 + $0x18] sm:$0xff] }
 0x48e   :  { %10186 = vmatpush3.msra.mxu1 %v8086_v35  ;;  %v8360_v35 = vld [vmem:[%s16778_s13 + $0x10] sm:$0xff]  ;;  %10627 = vmatpush3.msra.mxu0 %v8361_v13 }
 0x48f   :  { %10187 = vmatprep.subr.mxu1 %v8101_v11  ;;  %10628 = vmatprep.subr.mxu0 %v16944_v5  ;;  %v8359_v11 = vld [vmem:[%s16778_s13 + $0x8] sm:$0xff] }
 0x490   :  { %10188 = vmatpush3.msra.mxu1 %v8085_v37  ;;  %v8450_v37 = vld [vmem:[%s16780_s15 + $0x18] sm:$0xff]  ;;  %10629 = vmatpush3.msra.mxu0 %v8360_v35 }
 0x491   :  { %10189 = vmatprep.subr.mxu1 %v8100_v43  ;;  %10630 = vmatprep.subr.mxu0 %v16944_v5  ;;  %v8358_v43 = vld [vmem:[%s16778_s13] sm:$0xff] }
 0x492   :  { %10190 = vmatpush3.msra.mxu1 %v8084_v9  ;;  %10631 = vmatpush3.msra.mxu0 %v8359_v11 }
 0x493   :  { %10191 = vmatprep.subr.mxu1 %v8099_v17  ;;  %10632 = vmatprep.subr.mxu0 %v16944_v5  ;;  %v9228_v17 = vld [vmem:[%s16777_s12] ss:$0 sm:$0xff] }
 0x494   :  { %10192 = vmatpush3.msra.mxu1 %v8083_v33  ;;  %10633 = vmatpush3.msra.mxu0 %v8358_v43 }
 0x495   :  { %10193 = vmatprep.subr.mxu1 %v8098_v1  ;;  %10648 = vmatprep.subr.mxu0 %v16944_v5 }
 0x496   :  { %10194 = vmatpush3.msra.mxu1 %v8082_v50 }
 0x497   :  { %10195 = vmatprep.subr.mxu1 %v8097_v31 }
 0x498   :  { %10196 = vmatpush3.msra.mxu1 %v8081_v57  ;;  %v8449_v57 = vld [vmem:[%s16780_s15 + $0x10] sm:$0xff] }
 0x499   :  { %10197 = vmatprep.subr.mxu1 %v8096_v4  ;;  %v8448_v4 = vld [vmem:[%s16780_s15 + $0x8] sm:$0xff] }
 0x49a   :  { %10198 = vmatpush3.msra.mxu1 %v8080_v59  ;;  %v8447_v59 = vld [vmem:[%s16780_s15] sm:$0xff] }
 0x49b   :  { %10199 = vmatprep.subr.mxu1 %v8095_v26  ;;  %v9229_v26 = vld [vmem:[%s16779_s14] ss:$0 sm:$0xff] }
 0x49c   :  { %10200 = vmatpush3.msra.mxu1 %v8079_v51 }
 0x49d   :  { %10201 = vmatprep.subr.mxu1 %v8094_v14 }
 0x49e   :  { %10202 = vmatpush3.msra.mxu1 %v8078_v19 }
 0x49f   :  { %10599 = vmatprep.subr.mxu1 %v16944_v5 }
 0x4fc   :  { %v7858_v2 = vpop.f32.mrf.mxu1 }
 0x4fd   :  { %v7859_v0 = vadd.f32 %v7858_v2, %v7741_v36  ;;  %v9231_v2 = vld [vmem:[%s16781_s16] ss:$0 sm:$0xff] }
 0x4fe   :  { %v7860_v16 = vpop.f32.mrf.mxu1  ;;  %v7929_v21 = vpop.f32.mrf.mxu0 }
 0x4ff   :  { %v7861_v54 = vadd.f32 %v7860_v16, %v7745_v53  ;;  %v7930_v8 = vadd.f32 %v7929_v21, %v7859_v0  ;;  %v9233_v0 = vld [vmem:[%s16783_s18] ss:$0 sm:$0xff] }
 0x500   :  { %v7931_v60 = vpop.f32.mrf.mxu0 }
 0x501   :  { %v7932_v46 = vadd.f32 %v7931_v60, %v7861_v54 }
 0x53d   :  { %v8000_v18 = vpop.f32.mrf.mxu1 }
 0x53e   :  { %v8001_v22 = vadd.f32 %v8000_v18, %v7930_v8 }
 0x53f   :  { %v8002_v62 = vpop.f32.mrf.mxu1  ;;  %v8071_v6 = vpop.f32.mrf.mxu0 }
 0x540   :  { %v8003_v38 = vadd.f32 %v8002_v62, %v7932_v46  ;;  %v8072_v12 = vadd.f32 %v8071_v6, %v8001_v22 }
 0x541   :  { %v8073_v63 = vpop.f32.mrf.mxu0 }
 0x542   :  { %v8074_v56 = vadd.f32 %v8073_v63, %v8003_v38  ;;  %v8076_v10 = vmax.f32 %v8072_v12, 0.0 }
 0x543   :  { %v8272_v30 = vpop.f32.mrf.mxu0 }
 0x544   :  { %v8077_v41 = vmax.f32 %v8074_v56, 0.0 }
 0x545   :  { %v10598_v3 = vpop.f32.mrf.mxu0 }
 0x546   :  { %8181 = vmatprep.mubr.f32.mxu1 %v8077_v41 }
 0x547   :  { %8182 = vmatmul.mubr.f32.vlgmr.msra.gmra.mxu1 %v8076_v10 }
 0x548   :  { %10600 = vmatpush3.msra.mxu1 %v8195_v42  ;;  %10615 = vmatprep.mubr.msk.f32.mxu1 %vm10699_vm5, %v16944_v5 }
 0x549   :  { %10601 = vmatprep.subr.mxu1 %v16944_v5 }
 0x54a   :  { %10602 = vmatpush3.msra.mxu1 %v8194_v7 }
 0x54b   :  { %10603 = vmatprep.subr.mxu1 %v16944_v5 }
 0x54c   :  { %10604 = vmatpush3.msra.mxu1 %v8193_v29 }
 0x54d   :  { %10605 = vmatprep.subr.mxu1 %v16944_v5 }
 0x54e   :  { %10606 = vmatpush3.msra.mxu1 %v8192_v61 }
 0x54f   :  { %10607 = vmatprep.subr.mxu1 %v16944_v5 }
 0x550   :  { %10608 = vmatpush3.msra.mxu1 %v8191_v52 }
 0x551   :  { %10609 = vmatprep.subr.mxu1 %v16944_v5 }
 0x552   :  { %10610 = vmatpush3.msra.mxu1 %v8190_v34 }
 0x553   :  { %10611 = vmatprep.subr.mxu1 %v16944_v5 }
 0x554   :  { %10612 = vmatpush3.msra.mxu1 %v8189_v25 }
 0x555   :  { %10613 = vmatprep.subr.mxu1 %v16944_v5 }
 0x556   :  { %10614 = vmatpush3.msra.mxu1 %v8188_v44 }
 0x557   :  { %10637 = vmatprep.subr.mxu1 %v16944_v5 }
 0x607   :  { %v10203_v40 = vpop.f32.mrf.mxu1 }
 0x609   :  { %v10204_v48 = vpop.f32.mrf.mxu1 }
 0x60a   :  { %v10205_v39 = vadd.f32 %v10204_v48, %v10203_v40 }
 0x60c   :  { %v8184_v49 = vadd.f32 %v10205_v39, %v9224_v47 }
 0x60e   :  { %v8187_v23 = vmax.f32 %v8184_v49, 0.0 }
 0x610   :  { %10616 = vmatmul.mubr.msk.f32.vlgmr.msra.gmra.mxu1 %vm3443_vm2, %v8187_v23 }
 0x611   :  { %10645 = vmatprep.mubr.msk.f32.mxu1 %vm10699_vm5, %v16944_v5  ;;  %10638 = vmatpush3.msra.mxu1 %v8450_v37 }
 0x612   :  { %10639 = vmatprep.subr.mxu1 %v16944_v5 }
 0x613   :  { %10640 = vmatpush3.msra.mxu1 %v8449_v57 }
 0x614   :  { %10641 = vmatprep.subr.mxu1 %v16944_v5 }
 0x615   :  { %10642 = vmatpush3.msra.mxu1 %v8448_v4 }
 0x616   :  { %10643 = vmatprep.subr.mxu1 %v16944_v5 }
 0x617   :  { %10644 = vmatpush3.msra.mxu1 %v8447_v59 }
 0x6d0   :  { %v8345_v9 = vpop.f32.mrf.mxu1 }
 0x6d1   :  { %v8346_v33 = vadd.f32 %v8345_v9, %v8272_v30 }
 0x6d2   :  { %v10617_v1 = vpop.f32.mrf.mxu1 }
 0x6d3   :  { %v8356_v50 = vadd.f32 %v9228_v17, %v8346_v33 }
 0x6d5   :  { %v8357_v31 = vmax.f32 %v8356_v50, 0.0 }
 0x6d7   :  { %10635 = vmatmul.mubr.msk.f32.vlgmr.msra.gmra.mxu0 %vm3443_vm2, %v8357_v31  ;;  %vm8458_vm2 = vcmask 261120  }
 0x6d8   :  { %10652 = vmatprep.mubr.msk.f32.mxu0 %vm10699_vm5, %v16944_v5  ;;  %10649 = vmatpush3.msra.mxu0 %v8534_v32 }
 0x6d9   :  { %10650 = vmatprep.subr.mxu0 %v16944_v5 }
 0x6da   :  { %10651 = vmatpush3.msra.mxu0 %v8533_v20 }
 0x797   :  { %v8442_v51 = vpop.f32.mrf.mxu0 }
 0x798   :  { %v8443_v14 = vadd.f32 %v9229_v26, %v8442_v51 }
 0x799   :  { %v10636_v19 = vpop.f32.mrf.mxu0 }
 0x79a   :  { %v8446_v15 = vmax.f32 %v8443_v14, 0.0 }
 0x79c   :  { %10646 = vmatmul.mubr.msk.f32.vlgmr.msra.gmra.mxu1 %vm8458_vm2, %v8446_v15 }
 0x85c   :  { %v8528_v36 = vpop.f32.mrf.mxu1 }
 0x85d   :  { %v8529_v53 = vadd.f32 %v9231_v2, %v8528_v36 }
 0x85e   :  { %v10647_v16 = vpop.f32.mrf.mxu1 }
 0x85f   :  { %v8532_v21 = vmax.f32 %v8529_v53, 0.0 }
 0x861   :  { %10653 = vmatmul.mubr.msk.f32.vlgmr.msra.gmra.mxu0 %vm5607_vm4, %v8532_v21 }
 0x921   :  { %v8611_v54 = vpop.f32.mrf.mxu0 }
 0x922   :  { %v8612_v60 = vadd.f32 %v9233_v0, %v8611_v54 }
 0x923   :  { %v10654_v5 = vpop.f32.mrf.mxu0 }
 0x924   :  { %8615 = vst [vmem:[#allocation5] sm:$0x3] %v8612_v60 }
 0x925   :  { %10679 = shalt.err (!%p10676_p4)
}
 0x926   :  { %8625 = dma.vmem_to_hbm [thread:$0]  %s8623_s17, 32, %s16784_s19, [#allocation6]  }
 0x927   :  { %10688 = dma.done.wait [#allocation6], 32  }
 0x928   :  { %10689 = vsyncadd [#allocation6], 4294967264 }
 0x929   :  { %8629 = vsyncpa [#allocation6], 1 }

</bundles_post_ra>
